<compile_context>
chip_gen: v7x
topology: tpu7x:2x2x1
jax: 0.10.0
libtpu: 0.0.40
codegen_flags: <defaults>
</compile_context>

<pallas_src>
import numpy as np
import jax
import jax.numpy as jnp
from jax.experimental import pallas as pl
from jax.experimental.pallas import tpu as pltpu

B = 8       # point clouds per call (more rows -> better MXU utilization)
N = 16      # points per cloud
EPS = 1e-5
VEC_W = 1024  # lane width used to pack all small per-channel / small-weight rows


def _bn_relu_fused(h, gamma, beta, inv_n):
    """Training-mode BatchNorm (biased variance, eps=1e-5) + ReLU, fused form.

    Two reductions (sum, sum-of-squares) give per-channel scale/shift; the
    normalize+affine+ReLU is one fused elementwise pass over h. The fused variance is
    clamped at 0 to guard against catastrophic cancellation feeding rsqrt a negative.
    """
    s1 = jnp.sum(h, axis=0, keepdims=True)
    s2 = jnp.sum(h * h, axis=0, keepdims=True)
    mean = s1 * inv_n
    var = jnp.maximum(s2 * inv_n - mean * mean, 0.0)
    scale = gamma * jax.lax.rsqrt(var + EPS)
    shift = beta - mean * scale
    return jnp.maximum(h * scale + shift, 0.0)


def stn3d_kernel(x_ref, vecs_ref, w2_ref, w3_hbm, fw1_hbm, fw2_hbm,
                 out_ref, w3_v, fw1_v, fw2_v, sems):
    # ---- kick off the big weight DMAs immediately; wait right before each matmul ----
    cp_w3 = pltpu.make_async_copy(w3_hbm, w3_v, sems.at[0])    # 128x1024 bf16, 256 KiB
    cp_fw1 = pltpu.make_async_copy(fw1_hbm, fw1_v, sems.at[1])  # 1024x512 bf16, 1 MiB
    cp_fw2 = pltpu.make_async_copy(fw2_hbm, fw2_v, sems.at[2])  # 512x256  bf16, 256 KiB
    cp_w3.start()
    cp_fw1.start()
    cp_fw2.start()

    bn_rows = x_ref.shape[0]          # B*N rows seen by the conv-side BatchNorms
    b_rows = out_ref.shape[0]         # B rows seen by the fc-side BatchNorms
    n_pts = bn_rows // b_rows
    inv_bn = 1.0 / float(bn_rows)
    inv_b = 1.0 / float(b_rows)

    # Packed small data (rows of a (25, 1024) fp32 buffer):
    #   0..9  : bn1..bn5 gamma/beta pairs
    #   10    : fc3 bias + identity offset
    #   11..13: conv1 weight (3, 64)
    #   14..15: zero padding (sublane alignment for the fc3^T block)
    #   16..24: fc3 weight transposed (9, 256)
    g1, be1 = vecs_ref[0:1, 0:64],   vecs_ref[1:2, 0:64]
    g2, be2 = vecs_ref[2:3, 0:128],  vecs_ref[3:4, 0:128]
    g3, be3 = vecs_ref[4:5, :],      vecs_ref[5:6, :]
    g4, be4 = vecs_ref[6:7, 0:512],  vecs_ref[7:8, 0:512]
    g5, be5 = vecs_ref[8:9, 0:256],  vecs_ref[9:10, 0:256]
    bias9 = vecs_ref[10:11, 0:9]
    w1 = vecs_ref[11:14, 0:64]        # (3, 64)
    fw3t = vecs_ref[16:25, 0:256]     # (9, 256) = fc3 weight transposed

    x = x_ref[...]                                          # (B*N, 3) fp32

    # conv1 (3 -> 64): K=3 contraction on the VPU as 3 broadcast FMAs.
    # (Conv bias is cancelled by the following training-mode BatchNorm.)
    h = (x[:, 0:1] * w1[0:1, :]
         + x[:, 1:2] * w1[1:2, :]
         + x[:, 2:3] * w1[2:3, :])                          # (B*N, 64)
    h = _bn_relu_fused(h, g1, be1, inv_bn)

    # conv2 (64 -> 128), bf16 MXU matmul, fp32 accumulation / BN.
    h = jnp.dot(h.astype(jnp.bfloat16), w2_ref[...],
                preferred_element_type=jnp.float32)
    h = _bn_relu_fused(h, g2, be2, inv_bn)                  # (B*N, 128)

    # conv3 (128 -> 1024), bf16 weights prefetched via manual DMA.
    cp_w3.wait()
    h = jnp.dot(h.astype(jnp.bfloat16), w3_v[...],
                preferred_element_type=jnp.float32)
    h = _bn_relu_fused(h, g3, be3, inv_bn)                  # (B*N, 1024)

    # torch.max(x, 2): max over the N points of each cloud (sublane reduce).
    pooled = jnp.max(h.reshape(b_rows, n_pts, 1024), axis=1)  # (B, 1024)

    # fc1 (1024 -> 512), bf16 weights (DMA overlapped with the whole conv stack).
    cp_fw1.wait()
    f = jnp.dot(pooled.astype(jnp.bfloat16), fw1_v[...],
                preferred_element_type=jnp.float32)
    f = _bn_relu_fused(f, g4, be4, inv_b)                   # (B, 512)

    # fc2 (512 -> 256), bf16 weights.
    cp_fw2.wait()
    f = jnp.dot(f.astype(jnp.bfloat16), fw2_v[...],
                preferred_element_type=jnp.float32)
    f = _bn_relu_fused(f, g5, be5, inv_b)                   # (B, 256)

    # fc3 (256 -> 9), fp32, contraction against the packed fc3^T rows (trans-B matmul,
    # same dot_general pattern as q @ k^T). Bias is pre-folded with the identity.
    f = jnp.einsum('bc,oc->bo', f, fw3t,
                   preferred_element_type=jnp.float32)       # (B, 9)
    out_ref[...] = f + bias9


def init_params(key):
    """Deterministic PyTorch-style (uniform +/- 1/sqrt(fan_in)) initialization.

    Weights are stored as (C_in, C_out) for the channels-last matmul layout.
    Order: (w1,b1,g1,be1, w2,b2,g2,be2, w3,b3,g3,be3,
            fw1,fb1,g4,be4, fw2,fb2,g5,be5, fw3,fb3)
    """
    dims = [(3, 64), (64, 128), (128, 1024), (1024, 512), (512, 256), (256, 9)]
    keys = jax.random.split(key, 2 * len(dims))
    params = []
    for i, (cin, cout) in enumerate(dims):
        bound = 1.0 / np.sqrt(cin)
        w = jax.random.uniform(keys[2 * i], (cin, cout), jnp.float32, -bound, bound)
        b = jax.random.uniform(keys[2 * i + 1], (1, cout), jnp.float32, -bound, bound)
        params += [w, b]
        if i < 5:  # bn1..bn5 (no BN after fc3)
            params += [jnp.ones((1, cout), jnp.float32),   # gamma
                       jnp.zeros((1, cout), jnp.float32)]  # beta
    return tuple(params)


def pack_params(params):
    """One-time preparation of kernel inputs (done once, NOT per forward call).

    Returns (vecs, w2_bf16, w3_bf16, fw1_bf16, fw2_bf16) where `vecs` is a (25, 1024)
    fp32 buffer holding all BN gammas/betas, fc3-bias+identity, conv1's weight rows and
    fc3's transposed weight.
    """
    (w1, _b1, g1, be1, w2, _b2, g2, be2, w3, _b3, g3, be3,
     fw1, _fb1, g4, be4, fw2, _fb2, g5, be5, fw3, fb3) = params
    iden = jnp.array([[1., 0., 0., 0., 1., 0., 0., 0., 1.]], dtype=jnp.float32)
    rows = [g1, be1, g2, be2, g3, be3, g4, be4,            # rows 0..7
            g5, be5, fb3 + iden,                           # rows 8..10
            w1,                                            # rows 11..13  (3, 64)
            jnp.zeros((2, VEC_W), jnp.float32),            # rows 14..15  (alignment)
            fw3.T]                                         # rows 16..24  (9, 256)
    vecs = jnp.concatenate(
        [jnp.pad(r, ((0, 0), (0, VEC_W - r.shape[-1]))) for r in rows], axis=0)
    return (vecs,
            w2.astype(jnp.bfloat16),      # 64x128   -> 16 KiB
            w3.astype(jnp.bfloat16),      # 128x1024 -> 256 KiB
            fw1.astype(jnp.bfloat16),     # 1024x512 -> 1 MiB
            fw2.astype(jnp.bfloat16))     # 512x256  -> 256 KiB


def stn3d_forward(x_ncl, packed):
    """x_ncl: (B, 3, N) float32, PyTorch NCL layout. Returns (B, 3, 3)."""
    vecs, w2, w3, fw1, fw2 = packed
    b, c, n = x_ncl.shape
    assert c == 3
    x_rows = jnp.transpose(x_ncl, (0, 2, 1)).reshape(b * n, 3)

    out = pl.pallas_call(
        stn3d_kernel,
        out_shape=jax.ShapeDtypeStruct((b, 9), jnp.float32),
        in_specs=[
            pl.BlockSpec(memory_space=pltpu.MemorySpace.VMEM),   # x rows
            pl.BlockSpec(memory_space=pltpu.MemorySpace.VMEM),   # packed vecs
            pl.BlockSpec(memory_space=pltpu.MemorySpace.VMEM),   # w2 (small)
            pl.BlockSpec(memory_space=pl.ANY),                   # w3  -> manual DMA
            pl.BlockSpec(memory_space=pl.ANY),                   # fw1 -> manual DMA
            pl.BlockSpec(memory_space=pl.ANY),                   # fw2 -> manual DMA
        ],
        out_specs=pl.BlockSpec(memory_space=pltpu.MemorySpace.VMEM),
        scratch_shapes=[
            pltpu.VMEM((128, 1024), jnp.bfloat16),   # w3 landing buffer
            pltpu.VMEM((1024, 512), jnp.bfloat16),   # fw1 landing buffer
            pltpu.VMEM((512, 256), jnp.bfloat16),    # fw2 landing buffer
            pltpu.SemaphoreType.DMA((3,)),
        ],
    )(x_rows, vecs, w2, w3, fw1, fw2)
    return out.reshape(b, 3, 3)


def stn3d_reference(x_ncl, params):
    """Pure-JAX reference for the correctness check.

    Faithful to the PyTorch module's math (biases included, standard training-mode
    BatchNorm), but uses the same bf16 precision for the conv2/conv3/fc1/fc2 matmul
    operands as the kernel so the comparison isolates Pallas-lowering differences.
    """
    (w1, b1, g1, be1, w2, b2, g2, be2, w3, b3, g3, be3,
     fw1, fb1, g4, be4, fw2, fb2, g5, be5, fw3, fb3) = params

    def bn_relu(h, gamma, beta):
        mean = jnp.mean(h, axis=0, keepdims=True)
        var = jnp.mean((h - mean) ** 2, axis=0, keepdims=True)
        return jnp.maximum((h - mean) * jax.lax.rsqrt(var + EPS) * gamma + beta, 0.0)

    def bf16_dot(a, w):
        return jnp.dot(a.astype(jnp.bfloat16), w.astype(jnp.bfloat16),
                       preferred_element_type=jnp.float32)

    b, c, n = x_ncl.shape
    x = jnp.transpose(x_ncl, (0, 2, 1)).reshape(b * n, 3)
    h = bn_relu(x @ w1 + b1, g1, be1)
    h = bn_relu(bf16_dot(h, w2) + b2, g2, be2)
    h = bn_relu(bf16_dot(h, w3) + b3, g3, be3)
    pooled = jnp.max(h.reshape(b, n, 1024), axis=1)
    f = bn_relu(bf16_dot(pooled, fw1) + fb1, g4, be4)
    f = bn_relu(bf16_dot(f, fw2) + fb2, g5, be5)
    f = f @ fw3 + fb3
    iden = jnp.array([[1., 0., 0., 0., 1., 0., 0., 0., 1.]], dtype=jnp.float32)
    return (f + iden).reshape(b, 3, 3)


if __name__ == "__main__":
    key = jax.random.PRNGKey(0)
    kx, kp = jax.random.split(key)
    x = jax.random.normal(kx, (B, 3, N), dtype=jnp.float32)   # PyTorch NCL input
    params = init_params(kp)

    # One-time parameter preparation (bf16 casts + packing) — NOT per forward call.
    packed = pack_params(params)
    packed = jax.tree_util.tree_map(jax.block_until_ready, packed)

    fwd = jax.jit(stn3d_forward)
    out = jax.block_until_ready(fwd(x, packed))
    assert out.shape == (B, 3, 3) and out.dtype == jnp.float32

    ref = jax.block_until_ready(stn3d_reference(x, params))
    np.testing.assert_allclose(np.asarray(out), np.asarray(ref), rtol=1e-2, atol=1e-2)

    print("KERNEL_OK")
</pallas_src>

<mosaic_0001>
module attributes {stable_mosaic.version = 11 : i64} {
  func.func @stn3d_kernel(%arg0: memref<128x3xf32, #tpu.memory_space<vmem>>, %arg1: memref<25x1024xf32, #tpu.memory_space<vmem>>, %arg2: memref<64x128xbf16, #tpu.memory_space<vmem>>, %arg3: memref<128x1024xbf16, #tpu.memory_space<any>>, %arg4: memref<1024x512xbf16, #tpu.memory_space<any>>, %arg5: memref<512x256xbf16, #tpu.memory_space<any>>, %arg6: memref<8x9xf32, #tpu.memory_space<vmem>>, %arg7: memref<128x1024xbf16, #tpu.memory_space<vmem>>, %arg8: memref<1024x512xbf16, #tpu.memory_space<vmem>>, %arg9: memref<512x256xbf16, #tpu.memory_space<vmem>>, %arg10: memref<3x!tpu.dma_semaphore, #tpu.memory_space<semaphore_mem>>) attributes {dimension_semantics = [], scalar_prefetch = 0 : i64, scratch_operands = 4 : i64, tpu.core_type = #tpu.core_type<tc>} {
    %c0_i32 = arith.constant 0 : i32
    %0 = tpu.memref_slice %arg10[%c0_i32] : memref<3x!tpu.dma_semaphore, #tpu.memory_space<semaphore_mem>> -> memref<1x!tpu.dma_semaphore, #tpu.memory_space<semaphore_mem>>
    %1 = tpu.memref_squeeze %0 : memref<1x!tpu.dma_semaphore, #tpu.memory_space<semaphore_mem>> -> memref<!tpu.dma_semaphore, #tpu.memory_space<semaphore_mem>>
    tpu.enqueue_dma source(%arg3 : memref<128x1024xbf16, #tpu.memory_space<any>>) target(%arg7 : memref<128x1024xbf16, #tpu.memory_space<vmem>>) target_semaphore(%1 : memref<!tpu.dma_semaphore, #tpu.memory_space<semaphore_mem>>)
    %c1_i32 = arith.constant 1 : i32
    %2 = tpu.memref_slice %arg10[%c1_i32] : memref<3x!tpu.dma_semaphore, #tpu.memory_space<semaphore_mem>> -> memref<1x!tpu.dma_semaphore, #tpu.memory_space<semaphore_mem>>
    %3 = tpu.memref_squeeze %2 : memref<1x!tpu.dma_semaphore, #tpu.memory_space<semaphore_mem>> -> memref<!tpu.dma_semaphore, #tpu.memory_space<semaphore_mem>>
    tpu.enqueue_dma source(%arg4 : memref<1024x512xbf16, #tpu.memory_space<any>>) target(%arg8 : memref<1024x512xbf16, #tpu.memory_space<vmem>>) target_semaphore(%3 : memref<!tpu.dma_semaphore, #tpu.memory_space<semaphore_mem>>)
    %c2_i32 = arith.constant 2 : i32
    %4 = tpu.memref_slice %arg10[%c2_i32] : memref<3x!tpu.dma_semaphore, #tpu.memory_space<semaphore_mem>> -> memref<1x!tpu.dma_semaphore, #tpu.memory_space<semaphore_mem>>
    %5 = tpu.memref_squeeze %4 : memref<1x!tpu.dma_semaphore, #tpu.memory_space<semaphore_mem>> -> memref<!tpu.dma_semaphore, #tpu.memory_space<semaphore_mem>>
    tpu.enqueue_dma source(%arg5 : memref<512x256xbf16, #tpu.memory_space<any>>) target(%arg9 : memref<512x256xbf16, #tpu.memory_space<vmem>>) target_semaphore(%5 : memref<!tpu.dma_semaphore, #tpu.memory_space<semaphore_mem>>)
    %c0 = arith.constant 0 : index
    %c0_0 = arith.constant 0 : index
    %6 = vector.load %arg1[%c0, %c0_0] : memref<25x1024xf32, #tpu.memory_space<vmem>>, vector<1x64xf32>
    %c1 = arith.constant 1 : index
    %c0_1 = arith.constant 0 : index
    %7 = vector.load %arg1[%c1, %c0_1] : memref<25x1024xf32, #tpu.memory_space<vmem>>, vector<1x64xf32>
    %c2 = arith.constant 2 : index
    %c0_2 = arith.constant 0 : index
    %8 = vector.load %arg1[%c2, %c0_2] : memref<25x1024xf32, #tpu.memory_space<vmem>>, vector<1x128xf32>
    %c3 = arith.constant 3 : index
    %c0_3 = arith.constant 0 : index
    %9 = vector.load %arg1[%c3, %c0_3] : memref<25x1024xf32, #tpu.memory_space<vmem>>, vector<1x128xf32>
    %c4 = arith.constant 4 : index
    %c0_4 = arith.constant 0 : index
    %10 = vector.load %arg1[%c4, %c0_4] : memref<25x1024xf32, #tpu.memory_space<vmem>>, vector<1x1024xf32>
    %c5 = arith.constant 5 : index
    %c0_5 = arith.constant 0 : index
    %11 = vector.load %arg1[%c5, %c0_5] : memref<25x1024xf32, #tpu.memory_space<vmem>>, vector<1x1024xf32>
    %c6 = arith.constant 6 : index
    %c0_6 = arith.constant 0 : index
    %12 = vector.load %arg1[%c6, %c0_6] : memref<25x1024xf32, #tpu.memory_space<vmem>>, vector<1x512xf32>
    %c7 = arith.constant 7 : index
    %c0_7 = arith.constant 0 : index
    %13 = vector.load %arg1[%c7, %c0_7] : memref<25x1024xf32, #tpu.memory_space<vmem>>, vector<1x512xf32>
    %c8 = arith.constant 8 : index
    %c0_8 = arith.constant 0 : index
    %14 = vector.load %arg1[%c8, %c0_8] : memref<25x1024xf32, #tpu.memory_space<vmem>>, vector<1x256xf32>
    %c9 = arith.constant 9 : index
    %c0_9 = arith.constant 0 : index
    %15 = vector.load %arg1[%c9, %c0_9] : memref<25x1024xf32, #tpu.memory_space<vmem>>, vector<1x256xf32>
    %c10 = arith.constant 10 : index
    %c0_10 = arith.constant 0 : index
    %16 = vector.load %arg1[%c10, %c0_10] : memref<25x1024xf32, #tpu.memory_space<vmem>>, vector<1x9xf32>
    %c11 = arith.constant 11 : index
    %c0_11 = arith.constant 0 : index
    %17 = vector.load %arg1[%c11, %c0_11] : memref<25x1024xf32, #tpu.memory_space<vmem>>, vector<3x64xf32>
    %c16 = arith.constant 16 : index
    %c0_12 = arith.constant 0 : index
    %18 = vector.load %arg1[%c16, %c0_12] : memref<25x1024xf32, #tpu.memory_space<vmem>>, vector<9x256xf32>
    %c0_13 = arith.constant 0 : index
    %c0_14 = arith.constant 0 : index
    %19 = vector.load %arg0[%c0_13, %c0_14] : memref<128x3xf32, #tpu.memory_space<vmem>>, vector<128x3xf32>
    %20 = vector.extract_strided_slice %19 {offsets = [0, 0], sizes = [128, 1], strides = [1, 1]} : vector<128x3xf32> to vector<128x1xf32>
    %21 = vector.extract_strided_slice %17 {offsets = [0, 0], sizes = [1, 64], strides = [1, 1]} : vector<3x64xf32> to vector<1x64xf32>
    %22 = vector.broadcast %20 : vector<128x1xf32> to vector<128x64xf32>
    %23 = vector.broadcast %21 : vector<1x64xf32> to vector<128x64xf32>
    %24 = arith.mulf %22, %23 : vector<128x64xf32>
    %25 = vector.extract_strided_slice %19 {offsets = [0, 1], sizes = [128, 1], strides = [1, 1]} : vector<128x3xf32> to vector<128x1xf32>
    %26 = vector.extract_strided_slice %17 {offsets = [1, 0], sizes = [1, 64], strides = [1, 1]} : vector<3x64xf32> to vector<1x64xf32>
    %27 = vector.broadcast %25 : vector<128x1xf32> to vector<128x64xf32>
    %28 = vector.broadcast %26 : vector<1x64xf32> to vector<128x64xf32>
    %29 = arith.mulf %27, %28 : vector<128x64xf32>
    %30 = arith.addf %24, %29 : vector<128x64xf32>
    %31 = vector.extract_strided_slice %19 {offsets = [0, 2], sizes = [128, 1], strides = [1, 1]} : vector<128x3xf32> to vector<128x1xf32>
    %32 = vector.extract_strided_slice %17 {offsets = [2, 0], sizes = [1, 64], strides = [1, 1]} : vector<3x64xf32> to vector<1x64xf32>
    %33 = vector.broadcast %31 : vector<128x1xf32> to vector<128x64xf32>
    %34 = vector.broadcast %32 : vector<1x64xf32> to vector<128x64xf32>
    %35 = arith.mulf %33, %34 : vector<128x64xf32>
    %36 = arith.addf %30, %35 : vector<128x64xf32>
    %cst = arith.constant dense<0.000000e+00> : vector<64xf32>
    %37 = vector.multi_reduction <add>, %36, %cst [0] : vector<128x64xf32> to vector<64xf32>
    %38 = vector.shape_cast %37 : vector<64xf32> to vector<1x64xf32>
    %39 = arith.mulf %36, %36 : vector<128x64xf32>
    %cst_15 = arith.constant dense<0.000000e+00> : vector<64xf32>
    %40 = vector.multi_reduction <add>, %39, %cst_15 [0] : vector<128x64xf32> to vector<64xf32>
    %41 = vector.shape_cast %40 : vector<64xf32> to vector<1x64xf32>
    %cst_16 = arith.constant 7.812500e-03 : f32
    %42 = vector.broadcast %cst_16 : f32 to vector<1x64xf32>
    %43 = arith.mulf %38, %42 : vector<1x64xf32>
    %cst_17 = arith.constant 7.812500e-03 : f32
    %44 = vector.broadcast %cst_17 : f32 to vector<1x64xf32>
    %45 = arith.mulf %41, %44 : vector<1x64xf32>
    %46 = arith.mulf %43, %43 : vector<1x64xf32>
    %47 = arith.subf %45, %46 : vector<1x64xf32>
    %cst_18 = arith.constant 0.000000e+00 : f32
    %48 = vector.broadcast %cst_18 : f32 to vector<1x64xf32>
    %49 = arith.maximumf %47, %48 : vector<1x64xf32>
    %cst_19 = arith.constant 9.99999974E-6 : f32
    %50 = vector.broadcast %cst_19 : f32 to vector<1x64xf32>
    %51 = arith.addf %49, %50 : vector<1x64xf32>
    %52 = math.rsqrt %51 : vector<1x64xf32>
    %53 = arith.mulf %6, %52 : vector<1x64xf32>
    %54 = arith.mulf %43, %53 : vector<1x64xf32>
    %55 = arith.subf %7, %54 : vector<1x64xf32>
    %56 = vector.broadcast %53 : vector<1x64xf32> to vector<128x64xf32>
    %57 = arith.mulf %36, %56 : vector<128x64xf32>
    %58 = vector.broadcast %55 : vector<1x64xf32> to vector<128x64xf32>
    %59 = arith.addf %57, %58 : vector<128x64xf32>
    %cst_20 = arith.constant 0.000000e+00 : f32
    %60 = vector.broadcast %cst_20 : f32 to vector<128x64xf32>
    %61 = arith.maximumf %59, %60 : vector<128x64xf32>
    %62 = arith.truncf %61 : vector<128x64xf32> to vector<128x64xbf16>
    %c0_21 = arith.constant 0 : index
    %c0_22 = arith.constant 0 : index
    %63 = vector.load %arg2[%c0_21, %c0_22] : memref<64x128xbf16, #tpu.memory_space<vmem>>, vector<64x128xbf16>
    %cst_23 = arith.constant dense<0.000000e+00> : vector<128x128xf32>
    %64 = tpu.matmul %62, %63, %cst_23 {dimension_numbers = #tpu.dot_dimension_numbers<[1], [0], [0], [1], [0, 0, 1, 1], [], []>} : vector<128x64xbf16>, vector<64x128xbf16>, vector<128x128xf32> -> vector<128x128xf32>
    %cst_24 = arith.constant dense<0.000000e+00> : vector<128xf32>
    %65 = vector.multi_reduction <add>, %64, %cst_24 [0] : vector<128x128xf32> to vector<128xf32>
    %66 = vector.shape_cast %65 : vector<128xf32> to vector<1x128xf32>
    %67 = arith.mulf %64, %64 : vector<128x128xf32>
    %cst_25 = arith.constant dense<0.000000e+00> : vector<128xf32>
    %68 = vector.multi_reduction <add>, %67, %cst_25 [0] : vector<128x128xf32> to vector<128xf32>
    %69 = vector.shape_cast %68 : vector<128xf32> to vector<1x128xf32>
    %cst_26 = arith.constant 7.812500e-03 : f32
    %70 = vector.broadcast %cst_26 : f32 to vector<1x128xf32>
    %71 = arith.mulf %66, %70 : vector<1x128xf32>
    %cst_27 = arith.constant 7.812500e-03 : f32
    %72 = vector.broadcast %cst_27 : f32 to vector<1x128xf32>
    %73 = arith.mulf %69, %72 : vector<1x128xf32>
    %74 = arith.mulf %71, %71 : vector<1x128xf32>
    %75 = arith.subf %73, %74 : vector<1x128xf32>
    %cst_28 = arith.constant 0.000000e+00 : f32
    %76 = vector.broadcast %cst_28 : f32 to vector<1x128xf32>
    %77 = arith.maximumf %75, %76 : vector<1x128xf32>
    %cst_29 = arith.constant 9.99999974E-6 : f32
    %78 = vector.broadcast %cst_29 : f32 to vector<1x128xf32>
    %79 = arith.addf %77, %78 : vector<1x128xf32>
    %80 = math.rsqrt %79 : vector<1x128xf32>
    %81 = arith.mulf %8, %80 : vector<1x128xf32>
    %82 = arith.mulf %71, %81 : vector<1x128xf32>
    %83 = arith.subf %9, %82 : vector<1x128xf32>
    %84 = vector.broadcast %81 : vector<1x128xf32> to vector<128x128xf32>
    %85 = arith.mulf %64, %84 : vector<128x128xf32>
    %86 = vector.broadcast %83 : vector<1x128xf32> to vector<128x128xf32>
    %87 = arith.addf %85, %86 : vector<128x128xf32>
    %cst_30 = arith.constant 0.000000e+00 : f32
    %88 = vector.broadcast %cst_30 : f32 to vector<128x128xf32>
    %89 = arith.maximumf %87, %88 : vector<128x128xf32>
    %c0_i32_31 = arith.constant 0 : i32
    %90 = tpu.memref_slice %arg10[%c0_i32_31] : memref<3x!tpu.dma_semaphore, #tpu.memory_space<semaphore_mem>> -> memref<1x!tpu.dma_semaphore, #tpu.memory_space<semaphore_mem>>
    %91 = tpu.memref_squeeze %90 : memref<1x!tpu.dma_semaphore, #tpu.memory_space<semaphore_mem>> -> memref<!tpu.dma_semaphore, #tpu.memory_space<semaphore_mem>>
    tpu.wait_dma2 semaphore(%91 : memref<!tpu.dma_semaphore, #tpu.memory_space<semaphore_mem>>) src(%arg3 : memref<128x1024xbf16, #tpu.memory_space<any>>) dst(%arg7 : memref<128x1024xbf16, #tpu.memory_space<vmem>>)
    %92 = arith.truncf %89 : vector<128x128xf32> to vector<128x128xbf16>
    %c0_32 = arith.constant 0 : index
    %c0_33 = arith.constant 0 : index
    %93 = vector.load %arg7[%c0_32, %c0_33] : memref<128x1024xbf16, #tpu.memory_space<vmem>>, vector<128x1024xbf16>
    %cst_34 = arith.constant dense<0.000000e+00> : vector<128x1024xf32>
    %94 = tpu.matmul %92, %93, %cst_34 {dimension_numbers = #tpu.dot_dimension_numbers<[1], [0], [0], [1], [0, 0, 1, 1], [], []>} : vector<128x128xbf16>, vector<128x1024xbf16>, vector<128x1024xf32> -> vector<128x1024xf32>
    %cst_35 = arith.constant dense<0.000000e+00> : vector<1024xf32>
    %95 = vector.multi_reduction <add>, %94, %cst_35 [0] : vector<128x1024xf32> to vector<1024xf32>
    %96 = vector.shape_cast %95 : vector<1024xf32> to vector<1x1024xf32>
    %97 = arith.mulf %94, %94 : vector<128x1024xf32>
    %cst_36 = arith.constant dense<0.000000e+00> : vector<1024xf32>
    %98 = vector.multi_reduction <add>, %97, %cst_36 [0] : vector<128x1024xf32> to vector<1024xf32>
    %99 = vector.shape_cast %98 : vector<1024xf32> to vector<1x1024xf32>
    %cst_37 = arith.constant 7.812500e-03 : f32
    %100 = vector.broadcast %cst_37 : f32 to vector<1x1024xf32>
    %101 = arith.mulf %96, %100 : vector<1x1024xf32>
    %cst_38 = arith.constant 7.812500e-03 : f32
    %102 = vector.broadcast %cst_38 : f32 to vector<1x1024xf32>
    %103 = arith.mulf %99, %102 : vector<1x1024xf32>
    %104 = arith.mulf %101, %101 : vector<1x1024xf32>
    %105 = arith.subf %103, %104 : vector<1x1024xf32>
    %cst_39 = arith.constant 0.000000e+00 : f32
    %106 = vector.broadcast %cst_39 : f32 to vector<1x1024xf32>
    %107 = arith.maximumf %105, %106 : vector<1x1024xf32>
    %cst_40 = arith.constant 9.99999974E-6 : f32
    %108 = vector.broadcast %cst_40 : f32 to vector<1x1024xf32>
    %109 = arith.addf %107, %108 : vector<1x1024xf32>
    %110 = math.rsqrt %109 : vector<1x1024xf32>
    %111 = arith.mulf %10, %110 : vector<1x1024xf32>
    %112 = arith.mulf %101, %111 : vector<1x1024xf32>
    %113 = arith.subf %11, %112 : vector<1x1024xf32>
    %114 = vector.broadcast %111 : vector<1x1024xf32> to vector<128x1024xf32>
    %115 = arith.mulf %94, %114 : vector<128x1024xf32>
    %116 = vector.broadcast %113 : vector<1x1024xf32> to vector<128x1024xf32>
    %117 = arith.addf %115, %116 : vector<128x1024xf32>
    %cst_41 = arith.constant 0.000000e+00 : f32
    %118 = vector.broadcast %cst_41 : f32 to vector<128x1024xf32>
    %119 = arith.maximumf %117, %118 : vector<128x1024xf32>
    %120 = vector.shape_cast %119 : vector<128x1024xf32> to vector<8x16x1024xf32>
    %cst_42 = arith.constant dense<0xFF800000> : vector<8x1024xf32>
    %121 = vector.multi_reduction <maximumf>, %120, %cst_42 [1] : vector<8x16x1024xf32> to vector<8x1024xf32>
    %c1_i32_43 = arith.constant 1 : i32
    %122 = tpu.memref_slice %arg10[%c1_i32_43] : memref<3x!tpu.dma_semaphore, #tpu.memory_space<semaphore_mem>> -> memref<1x!tpu.dma_semaphore, #tpu.memory_space<semaphore_mem>>
    %123 = tpu.memref_squeeze %122 : memref<1x!tpu.dma_semaphore, #tpu.memory_space<semaphore_mem>> -> memref<!tpu.dma_semaphore, #tpu.memory_space<semaphore_mem>>
    tpu.wait_dma2 semaphore(%123 : memref<!tpu.dma_semaphore, #tpu.memory_space<semaphore_mem>>) src(%arg4 : memref<1024x512xbf16, #tpu.memory_space<any>>) dst(%arg8 : memref<1024x512xbf16, #tpu.memory_space<vmem>>)
    %124 = arith.truncf %121 : vector<8x1024xf32> to vector<8x1024xbf16>
    %c0_44 = arith.constant 0 : index
    %c0_45 = arith.constant 0 : index
    %125 = vector.load %arg8[%c0_44, %c0_45] : memref<1024x512xbf16, #tpu.memory_space<vmem>>, vector<1024x512xbf16>
    %cst_46 = arith.constant dense<0.000000e+00> : vector<8x512xf32>
    %126 = tpu.matmul %124, %125, %cst_46 {dimension_numbers = #tpu.dot_dimension_numbers<[1], [0], [0], [1], [0, 0, 1, 1], [], []>} : vector<8x1024xbf16>, vector<1024x512xbf16>, vector<8x512xf32> -> vector<8x512xf32>
    %cst_47 = arith.constant dense<0.000000e+00> : vector<512xf32>
    %127 = vector.multi_reduction <add>, %126, %cst_47 [0] : vector<8x512xf32> to vector<512xf32>
    %128 = vector.shape_cast %127 : vector<512xf32> to vector<1x512xf32>
    %129 = arith.mulf %126, %126 : vector<8x512xf32>
    %cst_48 = arith.constant dense<0.000000e+00> : vector<512xf32>
    %130 = vector.multi_reduction <add>, %129, %cst_48 [0] : vector<8x512xf32> to vector<512xf32>
    %131 = vector.shape_cast %130 : vector<512xf32> to vector<1x512xf32>
    %cst_49 = arith.constant 1.250000e-01 : f32
    %132 = vector.broadcast %cst_49 : f32 to vector<1x512xf32>
    %133 = arith.mulf %128, %132 : vector<1x512xf32>
    %cst_50 = arith.constant 1.250000e-01 : f32
    %134 = vector.broadcast %cst_50 : f32 to vector<1x512xf32>
    %135 = arith.mulf %131, %134 : vector<1x512xf32>
    %136 = arith.mulf %133, %133 : vector<1x512xf32>
    %137 = arith.subf %135, %136 : vector<1x512xf32>
    %cst_51 = arith.constant 0.000000e+00 : f32
    %138 = vector.broadcast %cst_51 : f32 to vector<1x512xf32>
    %139 = arith.maximumf %137, %138 : vector<1x512xf32>
    %cst_52 = arith.constant 9.99999974E-6 : f32
    %140 = vector.broadcast %cst_52 : f32 to vector<1x512xf32>
    %141 = arith.addf %139, %140 : vector<1x512xf32>
    %142 = math.rsqrt %141 : vector<1x512xf32>
    %143 = arith.mulf %12, %142 : vector<1x512xf32>
    %144 = arith.mulf %133, %143 : vector<1x512xf32>
    %145 = arith.subf %13, %144 : vector<1x512xf32>
    %146 = vector.broadcast %143 : vector<1x512xf32> to vector<8x512xf32>
    %147 = arith.mulf %126, %146 : vector<8x512xf32>
    %148 = vector.broadcast %145 : vector<1x512xf32> to vector<8x512xf32>
    %149 = arith.addf %147, %148 : vector<8x512xf32>
    %cst_53 = arith.constant 0.000000e+00 : f32
    %150 = vector.broadcast %cst_53 : f32 to vector<8x512xf32>
    %151 = arith.maximumf %149, %150 : vector<8x512xf32>
    %c2_i32_54 = arith.constant 2 : i32
    %152 = tpu.memref_slice %arg10[%c2_i32_54] : memref<3x!tpu.dma_semaphore, #tpu.memory_space<semaphore_mem>> -> memref<1x!tpu.dma_semaphore, #tpu.memory_space<semaphore_mem>>
    %153 = tpu.memref_squeeze %152 : memref<1x!tpu.dma_semaphore, #tpu.memory_space<semaphore_mem>> -> memref<!tpu.dma_semaphore, #tpu.memory_space<semaphore_mem>>
    tpu.wait_dma2 semaphore(%153 : memref<!tpu.dma_semaphore, #tpu.memory_space<semaphore_mem>>) src(%arg5 : memref<512x256xbf16, #tpu.memory_space<any>>) dst(%arg9 : memref<512x256xbf16, #tpu.memory_space<vmem>>)
    %154 = arith.truncf %151 : vector<8x512xf32> to vector<8x512xbf16>
    %c0_55 = arith.constant 0 : index
    %c0_56 = arith.constant 0 : index
    %155 = vector.load %arg9[%c0_55, %c0_56] : memref<512x256xbf16, #tpu.memory_space<vmem>>, vector<512x256xbf16>
    %cst_57 = arith.constant dense<0.000000e+00> : vector<8x256xf32>
    %156 = tpu.matmul %154, %155, %cst_57 {dimension_numbers = #tpu.dot_dimension_numbers<[1], [0], [0], [1], [0, 0, 1, 1], [], []>} : vector<8x512xbf16>, vector<512x256xbf16>, vector<8x256xf32> -> vector<8x256xf32>
    %cst_58 = arith.constant dense<0.000000e+00> : vector<256xf32>
    %157 = vector.multi_reduction <add>, %156, %cst_58 [0] : vector<8x256xf32> to vector<256xf32>
    %158 = vector.shape_cast %157 : vector<256xf32> to vector<1x256xf32>
    %159 = arith.mulf %156, %156 : vector<8x256xf32>
    %cst_59 = arith.constant dense<0.000000e+00> : vector<256xf32>
    %160 = vector.multi_reduction <add>, %159, %cst_59 [0] : vector<8x256xf32> to vector<256xf32>
    %161 = vector.shape_cast %160 : vector<256xf32> to vector<1x256xf32>
    %cst_60 = arith.constant 1.250000e-01 : f32
    %162 = vector.broadcast %cst_60 : f32 to vector<1x256xf32>
    %163 = arith.mulf %158, %162 : vector<1x256xf32>
    %cst_61 = arith.constant 1.250000e-01 : f32
    %164 = vector.broadcast %cst_61 : f32 to vector<1x256xf32>
    %165 = arith.mulf %161, %164 : vector<1x256xf32>
    %166 = arith.mulf %163, %163 : vector<1x256xf32>
    %167 = arith.subf %165, %166 : vector<1x256xf32>
    %cst_62 = arith.constant 0.000000e+00 : f32
    %168 = vector.broadcast %cst_62 : f32 to vector<1x256xf32>
    %169 = arith.maximumf %167, %168 : vector<1x256xf32>
    %cst_63 = arith.constant 9.99999974E-6 : f32
    %170 = vector.broadcast %cst_63 : f32 to vector<1x256xf32>
    %171 = arith.addf %169, %170 : vector<1x256xf32>
    %172 = math.rsqrt %171 : vector<1x256xf32>
    %173 = arith.mulf %14, %172 : vector<1x256xf32>
    %174 = arith.mulf %163, %173 : vector<1x256xf32>
    %175 = arith.subf %15, %174 : vector<1x256xf32>
    %176 = vector.broadcast %173 : vector<1x256xf32> to vector<8x256xf32>
    %177 = arith.mulf %156, %176 : vector<8x256xf32>
    %178 = vector.broadcast %175 : vector<1x256xf32> to vector<8x256xf32>
    %179 = arith.addf %177, %178 : vector<8x256xf32>
    %cst_64 = arith.constant 0.000000e+00 : f32
    %180 = vector.broadcast %cst_64 : f32 to vector<8x256xf32>
    %181 = arith.maximumf %179, %180 : vector<8x256xf32>
    "tpu.trace_start"() <{level = 10 : i32, message = "bc,oc->bo"}> : () -> ()
    %cst_65 = arith.constant dense<0.000000e+00> : vector<8x9xf32>
    %182 = tpu.matmul %181, %18, %cst_65 {dimension_numbers = #tpu.dot_dimension_numbers<[1], [1], [0], [0], [0, 0, 1, 0], [], []>} : vector<8x256xf32>, vector<9x256xf32>, vector<8x9xf32> -> vector<8x9xf32>
    "tpu.trace_stop"() : () -> ()
    %183 = vector.broadcast %16 : vector<1x9xf32> to vector<8x9xf32>
    %184 = arith.addf %182, %183 : vector<8x9xf32>
    %c0_66 = arith.constant 0 : index
    %c0_67 = arith.constant 0 : index
    %185 = vector.load %arg6[%c0_66, %c0_67] : memref<8x9xf32, #tpu.memory_space<vmem>>, vector<8x9xf32>
    tpu.vector_store %arg6[%c0_66, %c0_67], %184 {strides = array<i32>} : memref<8x9xf32, #tpu.memory_space<vmem>>, vector<8x9xf32>,
    return
  }
}

</mosaic_0001>

<bundles_post_ra>
// kernel: stn3d_forward.1
= control target key start
LH: loop header
LB: loop body
LE: loop exit
PB: predicated region body
PF: predicated region fallthrough
CT: control target
= control target key end

     0   :  { %11 = vsyncpa [#allocation7], 0  ;;  %s4616_s21 = smov [#allocation6]   ;;  %s7923_s0 = inlined_call_operand.vmem [shape: f32[128,3], index: 0, kind: input, shape index: {}]   ;;  %s7924_s1 = inlined_call_operand.hbm [shape: f32[25,1024], index: 1, kind: input, shape index: {}]   ;;  %s7925_s2 = inlined_call_operand.vmem [shape: bf16[64,128], index: 2, kind: input, shape index: {}]   ;;  %s7926_s3 = inlined_call_operand.hbm [shape: bf16[128,1024], index: 3, kind: input, shape index: {}]   ;;  %s7927_s4 = inlined_call_operand.hbm [shape: bf16[1024,512], index: 4, kind: input, shape index: {}]   ;;  %s7928_s5 = inlined_call_operand.hbm [shape: bf16[512,256], index: 5, kind: input, shape index: {}]   ;;  %s7929_s6 = inlined_call_operand.vmem [shape: f32[8,9], index: 6, kind: output, shape index: {}]  }
   0x1   :  { %s19_s22 = sshll.u32 %s4616_s21, 4  ;;  %s4586_s25 = scalar_lea.hbm %s7924_s1, 4096  ;;  %s20_s22 = int_to_ptr.vmem [resolvable:$true] %s19_s22 }
   0x2   :  { %p4587_p0 = scmp.ne.s32.totalorder %s7924_s1, %s4586_s25  ;;  %p4590_p1 = scmp.lt.u32.totalorder %s4586_s25, %s7924_s1 }
   0x4   :  { %p4592_p2 = pnand %p4590_p1, %p4587_p0 }
   0x6   :  { %4595 = shalt.err (!%p4592_p2)
}
   0x7   :  { %s4596_s30 = scalar_lea.vmem %s20_s22, 4096  ;;  %p4601_p4 = scmp.lt.s32.totalorder %s20_s22, %s20_s22 }
   0x8   :  { %p4597_p3 = scmp.ne.s32.totalorder %s20_s22, %s4596_s30  ;;  %p4602_p5 = scmp.lt.s32.totalorder %s4596_s30, %s4596_s30 }
   0xa   :  { %p4603_p6 = por %p4602_p5, %p4601_p4 }
   0xc   :  { %p4604_p7 = pnand %p4603_p6, %p4597_p3 }
   0xe   :  { %4607 = shalt.err (!%p4604_p7)
}
   0xf   :  { %s4617_s7 = smov 1024   ;;  %s4618_s8 = smov 64  }
  0x10   :  { %25 = dma.hbm_to_vmem [thread:$0]  %s7924_s1, 4096, %s20_s22, [#allocation7], %s4617_s7, %s4617_s7, %s4618_s8  }
  0x11   :  { %4608 = dma.done.wait [#allocation7], 4096  }
  0x12   :  { %4609 = vsyncadd [#allocation7], 4294963200  ;;  %s36_s11 = sld [smem:[#allocation0]]   ;;  %48 = sst [smem:[#allocation9]] %s4617_s7  ;;  %v4619_v0 = vmov 2   ;;  %v4620_v1 = vmov 1   ;;  %v259_v51 = vlaneseq }
  0x13   :  { %4521 = vset.pattern.permute.xlu0 %v4619_v0  ;;  %4520 = vset.pattern.permute.xlu1 %v4620_v1  ;;  %50 = sst [smem:[#allocation9 + $0x1]] %s4617_s7  ;;  %s4621_s12 = smov [#allocation2]   ;;  %v7930_v25 = vmov 0   ;;  %vm479_vm0 = vcmask 523264  }
  0x14   :  { %s44_s13 = sshll.u32 %s4621_s12, 4  ;;  %s4622_s14 = smov 8   ;;  %v4852_v54 = vshrl.u32 %v259_v51, 7  ;;  %s45_s13 = int_to_ptr.vmem [resolvable:$true] %s44_s13 }
  0x15   :  { %52 = sst [smem:[#allocation9 + $0x2]] %s4622_s14  ;;  %s4623_s1 = smov 128  }
  0x16   :  { %54 = sst [smem:[#allocation9 + $0x3]] %s4618_s8  ;;  %s4624_s16 = smov 2   ;;  %v4862_v58 = vsub.s32 4, %v4852_v54  ;;  %v4865_v59 = vsub.s32 5, %v4852_v54  ;;  %v4868_v60 = vsub.s32 3, %v4852_v54 }
  0x17   :  { %62 = sst [smem:[#allocation9 + $0x7]] %s4618_s8  ;;  %s4625_s18 = smov 512  }
  0x18   :  { %56 = sst [smem:[#allocation9 + $0x4]] %s4623_s1  ;;  %s4409_s15 = sshll.u32 %s36_s11, 26 }
  0x19   :  { %58 = sst [smem:[#allocation9 + $0x5]] %s4624_s16  ;;  %s4692_s17 = sadd.s32 134217728, %s4409_s15 }
  0x1a   :  { %60 = sst [smem:[#allocation9 + $0x6]] %s4625_s18  ;;  %s4626_s19 = smov 4  }
  0x1b   :  { %64 = sst [smem:[#allocation9 + $0x8]] %s4626_s19  ;;  %s4627_s20 = smov [#allocation5]  }
  0x1c   :  { %s4628_s21 = smov [#allocation8]   ;;  %s4629_s24 = smov [#allocation3]  }
  0x1d   :  { %66 = dma.general %s7926_s3, 8192, %s45_s13, %s4627_s20, %s4628_s21, [#allocation9], %s4692_s17, 0  }
  0x1e   :  { %83 = sst [smem:[#allocation11]] %s4625_s18  ;;  %s79_s25 = sshll.u32 %s4629_s24, 4  ;;  %s80_s25 = int_to_ptr.vmem [resolvable:$true] %s79_s25 }
  0x1f   :  { %85 = sst [smem:[#allocation11 + $0x1]] %s4625_s18  ;;  %s4630_s26 = smov 256  }
  0x20   :  { %87 = sst [smem:[#allocation11 + $0x2]] %s4626_s19  ;;  %s4631_s3 = smov [#allocation5 + $0x1]  }
  0x21   :  { %89 = sst [smem:[#allocation11 + $0x3]] %s4618_s8  ;;  %s4632_s27 = smov [#allocation10]  }
  0x22   :  { %91 = sst [smem:[#allocation11 + $0x4]] %s4623_s1  ;;  %s4633_s30 = smov [#allocation4]  }
  0x23   :  { %93 = sst [smem:[#allocation11 + $0x5]] %s4624_s16  ;;  %s114_s7 = sshll.u32 %s4633_s30, 4  ;;  %s115_s7 = int_to_ptr.vmem [resolvable:$true] %s114_s7 }
  0x24   :  { %95 = sst [smem:[#allocation11 + $0x6]] %s4630_s26  ;;  %s4635_s9 = smov [#allocation12]  }
  0x25   :  { %97 = sst [smem:[#allocation11 + $0x7]] %s4618_s8 }
  0x26   :  { %99 = sst [smem:[#allocation11 + $0x8]] %s4626_s19 }
  0x27   :  { %101 = dma.general %s7927_s4, 32768, %s80_s25, %s4631_s3, %s4632_s27, [#allocation11], %s4692_s17, 0  }
  0x28   :  { %118 = sst [smem:[#allocation13]] %s4630_s26  ;;  %s4634_s4 = smov [#allocation5 + $0x2]  }
  0x29   :  { %120 = sst [smem:[#allocation13 + $0x1]] %s4630_s26 }
  0x2a   :  { %122 = sst [smem:[#allocation13 + $0x2]] %s4624_s16 }
  0x2b   :  { %124 = sst [smem:[#allocation13 + $0x3]] %s4618_s8 }
  0x2c   :  { %126 = sst [smem:[#allocation13 + $0x4]] %s4623_s1 }
  0x2d   :  { %128 = sst [smem:[#allocation13 + $0x5]] %s4624_s16 }
  0x2e   :  { %130 = sst [smem:[#allocation13 + $0x6]] %s4623_s1 }
  0x2f   :  { %132 = sst [smem:[#allocation13 + $0x7]] %s4618_s8 }
  0x30   :  { %134 = sst [smem:[#allocation13 + $0x8]] %s4626_s19 }
  0x31   :  { %136 = dma.general %s7928_s5, 8192, %s115_s7, %s4634_s4, %s4635_s9, [#allocation13], %s4692_s17, 0  }
  0x32   :  { %v4720_v2 = vld [vmem:[#allocation6 + $0x4] ss:$8 sm:$0xf]  ;;  %v4726_v5 = vld [vmem:[#allocation6 + $0x5] ss:$8 sm:$0xf] }
  0x33   :  { %v4722_v3 = vld [vmem:[#allocation6 + $0x4] ss:$8 sm:$0xf0]  ;;  %8147 = vst [vmem:[#allocation18_spill] sm:$0xff] %v4726_v5  ;;  %v4740_v12 = vld [vmem:[#allocation6 + $0x42] ss:$0 sm:$0xff] }
  0x34   :  { %v4728_v6 = vld [vmem:[#allocation6 + $0x5] ss:$8 sm:$0xf0]  ;;  %v4732_v8 = vld [vmem:[#allocation6 + $0x6] ss:$8 sm:$0xf] }
  0x35   :  { %8148 = vst [vmem:[#allocation19_spill] sm:$0xff] %v4728_v6  ;;  %8149 = vst [vmem:[#allocation20_spill] sm:$0xff] %v4732_v8  ;;  %v4734_v9 = vld [vmem:[#allocation6 + $0x7] ss:$8 sm:$0xf] }
  0x36   :  { %8150 = vst [vmem:[#allocation21_spill] sm:$0xff] %v4734_v9  ;;  %v4736_v10 = vld [vmem:[#allocation6 + $0x40] ss:$8 sm:$0x3]  ;;  %8153 = vst [vmem:[#allocation24_spill] sm:$0xff] %v4740_v12  ;;  %v169_v20 = vld [vmem:[%s7923_s0 + $0x30] sm:$0xff] }
  0x37   :  { %8151 = vst [vmem:[#allocation22_spill] sm:$0xff] %v4736_v10  ;;  %v4738_v11 = vld [vmem:[#allocation6 + $0x41] ss:$8 sm:$0x3]  ;;  %v4746_v15 = vld [vmem:[#allocation6 + $0xc0] sm:$0x1] }
  0x38   :  { %8152 = vst [vmem:[#allocation23_spill] sm:$0xff] %v4738_v11  ;;  %v4742_v13 = vld [vmem:[#allocation6 + $0x80] sm:$0xff]  ;;  %v4744_v14 = vld [vmem:[#allocation6 + $0x88] sm:$0xff]  ;;  %8156 = vst [vmem:[#allocation27_spill] sm:$0xff] %v4746_v15 }
  0x39   :  { %8154 = vst [vmem:[#allocation25_spill] sm:$0xff] %v4742_v13  ;;  %8155 = vst [vmem:[#allocation26_spill] sm:$0xff] %v4744_v14  ;;  %v4748_v16 = vld [vmem:[#allocation6 + $0xc8] sm:$0x1]  ;;  %v163_v17 = vld [vmem:[%s7923_s0] sm:$0xff] }
  0x3a   :  { %8157 = vst [vmem:[#allocation28_spill] sm:$0xff] %v4748_v16  ;;  %380 = vperm.xlu0 %4521, %v163_v17   ;;  %280 = vperm.xlu1 %4520, %v163_v17   ;;  %v168_v18 = vld [vmem:[%s7923_s0 + $0x28] sm:$0xff]  ;;  %v165_v21 = vld [vmem:[%s7923_s0 + $0x10] sm:$0xff]  ;;  %v174_v23 = vld [vmem:[%s7923_s0 + $0x58] sm:$0xff] }
  0x3b   :  { %v164_v19 = vld [vmem:[%s7923_s0 + $0x8] sm:$0xff]  ;;  %v173_v22 = vld [vmem:[%s7923_s0 + $0x50] sm:$0xff]  ;;  %v166_v24 = vld [vmem:[%s7923_s0 + $0x18] sm:$0xff]  ;;  %8158 = vst [vmem:[#allocation29_spill] sm:$0xff] %v4868_v60 }
  0x3c   :  { %v167_v26 = vld [vmem:[%s7923_s0 + $0x20] sm:$0xff]  ;;  %v172_v28 = vld [vmem:[%s7923_s0 + $0x48] sm:$0xff]  ;;  %v177_v30 = vld [vmem:[%s7923_s0 + $0x70] sm:$0xff] }
  0x3d   :  { %v171_v27 = vld [vmem:[%s7923_s0 + $0x40] sm:$0xff]  ;;  %v176_v29 = vld [vmem:[%s7923_s0 + $0x68] sm:$0xff]  ;;  %v170_v31 = vld [vmem:[%s7923_s0 + $0x38] sm:$0xff] }
  0x3e   :  { %400 = vperm.xlu0 %4521, %v168_v18   ;;  %284 = vperm.xlu1 %4520, %v164_v19   ;;  %v178_v32 = vld [vmem:[%s7923_s0 + $0x78] sm:$0xff]  ;;  %v175_v33 = vld [vmem:[%s7923_s0 + $0x60] sm:$0xff]  ;;  %v4551_v63 = vld [vmem:[%s7925_s2 + $0x8] sm:$0xff]  }
  0x3f   :  { %v4550_v57 = vld [vmem:[%s7925_s2] sm:$0xff]  }
  0x40   :  { %4442 = vmatprep.subr.bf16.mxu1 %v4550_v57  ;;  %v158_v61 = vld [vmem:[#allocation6 + $0x40] sm:$0x38] }
  0x41   :  { %4443 = vmatpush3.bf16.msra.mxu1 %v4550_v57 }
  0x42   :  { %404 = vperm.xlu0 %4521, %v169_v20   ;;  %288 = vperm.xlu1 %4520, %v165_v21  }
  0x43   :  { %4444 = vmatprep.subr.bf16.mxu1 %v4551_v63 }
  0x45   :  { %4445 = vmatpush3.bf16.msra.mxu1 %v4551_v63 }
  0x46   :  { %420 = vperm.xlu0 %4521, %v173_v22   ;;  %4522 = vset.pattern.permute.xlu1 %v4619_v0 }
  0x47   :  { %384 = vperm.xlu1 %4522, %v164_v19  }
  0x4a   :  { %424 = vperm.xlu0 %4521, %v174_v23  }
  0x4b   :  { %4523 = vset.pattern.permute.xlu1 %v7930_v25 }
  0x4c   :  { %196 = vperm.xlu1 %4523, %v166_v24  }
  0x4e   :  { %4541 = vset.pattern.permute.xlu0 %v4620_v1 }
  0x4f   :  { %292 = vperm.xlu0 %4541, %v166_v24  }
  0x50   :  { %4524 = vset.pattern.permute.xlu1 %v4619_v0 }
  0x51   :  { %388 = vperm.xlu1 %4524, %v165_v21  }
  0x53   :  { %296 = vperm.xlu0 %4541, %v167_v26  }
  0x55   :  { %4525 = vset.pattern.permute.xlu1 %v7930_v25 }
  0x56   :  { %201 = vperm.xlu1 %4525, %v167_v26  }
  0x57   :  { %312 = vperm.xlu0 %4541, %v171_v27  }
  0x5a   :  { %4526 = vset.pattern.permute.xlu1 %v4619_v0 }
  0x5b   :  { %316 = vperm.xlu0 %4541, %v172_v28   ;;  %392 = vperm.xlu1 %4526, %v166_v24  }
  0x5f   :  { %332 = vperm.xlu0 %4541, %v176_v29   ;;  %4527 = vset.pattern.permute.xlu1 %v4620_v1 }
  0x60   :  { %300 = vperm.xlu1 %4527, %v168_v18  }
  0x63   :  { %336 = vperm.xlu0 %4541, %v177_v30  }
  0x64   :  { %4528 = vset.pattern.permute.xlu1 %v4619_v0 }
  0x65   :  { %396 = vperm.xlu1 %4528, %v167_v26  }
  0x67   :  { %4545 = vset.pattern.permute.xlu0 %v7930_v25 }
  0x68   :  { %181 = vperm.xlu0 %4545, %v163_v17   ;;  %v4879_v17 = vrot.slane %v158_v61, %v4865_v59 }
  0x69   :  { %4529 = vset.pattern.permute.xlu1 %v4620_v1 }
  0x6a   :  { %304 = vperm.xlu1 %4529, %v169_v20  }
  0x6c   :  { %186 = vperm.xlu0 %4545, %v164_v19  }
  0x6e   :  { %4530 = vset.pattern.permute.xlu1 %v7930_v25 }
  0x6f   :  { %216 = vperm.xlu1 %4530, %v170_v31  }
  0x70   :  { %191 = vperm.xlu0 %4545, %v165_v21  }
  0x73   :  { %4531 = vset.pattern.permute.xlu1 %v4620_v1 }
  0x74   :  { %206 = vperm.xlu0 %4545, %v168_v18   ;;  %308 = vperm.xlu1 %4531, %v170_v31   ;;  %v4882_v18 = vrot.slane %v158_v61, %v4868_v60 }
  0x78   :  { %211 = vperm.xlu0 %4545, %v169_v20   ;;  %4532 = vset.pattern.permute.xlu1 %v7930_v25 }
  0x79   :  { %221 = vperm.xlu1 %4532, %v171_v27  }
  0x7c   :  { %231 = vperm.xlu0 %4545, %v173_v22  }
  0x7d   :  { %4533 = vset.pattern.permute.xlu1 %v4619_v0 }
  0x7e   :  { %408 = vperm.xlu1 %4533, %v170_v31  }
  0x80   :  { %236 = vperm.xlu0 %4545, %v174_v23  }
  0x82   :  { %4534 = vset.pattern.permute.xlu1 %v7930_v25 }
  0x83   :  { %226 = vperm.xlu1 %4534, %v172_v28  }
  0x84   :  { %256 = vperm.xlu0 %4545, %v178_v32  }
  0x87   :  { %4535 = vset.pattern.permute.xlu1 %v4619_v0 }
  0x88   :  { %412 = vperm.xlu1 %4535, %v171_v27   ;;  %4549 = vset.pattern.permute.xlu0 %v4619_v0 }
  0x89   :  { %440 = vperm.xlu0 %4549, %v178_v32  }
  0x8c   :  { %4536 = vset.pattern.permute.xlu1 %v4620_v1 }
  0x8d   :  { %320 = vperm.xlu1 %4536, %v173_v22   ;;  %v4552_v22 = vld [vmem:[%s7925_s2 + $0x10] sm:$0xff]  }
  0x8e   :  { %4446 = vmatprep.subr.bf16.mxu1 %v4552_v22 }
  0x8f   :  { %4447 = vmatpush3.bf16.msra.mxu1 %v4552_v22 }
  0x91   :  { %4537 = vset.pattern.permute.xlu1 %v4619_v0 }
  0x92   :  { %416 = vperm.xlu1 %4537, %v172_v28   ;;  %v4553_v28 = vld [vmem:[%s7925_s2 + $0x18] sm:$0xff]  }
  0x93   :  { %4448 = vmatprep.subr.bf16.mxu1 %v4553_v28 }
  0x94   :  { %4449 = vmatpush3.bf16.msra.mxu1 %v4553_v28 }
  0x96   :  { %4538 = vset.pattern.permute.xlu1 %v4620_v1 }
  0x97   :  { %324 = vperm.xlu1 %4538, %v174_v23  }
  0x9b   :  { %4539 = vset.pattern.permute.xlu1 %v7930_v25 }
  0x9c   :  { %241 = vperm.xlu1 %4539, %v175_v33  }
  0xa0   :  { %4540 = vset.pattern.permute.xlu1 %v4620_v1 }
  0xa1   :  { %328 = vperm.xlu1 %4540, %v175_v33  }
  0xa5   :  { %4542 = vset.pattern.permute.xlu1 %v7930_v25 }
  0xa6   :  { %246 = vperm.xlu1 %4542, %v176_v29  }
  0xaa   :  { %4543 = vset.pattern.permute.xlu1 %v4619_v0 }
  0xab   :  { %428 = vperm.xlu1 %4543, %v175_v33  }
  0xaf   :  { %4544 = vset.pattern.permute.xlu1 %v7930_v25 }
  0xb0   :  { %251 = vperm.xlu1 %4544, %v177_v30  }
  0xb4   :  { %4546 = vset.pattern.permute.xlu1 %v4619_v0 }
  0xb5   :  { %432 = vperm.xlu1 %4546, %v176_v29  }
  0xb9   :  { %4547 = vset.pattern.permute.xlu1 %v4620_v1  ;;  %v4825_v34 = vpop.permute.xlu1 %280  ;;  %v4827_v35 = vpop.permute.xlu0 %380  ;;  %v4876_v1 = vrot.slane %v158_v61, %v4862_v58 }
  0xba   :  { %340 = vperm.xlu1 %4547, %v178_v32  }
  0xbd   :  { %v285_v36 = vpop.permute.xlu1 %284  ;;  %v4829_v37 = vpop.permute.xlu0 %400 }
  0xbe   :  { %4548 = vset.pattern.permute.xlu1 %v4619_v0  ;;  %v348_v20 = vmul.f32 %v4876_v1, %v285_v36 }
  0xbf   :  { %436 = vperm.xlu1 %4548, %v177_v30  }
  0xc1   :  { %v289_v38 = vpop.permute.xlu1 %288  ;;  %v4832_v39 = vpop.permute.xlu0 %404 }
  0xc2   :  { %v349_v29 = vmul.f32 %v4876_v1, %v289_v38 }
  0xc5   :  { %v4834_v40 = vpop.permute.xlu0 %420 }
  0xc6   :  { %v385_v41 = vpop.permute.xlu1 %384 }
  0xc7   :  { %v448_v23 = vmul.f32 %v4879_v17, %v385_v41 }
  0xc9   :  { %v4836_v42 = vpop.permute.xlu0 %424 }
  0xcb   :  { %v4838_v43 = vpop.permute.xlu1 %196 }
  0xce   :  { %v293_v44 = vpop.permute.xlu0 %292 }
  0xd0   :  { %v389_v45 = vpop.permute.xlu1 %388 }
  0xd1   :  { %v449_v32 = vmul.f32 %v4879_v17, %v389_v45  ;;  %v447_v45 = vmul.f32 %v4879_v17, %v4827_v35 }
  0xd2   :  { %v4840_v46 = vpop.permute.xlu0 %296 }
  0xd3   :  { %v351_v35 = vmul.f32 %v4876_v1, %v4840_v46 }
  0xd5   :  { %v4842_v47 = vpop.permute.xlu1 %201 }
  0xd6   :  { %v4844_v48 = vpop.permute.xlu0 %312 }
  0xda   :  { %v393_v49 = vpop.permute.xlu1 %392  ;;  %v4846_v50 = vpop.permute.xlu0 %316 }
  0xde   :  { %v4848_v52 = vpop.permute.xlu0 %332 }
  0xdf   :  { %v4850_v53 = vpop.permute.xlu1 %300 }
  0xe2   :  { %v4854_v55 = vpop.permute.xlu0 %336 }
  0xe4   :  { %v4856_v56 = vpop.permute.xlu1 %396 }
  0xe7   :  { %v182_v62 = vpop.permute.xlu0 %181 }
  0xe8   :  { %v263_v38 = vmul.f32 %v4882_v18, %v182_v62  ;;  %v450_v62 = vmul.f32 %v4879_v17, %v393_v49 }
  0xe9   :  { %v4873_v0 = vpop.permute.xlu1 %304 }
  0xeb   :  { %v187_v19 = vpop.permute.xlu0 %186 }
  0xec   :  { %v264_v21 = vmul.f32 %v4882_v18, %v187_v19 }
  0xee   :  { %v364_v24 = vadd.f32 %v348_v20, %v264_v21  ;;  %v4890_v26 = vpop.permute.xlu1 %216  ;;  %v347_v21 = vmul.f32 %v4876_v1, %v4825_v34 }
  0xef   :  { %v192_v27 = vpop.permute.xlu0 %191 }
  0xf0   :  { %v4896_v30 = vadd.f32 %v448_v23, %v364_v24  ;;  %v265_v31 = vmul.f32 %v4882_v18, %v192_v27  ;;  %v363_v22 = vadd.f32 %v347_v21, %v263_v38  ;;  %v350_v27 = vmul.f32 %v4876_v1, %v293_v44 }
  0xf2   :  { %v365_v33 = vadd.f32 %v349_v29, %v265_v31  ;;  %v4916_v28 = vadd.f32 %v447_v45, %v363_v22  ;;  %v266_v29 = vmul.f32 %v4882_v18, %v4838_v43  ;;  %v518_v31 = vmul.f32 %v4896_v30, %v4896_v30 }
  0xf3   :  { %v309_v36 = vpop.permute.xlu1 %308  ;;  %v207_v24 = vpop.permute.xlu0 %206  ;;  %v481_v43 = vsel %vm479_vm0, %v4896_v30, 0.0  ;;  %v451_v45 = vmul.f32 %v4879_v17, %v4856_v56 }
  0xf4   :  { %v4900_v41 = vadd.f32 %v449_v32, %v365_v33  ;;  %v366_v32 = vadd.f32 %v350_v27, %v266_v29  ;;  %v267_v33 = vmul.f32 %v4882_v18, %v4842_v47  ;;  %v517_v44 = vmul.f32 %v4916_v28, %v4916_v28 }
  0xf5   :  { %v480_v46 = vsel %vm479_vm0, %v4916_v28, 0.0  ;;  %v534_v47 = vsel %vm479_vm0, %v518_v31, 0.0  ;;  %v268_v27 = vmul.f32 %v4882_v18, %v207_v24  ;;  %v353_v31 = vmul.f32 %v4876_v1, %v4873_v0 }
  0xf6   :  { %v519_v49 = vmul.f32 %v4900_v41, %v4900_v41  ;;  %v4935_v21 = vadd.f32 %v450_v62, %v366_v32  ;;  %v483_v22 = vsel %vm479_vm0, %v4900_v41, 0.0  ;;  %v367_v29 = vadd.f32 %v351_v35, %v267_v33 }
  0xf7   :  { %v212_v38 = vpop.permute.xlu0 %211  ;;  %v482_v7 = vadd.f32 %v481_v43, %v480_v46  ;;  %v352_v62 = vmul.f32 %v4876_v1, %v4850_v53  ;;  %v533_v56 = vsel %vm479_vm0, %v517_v44, 0.0  ;;  %v452_v53 = vmul.f32 %v4879_v17, %v4829_v37 }
  0xf8   :  { %v222_v51 = vpop.permute.xlu1 %221  ;;  %v269_v4 = vmul.f32 %v4882_v18, %v212_v38  ;;  %v536_v32 = vsel %vm479_vm0, %v519_v49, 0.0  ;;  %v4950_v12 = vadd.f32 %v451_v45, %v367_v29  ;;  %v535_v11 = vadd.f32 %v534_v47, %v533_v56 }
  0xf9   :  { %v484_v10 = vadd.f32 %v483_v22, %v482_v7  ;;  %v520_v24 = vmul.f32 %v4935_v21, %v4935_v21  ;;  %v368_v35 = vadd.f32 %v352_v62, %v268_v27  ;;  %v453_v44 = vmul.f32 %v4879_v17, %v4832_v39 }
  0xfa   :  { %v537_v33 = vadd.f32 %v536_v32, %v535_v11  ;;  %v369_v43 = vadd.f32 %v353_v31, %v269_v4  ;;  %v485_v49 = vsel %vm479_vm0, %v4935_v21, 0.0  ;;  %v354_v38 = vmul.f32 %v4876_v1, %v309_v36 }
  0xfb   :  { %v355_v7 = vmul.f32 %v4876_v1, %v4844_v48  ;;  %v521_v45 = vmul.f32 %v4950_v12, %v4950_v12  ;;  %v486_v11 = vadd.f32 %v485_v49, %v484_v10  ;;  %v271_v4 = vmul.f32 %v4882_v18, %v222_v51  ;;  %v232_v46 = vpop.permute.xlu0 %231 }
  0xfc   :  { %v538_v37 = vsel %vm479_vm0, %v520_v24, 0.0  ;;  %v270_v39 = vmul.f32 %v4882_v18, %v4890_v26  ;;  %v4971_v47 = vadd.f32 %v452_v53, %v368_v35  ;;  %v4974_v27 = vadd.f32 %v453_v44, %v369_v43 }
  0xfd   :  { %v409_v57 = vpop.permute.xlu1 %408  ;;  %v539_v22 = vadd.f32 %v538_v37, %v537_v33  ;;  %v356_v10 = vmul.f32 %v4876_v1, %v4846_v50  ;;  %v487_v51 = vsel %vm479_vm0, %v4950_v12, 0.0  ;;  %v540_v26 = vsel %vm479_vm0, %v521_v45, 0.0 }
  0xfe   :  { %v454_v36 = vmul.f32 %v4879_v17, %v409_v57  ;;  %v370_v29 = vadd.f32 %v354_v38, %v270_v39  ;;  %v488_v56 = vadd.f32 %v487_v51, %v486_v11  ;;  %v371_v32 = vadd.f32 %v355_v7, %v271_v4 }
  0xff   :  { %v237_v57 = vpop.permute.xlu0 %236  ;;  %v489_v24 = vsel %vm479_vm0, %v4971_v47, 0.0  ;;  %v541_v33 = vadd.f32 %v540_v26, %v539_v22  ;;  %v273_v53 = vmul.f32 %v4882_v18, %v232_v46  ;;  %v491_v4 = vsel %vm479_vm0, %v4974_v27, 0.0 }
 0x100   :  { %v4988_v50 = vadd.f32 %v454_v36, %v370_v29  ;;  %v274_v38 = vmul.f32 %v4882_v18, %v237_v57  ;;  %v490_v45 = vadd.f32 %v489_v24, %v488_v56  ;;  %v458_v39 = vmul.f32 %v4879_v17, %v4836_v42 }
 0x101   :  { %v360_v29 = vmul.f32 %v4876_v1, %v4848_v52 }
 0x102   :  { %v4902_v61 = vpop.permute.xlu1 %226  ;;  %v524_v46 = vmul.f32 %v4988_v50, %v4988_v50 }
 0x103   :  { %v272_v62 = vmul.f32 %v4882_v18, %v4902_v61  ;;  %v523_v61 = vmul.f32 %v4974_v27, %v4974_v27 }
 0x104   :  { %v546_v56 = vsel %vm479_vm0, %v524_v46, 0.0 }
 0x105   :  { %v372_v44 = vadd.f32 %v356_v10, %v272_v62  ;;  %v544_v22 = vsel %vm479_vm0, %v523_v61, 0.0  ;;  %v492_v62 = vadd.f32 %v491_v4, %v490_v45 }
 0x107   :  { %v413_v63 = vpop.permute.xlu1 %412 }
 0x108   :  { %v455_v48 = vmul.f32 %v4879_v17, %v413_v63  ;;  %v522_v63 = vmul.f32 %v4971_v47, %v4971_v47 }
 0x10a   :  { %v4994_v43 = vadd.f32 %v455_v48, %v371_v32  ;;  %v542_v11 = vsel %vm479_vm0, %v522_v63, 0.0  ;;  %v493_v48 = vsel %vm479_vm0, %v4988_v50, 0.0 }
 0x10b   :  { %v543_v36 = vadd.f32 %v542_v11, %v541_v33  ;;  %v494_v24 = vadd.f32 %v493_v48, %v492_v62 }
 0x10c   :  { %v4904_v19 = vpop.permute.xlu1 %320 }
 0x10d   :  { %v357_v49 = vmul.f32 %v4876_v1, %v4904_v19  ;;  %v545_v63 = vadd.f32 %v544_v22, %v543_v36 }
 0x10f   :  { %v373_v10 = vadd.f32 %v357_v49, %v273_v53  ;;  %v547_v49 = vadd.f32 %v546_v56, %v545_v63 }
 0x111   :  { %v4907_v20 = vpop.permute.xlu1 %416 }
 0x112   :  { %v456_v35 = vmul.f32 %v4879_v17, %v4907_v20  ;;  %v457_v20 = vmul.f32 %v4879_v17, %v4834_v40 }
 0x114   :  { %v5009_v37 = vadd.f32 %v456_v35, %v372_v44  ;;  %v257_v35 = vpop.permute.xlu0 %256 }
 0x115   :  { %v278_v22 = vmul.f32 %v4882_v18, %v257_v35 }
 0x116   :  { %v4913_v23 = vpop.permute.xlu1 %324  ;;  %v526_v32 = vmul.f32 %v5009_v37, %v5009_v37 }
 0x117   :  { %v358_v7 = vmul.f32 %v4876_v1, %v4913_v23  ;;  %v525_v23 = vmul.f32 %v4994_v43, %v4994_v43 }
 0x118   :  { %v441_v46 = vpop.permute.xlu0 %440 }
 0x119   :  { %v374_v51 = vadd.f32 %v358_v7, %v274_v38  ;;  %v548_v52 = vsel %vm479_vm0, %v525_v23, 0.0 }
 0x11a   :  { %v549_v11 = vadd.f32 %v548_v52, %v547_v49 }
 0x11b   :  { %v4923_v34 = vpop.permute.xlu1 %241  ;;  %v5035_v53 = vadd.f32 %v458_v39, %v374_v51 }
 0x11c   :  { %v275_v42 = vmul.f32 %v4882_v18, %v4923_v34  ;;  %v5031_v34 = vadd.f32 %v457_v20, %v373_v10 }
 0x11d   :  { %v528_v36 = vmul.f32 %v5035_v53, %v5035_v53 }
 0x11e   :  { %v527_v20 = vmul.f32 %v5031_v34, %v5031_v34  ;;  %v499_v51 = vsel %vm479_vm0, %v5031_v34, 0.0 }
 0x120   :  { %v329_v25 = vpop.permute.xlu1 %328 }
 0x121   :  { %v359_v40 = vmul.f32 %v4876_v1, %v329_v25  ;;  %v495_v25 = vsel %vm479_vm0, %v4994_v43, 0.0 }
 0x122   :  { %v496_v38 = vadd.f32 %v495_v25, %v494_v24 }
 0x123   :  { %v375_v33 = vadd.f32 %v359_v40, %v275_v42  ;;  %v462_v42 = vmul.f32 %v4879_v17, %v441_v46 }
 0x125   :  { %v247_v0 = vpop.permute.xlu1 %246 }
 0x126   :  { %v276_v57 = vmul.f32 %v4882_v18, %v247_v0  ;;  %v550_v0 = vsel %vm479_vm0, %v526_v32, 0.0  ;;  %v552_v32 = vsel %vm479_vm0, %v527_v20, 0.0 }
 0x127   :  { %v551_v40 = vadd.f32 %v550_v0, %v549_v11 }
 0x128   :  { %v376_v45 = vadd.f32 %v360_v29, %v276_v57  ;;  %v501_v29 = vsel %vm479_vm0, %v5035_v53, 0.0  ;;  %v554_v57 = vsel %vm479_vm0, %v528_v36, 0.0 }
 0x129   :  { %v553_v52 = vadd.f32 %v552_v32, %v551_v40 }
 0x12a   :  { %v429_v31 = vpop.permute.xlu1 %428 }
 0x12b   :  { %v459_v26 = vmul.f32 %v4879_v17, %v429_v31  ;;  %v497_v31 = vsel %vm479_vm0, %v5009_v37, 0.0 }
 0x12c   :  { %v498_v4 = vadd.f32 %v497_v31, %v496_v38 }
 0x12d   :  { %v5038_v7 = vadd.f32 %v459_v26, %v375_v33  ;;  %v361_v26 = vmul.f32 %v4876_v1, %v4854_v55 }
 0x12e   :  { %v500_v56 = vadd.f32 %v499_v51, %v498_v4 }
 0x12f   :  { %v252_v19 = vpop.permute.xlu1 %251  ;;  %v529_v48 = vmul.f32 %v5038_v7, %v5038_v7  ;;  %v503_v24 = vsel %vm479_vm0, %v5038_v7, 0.0 }
 0x130   :  { %v277_v62 = vmul.f32 %v4882_v18, %v252_v19  ;;  %v502_v35 = vadd.f32 %v501_v29, %v500_v56 }
 0x131   :  { %v556_v18 = vsel %vm479_vm0, %v529_v48, 0.0 }
 0x132   :  { %v377_v33 = vadd.f32 %v361_v26, %v277_v62  ;;  %v504_v31 = vadd.f32 %v503_v24, %v502_v35 }
 0x134   :  { %v433_v61 = vpop.permute.xlu1 %432 }
 0x135   :  { %v460_v44 = vmul.f32 %v4879_v17, %v433_v61 }
 0x137   :  { %v5045_v39 = vadd.f32 %v460_v44, %v376_v45  ;;  %v555_v44 = vadd.f32 %v554_v57, %v553_v52 }
 0x139   :  { %v341_v23 = vpop.permute.xlu1 %340  ;;  %v530_v63 = vmul.f32 %v5045_v39, %v5045_v39  ;;  %v505_v55 = vsel %vm479_vm0, %v5045_v39, 0.0  ;;  %v557_v0 = vadd.f32 %v556_v18, %v555_v44 }
 0x13a   :  { %v362_v10 = vmul.f32 %v4876_v1, %v341_v23  ;;  %v506_v45 = vadd.f32 %v505_v55, %v504_v31  ;;  %v137_v31 = vld [vmem:[#allocation6] ss:$0 sm:$0xff] }
 0x13b   :  { %v558_v49 = vsel %vm479_vm0, %v530_v63, 0.0 }
 0x13c   :  { %v378_v25 = vadd.f32 %v362_v10, %v278_v22  ;;  %v559_v20 = vadd.f32 %v558_v49, %v557_v0  ;;  %v138_v0 = vld [vmem:[#allocation6 + $0x1] ss:$0 sm:$0xff] }
 0x13e   :  { %v437_v19 = vpop.permute.xlu1 %436  ;;  %v5068_v1 = vadd.f32 %v462_v42, %v378_v25 }
 0x13f   :  { %v461_v61 = vmul.f32 %v4879_v17, %v437_v19 }
 0x140   :  { %v532_v11 = vmul.f32 %v5068_v1, %v5068_v1  ;;  %v509_v23 = vsel %vm479_vm0, %v5068_v1, 0.0 }
 0x141   :  { %v477_v38 = vadd.f32 %v461_v61, %v377_v33 }
 0x142   :  { %v562_v48 = vsel %vm479_vm0, %v532_v11, 0.0 }
 0x143   :  { %v507_v4 = vsel %vm479_vm0, %v477_v38, 0.0  ;;  %v531_v46 = vmul.f32 %v477_v38, %v477_v38 }
 0x144   :  { %v508_v36 = vadd.f32 %v507_v4, %v506_v45 }
 0x145   :  { %v560_v17 = vsel %vm479_vm0, %v531_v46, 0.0 }
 0x146   :  { %v510_v40 = vadd.f32 %v509_v23, %v508_v36  ;;  %v561_v22 = vadd.f32 %v560_v17, %v559_v20 }
 0x148   :  { %v511_v10 = vrot.slane %v510_v40, 4  ;;  %v563_v51 = vadd.f32 %v562_v48, %v561_v22 }
 0x14a   :  { %v512_v29 = vadd.f32 %v511_v10, %v510_v40  ;;  %v564_v62 = vrot.slane %v563_v51, 4 }
 0x14c   :  { %v513_v42 = vrot.slane %v512_v29, 2  ;;  %v565_v26 = vadd.f32 %v564_v62, %v563_v51 }
 0x14e   :  { %v514_v56 = vadd.f32 %v513_v42, %v512_v29  ;;  %v566_v25 = vrot.slane %v565_v26, 2 }
 0x150   :  { %v515_v32 = vrot.slane %v514_v56, 1  ;;  %v567_v57 = vadd.f32 %v566_v25, %v565_v26 }
 0x152   :  { %v516_v24 = vadd.f32 %v515_v32, %v514_v56  ;;  %v568_v63 = vrot.slane %v567_v57, 1 }
 0x154   :  { %v569_v52 = vadd.f32 %v568_v63, %v567_v57  ;;  %v570_v35 = vmul.f32 0.0078125, %v516_v24 }
 0x156   :  { %v571_v18 = vmul.f32 0.0078125, %v569_v52  ;;  %v572_v19 = vmul.f32 %v570_v35, %v570_v35 }
 0x158   :  { %v573_v33 = vsub.f32 %v571_v18, %v572_v19 }
 0x15a   :  { %v574_v55 = vmax.f32 %v573_v33, 0.0 }
 0x15c   :  { %v575_v61 = vadd.f32 1e-05, %v574_v55 }
 0x15e   :  { %4554 = vrsqrt.f32 %v575_v61 }
 0x168   :  { %v4555_v44 = vpop.eup %4554 }
 0x169   :  { %v577_v49 = vmul.f32 %v4555_v44, %v137_v31 }
 0x16b   :  { %v578_v45 = vmul.f32 %v577_v49, %v570_v35  ;;  %v580_v4 = vmul.f32 %v577_v49, %v4916_v28  ;;  %v581_v46 = vmul.f32 %v577_v49, %v4896_v30  ;;  %v582_v20 = vmul.f32 %v577_v49, %v4900_v41 }
 0x16c   :  { %v583_v36 = vmul.f32 %v577_v49, %v4935_v21  ;;  %v584_v23 = vmul.f32 %v577_v49, %v4950_v12  ;;  %v585_v17 = vmul.f32 %v577_v49, %v4971_v47  ;;  %v594_v10 = vmul.f32 %v577_v49, %v477_v38 }
 0x16d   :  { %v579_v11 = vsub.f32 %v138_v0, %v578_v45  ;;  %v586_v30 = vmul.f32 %v577_v49, %v4974_v27  ;;  %v587_v21 = vmul.f32 %v577_v49, %v4988_v50  ;;  %v588_v47 = vmul.f32 %v577_v49, %v4994_v43 }
 0x16e   :  { %v589_v32 = vmul.f32 %v577_v49, %v5009_v37  ;;  %v595_v27 = vmul.f32 %v577_v49, %v5068_v1  ;;  %v590_v61 = vmul.f32 %v577_v49, %v5031_v34  ;;  %v591_v31 = vmul.f32 %v577_v49, %v5035_v53 }
 0x16f   :  { %v596_v40 = vadd.f32 %v580_v4, %v579_v11  ;;  %v597_v22 = vadd.f32 %v581_v46, %v579_v11  ;;  %v598_v48 = vadd.f32 %v582_v20, %v579_v11  ;;  %v599_v51 = vadd.f32 %v583_v36, %v579_v11 }
 0x170   :  { %v600_v29 = vadd.f32 %v584_v23, %v579_v11  ;;  %v601_v62 = vadd.f32 %v585_v17, %v579_v11  ;;  %v610_v57 = vadd.f32 %v594_v10, %v579_v11  ;;  %v602_v24 = vadd.f32 %v586_v30, %v579_v11 }
 0x171   :  { %v612_v42 = vmax.f32 %v596_v40, 0.0  ;;  %v613_v26 = vmax.f32 %v597_v22, 0.0  ;;  %v614_v28 = vmax.f32 %v598_v48, 0.0  ;;  %v615_v56 = vmax.f32 %v599_v51, 0.0 }
 0x172   :  { %v616_v41 = vmax.f32 %v600_v29, 0.0  ;;  %v617_v25 = vmax.f32 %v601_v62, 0.0  ;;  %v603_v63 = vadd.f32 %v587_v21, %v579_v11  ;;  %v604_v35 = vadd.f32 %v588_v47, %v579_v11 }
 0x173   :  { %v628_v12 = vpack.c.bf16 %v613_v26, %v612_v42  ;;  %v629_v38 = vpack.c.bf16 %v615_v56, %v614_v28  ;;  %v605_v18 = vadd.f32 %v589_v32, %v579_v11  ;;  %v618_v50 = vmax.f32 %v602_v24, 0.0 }
 0x174   :  { %v630_v52 = vpack.c.bf16 %v617_v25, %v616_v41  ;;  %v619_v19 = vmax.f32 %v603_v63, 0.0  ;;  %v611_v43 = vadd.f32 %v595_v27, %v579_v11  ;;  %v626_v33 = vmax.f32 %v610_v57, 0.0 }
 0x175   :  { %4450 = vmatprep.mubr.msk.bf16.mxu1 %vm479_vm0, %v628_v12  ;;  %v620_v37 = vmax.f32 %v604_v35, 0.0  ;;  %v621_v55 = vmax.f32 %v605_v18, 0.0  ;;  %v592_v0 = vmul.f32 %v577_v49, %v5038_v7  ;;  %v593_v45 = vmul.f32 %v577_v49, %v5045_v39 }
 0x176   :  { %4451 = vmatmul.mubr.msk.bf16.vlgmr.msra.gmra.mrb[0].mxu1 %vm479_vm0, %v629_v38  ;;  %v627_v44 = vmax.f32 %v611_v43, 0.0  ;;  %v631_v4 = vpack.c.bf16 %v619_v19, %v618_v50  ;;  %v606_v46 = vadd.f32 %v590_v61, %v579_v11  ;;  %v607_v1 = vadd.f32 %v591_v31, %v579_v11 }
 0x177   :  { %4454 = vmatprep.mubr.msk.bf16.mxu1 %vm479_vm0, %v630_v52  ;;  %v632_v36 = vpack.c.bf16 %v621_v55, %v620_v37  ;;  %v608_v23 = vadd.f32 %v592_v0, %v579_v11  ;;  %v609_v17 = vadd.f32 %v593_v45, %v579_v11 }
 0x178   :  { %v635_v20 = vpack.c.bf16 %v627_v44, %v626_v33  ;;  %v622_v40 = vmax.f32 %v606_v46, 0.0  ;;  %v623_v34 = vmax.f32 %v607_v1, 0.0 }
 0x179   :  { %v624_v22 = vmax.f32 %v608_v23, 0.0  ;;  %v625_v53 = vmax.f32 %v609_v17, 0.0 }
 0x17a   :  { %v633_v48 = vpack.c.bf16 %v623_v34, %v622_v40 }
 0x17b   :  { %v634_v10 = vpack.c.bf16 %v625_v53, %v624_v22 }
 0x17e   :  { %4455 = vmatmul.mubr.msk.bf16.gmra.mrb[4].mxu1 %vm479_vm0, %v631_v4 }
 0x17f   :  { %4458 = vmatprep.mubr.msk.bf16.mxu1 %vm479_vm0, %v632_v36 }
 0x186   :  { %4459 = vmatmul.mubr.msk.bf16.gmra.mrb[8].mxu1 %vm479_vm0, %v633_v48 }
 0x187   :  { %4462 = vmatprep.mubr.msk.bf16.mxu1 %vm479_vm0, %v634_v10 }
 0x18e   :  { %4463 = vmatmul.mubr.msk.bf16.gmra.mrb[12].mxu1 %vm479_vm0, %v635_v20 }
 0x249   :  { %v5102_v7 = vpop.f32.mrb[0].mxu1 }
 0x24a   :  { %v5104_v39 = vpop.f32.mrb[1].mxu1  ;;  %v812_v42 = vmul.f32 %v5102_v7, %v5102_v7 }
 0x24b   :  { %v5106_v49 = vpop.f32.mrb[2].mxu1  ;;  %v810_v51 = vmul.f32 %v5104_v39, %v5104_v39 }
 0x24c   :  { %v5108_v11 = vpop.f32.mrb[3].mxu1  ;;  %v813_v30 = vmul.f32 %v5106_v49, %v5106_v49 }
 0x24d   :  { %v789_v29 = vadd.f32 %v5108_v11, %v5104_v39  ;;  %v811_v62 = vmul.f32 %v5108_v11, %v5108_v11 }
 0x24f   :  { %v790_v26 = vadd.f32 %v5102_v7, %v789_v29  ;;  %v826_v28 = vadd.f32 %v811_v62, %v810_v51 }
 0x251   :  { %v827_v56 = vadd.f32 %v826_v28, %v812_v42  ;;  %v5121_v41 = vpop.f32.mrb[4].mxu1  ;;  %v791_v25 = vadd.f32 %v5106_v49, %v790_v26 }
 0x252   :  { %v5124_v21 = vpop.f32.mrb[5].mxu1  ;;  %v816_v35 = vmul.f32 %v5121_v41, %v5121_v41 }
 0x253   :  { %v792_v12 = vadd.f32 %v791_v25, %v5124_v21  ;;  %v814_v47 = vmul.f32 %v5124_v21, %v5124_v21  ;;  %v828_v32 = vadd.f32 %v827_v56, %v813_v30  ;;  %v5129_v57 = vpop.f32.mrb[6].mxu1 }
 0x254   :  { %v5131_v38 = vpop.f32.mrb[7].mxu1  ;;  %v817_v50 = vmul.f32 %v5129_v57, %v5129_v57 }
 0x255   :  { %v829_v24 = vadd.f32 %v828_v32, %v814_v47  ;;  %v793_v63 = vadd.f32 %v792_v12, %v5131_v38  ;;  %v815_v52 = vmul.f32 %v5131_v38, %v5131_v38 }
 0x257   :  { %v794_v18 = vadd.f32 %v5121_v41, %v793_v63  ;;  %v830_v27 = vadd.f32 %v829_v24, %v815_v52 }
 0x259   :  { %v831_v19 = vadd.f32 %v830_v27, %v816_v35  ;;  %v5141_v43 = vpop.f32.mrb[8].mxu1  ;;  %v795_v33 = vadd.f32 %v5129_v57, %v794_v18 }
 0x25a   :  { %v5144_v37 = vpop.f32.mrb[9].mxu1  ;;  %v820_v1 = vmul.f32 %v5141_v43, %v5141_v43 }
 0x25b   :  { %v796_v55 = vadd.f32 %v795_v33, %v5144_v37  ;;  %v818_v61 = vmul.f32 %v5144_v37, %v5144_v37  ;;  %v832_v31 = vadd.f32 %v831_v19, %v817_v50  ;;  %v5149_v44 = vpop.f32.mrb[10].mxu1 }
 0x25c   :  { %v761_v0 = vpop.f32.mrb[11].mxu1  ;;  %v821_v23 = vmul.f32 %v5149_v44, %v5149_v44 }
 0x25d   :  { %v833_v45 = vadd.f32 %v832_v31, %v818_v61  ;;  %v797_v4 = vadd.f32 %v796_v55, %v761_v0  ;;  %v819_v46 = vmul.f32 %v761_v0, %v761_v0 }
 0x25f   :  { %v798_v20 = vadd.f32 %v5141_v43, %v797_v4  ;;  %v834_v36 = vadd.f32 %v833_v45, %v819_v46 }
 0x261   :  { %v835_v17 = vadd.f32 %v834_v36, %v820_v1  ;;  %v4464_v40 = vpop.f32.mrb[12].mxu1  ;;  %v799_v34 = vadd.f32 %v5149_v44, %v798_v20 }
 0x262   :  { %v774_v22 = vpop.f32.mrb[13].mxu1  ;;  %v824_v28 = vmul.f32 %v4464_v40, %v4464_v40 }
 0x263   :  { %v800_v53 = vadd.f32 %v799_v34, %v774_v22  ;;  %v822_v48 = vmul.f32 %v774_v22, %v774_v22  ;;  %v836_v10 = vadd.f32 %v835_v17, %v821_v23  ;;  %v4465_v51 = vpop.f32.mrb[14].mxu1  ;;  %v139_v23 = vld [vmem:[#allocation6 + $0x2] ss:$0 sm:$0xff] }
 0x264   :  { %v777_v29 = vpop.f32.mrb[15].mxu1  ;;  %v825_v25 = vmul.f32 %v4465_v51, %v4465_v51 }
 0x265   :  { %v837_v62 = vadd.f32 %v836_v10, %v822_v48  ;;  %v801_v42 = vadd.f32 %v800_v53, %v777_v29  ;;  %v823_v26 = vmul.f32 %v777_v29, %v777_v29  ;;  %v140_v53 = vld [vmem:[#allocation6 + $0x3] ss:$0 sm:$0xff] }
 0x267   :  { %v802_v30 = vadd.f32 %v4464_v40, %v801_v42  ;;  %v838_v56 = vadd.f32 %v837_v62, %v823_v26 }
 0x269   :  { %v803_v12 = vadd.f32 %v4465_v51, %v802_v30  ;;  %v839_v47 = vadd.f32 %v838_v56, %v824_v28 }
 0x26b   :  { %v804_v32 = vrot.slane %v803_v12, 4  ;;  %v840_v24 = vadd.f32 %v839_v47, %v825_v25 }
 0x26d   :  { %v805_v63 = vadd.f32 %v804_v32, %v803_v12  ;;  %v841_v52 = vrot.slane %v840_v24, 4 }
 0x26f   :  { %v806_v35 = vrot.slane %v805_v63, 2  ;;  %v842_v18 = vadd.f32 %v841_v52, %v840_v24 }
 0x271   :  { %v807_v27 = vadd.f32 %v806_v35, %v805_v63  ;;  %v843_v50 = vrot.slane %v842_v18, 2 }
 0x273   :  { %v808_v19 = vrot.slane %v807_v27, 1  ;;  %v844_v33 = vadd.f32 %v843_v50, %v842_v18 }
 0x275   :  { %v809_v55 = vadd.f32 %v808_v19, %v807_v27  ;;  %v845_v61 = vrot.slane %v844_v33, 1 }
 0x277   :  { %v846_v31 = vadd.f32 %v845_v61, %v844_v33  ;;  %v847_v45 = vmul.f32 0.0078125, %v809_v55 }
 0x279   :  { %v848_v4 = vmul.f32 0.0078125, %v846_v31  ;;  %v849_v46 = vmul.f32 %v847_v45, %v847_v45 }
 0x27b   :  { %v850_v1 = vsub.f32 %v848_v4, %v849_v46 }
 0x27d   :  { %v851_v20 = vmax.f32 %v850_v1, 0.0 }
 0x27f   :  { %v852_v36 = vadd.f32 1e-05, %v851_v20 }
 0x281   :  { %4556 = vrsqrt.f32 %v852_v36 }
 0x28b   :  { %v4557_v17 = vpop.eup %4556 }
 0x28c   :  { %v854_v34 = vmul.f32 %v4557_v17, %v139_v23 }
 0x28e   :  { %v855_v48 = vmul.f32 %v854_v34, %v847_v45  ;;  %v857_v10 = vmul.f32 %v854_v34, %v5104_v39  ;;  %v858_v62 = vmul.f32 %v854_v34, %v5108_v11  ;;  %v859_v42 = vmul.f32 %v5102_v7, %v854_v34 }
 0x28f   :  { %v860_v26 = vmul.f32 %v5106_v49, %v854_v34  ;;  %v861_v28 = vmul.f32 %v854_v34, %v5124_v21  ;;  %v862_v30 = vmul.f32 %v854_v34, %v5131_v38  ;;  %v863_v56 = vmul.f32 %v5121_v41, %v854_v34 }
 0x290   :  { %v856_v25 = vsub.f32 %v140_v53, %v855_v48  ;;  %v864_v12 = vmul.f32 %v5129_v57, %v854_v34  ;;  %v865_v47 = vmul.f32 %v854_v34, %v5144_v37  ;;  %v866_v32 = vmul.f32 %v854_v34, %v761_v0 }
 0x291   :  { %v867_v39 = vmul.f32 %v5141_v43, %v854_v34  ;;  %v868_v11 = vmul.f32 %v5149_v44, %v854_v34  ;;  %v869_v24 = vmul.f32 %v854_v34, %v774_v22  ;;  %v870_v7 = vmul.f32 %v854_v34, %v777_v29 }
 0x292   :  { %v871_v63 = vmul.f32 %v4464_v40, %v854_v34  ;;  %v872_v49 = vmul.f32 %v4465_v51, %v854_v34  ;;  %v5168_v52 = vadd.f32 %v857_v10, %v856_v25  ;;  %v5170_v21 = vadd.f32 %v858_v62, %v856_v25 }
 0x293   :  { %v5172_v38 = vadd.f32 %v859_v42, %v856_v25  ;;  %v5174_v41 = vadd.f32 %v860_v26, %v856_v25  ;;  %v5176_v57 = vadd.f32 %v861_v28, %v856_v25  ;;  %v5178_v37 = vadd.f32 %v862_v30, %v856_v25 }
 0x294   :  { %v5180_v0 = vadd.f32 %v863_v56, %v856_v25  ;;  %v5182_v43 = vadd.f32 %v864_v12, %v856_v25  ;;  %v5184_v44 = vadd.f32 %v865_v47, %v856_v25  ;;  %v5186_v40 = vadd.f32 %v866_v32, %v856_v25 }
 0x295   :  { %v5188_v22 = vadd.f32 %v867_v39, %v856_v25  ;;  %v5190_v51 = vadd.f32 %v868_v11, %v856_v25  ;;  %v5192_v29 = vadd.f32 %v869_v24, %v856_v25  ;;  %v5194_v35 = vadd.f32 %v870_v7, %v856_v25 }
 0x296   :  { %v5196_v18 = vadd.f32 %v871_v63, %v856_v25  ;;  %v5198_v27 = vadd.f32 %v872_v49, %v856_v25  ;;  %v889_v50 = vmax.f32 %v5168_v52, 0.0  ;;  %v890_v19 = vmax.f32 %v5170_v21, 0.0 }
 0x297   :  { %v891_v33 = vmax.f32 %v5172_v38, 0.0  ;;  %v892_v55 = vmax.f32 %v5174_v41, 0.0  ;;  %v893_v61 = vmax.f32 %v5176_v57, 0.0  ;;  %v894_v31 = vmax.f32 %v5178_v37, 0.0 }
 0x298   :  { %v895_v45 = vmax.f32 %v5180_v0, 0.0  ;;  %v896_v4 = vmax.f32 %v5182_v43, 0.0  ;;  %v897_v46 = vmax.f32 %v5184_v44, 0.0  ;;  %v898_v1 = vmax.f32 %v5186_v40, 0.0 }
 0x299   :  { %v899_v20 = vmax.f32 %v5188_v22, 0.0  ;;  %v900_v36 = vmax.f32 %v5190_v51, 0.0  ;;  %v901_v23 = vmax.f32 %v5192_v29, 0.0  ;;  %v902_v17 = vmax.f32 %v5194_v35, 0.0 }
 0x29a   :  { %v903_v34 = vmax.f32 %v5196_v18, 0.0  ;;  %v904_v53 = vmax.f32 %v5198_v27, 0.0 }
 0x29b   :  { %4610 = dma.done.wait [#allocation5], 8192 }
 0x29c   :  { %4611 = vsyncadd [#allocation5], 4294959104  ;;  %v8159_v48 = vmov 0   ;;  %v918_v10 = vld [vmem:[#allocation2 + $0x8] sm:$0xff]  ;;  %v917_v62 = vld [vmem:[#allocation2] sm:$0xff]  ;;  %v5240_v41 = vpack.c.bf16 %v894_v31, %v893_v61  ;;  %v5250_v57 = vpack.c.bf16 %v896_v4, %v895_v45  ;;  %v5260_v0 = vpack.c.bf16 %v898_v1, %v897_v46 }
 0x29d   :  { %1013 = vmatprep.mubr.bf16.mxu0 %v8159_v48  ;;  %1239 = vmatprep.mubr.bf16.mxu1 %v8159_v48  ;;  %v926_v42 = vld [vmem:[#allocation2 + $0x48] sm:$0xff]  ;;  %v925_v26 = vld [vmem:[#allocation2 + $0x40] sm:$0xff]  ;;  %v927_v21 = vld [vmem:[#allocation2 + $0x50] sm:$0xff]  ;;  %v5270_v43 = vpack.c.bf16 %v900_v36, %v899_v20  ;;  %v5280_v44 = vpack.c.bf16 %v902_v17, %v901_v23  ;;  %v5290_v40 = vpack.c.bf16 %v904_v53, %v903_v34 }
 0x29e   :  { %981 = vmatprep.subr.bf16.mxu0 %v918_v10  ;;  %v934_v28 = vld [vmem:[#allocation2 + $0x88] sm:$0xff]  ;;  %v933_v30 = vld [vmem:[#allocation2 + $0x80] sm:$0xff]  ;;  %v952_v38 = vld [vmem:[#allocation2 + $0x118] sm:$0xff] }
 0x29f   :  { %982 = vmatpush1.bf16.msra.mxu0 %v917_v62  ;;  %v942_v56 = vld [vmem:[#allocation2 + $0xc8] sm:$0xff]  ;;  %v941_v12 = vld [vmem:[#allocation2 + $0xc0] sm:$0xff]  ;;  %v967_v37 = vld [vmem:[#allocation2 + $0x190] sm:$0xff] }
 0x2a0   :  { %983 = vmatprep.subr.bf16.mxu0 %v926_v42  ;;  %v922_v25 = vld [vmem:[#allocation2 + $0x28] sm:$0xff]  ;;  %v921_v47 = vld [vmem:[#allocation2 + $0x20] sm:$0xff]  ;;  %v976_v61 = vld [vmem:[#allocation2 + $0x1d8] sm:$0xff] }
 0x2a1   :  { %1207 = vmatprep.subr.bf16.mxu1 %v922_v25  ;;  %v930_v32 = vld [vmem:[#allocation2 + $0x68] sm:$0xff]  ;;  %v929_v11 = vld [vmem:[#allocation2 + $0x60] sm:$0xff]  ;;  %v975_v31 = vld [vmem:[#allocation2 + $0x1d0] sm:$0xff] }
 0x2a2   :  { %v950_v39 = vld [vmem:[#allocation2 + $0x108] sm:$0xff]  ;;  %1208 = vmatpush1.bf16.msra.mxu1 %v921_v47  ;;  %v949_v7 = vld [vmem:[#allocation2 + $0x100] sm:$0xff]  ;;  %v923_v22 = vld [vmem:[#allocation2 + $0x30] sm:$0xff] }
 0x2a3   :  { %984 = vmatpush1.bf16.msra.mxu0 %v925_v26  ;;  %1209 = vmatprep.subr.bf16.mxu1 %v930_v32  ;;  %v938_v24 = vld [vmem:[#allocation2 + $0xa8] sm:$0xff]  ;;  %v937_v49 = vld [vmem:[#allocation2 + $0xa0] sm:$0xff]  ;;  %v920_v32 = vld [vmem:[#allocation2 + $0x18] sm:$0xff] }
 0x2a4   :  { %985 = vmatprep.subr.bf16.mxu0 %v934_v28  ;;  %v958_v63 = vld [vmem:[#allocation2 + $0x148] sm:$0xff]  ;;  %v957_v62 = vld [vmem:[#allocation2 + $0x140] sm:$0xff]  ;;  %v932_v51 = vld [vmem:[#allocation2 + $0x78] sm:$0xff] }
 0x2a5   :  { %v946_v10 = vld [vmem:[#allocation2 + $0xe8] sm:$0xff]  ;;  %v945_v26 = vld [vmem:[#allocation2 + $0xe0] sm:$0xff]  ;;  %v931_v29 = vld [vmem:[#allocation2 + $0x70] sm:$0xff] }
 0x2a6   :  { %1210 = vmatpush1.bf16.msra.mxu1 %v929_v11  ;;  %v966_v42 = vld [vmem:[#allocation2 + $0x188] sm:$0xff]  ;;  %v953_v25 = vld [vmem:[#allocation2 + $0x120] sm:$0xff]  ;;  %v940_v35 = vld [vmem:[#allocation2 + $0xb8] sm:$0xff] }
 0x2a7   :  { %986 = vmatpush1.bf16.msra.mxu0 %v933_v30  ;;  %1211 = vmatprep.subr.bf16.mxu1 %v938_v24  ;;  %v954_v28 = vld [vmem:[#allocation2 + $0x128] sm:$0xff]  ;;  %v965_v30 = vld [vmem:[#allocation2 + $0x180] sm:$0xff]  ;;  %v939_v18 = vld [vmem:[#allocation2 + $0xb0] sm:$0xff] }
 0x2a8   :  { %987 = vmatprep.subr.bf16.mxu0 %v942_v56  ;;  %v974_v56 = vld [vmem:[#allocation2 + $0x1c8] sm:$0xff]  ;;  %v973_v47 = vld [vmem:[#allocation2 + $0x1c0] sm:$0xff]  ;;  %v948_v27 = vld [vmem:[#allocation2 + $0xf8] sm:$0xff] }
 0x2a9   :  { %v961_v11 = vld [vmem:[#allocation2 + $0x160] sm:$0xff]  ;;  %v970_v24 = vld [vmem:[#allocation2 + $0x1a8] sm:$0xff]  ;;  %v947_v45 = vld [vmem:[#allocation2 + $0xf0] sm:$0xff] }
 0x2aa   :  { %1212 = vmatpush1.bf16.msra.mxu1 %v937_v49  ;;  %v969_v49 = vld [vmem:[#allocation2 + $0x1a0] sm:$0xff]  ;;  %v978_v52 = vld [vmem:[#allocation2 + $0x1e8] sm:$0xff]  ;;  %v956_v4 = vld [vmem:[#allocation2 + $0x138] sm:$0xff] }
 0x2ab   :  { %988 = vmatpush1.bf16.msra.mxu0 %v941_v12  ;;  %1213 = vmatprep.subr.bf16.mxu1 %v946_v10  ;;  %v962_v12 = vld [vmem:[#allocation2 + $0x168] sm:$0xff]  ;;  %v977_v10 = vld [vmem:[#allocation2 + $0x1e0] sm:$0xff]  ;;  %v955_v46 = vld [vmem:[#allocation2 + $0x130] sm:$0xff] }
 0x2ac   :  { %989 = vmatprep.subr.bf16.mxu0 %v950_v39  ;;  %v5222_v39 = vpack.c.bf16 %v890_v19, %v889_v50  ;;  %v936_v50 = vld [vmem:[#allocation2 + $0x98] sm:$0xff]  ;;  %v5230_v19 = vpack.c.bf16 %v892_v55, %v891_v33  ;;  %v951_v33 = vld [vmem:[#allocation2 + $0x110] sm:$0xff] }
 0x2ad   :  { %v960_v55 = vld [vmem:[#allocation2 + $0x158] sm:$0xff]  ;;  %v963_v20 = vld [vmem:[#allocation2 + $0x170] sm:$0xff] }
 0x2ae   :  { %1214 = vmatpush1.bf16.msra.mxu1 %v945_v26  ;;  %v943_v26 = vld [vmem:[#allocation2 + $0xd0] sm:$0xff]  ;;  %v964_v1 = vld [vmem:[#allocation2 + $0x178] sm:$0xff] }
 0x2af   :  { %990 = vmatpush1.bf16.msra.mxu0 %v949_v7  ;;  %1215 = vmatprep.subr.bf16.mxu1 %v954_v28  ;;  %v919_v7 = vld [vmem:[#allocation2 + $0x10] sm:$0xff]  ;;  %v972_v36 = vld [vmem:[#allocation2 + $0x1b8] sm:$0xff] }
 0x2b0   :  { %991 = vmatprep.subr.bf16.mxu0 %v958_v63  ;;  %v928_v63 = vld [vmem:[#allocation2 + $0x58] sm:$0xff]  ;;  %v959_v28 = vld [vmem:[#allocation2 + $0x150] sm:$0xff] }
 0x2b1   :  { %v971_v23 = vld [vmem:[#allocation2 + $0x1b0] sm:$0xff]  ;;  %v980_v17 = vld [vmem:[#allocation2 + $0x1f8] sm:$0xff] }
 0x2b2   :  { %1216 = vmatpush1.bf16.msra.mxu1 %v953_v25  ;;  %v979_v34 = vld [vmem:[#allocation2 + $0x1f0] sm:$0xff] }
 0x2b3   :  { %992 = vmatpush1.bf16.msra.mxu0 %v957_v62  ;;  %1217 = vmatprep.subr.bf16.mxu1 %v962_v12  ;;  %v935_v62 = vld [vmem:[#allocation2 + $0x90] sm:$0xff] }
 0x2b4   :  { %993 = vmatprep.subr.bf16.mxu0 %v966_v42  ;;  %v944_v42 = vld [vmem:[#allocation2 + $0xd8] sm:$0xff] }
 0x2b6   :  { %1218 = vmatpush1.bf16.msra.mxu1 %v961_v11 }
 0x2b7   :  { %994 = vmatpush1.bf16.msra.mxu0 %v965_v30  ;;  %1219 = vmatprep.subr.bf16.mxu1 %v970_v24  ;;  %v968_v30 = vld [vmem:[#allocation2 + $0x198] sm:$0xff] }
 0x2b8   :  { %995 = vmatprep.subr.bf16.mxu0 %v974_v56  ;;  %v924_v56 = vld [vmem:[#allocation2 + $0x38] sm:$0xff] }
 0x2ba   :  { %1220 = vmatpush1.bf16.msra.mxu1 %v969_v49 }
 0x2bb   :  { %996 = vmatpush1.bf16.msra.mxu0 %v973_v47  ;;  %1221 = vmatprep.subr.bf16.mxu1 %v978_v52 }
 0x2bc   :  { %1094 = vmatprep.subr.bf16.mxu0 %v920_v32 }
 0x2be   :  { %1014 = vmatmul.mubr.bf16.vlgmr.msra.gmra.mrb[0].mxu0 %v5222_v39  ;;  %1222 = vmatpush1.bf16.msra.mxu1 %v977_v10 }
 0x2bf   :  { %1095 = vmatpush1.bf16.msra.mxu0 %v919_v7  ;;  %1023 = vmatprep.mubr.bf16.mxu0 %v8159_v48 }
 0x2c0   :  { %1096 = vmatprep.subr.bf16.mxu0 %v928_v63 }
 0x2c1   :  { %1240 = vmatmul.mubr.bf16.vlgmr.msra.gmra.mrb[16].mxu1 %v5222_v39 }
 0x2c2   :  { %1249 = vmatprep.mubr.bf16.mxu1 %v8159_v48 }
 0x2c3   :  { %1097 = vmatpush1.bf16.msra.mxu0 %v927_v21 }
 0x2c4   :  { %1098 = vmatprep.subr.bf16.mxu0 %v936_v50 }
 0x2c6   :  { %1024 = vmatmul.mubr.bf16.gmra.mrb[4].mxu0 %v5230_v19 }
 0x2c7   :  { %1033 = vmatprep.mubr.bf16.mxu0 %v8159_v48  ;;  %1099 = vmatpush1.bf16.msra.mxu0 %v935_v62 }
 0x2c8   :  { %1100 = vmatprep.subr.bf16.mxu0 %v944_v42 }
 0x2c9   :  { %1250 = vmatmul.mubr.bf16.gmra.mrb[20].mxu1 %v5230_v19 }
 0x2ca   :  { %1259 = vmatprep.mubr.bf16.mxu1 %v8159_v48 }
 0x2cb   :  { %1101 = vmatpush1.bf16.msra.mxu0 %v943_v26 }
 0x2cc   :  { %1102 = vmatprep.subr.bf16.mxu0 %v952_v38 }
 0x2ce   :  { %1034 = vmatmul.mubr.bf16.gmra.mrb[8].mxu0 %v5240_v41 }
 0x2cf   :  { %1043 = vmatprep.mubr.bf16.mxu0 %v8159_v48  ;;  %1103 = vmatpush1.bf16.msra.mxu0 %v951_v33 }
 0x2d0   :  { %1104 = vmatprep.subr.bf16.mxu0 %v960_v55 }
 0x2d1   :  { %1260 = vmatmul.mubr.bf16.gmra.mrb[24].mxu1 %v5240_v41 }
 0x2d2   :  { %1269 = vmatprep.mubr.bf16.mxu1 %v8159_v48 }
 0x2d3   :  { %1105 = vmatpush1.bf16.msra.mxu0 %v959_v28 }
 0x2d4   :  { %1106 = vmatprep.subr.bf16.mxu0 %v968_v30 }
 0x2d6   :  { %1044 = vmatmul.mubr.bf16.gmra.mrb[12].mxu0 %v5250_v57 }
 0x2d7   :  { %1053 = vmatprep.mubr.bf16.mxu0 %v8159_v48  ;;  %1107 = vmatpush1.bf16.msra.mxu0 %v967_v37 }
 0x2d8   :  { %1108 = vmatprep.subr.bf16.mxu0 %v976_v61 }
 0x2d9   :  { %1270 = vmatmul.mubr.bf16.gmra.mrb[28].mxu1 %v5250_v57 }
 0x2da   :  { %1279 = vmatprep.mubr.bf16.mxu1 %v8159_v48 }
 0x2db   :  { %1109 = vmatpush1.bf16.msra.mxu0 %v975_v31 }
 0x2dc   :  { %1320 = vmatprep.subr.bf16.mxu0 %v924_v56 }
 0x2de   :  { %1054 = vmatmul.mubr.bf16.gmra.mrb[16].mxu0 %v5260_v0 }
 0x2df   :  { %1063 = vmatprep.mubr.bf16.mxu0 %v8159_v48 }
 0x2e1   :  { %1280 = vmatmul.mubr.bf16.gmra.mrb[32].mxu1 %v5260_v0 }
 0x2e2   :  { %1289 = vmatprep.mubr.bf16.mxu1 %v8159_v48 }
 0x2e6   :  { %1064 = vmatmul.mubr.bf16.gmra.mrb[20].mxu0 %v5270_v43 }
 0x2e7   :  { %1073 = vmatprep.mubr.bf16.mxu0 %v8159_v48 }
 0x2e9   :  { %1290 = vmatmul.mubr.bf16.gmra.mrb[36].mxu1 %v5270_v43 }
 0x2ea   :  { %1299 = vmatprep.mubr.bf16.mxu1 %v8159_v48 }
 0x2ee   :  { %1074 = vmatmul.mubr.bf16.gmra.mrb[24].mxu0 %v5280_v44 }
 0x2ef   :  { %1083 = vmatprep.mubr.bf16.mxu0 %v8159_v48 }
 0x2f1   :  { %1300 = vmatmul.mubr.bf16.gmra.mrb[40].mxu1 %v5280_v44 }
 0x2f2   :  { %1309 = vmatprep.mubr.bf16.mxu1 %v8159_v48 }
 0x2f6   :  { %1084 = vmatmul.mubr.bf16.gmra.mrb[28].mxu0 %v5290_v40 }
 0x2f7   :  { %1126 = vmatprep.mubr.bf16.mxu0 %v8159_v48 }
 0x2f9   :  { %1310 = vmatmul.mubr.bf16.gmra.mrb[44].mxu1 %v5290_v40 }
 0x2fe   :  { %1127 = vmatmul.mubr.bf16.vlgmr.msra.gmra.mrb[32].mxu0 %v5222_v39 }
 0x2ff   :  { %1321 = vmatpush1.bf16.msra.mxu0 %v923_v22  ;;  %1136 = vmatprep.mubr.bf16.mxu0 %v8159_v48 }
 0x300   :  { %1322 = vmatprep.subr.bf16.mxu0 %v932_v51 }
 0x303   :  { %1323 = vmatpush1.bf16.msra.mxu0 %v931_v29 }
 0x304   :  { %1324 = vmatprep.subr.bf16.mxu0 %v940_v35 }
 0x306   :  { %1137 = vmatmul.mubr.bf16.gmra.mrb[36].mxu0 %v5230_v19 }
 0x307   :  { %1146 = vmatprep.mubr.bf16.mxu0 %v8159_v48  ;;  %1325 = vmatpush1.bf16.msra.mxu0 %v939_v18 }
 0x308   :  { %1326 = vmatprep.subr.bf16.mxu0 %v948_v27 }
 0x30b   :  { %1327 = vmatpush1.bf16.msra.mxu0 %v947_v45 }
 0x30c   :  { %1328 = vmatprep.subr.bf16.mxu0 %v956_v4 }
 0x30e   :  { %1147 = vmatmul.mubr.bf16.gmra.mrb[40].mxu0 %v5240_v41 }
 0x30f   :  { %1156 = vmatprep.mubr.bf16.mxu0 %v8159_v48  ;;  %1329 = vmatpush1.bf16.msra.mxu0 %v955_v46 }
 0x310   :  { %1330 = vmatprep.subr.bf16.mxu0 %v964_v1 }
 0x313   :  { %1331 = vmatpush1.bf16.msra.mxu0 %v963_v20 }
 0x314   :  { %1332 = vmatprep.subr.bf16.mxu0 %v972_v36 }
 0x316   :  { %1157 = vmatmul.mubr.bf16.gmra.mrb[44].mxu0 %v5250_v57 }
 0x317   :  { %1166 = vmatprep.mubr.bf16.mxu0 %v8159_v48  ;;  %1333 = vmatpush1.bf16.msra.mxu0 %v971_v23 }
 0x318   :  { %1334 = vmatprep.subr.bf16.mxu0 %v980_v17 }
 0x31b   :  { %1335 = vmatpush1.bf16.msra.mxu0 %v979_v34 }
 0x31e   :  { %1167 = vmatmul.mubr.bf16.gmra.mrb[48].mxu0 %v5260_v0 }
 0x31f   :  { %1176 = vmatprep.mubr.bf16.mxu0 %v8159_v48 }
 0x326   :  { %1177 = vmatmul.mubr.bf16.gmra.mrb[52].mxu0 %v5270_v43 }
 0x327   :  { %1186 = vmatprep.mubr.bf16.mxu0 %v8159_v48 }
 0x32e   :  { %1187 = vmatmul.mubr.bf16.gmra.mrb[56].mxu0 %v5280_v44 }
 0x32f   :  { %1196 = vmatprep.mubr.bf16.mxu0 %v8159_v48 }
 0x336   :  { %1197 = vmatmul.mubr.bf16.gmra.mrb[60].mxu0 %v5290_v40 }
 0x337   :  { %1352 = vmatprep.mubr.bf16.mxu0 %v8159_v48 }
 0x33e   :  { %1353 = vmatmul.mubr.bf16.vlgmr.msra.gmra.mrb[64].mxu0 %v5222_v39 }
 0x33f   :  { %1362 = vmatprep.mubr.bf16.mxu0 %v8159_v48 }
 0x346   :  { %1363 = vmatmul.mubr.bf16.gmra.mrb[68].mxu0 %v5230_v19 }
 0x347   :  { %1372 = vmatprep.mubr.bf16.mxu0 %v8159_v48 }
 0x34e   :  { %1373 = vmatmul.mubr.bf16.gmra.mrb[72].mxu0 %v5240_v41 }
 0x34f   :  { %1382 = vmatprep.mubr.bf16.mxu0 %v8159_v48 }
 0x356   :  { %1383 = vmatmul.mubr.bf16.gmra.mrb[76].mxu0 %v5250_v57 }
 0x357   :  { %1392 = vmatprep.mubr.bf16.mxu0 %v8159_v48 }
 0x35e   :  { %1393 = vmatmul.mubr.bf16.gmra.mrb[80].mxu0 %v5260_v0 }
 0x35f   :  { %1402 = vmatprep.mubr.bf16.mxu0 %v8159_v48 }
 0x366   :  { %1403 = vmatmul.mubr.bf16.gmra.mrb[84].mxu0 %v5270_v43 }
 0x367   :  { %1412 = vmatprep.mubr.bf16.mxu0 %v8159_v48 }
 0x36e   :  { %1413 = vmatmul.mubr.bf16.gmra.mrb[88].mxu0 %v5280_v44 }
 0x36f   :  { %1422 = vmatprep.mubr.bf16.mxu0 %v8159_v48 }
 0x376   :  { %1423 = vmatmul.mubr.bf16.gmra.mrb[92].mxu0 %v5290_v40 }
 0x391   :  { %v5328_v53 = vpop.f32.mrb[0].mxu0 }
 0x392   :  { %v5330_v25 = vpop.f32.mrb[1].mxu0  ;;  %v1601_v47 = vmul.f32 %v5328_v53, %v5328_v53 }
 0x393   :  { %v5332_v12 = vpop.f32.mrb[2].mxu0  ;;  %v1602_v48 = vmul.f32 %v5330_v25, %v5330_v25 }
 0x394   :  { %v1433_v32 = vadd.f32 %v5332_v12, %v5328_v53  ;;  %v1609_v39 = vmul.f32 %v5332_v12, %v5332_v12  ;;  %v5340_v11 = vpop.f32.mrb[3].mxu0  ;;  %v5360_v26 = vpop.f32.mrb[16].mxu1 }
 0x395   :  { %v1454_v24 = vadd.f32 %v5340_v11, %v5330_v25  ;;  %v1610_v7 = vmul.f32 %v5340_v11, %v5340_v11  ;;  %v1605_v28 = vmul.f32 %v5360_v26, %v5360_v26  ;;  %v5369_v30 = vpop.f32.mrb[17].mxu1 }
 0x396   :  { %v1729_v63 = vadd.f32 %v1609_v39, %v1601_v47  ;;  %v1606_v31 = vmul.f32 %v5369_v30, %v5369_v30  ;;  %v5376_v56 = vpop.f32.mrb[18].mxu1 }
 0x397   :  { %v1750_v49 = vadd.f32 %v1610_v7, %v1602_v48  ;;  %v1517_v43 = vadd.f32 %v5376_v56, %v5360_v26  ;;  %v1613_v44 = vmul.f32 %v5376_v56, %v5376_v56  ;;  %v5382_v40 = vpop.f32.mrb[19].mxu1 }
 0x398   :  { %v1538_v51 = vadd.f32 %v5382_v40, %v5369_v30  ;;  %v1614_v29 = vmul.f32 %v5382_v40, %v5382_v40 }
 0x399   :  { %v5348_v52 = vpop.f32.mrb[4].mxu0  ;;  %v1813_v35 = vadd.f32 %v1613_v44, %v1605_v28 }
 0x39a   :  { %v1434_v21 = vadd.f32 %v1433_v32, %v5348_v52  ;;  %v1617_v50 = vmul.f32 %v5348_v52, %v5348_v52  ;;  %v5353_v19 = vpop.f32.mrb[5].mxu0  ;;  %v1834_v27 = vadd.f32 %v1614_v29, %v1606_v31 }
 0x39b   :  { %v1455_v10 = vadd.f32 %v1454_v24, %v5353_v19  ;;  %v1618_v62 = vmul.f32 %v5353_v19, %v5353_v19  ;;  %v5358_v42 = vpop.f32.mrb[6].mxu0 }
 0x39c   :  { %8160 = vst [vmem:[#allocation30_spill] sm:$0xff] %v5358_v42  ;;  %v1730_v38 = vadd.f32 %v1729_v63, %v1617_v50  ;;  %v1435_v41 = vadd.f32 %v1434_v21, %v5358_v42  ;;  %v1625_v33 = vmul.f32 %v5358_v42, %v5358_v42  ;;  %v5365_v55 = vpop.f32.mrb[7].mxu0  ;;  %v5400_v23 = vpop.f32.mrb[20].mxu1 }
 0x39d   :  { %8161 = vst [vmem:[#allocation31_spill] sm:$0xff] %v5365_v55  ;;  %v1751_v57 = vadd.f32 %v1750_v49, %v1618_v62  ;;  %v1456_v37 = vadd.f32 %v1455_v10, %v5365_v55  ;;  %v1626_v61 = vmul.f32 %v5365_v55, %v5365_v55  ;;  %8165 = vst [vmem:[#allocation35_spill] sm:$0xff] %v5400_v23  ;;  %v5408_v48 = vpop.f32.mrb[21].mxu1 }
 0x39e   :  { %v1731_v0 = vadd.f32 %v1730_v38, %v1625_v33  ;;  %v1518_v39 = vadd.f32 %v1517_v43, %v5400_v23  ;;  %8167 = vst [vmem:[#allocation37_spill] sm:$0xff] %v5408_v48  ;;  %v1621_v49 = vmul.f32 %v5400_v23, %v5400_v23  ;;  %v5415_v21 = vpop.f32.mrb[22].mxu1  ;;  %v1539_v10 = vadd.f32 %v1538_v51, %v5408_v48 }
 0x39f   :  { %v1752_v22 = vadd.f32 %v1751_v57, %v1626_v61  ;;  %8168 = vst [vmem:[#allocation38_spill] sm:$0xff] %v5415_v21  ;;  %v1622_v62 = vmul.f32 %v5408_v48, %v5408_v48  ;;  %v1629_v57 = vmul.f32 %v5415_v21, %v5415_v21 }
 0x3a0   :  { %v1519_v38 = vadd.f32 %v1518_v39, %v5415_v21  ;;  %v1814_v28 = vadd.f32 %v1813_v35, %v1621_v49 }
 0x3a1   :  { %v5388_v18 = vpop.f32.mrb[8].mxu0  ;;  %v1835_v61 = vadd.f32 %v1834_v27, %v1622_v62 }
 0x3a2   :  { %8162 = vst [vmem:[#allocation32_spill] sm:$0xff] %v5388_v18  ;;  %v1436_v45 = vadd.f32 %v1435_v41, %v5388_v18  ;;  %v1633_v4 = vmul.f32 %v5388_v18, %v5388_v18  ;;  %v5393_v46 = vpop.f32.mrb[9].mxu0  ;;  %v5421_v41 = vpop.f32.mrb[23].mxu1  ;;  %v1815_v43 = vadd.f32 %v1814_v28, %v1629_v57 }
 0x3a3   :  { %8163 = vst [vmem:[#allocation33_spill] sm:$0xff] %v5393_v46  ;;  %v1457_v1 = vadd.f32 %v1456_v37, %v5393_v46  ;;  %v1634_v20 = vmul.f32 %v5393_v46, %v5393_v46  ;;  %v5398_v36 = vpop.f32.mrb[10].mxu0  ;;  %8169 = vst [vmem:[#allocation39_spill] sm:$0xff] %v5421_v41  ;;  %v1630_v37 = vmul.f32 %v5421_v41, %v5421_v41 }
 0x3a4   :  { %8164 = vst [vmem:[#allocation34_spill] sm:$0xff] %v5398_v36  ;;  %v1732_v17 = vadd.f32 %v1731_v0, %v1633_v4  ;;  %v1437_v34 = vadd.f32 %v1436_v45, %v5398_v36  ;;  %v1641_v47 = vmul.f32 %v5398_v36, %v5398_v36  ;;  %v5405_v32 = vpop.f32.mrb[11].mxu0  ;;  %v1540_v31 = vadd.f32 %v1539_v10, %v5421_v41  ;;  %v5440_v27 = vpop.f32.mrb[24].mxu1 }
 0x3a5   :  { %8166 = vst [vmem:[#allocation36_spill] sm:$0xff] %v5405_v32  ;;  %v1753_v24 = vadd.f32 %v1752_v22, %v1634_v20  ;;  %v1458_v7 = vadd.f32 %v1457_v1, %v5405_v32  ;;  %v1642_v63 = vmul.f32 %v5405_v32, %v5405_v32  ;;  %v1836_v29 = vadd.f32 %v1835_v61, %v1630_v37  ;;  %v5448_v39 = vpop.f32.mrb[25].mxu1 }
 0x3a6   :  { %v1733_v50 = vadd.f32 %v1732_v17, %v1641_v47  ;;  %8173 = vst [vmem:[#allocation43_spill] sm:$0xff] %v5440_v27  ;;  %v1520_v47 = vadd.f32 %v1519_v38, %v5440_v27  ;;  %8175 = vst [vmem:[#allocation45_spill] sm:$0xff] %v5448_v39  ;;  %v1637_v49 = vmul.f32 %v5440_v27, %v5440_v27 }
 0x3a7   :  { %v1754_v33 = vadd.f32 %v1753_v24, %v1642_v63  ;;  %v1541_v62 = vadd.f32 %v1540_v31, %v5448_v39  ;;  %v1638_v28 = vmul.f32 %v5448_v39, %v5448_v39 }
 0x3a8   :  { %v1816_v37 = vadd.f32 %v1815_v43, %v1637_v49 }
 0x3a9   :  { %v5428_v0 = vpop.f32.mrb[12].mxu0 }
 0x3aa   :  { %8170 = vst [vmem:[#allocation40_spill] sm:$0xff] %v5428_v0  ;;  %v1438_v44 = vadd.f32 %v1437_v34, %v5428_v0  ;;  %v1649_v22 = vmul.f32 %v5428_v0, %v5428_v0  ;;  %v5433_v51 = vpop.f32.mrb[13].mxu0 }
 0x3ab   :  { %8171 = vst [vmem:[#allocation41_spill] sm:$0xff] %v5433_v51  ;;  %v1459_v35 = vadd.f32 %v1458_v7, %v5433_v51  ;;  %v1650_v45 = vmul.f32 %v5433_v51, %v5433_v51  ;;  %v5438_v4 = vpop.f32.mrb[14].mxu0 }
 0x3ac   :  { %8172 = vst [vmem:[#allocation42_spill] sm:$0xff] %v5438_v4  ;;  %v1734_v1 = vadd.f32 %v1733_v50, %v1649_v22  ;;  %v1439_v20 = vadd.f32 %v1438_v44, %v5438_v4  ;;  %v1657_v17 = vmul.f32 %v5438_v4, %v5438_v4  ;;  %v5445_v34 = vpop.f32.mrb[15].mxu0  ;;  %v5455_v50 = vpop.f32.mrb[26].mxu1  ;;  %v1837_v22 = vadd.f32 %v1836_v29, %v1638_v28 }
 0x3ad   :  { %8174 = vst [vmem:[#allocation44_spill] sm:$0xff] %v5445_v34  ;;  %v1755_v24 = vadd.f32 %v1754_v33, %v1650_v45  ;;  %v1460_v7 = vadd.f32 %v1459_v35, %v5445_v34  ;;  %v1658_v63 = vmul.f32 %v5445_v34, %v5445_v34  ;;  %8176 = vst [vmem:[#allocation46_spill] sm:$0xff] %v5455_v50  ;;  %v5461_v57 = vpop.f32.mrb[27].mxu1 }
 0x3ae   :  { %v1735_v10 = vadd.f32 %v1734_v1, %v1657_v17  ;;  %v1521_v38 = vadd.f32 %v1520_v47, %v5455_v50  ;;  %8177 = vst [vmem:[#allocation47_spill] sm:$0xff] %v5461_v57  ;;  %v1645_v61 = vmul.f32 %v5455_v50, %v5455_v50  ;;  %v1646_v44 = vmul.f32 %v5461_v57, %v5461_v57  ;;  %v5480_v29 = vpop.f32.mrb[28].mxu1 }
 0x3af   :  { %v1756_v33 = vadd.f32 %v1755_v24, %v1658_v63  ;;  %v1542_v35 = vadd.f32 %v1541_v62, %v5461_v57  ;;  %8181 = vst [vmem:[#allocation51_spill] sm:$0xff] %v5480_v29 }
 0x3b0   :  { %v1817_v31 = vadd.f32 %v1816_v37, %v1645_v61  ;;  %v1838_v43 = vadd.f32 %v1837_v22, %v1646_v44  ;;  %v1522_v61 = vadd.f32 %v1521_v38, %v5480_v29  ;;  %v5488_v44 = vpop.f32.mrb[29].mxu1 }
 0x3b1   :  { %v5468_v45 = vpop.f32.mrb[16].mxu0  ;;  %8183 = vst [vmem:[#allocation53_spill] sm:$0xff] %v5488_v44  ;;  %v1543_v13 = vadd.f32 %v1542_v35, %v5488_v44  ;;  %v1654_v16 = vmul.f32 %v5488_v44, %v5488_v44 }
 0x3b2   :  { %8178 = vst [vmem:[#allocation48_spill] sm:$0xff] %v5468_v45  ;;  %v1440_v1 = vadd.f32 %v1439_v20, %v5468_v45  ;;  %v1665_v17 = vmul.f32 %v5468_v45, %v5468_v45  ;;  %v5473_v47 = vpop.f32.mrb[17].mxu0 }
 0x3b3   :  { %8179 = vst [vmem:[#allocation49_spill] sm:$0xff] %v5473_v47  ;;  %v1461_v24 = vadd.f32 %v1460_v7, %v5473_v47  ;;  %v1666_v63 = vmul.f32 %v5473_v47, %v5473_v47  ;;  %v5478_v49 = vpop.f32.mrb[18].mxu0  ;;  %v1839_v8 = vadd.f32 %v1838_v43, %v1654_v16 }
 0x3b4   :  { %8180 = vst [vmem:[#allocation50_spill] sm:$0xff] %v5478_v49  ;;  %v1736_v62 = vadd.f32 %v1735_v10, %v1665_v17  ;;  %v1441_v28 = vadd.f32 %v1440_v1, %v5478_v49  ;;  %v1673_v20 = vmul.f32 %v5478_v49, %v5478_v49  ;;  %v5485_v37 = vpop.f32.mrb[19].mxu0  ;;  %v1653_v10 = vmul.f32 %v5480_v29, %v5480_v29  ;;  %v5495_v17 = vpop.f32.mrb[30].mxu1 }
 0x3b5   :  { %8182 = vst [vmem:[#allocation52_spill] sm:$0xff] %v5485_v37  ;;  %v1757_v7 = vadd.f32 %v1756_v33, %v1666_v63  ;;  %v1462_v22 = vadd.f32 %v1461_v24, %v5485_v37  ;;  %v1674_v15 = vmul.f32 %v5485_v37, %v5485_v37  ;;  %8184 = vst [vmem:[#allocation54_spill] sm:$0xff] %v5495_v17  ;;  %v5501_v14 = vpop.f32.mrb[31].mxu1 }
 0x3b6   :  { %v1737_v1 = vadd.f32 %v1736_v62, %v1673_v20  ;;  %v1523_v38 = vadd.f32 %v1522_v61, %v5495_v17  ;;  %8185 = vst [vmem:[#allocation55_spill] sm:$0xff] %v5501_v14  ;;  %v1818_v24 = vadd.f32 %v1817_v31, %v1653_v10  ;;  %v1661_v63 = vmul.f32 %v5495_v17, %v5495_v17  ;;  %v5520_v16 = vpop.f32.mrb[32].mxu1 }
 0x3b7   :  { %v1758_v33 = vadd.f32 %v1757_v7, %v1674_v15  ;;  %v1662_v9 = vmul.f32 %v5501_v14, %v5501_v14  ;;  %v1544_v62 = vadd.f32 %v1543_v13, %v5501_v14  ;;  %8189 = vst [vmem:[#allocation59_spill] sm:$0xff] %v5520_v16 }
 0x3b8   :  { %v1819_v35 = vadd.f32 %v1818_v24, %v1661_v63  ;;  %v1524_v63 = vadd.f32 %v1523_v38, %v5520_v16 }
 0x3b9   :  { %v5508_v20 = vpop.f32.mrb[20].mxu0  ;;  %v1840_v15 = vadd.f32 %v1839_v8, %v1662_v9  ;;  %v5528_v8 = vpop.f32.mrb[33].mxu1 }
 0x3ba   :  { %8186 = vst [vmem:[#allocation56_spill] sm:$0xff] %v5508_v20  ;;  %v1442_v37 = vadd.f32 %v1441_v28, %v5508_v20  ;;  %v1681_v61 = vmul.f32 %v5508_v20, %v5508_v20  ;;  %v5513_v49 = vpop.f32.mrb[21].mxu0  ;;  %8191 = vst [vmem:[#allocation61_spill] sm:$0xff] %v5528_v8  ;;  %v1670_v20 = vmul.f32 %v5528_v8, %v5528_v8 }
 0x3bb   :  { %8187 = vst [vmem:[#allocation57_spill] sm:$0xff] %v5513_v49  ;;  %v1463_v31 = vadd.f32 %v1462_v22, %v5513_v49  ;;  %v1682_v7 = vmul.f32 %v5513_v49, %v5513_v49  ;;  %v5518_v10 = vpop.f32.mrb[22].mxu0 }
 0x3bc   :  { %8188 = vst [vmem:[#allocation58_spill] sm:$0xff] %v5518_v10  ;;  %v1738_v13 = vadd.f32 %v1737_v1, %v1681_v61  ;;  %v1443_v43 = vadd.f32 %v1442_v37, %v5518_v10  ;;  %v1689_v28 = vmul.f32 %v5518_v10, %v5518_v10  ;;  %v5525_v24 = vpop.f32.mrb[23].mxu0  ;;  %v1669_v1 = vmul.f32 %v5520_v16, %v5520_v16  ;;  %v5535_v61 = vpop.f32.mrb[34].mxu1 }
 0x3bd   :  { %8190 = vst [vmem:[#allocation60_spill] sm:$0xff] %v5525_v24  ;;  %v1759_v9 = vadd.f32 %v1758_v33, %v1682_v7  ;;  %v1464_v22 = vadd.f32 %v1463_v31, %v5525_v24  ;;  %v1690_v49 = vmul.f32 %v5525_v24, %v5525_v24  ;;  %8192 = vst [vmem:[#allocation62_spill] sm:$0xff] %v5535_v61  ;;  %v5541_v47 = vpop.f32.mrb[35].mxu1 }
 0x3be   :  { %v1739_v37 = vadd.f32 %v1738_v13, %v1689_v28  ;;  %v1545_v10 = vadd.f32 %v1544_v62, %v5528_v8  ;;  %v1525_v38 = vadd.f32 %v1524_v63, %v5535_v61  ;;  %8193 = vst [vmem:[#allocation63_spill] sm:$0xff] %v5541_v47  ;;  %v1820_v31 = vadd.f32 %v1819_v35, %v1669_v1 }
 0x3bf   :  { %v1760_v33 = vadd.f32 %v1759_v9, %v1690_v49  ;;  %v1677_v7 = vmul.f32 %v5535_v61, %v5535_v61  ;;  %v1678_v24 = vmul.f32 %v5541_v47, %v5541_v47  ;;  %v1841_v16 = vadd.f32 %v1840_v15, %v1670_v20  ;;  %v5560_v20 = vpop.f32.mrb[36].mxu1 }
 0x3c0   :  { %v1546_v13 = vadd.f32 %v1545_v10, %v5541_v47  ;;  %8197 = vst [vmem:[#allocation67_spill] sm:$0xff] %v5560_v20 }
 0x3c1   :  { %v5548_v28 = vpop.f32.mrb[24].mxu0  ;;  %v1821_v62 = vadd.f32 %v1820_v31, %v1677_v7  ;;  %v1842_v49 = vadd.f32 %v1841_v16, %v1678_v24  ;;  %v1526_v7 = vadd.f32 %v1525_v38, %v5560_v20  ;;  %v5568_v16 = vpop.f32.mrb[37].mxu1 }
 0x3c2   :  { %8194 = vst [vmem:[#allocation64_spill] sm:$0xff] %v5548_v28  ;;  %v1444_v8 = vadd.f32 %v1443_v43, %v5548_v28  ;;  %v1697_v63 = vmul.f32 %v5548_v28, %v5548_v28  ;;  %v5553_v45 = vpop.f32.mrb[25].mxu0  ;;  %8199 = vst [vmem:[#allocation69_spill] sm:$0xff] %v5568_v16  ;;  %v1686_v28 = vmul.f32 %v5568_v16, %v5568_v16 }
 0x3c3   :  { %8195 = vst [vmem:[#allocation65_spill] sm:$0xff] %v5553_v45  ;;  %v1465_v35 = vadd.f32 %v1464_v22, %v5553_v45  ;;  %v1698_v9 = vmul.f32 %v5553_v45, %v5553_v45  ;;  %v5558_v1 = vpop.f32.mrb[26].mxu0 }
 0x3c4   :  { %8196 = vst [vmem:[#allocation66_spill] sm:$0xff] %v5558_v1  ;;  %v1740_v15 = vadd.f32 %v1739_v37, %v1697_v63  ;;  %v1445_v10 = vadd.f32 %v1444_v8, %v5558_v1  ;;  %v1705_v43 = vmul.f32 %v5558_v1, %v5558_v1  ;;  %v5565_v31 = vpop.f32.mrb[27].mxu0  ;;  %v1685_v37 = vmul.f32 %v5560_v20, %v5560_v20  ;;  %v5575_v63 = vpop.f32.mrb[38].mxu1 }
 0x3c5   :  { %8198 = vst [vmem:[#allocation68_spill] sm:$0xff] %v5565_v31  ;;  %v1761_v24 = vadd.f32 %v1760_v33, %v1698_v9  ;;  %v1466_v22 = vadd.f32 %v1465_v35, %v5565_v31  ;;  %v1706_v45 = vmul.f32 %v5565_v31, %v5565_v31  ;;  %8200 = vst [vmem:[#allocation70_spill] sm:$0xff] %v5575_v63  ;;  %v5581_v47 = vpop.f32.mrb[39].mxu1 }
 0x3c6   :  { %v1741_v8 = vadd.f32 %v1740_v15, %v1705_v43  ;;  %v1547_v1 = vadd.f32 %v1546_v13, %v5568_v16  ;;  %v1527_v38 = vadd.f32 %v1526_v7, %v5575_v63  ;;  %8201 = vst [vmem:[#allocation71_spill] sm:$0xff] %v5581_v47  ;;  %v1822_v35 = vadd.f32 %v1821_v62, %v1685_v37 }
 0x3c7   :  { %v1762_v33 = vadd.f32 %v1761_v24, %v1706_v45  ;;  %v1693_v9 = vmul.f32 %v5575_v63, %v5575_v63  ;;  %v1694_v31 = vmul.f32 %v5581_v47, %v5581_v47  ;;  %v1843_v20 = vadd.f32 %v1842_v49, %v1686_v28  ;;  %v5600_v28 = vpop.f32.mrb[40].mxu1 }
 0x3c8   :  { %v1548_v15 = vadd.f32 %v1547_v1, %v5581_v47  ;;  %8205 = vst [vmem:[#allocation75_spill] sm:$0xff] %v5600_v28 }
 0x3c9   :  { %v5588_v43 = vpop.f32.mrb[28].mxu0  ;;  %v1823_v13 = vadd.f32 %v1822_v35, %v1693_v9  ;;  %v1844_v45 = vadd.f32 %v1843_v20, %v1694_v31  ;;  %v1528_v9 = vadd.f32 %v1527_v38, %v5600_v28  ;;  %v5608_v20 = vpop.f32.mrb[41].mxu1 }
 0x3ca   :  { %8202 = vst [vmem:[#allocation72_spill] sm:$0xff] %v5588_v43  ;;  %v1446_v16 = vadd.f32 %v1445_v10, %v5588_v43  ;;  %v1713_v7 = vmul.f32 %v5588_v43, %v5588_v43  ;;  %v5593_v61 = vpop.f32.mrb[29].mxu0  ;;  %8207 = vst [vmem:[#allocation77_spill] sm:$0xff] %v5608_v20  ;;  %v1702_v38 = vmul.f32 %v5608_v20, %v5608_v20 }
 0x3cb   :  { %8203 = vst [vmem:[#allocation73_spill] sm:$0xff] %v5593_v61  ;;  %v1467_v62 = vadd.f32 %v1466_v22, %v5593_v61  ;;  %v1714_v24 = vmul.f32 %v5593_v61, %v5593_v61  ;;  %v5598_v37 = vpop.f32.mrb[30].mxu0 }
 0x3cc   :  { %8204 = vst [vmem:[#allocation74_spill] sm:$0xff] %v5598_v37  ;;  %v1742_v49 = vadd.f32 %v1741_v8, %v1713_v7  ;;  %v1447_v1 = vadd.f32 %v1446_v16, %v5598_v37  ;;  %v1721_v10 = vmul.f32 %v5598_v37, %v5598_v37  ;;  %v5605_v35 = vpop.f32.mrb[31].mxu0  ;;  %v1701_v8 = vmul.f32 %v5600_v28, %v5600_v28  ;;  %v5615_v7 = vpop.f32.mrb[42].mxu1 }
 0x3cd   :  { %8206 = vst [vmem:[#allocation76_spill] sm:$0xff] %v5605_v35  ;;  %v1763_v31 = vadd.f32 %v1762_v33, %v1714_v24  ;;  %v1468_v22 = vadd.f32 %v1467_v62, %v5605_v35  ;;  %v1722_v61 = vmul.f32 %v5605_v35, %v5605_v35  ;;  %8208 = vst [vmem:[#allocation78_spill] sm:$0xff] %v5615_v7  ;;  %v5620_v47 = vpop.f32.mrb[43].mxu1 }
 0x3ce   :  { %v1448_v16 = vrot.slane %v1447_v1, 4  ;;  %v1743_v43 = vadd.f32 %v1742_v49, %v1721_v10  ;;  %v1549_v37 = vadd.f32 %v1548_v15, %v5608_v20  ;;  %8209 = vst [vmem:[#allocation79_spill] sm:$0xff] %v5620_v47  ;;  %v1824_v62 = vadd.f32 %v1823_v13, %v1701_v8 }
 0x3cf   :  { %v1469_v33 = vrot.slane %v1468_v22, 4  ;;  %v1764_v24 = vadd.f32 %v1763_v31, %v1722_v61  ;;  %v1529_v63 = vadd.f32 %v1528_v9, %v5615_v7  ;;  %v1845_v17 = vadd.f32 %v1844_v45, %v1702_v38 }
 0x3d0   :  { %v1449_v35 = vadd.f32 %v1448_v16, %v1447_v1  ;;  %v1744_v14 = vrot.slane %v1743_v43, 4  ;;  %v1709_v28 = vmul.f32 %v5615_v7, %v5615_v7  ;;  %v1550_v15 = vadd.f32 %v1549_v37, %v5620_v47  ;;  %v5638_v37 = vpop.f32.mrb[44].mxu1 }
 0x3d1   :  { %v1470_v34 = vadd.f32 %v1469_v33, %v1468_v22  ;;  %v1765_v49 = vrot.slane %v1764_v24, 4  ;;  %v5625_v10 = vpop.f32.mrb[32].mxu0  ;;  %v1710_v20 = vmul.f32 %v5620_v47, %v5620_v47  ;;  %8210 = vst [vmem:[#allocation80_spill] sm:$0xff] %v5638_v37  ;;  %v1530_v44 = vadd.f32 %v1529_v63, %v5638_v37 }
 0x3d2   :  { %v1450_v4 = vrot.slane %v1449_v35, 2  ;;  %v1745_v61 = vadd.f32 %v1744_v14, %v1743_v43  ;;  %v1603_v13 = vmul.f32 %v5625_v10, %v5625_v10  ;;  %v5632_v1 = vpop.f32.mrb[33].mxu0  ;;  %v1825_v45 = vadd.f32 %v1824_v62, %v1709_v28  ;;  %v5646_v28 = vpop.f32.mrb[45].mxu1 }
 0x3d3   :  { %v1471_v9 = vrot.slane %v1470_v34, 2  ;;  %v1766_v31 = vadd.f32 %v1765_v49, %v1764_v24  ;;  %v1604_v22 = vmul.f32 %v5632_v1, %v5632_v1  ;;  %v5636_v8 = vpop.f32.mrb[34].mxu0  ;;  %v1846_v16 = vadd.f32 %v1845_v17, %v1710_v20  ;;  %8211 = vst [vmem:[#allocation81_spill] sm:$0xff] %v5646_v28 }
 0x3d4   :  { %v1451_v38 = vadd.f32 %v1450_v4, %v1449_v35  ;;  %v1746_v33 = vrot.slane %v1745_v61, 2  ;;  %v1475_v14 = vadd.f32 %v5636_v8, %v5625_v10  ;;  %v1611_v43 = vmul.f32 %v5636_v8, %v5636_v8  ;;  %v5644_v47 = vpop.f32.mrb[35].mxu0  ;;  %v5652_v4 = vpop.f32.mrb[46].mxu1 }
 0x3d5   :  { %v1472_v24 = vadd.f32 %v1471_v9, %v1470_v34  ;;  %v1767_v62 = vrot.slane %v1766_v31, 2  ;;  %v1496_v49 = vadd.f32 %v5644_v47, %v5632_v1  ;;  %v1612_v17 = vmul.f32 %v5644_v47, %v5644_v47  ;;  %8212 = vst [vmem:[#allocation82_spill] sm:$0xff] %v5652_v4  ;;  %v5655_v29 = vpop.f32.mrb[47].mxu1 }
 0x3d6   :  { %v1452_v35 = vrot.slane %v1451_v38, 1  ;;  %v1747_v20 = vadd.f32 %v1746_v33, %v1745_v61  ;;  %v1771_v7 = vadd.f32 %v1611_v43, %v1603_v13  ;;  %8213 = vst [vmem:[#allocation83_spill] sm:$0xff] %v5655_v29  ;;  %v1717_v34 = vmul.f32 %v5638_v37, %v5638_v37 }
 0x3d7   :  { %v1473_v51 = vrot.slane %v1472_v24, 1  ;;  %v1768_v0 = vadd.f32 %v1767_v62, %v1766_v31  ;;  %v1792_v57 = vadd.f32 %v1612_v17, %v1604_v22  ;;  %v1551_v32 = vadd.f32 %v1550_v15, %v5646_v28 }
 0x3d8   :  { %v1453_v9 = vadd.f32 %v1452_v35, %v1451_v38  ;;  %v1748_v50 = vrot.slane %v1747_v20, 1  ;;  %v1718_v36 = vmul.f32 %v5646_v28, %v5646_v28  ;;  %v1826_v63 = vadd.f32 %v1825_v45, %v1717_v34 }
 0x3d9   :  { %v1474_v39 = vadd.f32 %v1473_v51, %v1472_v24  ;;  %v1769_v61 = vrot.slane %v1768_v0, 1  ;;  %v5662_v13 = vpop.f32.mrb[36].mxu0  ;;  %v1531_v33 = vadd.f32 %v1530_v44, %v5652_v4 }
 0x3da   :  { %v1749_v43 = vadd.f32 %v1748_v50, %v1747_v20  ;;  %v5665_v31 = vmul.f32 0.0078125, %v1453_v9  ;;  %v1476_v22 = vadd.f32 %v1475_v14, %v5662_v13  ;;  %v1619_v38 = vmul.f32 %v5662_v13, %v5662_v13  ;;  %v5670_v62 = vpop.f32.mrb[37].mxu0 }
 0x3db   :  { %v1770_v15 = vadd.f32 %v1769_v61, %v1768_v0  ;;  %v5672_v17 = vmul.f32 0.0078125, %v1474_v39  ;;  %v1497_v51 = vadd.f32 %v1496_v49, %v5670_v62  ;;  %v1620_v45 = vmul.f32 %v5670_v62, %v5670_v62  ;;  %v5677_v24 = vpop.f32.mrb[38].mxu0 }
 0x3dc   :  { %8214 = vst [vmem:[#allocation84_spill] sm:$0xff] %v5677_v24  ;;  %v1905_v50 = vmul.f32 0.0078125, %v1749_v43  ;;  %v1913_v44 = vmul.f32 %v5665_v31, %v5665_v31  ;;  %v1772_v14 = vadd.f32 %v1771_v7, %v1619_v38  ;;  %v1477_v35 = vadd.f32 %v1476_v22, %v5677_v24  ;;  %v5682_v20 = vpop.f32.mrb[39].mxu0 }
 0x3dd   :  { %8215 = vst [vmem:[#allocation85_spill] sm:$0xff] %v5682_v20  ;;  %v1906_v34 = vmul.f32 0.0078125, %v1770_v15  ;;  %v1914_v0 = vmul.f32 %v5672_v17, %v5672_v17  ;;  %v1793_v39 = vadd.f32 %v1792_v57, %v1620_v45  ;;  %v1627_v49 = vmul.f32 %v5677_v24, %v5677_v24 }
 0x3de   :  { %v1921_v9 = vsub.f32 %v1905_v50, %v1913_v44  ;;  %v1498_v61 = vadd.f32 %v1497_v51, %v5682_v20  ;;  %v1628_v43 = vmul.f32 %v5682_v20, %v5682_v20  ;;  %v1847_v28 = vadd.f32 %v1846_v16, %v1718_v36 }
 0x3df   :  { %v1922_v7 = vsub.f32 %v1906_v34, %v1914_v0  ;;  %v1773_v38 = vadd.f32 %v1772_v14, %v1627_v49  ;;  %v1532_v22 = vrot.slane %v1531_v33, 4  ;;  %v1725_v15 = vmul.f32 %v5652_v4, %v5652_v4 }
 0x3e0   :  { %v1929_v37 = vmax.f32 %v1921_v9, 0.0  ;;  %v1794_v27 = vadd.f32 %v1793_v39, %v1628_v43  ;;  %v1552_v57 = vadd.f32 %v1551_v32, %v5655_v29  ;;  %v1726_v51 = vmul.f32 %v5655_v29, %v5655_v29 }
 0x3e1   :  { %v1930_v45 = vmax.f32 %v1922_v7, 0.0  ;;  %v5694_v46 = vpop.f32.mrb[40].mxu0  ;;  %v1533_v50 = vadd.f32 %v1532_v22, %v1531_v33  ;;  %v1827_v44 = vadd.f32 %v1826_v63, %v1725_v15 }
 0x3e2   :  { %8216 = vst [vmem:[#allocation86_spill] sm:$0xff] %v5694_v46  ;;  %v1937_v18 = vadd.f32 1e-05, %v1929_v37  ;;  %v1478_v36 = vadd.f32 %v1477_v35, %v5694_v46  ;;  %v1635_v16 = vmul.f32 %v5694_v46, %v5694_v46  ;;  %v5701_v14 = vpop.f32.mrb[41].mxu0  ;;  %v1553_v34 = vrot.slane %v1552_v57, 4 }
 0x3e3   :  { %8217 = vst [vmem:[#allocation87_spill] sm:$0xff] %v5701_v14  ;;  %v1938_v0 = vadd.f32 1e-05, %v1930_v45  ;;  %v1499_v32 = vadd.f32 %v1498_v61, %v5701_v14  ;;  %v1636_v39 = vmul.f32 %v5701_v14, %v5701_v14  ;;  %v5706_v33 = vpop.f32.mrb[42].mxu0  ;;  %v1534_v63 = vrot.slane %v1533_v50, 2 }
 0x3e4   :  { %8218 = vst [vmem:[#allocation88_spill] sm:$0xff] %v5706_v33  ;;  %4558 = vrsqrt.f32 %v1937_v18  ;;  %v1774_v49 = vadd.f32 %v1773_v38, %v1635_v16  ;;  %v1479_v37 = vadd.f32 %v1478_v36, %v5706_v33  ;;  %v1643_v35 = vmul.f32 %v5706_v33, %v5706_v33  ;;  %v5711_v9 = vpop.f32.mrb[43].mxu0 }
 0x3e5   :  { %8219 = vst [vmem:[#allocation89_spill] sm:$0xff] %v5711_v9  ;;  %4560 = vrsqrt.f32 %v1938_v0  ;;  %v1795_v43 = vadd.f32 %v1794_v27, %v1636_v39  ;;  %v1500_v7 = vadd.f32 %v1499_v32, %v5711_v9  ;;  %v1644_v61 = vmul.f32 %v5711_v9, %v5711_v9 }
 0x3e6   :  { %v1775_v22 = vadd.f32 %v1774_v49, %v1643_v35  ;;  %v1535_v15 = vadd.f32 %v1534_v63, %v1533_v50  ;;  %v1828_v45 = vrot.slane %v1827_v44, 4  ;;  %v1554_v29 = vadd.f32 %v1553_v34, %v1552_v57 }
 0x3e7   :  { %v1796_v18 = vadd.f32 %v1795_v43, %v1644_v61  ;;  %v1848_v38 = vadd.f32 %v1847_v28, %v1726_v51 }
 0x3e8   :  { %v1536_v16 = vrot.slane %v1535_v15, 1  ;;  %v1829_v36 = vadd.f32 %v1828_v45, %v1827_v44  ;;  %v1555_v4 = vrot.slane %v1554_v29, 2 }
 0x3e9   :  { %v5716_v14 = vpop.f32.mrb[44].mxu0  ;;  %v1849_v33 = vrot.slane %v1848_v38, 4 }
 0x3ea   :  { %8220 = vst [vmem:[#allocation90_spill] sm:$0xff] %v5716_v14  ;;  %v1480_v0 = vadd.f32 %v1479_v37, %v5716_v14  ;;  %v1651_v27 = vmul.f32 %v5716_v14, %v5716_v14  ;;  %v5721_v32 = vpop.f32.mrb[45].mxu0  ;;  %v1537_v39 = vadd.f32 %v1536_v16, %v1535_v15  ;;  %v1830_v49 = vrot.slane %v1829_v36, 2 }
 0x3eb   :  { %8221 = vst [vmem:[#allocation91_spill] sm:$0xff] %v5721_v32  ;;  %v1501_v50 = vadd.f32 %v1500_v7, %v5721_v32  ;;  %v1652_v28 = vmul.f32 %v5721_v32, %v5721_v32  ;;  %v5726_v57 = vpop.f32.mrb[46].mxu0  ;;  %v1556_v44 = vadd.f32 %v1555_v4, %v1554_v29  ;;  %v1850_v51 = vadd.f32 %v1849_v33, %v1848_v38 }
 0x3ec   :  { %8222 = vst [vmem:[#allocation92_spill] sm:$0xff] %v5726_v57  ;;  %v1776_v34 = vadd.f32 %v1775_v22, %v1651_v27  ;;  %v1481_v63 = vadd.f32 %v1480_v0, %v5726_v57  ;;  %v1659_v37 = vmul.f32 %v5726_v57, %v5726_v57  ;;  %v5731_v35 = vpop.f32.mrb[47].mxu0  ;;  %v1831_v43 = vadd.f32 %v1830_v49, %v1829_v36 }
 0x3ed   :  { %8223 = vst [vmem:[#allocation93_spill] sm:$0xff] %v5731_v35  ;;  %v1797_v61 = vadd.f32 %v1796_v18, %v1652_v28  ;;  %v1502_v15 = vadd.f32 %v1501_v50, %v5731_v35  ;;  %v1660_v7 = vmul.f32 %v5731_v35, %v5731_v35  ;;  %v5736_v45 = vmul.f32 0.0078125, %v1537_v39 }
 0x3ee   :  { %v5738_v16 = vpop.eup %4558  ;;  %v1777_v29 = vadd.f32 %v1776_v34, %v1659_v37  ;;  %v1832_v4 = vrot.slane %v1831_v43, 1  ;;  %v1557_v33 = vrot.slane %v1556_v44, 1  ;;  %v1851_v22 = vrot.slane %v1850_v51, 2 }
 0x3ef   :  { %v5740_v38 = vpop.eup %4560  ;;  %v1798_v0 = vadd.f32 %v1797_v61, %v1660_v7  ;;  %v1917_v36 = vmul.f32 %v5736_v45, %v5736_v45 }
 0x3f0   :  { %v1833_v27 = vadd.f32 %v1832_v4, %v1831_v43  ;;  %v1558_v49 = vadd.f32 %v1557_v33, %v1556_v44  ;;  %v1852_v50 = vadd.f32 %v1851_v22, %v1850_v51 }
 0x3f1   :  { %v5746_v39 = vpop.f32.mrb[48].mxu0 }
 0x3f2   :  { %8224 = vst [vmem:[#allocation94_spill] sm:$0xff] %v5746_v39  ;;  %v1482_v28 = vadd.f32 %v1481_v63, %v5746_v39  ;;  %v1667_v34 = vmul.f32 %v5746_v39, %v5746_v39  ;;  %v5751_v37 = vpop.f32.mrb[49].mxu0  ;;  %v1909_v35 = vmul.f32 0.0078125, %v1833_v27  ;;  %v1853_v43 = vrot.slane %v1852_v50, 1 }
 0x3f3   :  { %8225 = vst [vmem:[#allocation95_spill] sm:$0xff] %v5751_v37  ;;  %v1503_v61 = vadd.f32 %v1502_v15, %v5751_v37  ;;  %v1668_v7 = vmul.f32 %v5751_v37, %v5751_v37  ;;  %v5756_v57 = vpop.f32.mrb[50].mxu0  ;;  %v5758_v44 = vmul.f32 0.0078125, %v1558_v49 }
 0x3f4   :  { %8226 = vst [vmem:[#allocation96_spill] sm:$0xff] %v5756_v57  ;;  %v1778_v51 = vadd.f32 %v1777_v29, %v1667_v34  ;;  %v1483_v4 = vadd.f32 %v1482_v28, %v5756_v57  ;;  %v1675_v63 = vmul.f32 %v5756_v57, %v5756_v57  ;;  %v5763_v33 = vpop.f32.mrb[51].mxu0  ;;  %v1925_v22 = vsub.f32 %v1909_v35, %v1917_v36 }
 0x3f5   :  { %8227 = vst [vmem:[#allocation97_spill] sm:$0xff] %v5763_v33  ;;  %v1799_v27 = vadd.f32 %v1798_v0, %v1668_v7  ;;  %v1504_v15 = vadd.f32 %v1503_v61, %v5763_v33  ;;  %v1676_v18 = vmul.f32 %v5763_v33, %v5763_v33  ;;  %v1854_v37 = vadd.f32 %v1853_v43, %v1852_v50 }
 0x3f6   :  { %v1779_v39 = vadd.f32 %v1778_v51, %v1675_v63  ;;  %v1933_v32 = vmax.f32 %v1925_v22, 0.0  ;;  %v1918_v29 = vmul.f32 %v5758_v44, %v5758_v44 }
 0x3f7   :  { %v1800_v49 = vadd.f32 %v1799_v27, %v1676_v18  ;;  %v1910_v28 = vmul.f32 0.0078125, %v1854_v37 }
 0x3f8   :  { %v1941_v34 = vadd.f32 1e-05, %v1933_v32 }
 0x3f9   :  { %v5770_v14 = vpop.f32.mrb[52].mxu0  ;;  %v1926_v57 = vsub.f32 %v1910_v28, %v1918_v29 }
 0x3fa   :  { %8228 = vst [vmem:[#allocation98_spill] sm:$0xff] %v5770_v14  ;;  %v1484_v35 = vadd.f32 %v1483_v4, %v5770_v14  ;;  %v1683_v0 = vmul.f32 %v5770_v14, %v5770_v14  ;;  %v5775_v36 = vpop.f32.mrb[53].mxu0  ;;  %4562 = vrsqrt.f32 %v1941_v34 }
 0x3fb   :  { %8229 = vst [vmem:[#allocation99_spill] sm:$0xff] %v5775_v36  ;;  %v1505_v50 = vadd.f32 %v1504_v15, %v5775_v36  ;;  %v1684_v61 = vmul.f32 %v5775_v36, %v5775_v36  ;;  %v5780_v7 = vpop.f32.mrb[54].mxu0  ;;  %v1934_v18 = vmax.f32 %v1926_v57, 0.0 }
 0x3fc   :  { %8230 = vst [vmem:[#allocation100_spill] sm:$0xff] %v5780_v7  ;;  %v1780_v37 = vadd.f32 %v1779_v39, %v1683_v0  ;;  %v1485_v32 = vadd.f32 %v1484_v35, %v5780_v7  ;;  %v1691_v43 = vmul.f32 %v5780_v7, %v5780_v7  ;;  %v5785_v51 = vpop.f32.mrb[55].mxu0 }
 0x3fd   :  { %8231 = vst [vmem:[#allocation101_spill] sm:$0xff] %v5785_v51  ;;  %v1801_v4 = vadd.f32 %v1800_v49, %v1684_v61  ;;  %v1506_v63 = vadd.f32 %v1505_v50, %v5785_v51  ;;  %v1692_v22 = vmul.f32 %v5785_v51, %v5785_v51  ;;  %v1942_v27 = vadd.f32 1e-05, %v1934_v18 }
 0x3fe   :  { %v1781_v15 = vadd.f32 %v1780_v37, %v1691_v43 }
 0x3ff   :  { %v1802_v29 = vadd.f32 %v1801_v4, %v1692_v22  ;;  %4564 = vrsqrt.f32 %v1942_v27 }
 0x401   :  { %v5790_v57 = vpop.f32.mrb[56].mxu0 }
 0x402   :  { %8232 = vst [vmem:[#allocation102_spill] sm:$0xff] %v5790_v57  ;;  %v1486_v39 = vadd.f32 %v1485_v32, %v5790_v57  ;;  %v1699_v28 = vmul.f32 %v5790_v57, %v5790_v57  ;;  %v5795_v35 = vpop.f32.mrb[57].mxu0 }
 0x403   :  { %8233 = vst [vmem:[#allocation103_spill] sm:$0xff] %v5795_v35  ;;  %v1507_v49 = vadd.f32 %v1506_v63, %v5795_v35  ;;  %v1700_v34 = vmul.f32 %v5795_v35, %v5795_v35  ;;  %v5800_v0 = vpop.f32.mrb[58].mxu0 }
 0x404   :  { %8234 = vst [vmem:[#allocation104_spill] sm:$0xff] %v5800_v0  ;;  %v1782_v50 = vadd.f32 %v1781_v15, %v1699_v28  ;;  %v1487_v61 = vadd.f32 %v1486_v39, %v5800_v0  ;;  %v1707_v18 = vmul.f32 %v5800_v0, %v5800_v0  ;;  %v5805_v37 = vpop.f32.mrb[59].mxu0  ;;  %v5810_v63 = vpop.eup %4562 }
 0x405   :  { %8235 = vst [vmem:[#allocation105_spill] sm:$0xff] %v5805_v37  ;;  %v1803_v32 = vadd.f32 %v1802_v29, %v1700_v34  ;;  %v1508_v43 = vadd.f32 %v1507_v49, %v5805_v37  ;;  %v1708_v4 = vmul.f32 %v5805_v37, %v5805_v37 }
 0x406   :  { %v1783_v22 = vadd.f32 %v1782_v50, %v1707_v18 }
 0x407   :  { %v1804_v27 = vadd.f32 %v1803_v32, %v1708_v4 }
 0x409   :  { %v5812_v35 = vpop.eup %4564  ;;  %v5814_v15 = vpop.f32.mrb[60].mxu0 }
 0x40a   :  { %8236 = vst [vmem:[#allocation106_spill] sm:$0xff] %v5814_v15  ;;  %v1488_v39 = vadd.f32 %v1487_v61, %v5814_v15  ;;  %v1715_v28 = vmul.f32 %v5814_v15, %v5814_v15  ;;  %v5819_v0 = vpop.f32.mrb[61].mxu0 }
 0x40b   :  { %8237 = vst [vmem:[#allocation107_spill] sm:$0xff] %v5819_v0  ;;  %v1509_v49 = vadd.f32 %v1508_v43, %v5819_v0  ;;  %v1716_v34 = vmul.f32 %v5819_v0, %v5819_v0  ;;  %v5826_v50 = vpop.f32.mrb[62].mxu0 }
 0x40c   :  { %8238 = vst [vmem:[#allocation108_spill] sm:$0xff] %v5826_v50  ;;  %v1784_v18 = vadd.f32 %v1783_v22, %v1715_v28  ;;  %v1489_v32 = vadd.f32 %v1488_v39, %v5826_v50  ;;  %v1723_v61 = vmul.f32 %v5826_v50, %v5826_v50  ;;  %v5831_v4 = vpop.f32.mrb[63].mxu0 }
 0x40d   :  { %8239 = vst [vmem:[#allocation109_spill] sm:$0xff] %v5831_v4  ;;  %v1805_v15 = vadd.f32 %v1804_v27, %v1716_v34  ;;  %v1510_v37 = vadd.f32 %v1509_v49, %v5831_v4  ;;  %v1724_v29 = vmul.f32 %v5831_v4, %v5831_v4 }
 0x40e   :  { %v1490_v43 = vrot.slane %v1489_v32, 4  ;;  %v1785_v57 = vadd.f32 %v1784_v18, %v1723_v61 }
 0x40f   :  { %v1511_v51 = vrot.slane %v1510_v37, 4  ;;  %v1806_v0 = vadd.f32 %v1805_v15, %v1724_v29 }
 0x410   :  { %v1491_v7 = vadd.f32 %v1490_v43, %v1489_v32  ;;  %v1786_v36 = vrot.slane %v1785_v57, 4 }
 0x411   :  { %v1512_v22 = vadd.f32 %v1511_v51, %v1510_v37  ;;  %v1807_v28 = vrot.slane %v1806_v0, 4  ;;  %v5836_v39 = vpop.f32.mrb[64].mxu0 }
 0x412   :  { %v1492_v14 = vrot.slane %v1491_v7, 2  ;;  %v1787_v50 = vadd.f32 %v1786_v36, %v1785_v57  ;;  %v5838_v33 = vpop.f32.mrb[65].mxu0  ;;  %v1607_v49 = vmul.f32 %v5836_v39, %v5836_v39 }
 0x413   :  { %v1513_v27 = vrot.slane %v1512_v22, 2  ;;  %v1808_v34 = vadd.f32 %v1807_v28, %v1806_v0  ;;  %v1608_v18 = vmul.f32 %v5838_v33, %v5838_v33  ;;  %v5844_v61 = vpop.f32.mrb[66].mxu0 }
 0x414   :  { %v1493_v15 = vadd.f32 %v1492_v14, %v1491_v7  ;;  %v1788_v29 = vrot.slane %v1787_v50, 2  ;;  %v1559_v51 = vadd.f32 %v5844_v61, %v5836_v39  ;;  %v1615_v36 = vmul.f32 %v5844_v61, %v5844_v61  ;;  %v5850_v57 = vpop.f32.mrb[67].mxu0 }
 0x415   :  { %v1514_v37 = vadd.f32 %v1513_v27, %v1512_v22  ;;  %v1809_v0 = vrot.slane %v1808_v34, 2  ;;  %v1580_v32 = vadd.f32 %v5850_v57, %v5838_v33  ;;  %v1616_v43 = vmul.f32 %v5850_v57, %v5850_v57 }
 0x416   :  { %v1494_v28 = vrot.slane %v1493_v15, 1  ;;  %v1789_v4 = vadd.f32 %v1788_v29, %v1787_v50  ;;  %v1855_v14 = vadd.f32 %v1615_v36, %v1607_v49 }
 0x417   :  { %v1515_v7 = vrot.slane %v1514_v37, 1  ;;  %v1810_v9 = vadd.f32 %v1809_v0, %v1808_v34  ;;  %v1876_v46 = vadd.f32 %v1616_v43, %v1608_v18 }
 0x418   :  { %v1495_v5 = vadd.f32 %v1494_v28, %v1493_v15  ;;  %v1790_v6 = vrot.slane %v1789_v4, 1 }
 0x419   :  { %v1516_v41 = vadd.f32 %v1515_v7, %v1514_v37  ;;  %v1811_v21 = vrot.slane %v1810_v9, 1  ;;  %v5856_v20 = vpop.f32.mrb[68].mxu0 }
 0x41a   :  { %8240 = vst [vmem:[#allocation110_spill] sm:$0xff] %v5856_v20  ;;  %v1791_v22 = vadd.f32 %v1790_v6, %v1789_v4  ;;  %v5858_v27 = vmul.f32 0.0078125, %v1495_v5  ;;  %v1560_v24 = vadd.f32 %v1559_v51, %v5856_v20  ;;  %v1623_v55 = vmul.f32 %v5856_v20, %v5856_v20  ;;  %v5863_v42 = vpop.f32.mrb[69].mxu0 }
 0x41b   :  { %8241 = vst [vmem:[#allocation111_spill] sm:$0xff] %v5863_v42  ;;  %v1812_v50 = vadd.f32 %v1811_v21, %v1810_v9  ;;  %v5865_v49 = vmul.f32 0.0078125, %v1516_v41  ;;  %v1581_v34 = vadd.f32 %v1580_v32, %v5863_v42  ;;  %v1624_v18 = vmul.f32 %v5863_v42, %v5863_v42  ;;  %v5870_v15 = vpop.f32.mrb[70].mxu0 }
 0x41c   :  { %8242 = vst [vmem:[#allocation112_spill] sm:$0xff] %v5870_v15  ;;  %v1907_v6 = vmul.f32 0.0078125, %v1791_v22  ;;  %v1915_v5 = vmul.f32 %v5858_v27, %v5858_v27  ;;  %v1856_v4 = vadd.f32 %v1855_v14, %v1623_v55  ;;  %v1561_v29 = vadd.f32 %v1560_v24, %v5870_v15  ;;  %v5875_v51 = vpop.f32.mrb[71].mxu0 }
 0x41d   :  { %8243 = vst [vmem:[#allocation113_spill] sm:$0xff] %v5875_v51  ;;  %v1908_v36 = vmul.f32 0.0078125, %v1812_v50  ;;  %v1916_v21 = vmul.f32 %v5865_v49, %v5865_v49  ;;  %v1877_v41 = vadd.f32 %v1876_v46, %v1624_v18  ;;  %v1631_v9 = vmul.f32 %v5870_v15, %v5870_v15 }
 0x41e   :  { %v1923_v37 = vsub.f32 %v1907_v6, %v1915_v5  ;;  %v1582_v0 = vadd.f32 %v1581_v34, %v5875_v51  ;;  %v1632_v32 = vmul.f32 %v5875_v51, %v5875_v51 }
 0x41f   :  { %v1924_v43 = vsub.f32 %v1908_v36, %v1916_v21  ;;  %v1857_v55 = vadd.f32 %v1856_v4, %v1631_v9 }
 0x420   :  { %v1931_v28 = vmax.f32 %v1923_v37, 0.0  ;;  %v1878_v24 = vadd.f32 %v1877_v41, %v1632_v32  ;;  %v4637_v32 = vmov 1966171168  }
 0x421   :  { %v1932_v14 = vmax.f32 %v1924_v43, 0.0  ;;  %v5884_v7 = vpop.f32.mrb[72].mxu0  ;;  %v1966_v43 = vunpack.c.l.s4 %v4637_v32 }
 0x422   :  { %8244 = vst [vmem:[#allocation114_spill] sm:$0xff] %v5884_v7  ;;  %v1939_v22 = vadd.f32 1e-05, %v1931_v28  ;;  %v1562_v50 = vadd.f32 %v1561_v29, %v5884_v7  ;;  %v1639_v46 = vmul.f32 %v5884_v7, %v5884_v7  ;;  %v5889_v18 = vpop.f32.mrb[73].mxu0 }
 0x423   :  { %8245 = vst [vmem:[#allocation115_spill] sm:$0xff] %v5889_v18  ;;  %v1940_v6 = vadd.f32 1e-05, %v1932_v14  ;;  %v1583_v34 = vadd.f32 %v1582_v0, %v5889_v18  ;;  %v1640_v5 = vmul.f32 %v5889_v18, %v5889_v18  ;;  %v5894_v4 = vpop.f32.mrb[74].mxu0 }
 0x424   :  { %8246 = vst [vmem:[#allocation116_spill] sm:$0xff] %v5894_v4  ;;  %4566 = vrsqrt.f32 %v1939_v22  ;;  %v1858_v36 = vadd.f32 %v1857_v55, %v1639_v46  ;;  %v1563_v21 = vadd.f32 %v1562_v50, %v5894_v4  ;;  %v1647_v29 = vmul.f32 %v5894_v4, %v5894_v4  ;;  %v5899_v41 = vpop.f32.mrb[75].mxu0 }
 0x425   :  { %8247 = vst [vmem:[#allocation117_spill] sm:$0xff] %v5899_v41  ;;  %4568 = vrsqrt.f32 %v1940_v6  ;;  %v1879_v9 = vadd.f32 %v1878_v24, %v1640_v5  ;;  %v1584_v37 = vadd.f32 %v1583_v34, %v5899_v41  ;;  %v1648_v0 = vmul.f32 %v5899_v41, %v5899_v41 }
 0x426   :  { %v1859_v28 = vadd.f32 %v1858_v36, %v1647_v29  ;;  %v1967_v55 = vunpack.c.0.s8 %v1966_v43 }
 0x427   :  { %v1880_v14 = vadd.f32 %v1879_v9, %v1648_v0 }
 0x428   :  { %v5925_v43 = vsub.s32 %v1967_v55, %v4852_v54 }
 0x429   :  { %v5904_v22 = vpop.f32.mrb[76].mxu0 }
 0x42a   :  { %8248 = vst [vmem:[#allocation118_spill] sm:$0xff] %v5904_v22  ;;  %v1564_v50 = vadd.f32 %v1563_v21, %v5904_v22  ;;  %v1655_v46 = vmul.f32 %v5904_v22, %v5904_v22  ;;  %v5909_v4 = vpop.f32.mrb[77].mxu0  ;;  %8252 = vst [vmem:[#allocation122_spill] sm:$0xff] %v5925_v43 }
 0x42b   :  { %8249 = vst [vmem:[#allocation119_spill] sm:$0xff] %v5909_v4  ;;  %v1585_v24 = vadd.f32 %v1584_v37, %v5909_v4  ;;  %v1656_v6 = vmul.f32 %v5909_v4, %v5909_v4  ;;  %v5914_v34 = vpop.f32.mrb[78].mxu0 }
 0x42c   :  { %8250 = vst [vmem:[#allocation120_spill] sm:$0xff] %v5914_v34  ;;  %v1860_v5 = vadd.f32 %v1859_v28, %v1655_v46  ;;  %v1565_v36 = vadd.f32 %v1564_v50, %v5914_v34  ;;  %v1663_v29 = vmul.f32 %v5914_v34, %v5914_v34  ;;  %v5919_v9 = vpop.f32.mrb[79].mxu0  ;;  %v8254_v34 = vcombine.low %v5738_v16, %v5740_v38 }
 0x42d   :  { %8251 = vst [vmem:[#allocation121_spill] sm:$0xff] %v5919_v9  ;;  %v1881_v21 = vadd.f32 %v1880_v14, %v1656_v6  ;;  %v1586_v0 = vadd.f32 %v1585_v24, %v5919_v9  ;;  %v1664_v32 = vmul.f32 %v5919_v9, %v5919_v9 }
 0x42e   :  { %v4567_v37 = vpop.eup %4566  ;;  %v1861_v4 = vadd.f32 %v1860_v5, %v1663_v29  ;;  %v5933_v14 = vrot.slane %v8254_v34, %v5925_v43 }
 0x42f   :  { %v4569_v22 = vpop.eup %4568  ;;  %v1882_v28 = vadd.f32 %v1881_v21, %v1664_v32 }
 0x430   :  { %v1962_v46 = vcombine.low %v4567_v37, %v4569_v22 }
 0x431   :  { %v5927_v50 = vpop.f32.mrb[80].mxu0 }
 0x432   :  { %8253 = vst [vmem:[#allocation123_spill] sm:$0xff] %v5927_v50  ;;  %v5936_v24 = vrot.slane %v1962_v46, %v5925_v43  ;;  %v1566_v6 = vadd.f32 %v1565_v36, %v5927_v50  ;;  %v1671_v55 = vmul.f32 %v5927_v50, %v5927_v50  ;;  %v5941_v5 = vpop.f32.mrb[81].mxu0 }
 0x433   :  { %8255 = vst [vmem:[#allocation124_spill] sm:$0xff] %v5941_v5  ;;  %v1587_v22 = vadd.f32 %v1586_v0, %v5941_v5  ;;  %v1672_v29 = vmul.f32 %v5941_v5, %v5941_v5  ;;  %v5946_v21 = vpop.f32.mrb[82].mxu0 }
 0x434   :  { %8256 = vst [vmem:[#allocation125_spill] sm:$0xff] %v5946_v21  ;;  %v1862_v38 = vadd.f32 %v1861_v4, %v1671_v55  ;;  %v1567_v34 = vadd.f32 %v1566_v6, %v5946_v21  ;;  %v1679_v36 = vmul.f32 %v5946_v21, %v5946_v21  ;;  %v5953_v32 = vpop.f32.mrb[83].mxu0 }
 0x435   :  { %8257 = vst [vmem:[#allocation126_spill] sm:$0xff] %v5953_v32  ;;  %v1883_v37 = vadd.f32 %v1882_v28, %v1672_v29  ;;  %v1588_v46 = vadd.f32 %v1587_v22, %v5953_v32  ;;  %v1680_v0 = vmul.f32 %v5953_v32, %v5953_v32 }
 0x436   :  { %v1863_v5 = vadd.f32 %v1862_v38, %v1679_v36 }
 0x437   :  { %v1884_v50 = vadd.f32 %v1883_v37, %v1680_v0 }
 0x439   :  { %v5958_v9 = vpop.f32.mrb[84].mxu0 }
 0x43a   :  { %8258 = vst [vmem:[#allocation127_spill] sm:$0xff] %v5958_v9  ;;  %v1568_v16 = vadd.f32 %v1567_v34, %v5958_v9  ;;  %v1687_v4 = vmul.f32 %v5958_v9, %v5958_v9  ;;  %v5963_v6 = vpop.f32.mrb[85].mxu0 }
 0x43b   :  { %8259 = vst [vmem:[#allocation128_spill] sm:$0xff] %v5963_v6  ;;  %v1589_v55 = vadd.f32 %v1588_v46, %v5963_v6  ;;  %v1688_v28 = vmul.f32 %v5963_v6, %v5963_v6  ;;  %v5968_v22 = vpop.f32.mrb[86].mxu0 }
 0x43c   :  { %8260 = vst [vmem:[#allocation129_spill] sm:$0xff] %v5968_v22  ;;  %v1864_v29 = vadd.f32 %v1863_v5, %v1687_v4  ;;  %v1569_v38 = vadd.f32 %v1568_v16, %v5968_v22  ;;  %v1695_v36 = vmul.f32 %v5968_v22, %v5968_v22  ;;  %v5973_v37 = vpop.f32.mrb[87].mxu0 }
 0x43d   :  { %8261 = vst [vmem:[#allocation130_spill] sm:$0xff] %v5973_v37  ;;  %v1885_v34 = vadd.f32 %v1884_v50, %v1688_v28  ;;  %v1590_v0 = vadd.f32 %v1589_v55, %v5973_v37  ;;  %v1696_v9 = vmul.f32 %v5973_v37, %v5973_v37 }
 0x43e   :  { %v1865_v46 = vadd.f32 %v1864_v29, %v1695_v36 }
 0x43f   :  { %v1886_v32 = vadd.f32 %v1885_v34, %v1696_v9 }
 0x441   :  { %v5978_v21 = vpop.f32.mrb[88].mxu0 }
 0x442   :  { %8262 = vst [vmem:[#allocation131_spill] sm:$0xff] %v5978_v21  ;;  %v1570_v6 = vadd.f32 %v1569_v38, %v5978_v21  ;;  %v1703_v5 = vmul.f32 %v5978_v21, %v5978_v21  ;;  %v5983_v16 = vpop.f32.mrb[89].mxu0 }
 0x443   :  { %8263 = vst [vmem:[#allocation132_spill] sm:$0xff] %v5983_v16  ;;  %v1591_v4 = vadd.f32 %v1590_v0, %v5983_v16  ;;  %v1704_v50 = vmul.f32 %v5983_v16, %v5983_v16  ;;  %v5988_v55 = vpop.f32.mrb[90].mxu0 }
 0x444   :  { %8264 = vst [vmem:[#allocation133_spill] sm:$0xff] %v5988_v55  ;;  %v1866_v28 = vadd.f32 %v1865_v46, %v1703_v5  ;;  %v1571_v29 = vadd.f32 %v1570_v6, %v5988_v55  ;;  %v1711_v9 = vmul.f32 %v5988_v55, %v5988_v55  ;;  %v5993_v36 = vpop.f32.mrb[91].mxu0 }
 0x445   :  { %8265 = vst [vmem:[#allocation134_spill] sm:$0xff] %v5993_v36  ;;  %v1887_v38 = vadd.f32 %v1886_v32, %v1704_v50  ;;  %v1592_v34 = vadd.f32 %v1591_v4, %v5993_v36  ;;  %v1712_v21 = vmul.f32 %v5993_v36, %v5993_v36 }
 0x446   :  { %v1867_v0 = vadd.f32 %v1866_v28, %v1711_v9 }
 0x447   :  { %v1888_v37 = vadd.f32 %v1887_v38, %v1712_v21 }
 0x449   :  { %v5998_v22 = vpop.f32.mrb[92].mxu0 }
 0x44a   :  { %8266 = vst [vmem:[#allocation135_spill] sm:$0xff] %v5998_v22  ;;  %v1572_v16 = vadd.f32 %v1571_v29, %v5998_v22  ;;  %v1719_v6 = vmul.f32 %v5998_v22, %v5998_v22  ;;  %v6003_v46 = vpop.f32.mrb[93].mxu0 }
 0x44b   :  { %8267 = vst [vmem:[#allocation136_spill] sm:$0xff] %v6003_v46  ;;  %v1593_v5 = vadd.f32 %v1592_v34, %v6003_v46  ;;  %v1720_v32 = vmul.f32 %v6003_v46, %v6003_v46  ;;  %v6008_v4 = vpop.f32.mrb[94].mxu0 }
 0x44c   :  { %8268 = vst [vmem:[#allocation137_spill] sm:$0xff] %v6008_v4  ;;  %v1868_v50 = vadd.f32 %v1867_v0, %v1719_v6  ;;  %v1573_v28 = vadd.f32 %v1572_v16, %v6008_v4  ;;  %v1727_v21 = vmul.f32 %v6008_v4, %v6008_v4  ;;  %v6013_v9 = vpop.f32.mrb[95].mxu0 }
 0x44d   :  { %8269 = vst [vmem:[#allocation138_spill] sm:$0xff] %v6013_v9  ;;  %v1889_v29 = vadd.f32 %v1888_v37, %v1720_v32  ;;  %v1594_v38 = vadd.f32 %v1593_v5, %v6013_v9  ;;  %v1728_v22 = vmul.f32 %v6013_v9, %v6013_v9 }
 0x44e   :  { %v1574_v34 = vrot.slane %v1573_v28, 4  ;;  %v1869_v36 = vadd.f32 %v1868_v50, %v1727_v21 }
 0x44f   :  { %v1595_v55 = vrot.slane %v1594_v38, 4  ;;  %v1890_v46 = vadd.f32 %v1889_v29, %v1728_v22 }
 0x450   :  { %v1575_v41 = vadd.f32 %v1574_v34, %v1573_v28  ;;  %v1870_v18 = vrot.slane %v1869_v36, 4 }
 0x451   :  { %v1596_v0 = vadd.f32 %v1595_v55, %v1594_v38  ;;  %v1891_v6 = vrot.slane %v1890_v46, 4 }
 0x452   :  { %v1576_v16 = vrot.slane %v1575_v41, 2  ;;  %v1871_v7 = vadd.f32 %v1870_v18, %v1869_v36 }
 0x453   :  { %v1597_v51 = vrot.slane %v1596_v0, 2  ;;  %v1892_v4 = vadd.f32 %v1891_v6, %v1890_v46 }
 0x454   :  { %v1577_v15 = vadd.f32 %v1576_v16, %v1575_v41  ;;  %v1872_v42 = vrot.slane %v1871_v7, 2 }
 0x455   :  { %v1598_v37 = vadd.f32 %v1597_v51, %v1596_v0  ;;  %v1893_v32 = vrot.slane %v1892_v4, 2 }
 0x456   :  { %v1578_v5 = vrot.slane %v1577_v15, 1  ;;  %v1873_v20 = vadd.f32 %v1872_v42, %v1871_v7 }
 0x457   :  { %v1599_v48 = vrot.slane %v1598_v37, 1  ;;  %v1894_v9 = vadd.f32 %v1893_v32, %v1892_v4 }
 0x458   :  { %v1579_v23 = vadd.f32 %v1578_v5, %v1577_v15  ;;  %v1874_v50 = vrot.slane %v1873_v20, 1 }
 0x459   :  { %v1600_v21 = vadd.f32 %v1599_v48, %v1598_v37  ;;  %v1895_v22 = vrot.slane %v1894_v9, 1  ;;  %v8271_v37 = vcombine.low %v5933_v14, %v5936_v24  ;;  %v8275_v14 = vor.u32 %v4722_v3, %v4720_v2 }
 0x45a   :  { %v1875_v28 = vadd.f32 %v1874_v50, %v1873_v20  ;;  %v1903_v29 = vmul.f32 0.0078125, %v1579_v23  ;;  %v8270_v23 = vcombine.low %v5810_v63, %v5812_v35  ;;  %v6035_v35 = vsub.s32 2, %v4852_v54 }
 0x45b   :  { %v1896_v55 = vadd.f32 %v1895_v22, %v1894_v9  ;;  %v1904_v38 = vmul.f32 0.0078125, %v1600_v21  ;;  %v2001_v32 = vrot.slane %v8271_v37, %v5925_v43  ;;  %v6029_v21 = vsub.s32 0, %v4852_v54 }
 0x45c   :  { %v1911_v34 = vmul.f32 0.0078125, %v1875_v28  ;;  %v1919_v18 = vmul.f32 %v1903_v29, %v1903_v29  ;;  %v1985_v20 = vrot.slane %v8270_v23, %v5925_v43  ;;  %v6032_v22 = vsub.s32 1, %v4852_v54  ;;  %8274 = vst [vmem:[#allocation141_spill] sm:$0xff] %v6035_v35 }
 0x45d   :  { %v1912_v36 = vmul.f32 0.0078125, %v1896_v55  ;;  %v1920_v46 = vmul.f32 %v1904_v38, %v1904_v38  ;;  %8272 = vst [vmem:[#allocation139_spill] sm:$0xff] %v6029_v21  ;;  %v8043_v63 = vsub.s32 6, %v4852_v54  ;;  %v8042_v28 = vsub.s32 7, %v4852_v54 }
 0x45e   :  { %v1927_v41 = vsub.f32 %v1911_v34, %v1919_v18  ;;  %8273 = vst [vmem:[#allocation140_spill] sm:$0xff] %v6032_v22 }
 0x45f   :  { %v1928_v6 = vsub.f32 %v1912_v36, %v1920_v46 }
 0x460   :  { %v1935_v51 = vmax.f32 %v1927_v41, 0.0 }
 0x461   :  { %v1936_v0 = vmax.f32 %v1928_v6, 0.0 }
 0x462   :  { %v1943_v16 = vadd.f32 1e-05, %v1935_v51 }
 0x463   :  { %v1944_v42 = vadd.f32 1e-05, %v1936_v0 }
 0x464   :  { %4570 = vrsqrt.f32 %v1943_v16 }
 0x465   :  { %4572 = vrsqrt.f32 %v1944_v42 }
 0x46e   :  { %v4571_v15 = vpop.eup %4570 }
 0x46f   :  { %v4573_v7 = vpop.eup %4572 }
 0x470   :  { %v1964_v48 = vcombine.low %v4571_v15, %v4573_v7 }
 0x472   :  { %v1992_v4 = vrot.slane %v1964_v48, %v5925_v43 }
 0x474   :  { %v1994_v9 = vcombine.low %v1985_v20, %v1992_v4 }
 0x476   :  { %v2008_v5 = vrot.slane %v1994_v9, %v5925_v43 }
 0x478   :  { %v2009_v50 = vcombine.low %v2001_v32, %v2008_v5 }
 0x47a   :  { %v2011_v24 = vmul.f32 %v2009_v50, %v8275_v14 }
 0x47c   :  { %v6043_v55 = vrot.slane %v2011_v24, %v6029_v21  ;;  %v6046_v34 = vrot.slane %v2011_v24, %v6032_v22  ;;  %v6049_v18 = vrot.slane %v2011_v24, %v6035_v35  ;;  %v6052_v36 = vrot.slane %v2011_v24, %v4868_v60 }
 0x47d   :  { %v6055_v46 = vrot.slane %v2011_v24, %v4862_v58  ;;  %v6058_v41 = vrot.slane %v2011_v24, %v4865_v59  ;;  %v6062_v2 = vrot.slane %v2011_v24, %v8043_v63  ;;  %v6066_v3 = vrot.slane %v2011_v24, %v8042_v28  ;;  %v8302_v28 = vld [vmem:[#allocation34_spill] sm:$0xff]  ;;  %v8304_v63 = vld [vmem:[#allocation36_spill] sm:$0xff] }
 0x47e   :  { %v2053_v6 = vmul.f32 %v6043_v55, %v5665_v31  ;;  %v2054_v51 = vmul.f32 %v6046_v34, %v5672_v17  ;;  %v2055_v0 = vmul.f32 %v6049_v18, %v5858_v27  ;;  %v2056_v16 = vmul.f32 %v6052_v36, %v5865_v49 }
 0x47f   :  { %v2057_v42 = vmul.f32 %v6055_v46, %v5736_v45  ;;  %v2058_v15 = vmul.f32 %v6058_v41, %v5758_v44  ;;  %v2059_v7 = vmul.f32 %v6062_v2, %v1903_v29  ;;  %v2060_v48 = vmul.f32 %v6066_v3, %v1904_v38 }
 0x480   :  { %v2069_v31 = vcombine.low %v2053_v6, %v2054_v51  ;;  %v2070_v23 = vcombine.low %v2055_v0, %v2056_v16  ;;  %v6084_v17 = vmul.f32 %v6043_v55, %v5328_v53  ;;  %v6088_v27 = vmul.f32 %v6046_v34, %v5330_v25  ;;  %v8278_v51 = vld [vmem:[#allocation110_spill] sm:$0xff]  ;;  %v8279_v0 = vld [vmem:[#allocation111_spill] sm:$0xff] }
 0x481   :  { %v2071_v49 = vcombine.low %v2057_v42, %v2058_v15  ;;  %v2072_v20 = vcombine.low %v2059_v7, %v2060_v48  ;;  %v6092_v45 = vmul.f32 %v6049_v18, %v5625_v10  ;;  %v6096_v44 = vmul.f32 %v6052_v36, %v5632_v1  ;;  %v8280_v42 = vld [vmem:[#allocation30_spill] sm:$0xff]  ;;  %v8281_v15 = vld [vmem:[#allocation31_spill] sm:$0xff]  ;;  %v8282_v48 = vld [vmem:[#allocation84_spill] sm:$0xff] }
 0x482   :  { %v2079_v29 = vrot.slane %v2069_v31, %v5925_v43  ;;  %v2086_v38 = vrot.slane %v2070_v23, %v5925_v43  ;;  %v6102_v53 = vmul.f32 %v6055_v46, %v5360_v26  ;;  %v6106_v25 = vmul.f32 %v6058_v41, %v5369_v30  ;;  %v8283_v23 = vld [vmem:[#allocation85_spill] sm:$0xff] }
 0x483   :  { %v2093_v4 = vrot.slane %v2071_v49, %v5925_v43  ;;  %v2100_v10 = vrot.slane %v2072_v20, %v5925_v43  ;;  %v6112_v1 = vmul.f32 %v6062_v2, %v5836_v39  ;;  %v6116_v9 = vmul.f32 %v6066_v3, %v5838_v33  ;;  %v8284_v20 = vld [vmem:[#allocation38_spill] sm:$0xff] }
 0x484   :  { %v2101_v37 = vcombine.low %v2079_v29, %v2086_v38  ;;  %v6120_v26 = vmul.f32 %v6043_v55, %v5332_v12  ;;  %v6124_v30 = vmul.f32 %v6046_v34, %v5340_v11  ;;  %v6128_v32 = vmul.f32 %v6049_v18, %v5636_v8  ;;  %v8285_v38 = vld [vmem:[#allocation39_spill] sm:$0xff] }
 0x485   :  { %v2102_v5 = vcombine.low %v2093_v4, %v2100_v10  ;;  %v6132_v39 = vmul.f32 %v6052_v36, %v5644_v47  ;;  %v6136_v33 = vmul.f32 %v6055_v46, %v5376_v56  ;;  %v6140_v12 = vmul.f32 %v6058_v41, %v5382_v40  ;;  %v8286_v10 = vld [vmem:[#allocation112_spill] sm:$0xff] }
 0x486   :  { %v2109_v11 = vrot.slane %v2101_v37, %v5925_v43  ;;  %v6145_v50 = vmul.f32 %v6062_v2, %v5844_v61  ;;  %v6149_v8 = vmul.f32 %v6066_v3, %v5850_v57  ;;  %v6153_v47 = vmul.f32 %v6043_v55, %v5348_v52  ;;  %v8276_v57 = vld [vmem:[#allocation35_spill] sm:$0xff]  ;;  %v8277_v52 = vld [vmem:[#allocation37_spill] sm:$0xff] }
 0x487   :  { %v2116_v56 = vrot.slane %v2102_v5, %v5925_v43  ;;  %v6158_v40 = vmul.f32 %v6046_v34, %v5353_v19  ;;  %v6162_v14 = vmul.f32 %v6049_v18, %v5662_v13  ;;  %v6166_v61 = vmul.f32 %v6052_v36, %v5670_v62  ;;  %v8287_v5 = vld [vmem:[#allocation19_spill] sm:$0xff]  ;;  %v8306_v43 = vld [vmem:[#allocation88_spill] sm:$0xff] }
 0x488   :  { %v6170_v24 = vmul.f32 %v6055_v46, %v8276_v57  ;;  %v6174_v6 = vmul.f32 %v6058_v41, %v8277_v52  ;;  %v6178_v19 = vmul.f32 %v6062_v2, %v8278_v51  ;;  %v6182_v13 = vmul.f32 %v6066_v3, %v8279_v0  ;;  %v8290_v52 = vld [vmem:[#allocation113_spill] sm:$0xff]  ;;  %v8291_v0 = vld [vmem:[#allocation32_spill] sm:$0xff] }
 0x489   :  { %v2117_v16 = vcombine.low %v2109_v11, %v2116_v56  ;;  %v6186_v62 = vmul.f32 %v6043_v55, %v8280_v42  ;;  %v6190_v7 = vmul.f32 %v6046_v34, %v8281_v15  ;;  %v6194_v31 = vmul.f32 %v6049_v18, %v8282_v48  ;;  %v8288_v11 = vld [vmem:[#allocation18_spill] sm:$0xff]  ;;  %v8292_v15 = vld [vmem:[#allocation33_spill] sm:$0xff] }
 0x48a   :  { %v6198_v49 = vmul.f32 %v6052_v36, %v8283_v23  ;;  %v6202_v29 = vmul.f32 %v6055_v46, %v8284_v20  ;;  %v6206_v4 = vmul.f32 %v6058_v41, %v8285_v38  ;;  %v6210_v37 = vmul.f32 %v6062_v2, %v8286_v10  ;;  %v8293_v23 = vld [vmem:[#allocation86_spill] sm:$0xff]  ;;  %v8294_v38 = vld [vmem:[#allocation87_spill] sm:$0xff] }
 0x48b   :  { %v8289_v56 = vor.u32 %v8287_v5, %v8288_v11  ;;  %v6219_v51 = vmul.f32 %v6066_v3, %v8290_v52  ;;  %v6223_v42 = vmul.f32 %v6043_v55, %v8291_v0  ;;  %v6227_v48 = vmul.f32 %v6046_v34, %v8292_v15  ;;  %v8295_v10 = vld [vmem:[#allocation43_spill] sm:$0xff]  ;;  %v8296_v11 = vld [vmem:[#allocation45_spill] sm:$0xff]  ;;  %v8298_v52 = vld [vmem:[#allocation114_spill] sm:$0xff] }
 0x48c   :  { %v6231_v20 = vmul.f32 %v6049_v18, %v8293_v23  ;;  %v6239_v5 = vmul.f32 %v6055_v46, %v8295_v10  ;;  %v6247_v0 = vmul.f32 %v6062_v2, %v8298_v52  ;;  %v8300_v15 = vld [vmem:[#allocation115_spill] sm:$0xff]  ;;  %v6259_v10 = vmul.f32 %v6046_v34, %v8304_v63 }
 0x48d   :  { %v6215_v57 = vsub.f32 %v8289_v56, %v2117_v16  ;;  %v6235_v16 = vmul.f32 %v6052_v36, %v8294_v38  ;;  %v6243_v56 = vmul.f32 %v6058_v41, %v8296_v11  ;;  %v6251_v23 = vmul.f32 %v6066_v3, %v8300_v15 }
 0x48e   :  { %8299 = vst [vmem:[#allocation37_spill] sm:$0xff] %v6247_v0  ;;  %v6255_v38 = vmul.f32 %v6043_v55, %v8302_v28  ;;  %8305 = vst [vmem:[#allocation30_spill] sm:$0xff] %v6259_v10  ;;  %v6263_v11 = vmul.f32 %v6049_v18, %v8306_v43  ;;  %v8310_v0 = vld [vmem:[#allocation46_spill] sm:$0xff]  ;;  %v8316_v10 = vld [vmem:[#allocation117_spill] sm:$0xff] }
 0x48f   :  { %8297 = vst [vmem:[#allocation35_spill] sm:$0xff] %v6243_v56  ;;  %8301 = vst [vmem:[#allocation110_spill] sm:$0xff] %v6251_v23  ;;  %v8308_v56 = vld [vmem:[#allocation89_spill] sm:$0xff]  ;;  %v6271_v15 = vmul.f32 %v6055_v46, %v8310_v0  ;;  %v8312_v23 = vld [vmem:[#allocation47_spill] sm:$0xff]  ;;  %v6283_v43 = vmul.f32 %v6066_v3, %v8316_v10 }
 0x490   :  { %8303 = vst [vmem:[#allocation111_spill] sm:$0xff] %v6255_v38  ;;  %8307 = vst [vmem:[#allocation31_spill] sm:$0xff] %v6263_v11  ;;  %v6267_v52 = vmul.f32 %v6052_v36, %v8308_v56  ;;  %v6275_v28 = vmul.f32 %v6058_v41, %v8312_v23  ;;  %v8314_v38 = vld [vmem:[#allocation116_spill] sm:$0xff] }
 0x491   :  { %8311 = vst [vmem:[#allocation85_spill] sm:$0xff] %v6271_v15  ;;  %v6279_v63 = vmul.f32 %v6062_v2, %v8314_v38  ;;  %8317 = vst [vmem:[#allocation112_spill] sm:$0xff] %v6283_v43  ;;  %v8318_v11 = vld [vmem:[#allocation40_spill] sm:$0xff]  ;;  %v8322_v15 = vld [vmem:[#allocation90_spill] sm:$0xff] }
 0x492   :  { %8309 = vst [vmem:[#allocation84_spill] sm:$0xff] %v6267_v52  ;;  %8313 = vst [vmem:[#allocation38_spill] sm:$0xff] %v6275_v28  ;;  %v6287_v56 = vmul.f32 %v6043_v55, %v8318_v11  ;;  %v8320_v52 = vld [vmem:[#allocation41_spill] sm:$0xff]  ;;  %v6295_v23 = vmul.f32 %v6049_v18, %v8322_v15  ;;  %v8324_v28 = vld [vmem:[#allocation91_spill] sm:$0xff] }
 0x493   :  { %8315 = vst [vmem:[#allocation39_spill] sm:$0xff] %v6279_v63  ;;  %v6291_v0 = vmul.f32 %v6046_v34, %v8320_v52  ;;  %v6299_v38 = vmul.f32 %v6052_v36, %v8324_v28  ;;  %v8326_v63 = vld [vmem:[#allocation51_spill] sm:$0xff]  ;;  %v8328_v43 = vld [vmem:[#allocation53_spill] sm:$0xff] }
 0x494   :  { %8319 = vst [vmem:[#allocation19_spill] sm:$0xff] %v6287_v56  ;;  %8323 = vst [vmem:[#allocation113_spill] sm:$0xff] %v6295_v23  ;;  %v6303_v10 = vmul.f32 %v6055_v46, %v8326_v63  ;;  %v6307_v11 = vmul.f32 %v6058_v41, %v8328_v43  ;;  %v8330_v56 = vld [vmem:[#allocation118_spill] sm:$0xff] }
 0x495   :  { %8321 = vst [vmem:[#allocation18_spill] sm:$0xff] %v6291_v0  ;;  %8325 = vst [vmem:[#allocation32_spill] sm:$0xff] %v6299_v38  ;;  %v6311_v52 = vmul.f32 %v6062_v2, %v8330_v56  ;;  %v8332_v0 = vld [vmem:[#allocation119_spill] sm:$0xff]  ;;  %v8334_v23 = vld [vmem:[#allocation42_spill] sm:$0xff] }
 0x496   :  { %8327 = vst [vmem:[#allocation33_spill] sm:$0xff] %v6303_v10  ;;  %8329 = vst [vmem:[#allocation86_spill] sm:$0xff] %v6307_v11  ;;  %v6315_v15 = vmul.f32 %v6066_v3, %v8332_v0  ;;  %v6319_v28 = vmul.f32 %v6043_v55, %v8334_v23  ;;  %v8336_v38 = vld [vmem:[#allocation44_spill] sm:$0xff]  ;;  %v8340_v11 = vld [vmem:[#allocation93_spill] sm:$0xff] }
 0x497   :  { %8331 = vst [vmem:[#allocation87_spill] sm:$0xff] %v6311_v52  ;;  %v6323_v63 = vmul.f32 %v6046_v34, %v8336_v38  ;;  %v8338_v10 = vld [vmem:[#allocation92_spill] sm:$0xff]  ;;  %v6331_v56 = vmul.f32 %v6052_v36, %v8340_v11  ;;  %v8342_v52 = vld [vmem:[#allocation54_spill] sm:$0xff] }
 0x498   :  { %8333 = vst [vmem:[#allocation43_spill] sm:$0xff] %v6315_v15  ;;  %8335 = vst [vmem:[#allocation45_spill] sm:$0xff] %v6319_v28  ;;  %v6327_v43 = vmul.f32 %v6049_v18, %v8338_v10  ;;  %v6335_v0 = vmul.f32 %v6055_v46, %v8342_v52  ;;  %v8344_v15 = vld [vmem:[#allocation55_spill] sm:$0xff]  ;;  %v8346_v28 = vld [vmem:[#allocation120_spill] sm:$0xff] }
 0x499   :  { %8337 = vst [vmem:[#allocation114_spill] sm:$0xff] %v6323_v63  ;;  %8341 = vst [vmem:[#allocation34_spill] sm:$0xff] %v6331_v56  ;;  %v6339_v23 = vmul.f32 %v6058_v41, %v8344_v15  ;;  %v6343_v38 = vmul.f32 %v6062_v2, %v8346_v28  ;;  %v8348_v63 = vld [vmem:[#allocation121_spill] sm:$0xff] }
 0x49a   :  { %8339 = vst [vmem:[#allocation115_spill] sm:$0xff] %v6327_v43  ;;  %8343 = vst [vmem:[#allocation36_spill] sm:$0xff] %v6335_v0  ;;  %v6347_v10 = vmul.f32 %v6066_v3, %v8348_v63  ;;  %v8350_v43 = vld [vmem:[#allocation48_spill] sm:$0xff]  ;;  %v8352_v56 = vld [vmem:[#allocation49_spill] sm:$0xff] }
 0x49b   :  { %8345 = vst [vmem:[#allocation88_spill] sm:$0xff] %v6339_v23  ;;  %8347 = vst [vmem:[#allocation89_spill] sm:$0xff] %v6343_v38  ;;  %v6351_v11 = vmul.f32 %v6043_v55, %v8350_v43  ;;  %v6355_v52 = vmul.f32 %v6046_v34, %v8352_v56  ;;  %v8354_v0 = vld [vmem:[#allocation94_spill] sm:$0xff]  ;;  %v8356_v23 = vld [vmem:[#allocation95_spill] sm:$0xff] }
 0x49c   :  { %8349 = vst [vmem:[#allocation46_spill] sm:$0xff] %v6347_v10  ;;  %v6359_v15 = vmul.f32 %v6049_v18, %v8354_v0  ;;  %v6363_v28 = vmul.f32 %v6052_v36, %v8356_v23  ;;  %v8358_v38 = vld [vmem:[#allocation59_spill] sm:$0xff]  ;;  %v8360_v10 = vld [vmem:[#allocation61_spill] sm:$0xff] }
 0x49d   :  { %8351 = vst [vmem:[#allocation47_spill] sm:$0xff] %v6351_v11  ;;  %8353 = vst [vmem:[#allocation116_spill] sm:$0xff] %v6355_v52  ;;  %v6367_v63 = vmul.f32 %v6055_v46, %v8358_v38  ;;  %v6371_v43 = vmul.f32 %v6058_v41, %v8360_v10  ;;  %v8362_v11 = vld [vmem:[#allocation123_spill] sm:$0xff]  ;;  %v8364_v52 = vld [vmem:[#allocation124_spill] sm:$0xff] }
 0x49e   :  { %8355 = vst [vmem:[#allocation117_spill] sm:$0xff] %v6359_v15  ;;  %8357 = vst [vmem:[#allocation40_spill] sm:$0xff] %v6363_v28  ;;  %v6375_v56 = vmul.f32 %v6062_v2, %v8362_v11  ;;  %v6379_v0 = vmul.f32 %v6066_v3, %v8364_v52  ;;  %v8366_v15 = vld [vmem:[#allocation50_spill] sm:$0xff]  ;;  %v8368_v28 = vld [vmem:[#allocation52_spill] sm:$0xff] }
 0x49f   :  { %8359 = vst [vmem:[#allocation41_spill] sm:$0xff] %v6367_v63  ;;  %8361 = vst [vmem:[#allocation90_spill] sm:$0xff] %v6371_v43  ;;  %v6383_v23 = vmul.f32 %v6043_v55, %v8366_v15  ;;  %v6387_v38 = vmul.f32 %v6046_v34, %v8368_v28  ;;  %v8370_v63 = vld [vmem:[#allocation96_spill] sm:$0xff]  ;;  %v8372_v43 = vld [vmem:[#allocation97_spill] sm:$0xff] }
 0x4a0   :  { %8363 = vst [vmem:[#allocation91_spill] sm:$0xff] %v6375_v56  ;;  %8365 = vst [vmem:[#allocation51_spill] sm:$0xff] %v6379_v0  ;;  %v6391_v10 = vmul.f32 %v6049_v18, %v8370_v63  ;;  %v6395_v11 = vmul.f32 %v6052_v36, %v8372_v43  ;;  %v8374_v56 = vld [vmem:[#allocation62_spill] sm:$0xff]  ;;  %v8376_v0 = vld [vmem:[#allocation63_spill] sm:$0xff] }
 0x4a1   :  { %8367 = vst [vmem:[#allocation53_spill] sm:$0xff] %v6383_v23  ;;  %8369 = vst [vmem:[#allocation118_spill] sm:$0xff] %v6387_v38  ;;  %v6399_v52 = vmul.f32 %v6055_v46, %v8374_v56  ;;  %v6403_v15 = vmul.f32 %v6058_v41, %v8376_v0  ;;  %v8378_v23 = vld [vmem:[#allocation125_spill] sm:$0xff]  ;;  %v8380_v38 = vld [vmem:[#allocation126_spill] sm:$0xff] }
 0x4a2   :  { %8371 = vst [vmem:[#allocation119_spill] sm:$0xff] %v6391_v10  ;;  %8373 = vst [vmem:[#allocation42_spill] sm:$0xff] %v6395_v11  ;;  %v6407_v28 = vmul.f32 %v6062_v2, %v8378_v23  ;;  %v6411_v63 = vmul.f32 %v6066_v3, %v8380_v38  ;;  %v8382_v10 = vld [vmem:[#allocation56_spill] sm:$0xff]  ;;  %v8384_v11 = vld [vmem:[#allocation57_spill] sm:$0xff] }
 0x4a3   :  { %8375 = vst [vmem:[#allocation44_spill] sm:$0xff] %v6399_v52  ;;  %8377 = vst [vmem:[#allocation92_spill] sm:$0xff] %v6403_v15  ;;  %v6415_v43 = vmul.f32 %v6043_v55, %v8382_v10  ;;  %v6419_v56 = vmul.f32 %v6046_v34, %v8384_v11  ;;  %v8386_v52 = vld [vmem:[#allocation98_spill] sm:$0xff]  ;;  %v8388_v15 = vld [vmem:[#allocation99_spill] sm:$0xff] }
 0x4a4   :  { %8379 = vst [vmem:[#allocation93_spill] sm:$0xff] %v6407_v28  ;;  %8381 = vst [vmem:[#allocation54_spill] sm:$0xff] %v6411_v63  ;;  %v6423_v0 = vmul.f32 %v6049_v18, %v8386_v52  ;;  %v6427_v23 = vmul.f32 %v6052_v36, %v8388_v15  ;;  %v8390_v28 = vld [vmem:[#allocation67_spill] sm:$0xff]  ;;  %v8392_v63 = vld [vmem:[#allocation69_spill] sm:$0xff] }
 0x4a5   :  { %8383 = vst [vmem:[#allocation55_spill] sm:$0xff] %v6415_v43  ;;  %8385 = vst [vmem:[#allocation120_spill] sm:$0xff] %v6419_v56  ;;  %v6431_v38 = vmul.f32 %v6055_v46, %v8390_v28  ;;  %v6435_v10 = vmul.f32 %v6058_v41, %v8392_v63  ;;  %v8394_v43 = vld [vmem:[#allocation127_spill] sm:$0xff]  ;;  %v8396_v56 = vld [vmem:[#allocation128_spill] sm:$0xff] }
 0x4a6   :  { %8387 = vst [vmem:[#allocation121_spill] sm:$0xff] %v6423_v0  ;;  %8389 = vst [vmem:[#allocation48_spill] sm:$0xff] %v6427_v23  ;;  %v6439_v11 = vmul.f32 %v6062_v2, %v8394_v43  ;;  %v6443_v52 = vmul.f32 %v6066_v3, %v8396_v56  ;;  %v8398_v0 = vld [vmem:[#allocation58_spill] sm:$0xff]  ;;  %v8400_v23 = vld [vmem:[#allocation60_spill] sm:$0xff] }
 0x4a7   :  { %8391 = vst [vmem:[#allocation49_spill] sm:$0xff] %v6431_v38  ;;  %8393 = vst [vmem:[#allocation94_spill] sm:$0xff] %v6435_v10  ;;  %v6447_v15 = vmul.f32 %v6043_v55, %v8398_v0  ;;  %v6451_v28 = vmul.f32 %v6046_v34, %v8400_v23  ;;  %v8402_v38 = vld [vmem:[#allocation100_spill] sm:$0xff]  ;;  %v8404_v10 = vld [vmem:[#allocation101_spill] sm:$0xff] }
 0x4a8   :  { %8395 = vst [vmem:[#allocation95_spill] sm:$0xff] %v6439_v11  ;;  %8397 = vst [vmem:[#allocation59_spill] sm:$0xff] %v6443_v52  ;;  %v6455_v63 = vmul.f32 %v6049_v18, %v8402_v38  ;;  %v6459_v43 = vmul.f32 %v6052_v36, %v8404_v10  ;;  %v8406_v11 = vld [vmem:[#allocation70_spill] sm:$0xff]  ;;  %v8408_v52 = vld [vmem:[#allocation71_spill] sm:$0xff] }
 0x4a9   :  { %8399 = vst [vmem:[#allocation61_spill] sm:$0xff] %v6447_v15  ;;  %8401 = vst [vmem:[#allocation123_spill] sm:$0xff] %v6451_v28  ;;  %v6463_v56 = vmul.f32 %v6055_v46, %v8406_v11  ;;  %v6467_v0 = vmul.f32 %v6058_v41, %v8408_v52  ;;  %v8410_v15 = vld [vmem:[#allocation129_spill] sm:$0xff]  ;;  %v8412_v28 = vld [vmem:[#allocation130_spill] sm:$0xff] }
 0x4aa   :  { %8403 = vst [vmem:[#allocation124_spill] sm:$0xff] %v6455_v63  ;;  %8405 = vst [vmem:[#allocation50_spill] sm:$0xff] %v6459_v43  ;;  %v6471_v23 = vmul.f32 %v6062_v2, %v8410_v15  ;;  %v6475_v38 = vmul.f32 %v6066_v3, %v8412_v28  ;;  %v8414_v63 = vld [vmem:[#allocation64_spill] sm:$0xff]  ;;  %v8416_v43 = vld [vmem:[#allocation65_spill] sm:$0xff] }
 0x4ab   :  { %8407 = vst [vmem:[#allocation52_spill] sm:$0xff] %v6463_v56  ;;  %8409 = vst [vmem:[#allocation96_spill] sm:$0xff] %v6467_v0  ;;  %v6479_v10 = vmul.f32 %v6043_v55, %v8414_v63  ;;  %v6483_v11 = vmul.f32 %v6046_v34, %v8416_v43  ;;  %v8418_v56 = vld [vmem:[#allocation102_spill] sm:$0xff]  ;;  %v8420_v0 = vld [vmem:[#allocation103_spill] sm:$0xff] }
 0x4ac   :  { %8411 = vst [vmem:[#allocation97_spill] sm:$0xff] %v6471_v23  ;;  %8413 = vst [vmem:[#allocation62_spill] sm:$0xff] %v6475_v38  ;;  %v6487_v52 = vmul.f32 %v6049_v18, %v8418_v56  ;;  %v6491_v15 = vmul.f32 %v6052_v36, %v8420_v0  ;;  %v8422_v23 = vld [vmem:[#allocation75_spill] sm:$0xff]  ;;  %v8424_v38 = vld [vmem:[#allocation77_spill] sm:$0xff] }
 0x4ad   :  { %8415 = vst [vmem:[#allocation63_spill] sm:$0xff] %v6479_v10  ;;  %8417 = vst [vmem:[#allocation125_spill] sm:$0xff] %v6483_v11  ;;  %v6495_v28 = vmul.f32 %v6055_v46, %v8422_v23  ;;  %v6499_v63 = vmul.f32 %v6058_v41, %v8424_v38  ;;  %v8426_v10 = vld [vmem:[#allocation131_spill] sm:$0xff]  ;;  %v8428_v11 = vld [vmem:[#allocation132_spill] sm:$0xff] }
 0x4ae   :  { %8419 = vst [vmem:[#allocation126_spill] sm:$0xff] %v6487_v52  ;;  %8421 = vst [vmem:[#allocation56_spill] sm:$0xff] %v6491_v15  ;;  %v6503_v43 = vmul.f32 %v6062_v2, %v8426_v10  ;;  %v6507_v56 = vmul.f32 %v6066_v3, %v8428_v11  ;;  %v8430_v52 = vld [vmem:[#allocation66_spill] sm:$0xff]  ;;  %v8432_v15 = vld [vmem:[#allocation68_spill] sm:$0xff] }
 0x4af   :  { %8423 = vst [vmem:[#allocation57_spill] sm:$0xff] %v6495_v28  ;;  %8425 = vst [vmem:[#allocation98_spill] sm:$0xff] %v6499_v63  ;;  %v6511_v0 = vmul.f32 %v6043_v55, %v8430_v52  ;;  %v6515_v23 = vmul.f32 %v6046_v34, %v8432_v15  ;;  %v8434_v28 = vld [vmem:[#allocation104_spill] sm:$0xff]  ;;  %v8436_v63 = vld [vmem:[#allocation105_spill] sm:$0xff] }
 0x4b0   :  { %8427 = vst [vmem:[#allocation99_spill] sm:$0xff] %v6503_v43  ;;  %8429 = vst [vmem:[#allocation67_spill] sm:$0xff] %v6507_v56  ;;  %v6519_v38 = vmul.f32 %v6049_v18, %v8434_v28  ;;  %v6523_v10 = vmul.f32 %v6052_v36, %v8436_v63  ;;  %v8438_v43 = vld [vmem:[#allocation78_spill] sm:$0xff]  ;;  %v8440_v56 = vld [vmem:[#allocation79_spill] sm:$0xff] }
 0x4b1   :  { %8431 = vst [vmem:[#allocation69_spill] sm:$0xff] %v6511_v0  ;;  %8433 = vst [vmem:[#allocation127_spill] sm:$0xff] %v6515_v23  ;;  %v6527_v11 = vmul.f32 %v6055_v46, %v8438_v43  ;;  %v6531_v52 = vmul.f32 %v6058_v41, %v8440_v56  ;;  %v8442_v0 = vld [vmem:[#allocation133_spill] sm:$0xff]  ;;  %v8444_v23 = vld [vmem:[#allocation134_spill] sm:$0xff] }
 0x4b2   :  { %8435 = vst [vmem:[#allocation128_spill] sm:$0xff] %v6519_v38  ;;  %8437 = vst [vmem:[#allocation58_spill] sm:$0xff] %v6523_v10  ;;  %v6535_v15 = vmul.f32 %v6062_v2, %v8442_v0  ;;  %v6539_v28 = vmul.f32 %v6066_v3, %v8444_v23  ;;  %v8446_v38 = vld [vmem:[#allocation72_spill] sm:$0xff]  ;;  %v8448_v10 = vld [vmem:[#allocation73_spill] sm:$0xff] }
 0x4b3   :  { %8439 = vst [vmem:[#allocation60_spill] sm:$0xff] %v6527_v11  ;;  %8441 = vst [vmem:[#allocation100_spill] sm:$0xff] %v6531_v52  ;;  %v6543_v63 = vmul.f32 %v6043_v55, %v8446_v38  ;;  %v6547_v43 = vmul.f32 %v6046_v34, %v8448_v10  ;;  %v8450_v11 = vld [vmem:[#allocation106_spill] sm:$0xff]  ;;  %v8452_v52 = vld [vmem:[#allocation107_spill] sm:$0xff] }
 0x4b4   :  { %8443 = vst [vmem:[#allocation101_spill] sm:$0xff] %v6535_v15  ;;  %8445 = vst [vmem:[#allocation70_spill] sm:$0xff] %v6539_v28  ;;  %v6551_v56 = vmul.f32 %v6049_v18, %v8450_v11  ;;  %v6555_v0 = vmul.f32 %v6052_v36, %v8452_v52  ;;  %v8454_v15 = vld [vmem:[#allocation80_spill] sm:$0xff]  ;;  %v8456_v28 = vld [vmem:[#allocation81_spill] sm:$0xff] }
 0x4b5   :  { %8447 = vst [vmem:[#allocation71_spill] sm:$0xff] %v6543_v63  ;;  %8449 = vst [vmem:[#allocation129_spill] sm:$0xff] %v6547_v43  ;;  %v6559_v23 = vmul.f32 %v6055_v46, %v8454_v15  ;;  %v6563_v38 = vmul.f32 %v6058_v41, %v8456_v28  ;;  %v8458_v63 = vld [vmem:[#allocation135_spill] sm:$0xff]  ;;  %v8460_v43 = vld [vmem:[#allocation136_spill] sm:$0xff] }
 0x4b6   :  { %8451 = vst [vmem:[#allocation130_spill] sm:$0xff] %v6551_v56  ;;  %8453 = vst [vmem:[#allocation64_spill] sm:$0xff] %v6555_v0  ;;  %v6567_v10 = vmul.f32 %v6062_v2, %v8458_v63  ;;  %v6571_v11 = vmul.f32 %v6066_v3, %v8460_v43  ;;  %v8462_v56 = vld [vmem:[#allocation74_spill] sm:$0xff]  ;;  %v8463_v0 = vld [vmem:[#allocation76_spill] sm:$0xff] }
 0x4b7   :  { %8455 = vst [vmem:[#allocation65_spill] sm:$0xff] %v6559_v23  ;;  %8457 = vst [vmem:[#allocation102_spill] sm:$0xff] %v6563_v38  ;;  %v6575_v52 = vmul.f32 %v6043_v55, %v8462_v56  ;;  %v6579_v15 = vmul.f32 %v6046_v34, %v8463_v0  ;;  %v8464_v23 = vld [vmem:[#allocation108_spill] sm:$0xff]  ;;  %v8465_v38 = vld [vmem:[#allocation109_spill] sm:$0xff] }
 0x4b8   :  { %8459 = vst [vmem:[#allocation103_spill] sm:$0xff] %v6567_v10  ;;  %8461 = vst [vmem:[#allocation75_spill] sm:$0xff] %v6571_v11  ;;  %v6583_v28 = vmul.f32 %v6049_v18, %v8464_v23  ;;  %v6587_v63 = vmul.f32 %v6052_v36, %v8465_v38  ;;  %v8466_v10 = vld [vmem:[#allocation82_spill] sm:$0xff]  ;;  %v8467_v11 = vld [vmem:[#allocation83_spill] sm:$0xff]  ;;  %v6607_v36 = vrot.slane %v6215_v57, %v6029_v21  ;;  %v8470_v38 = vsub.s32 6, %v4852_v54 }
 0x4b9   :  { %v6591_v43 = vmul.f32 %v6055_v46, %v8466_v10  ;;  %v6595_v55 = vmul.f32 %v6058_v41, %v8467_v11  ;;  %v8468_v56 = vld [vmem:[#allocation137_spill] sm:$0xff]  ;;  %v8469_v0 = vld [vmem:[#allocation138_spill] sm:$0xff]  ;;  %v6611_v46 = vrot.slane %v6215_v57, %v6032_v22  ;;  %v6615_v41 = vrot.slane %v6215_v57, %v6035_v35  ;;  %v8486_v35 = vld [vmem:[#allocation111_spill] sm:$0xff] }
 0x4ba   :  { %v6599_v34 = vmul.f32 %v6062_v2, %v8468_v56  ;;  %v6603_v18 = vmul.f32 %v6066_v3, %v8469_v0  ;;  %v6619_v2 = vrot.slane %v6215_v57, %v4868_v60  ;;  %v6623_v3 = vrot.slane %v6215_v57, %v4862_v58  ;;  %v8484_v60 = vld [vmem:[#allocation110_spill] sm:$0xff]  ;;  %v8490_v21 = vld [vmem:[#allocation31_spill] sm:$0xff] }
 0x4bb   :  { %v6627_v23 = vrot.slane %v6215_v57, %v4865_v59  ;;  %v6632_v10 = vrot.slane %v6215_v57, %v8470_v38  ;;  %v8471_v11 = vsub.s32 7, %v4852_v54  ;;  %v6641_v0 = vadd.f32 %v6607_v36, %v6084_v17  ;;  %v8488_v22 = vld [vmem:[#allocation30_spill] sm:$0xff] }
 0x4bc   :  { %v6645_v58 = vadd.f32 %v6611_v46, %v6088_v27  ;;  %v6649_v59 = vadd.f32 %v6615_v41, %v6092_v45  ;;  %v6653_v38 = vadd.f32 %v6619_v2, %v6096_v44  ;;  %v6657_v54 = vadd.f32 %v6623_v3, %v6102_v53 }
 0x4bd   :  { %v6637_v56 = vrot.slane %v6215_v57, %v8471_v11  ;;  %v6661_v17 = vadd.f32 %v6627_v23, %v6106_v25  ;;  %v6665_v27 = vadd.f32 %v6632_v10, %v6112_v1  ;;  %v6673_v44 = vadd.f32 %v6607_v36, %v6120_v26  ;;  %v8482_v11 = vld [vmem:[#allocation37_spill] sm:$0xff] }
 0x4be   :  { %v6677_v53 = vadd.f32 %v6611_v46, %v6124_v30  ;;  %v6681_v25 = vadd.f32 %v6615_v41, %v6128_v32  ;;  %v6685_v1 = vadd.f32 %v6619_v2, %v6132_v39  ;;  %v6693_v26 = vadd.f32 %v6627_v23, %v6140_v12 }
 0x4bf   :  { %v6669_v45 = vadd.f32 %v6637_v56, %v6116_v9  ;;  %v6689_v9 = vadd.f32 %v6623_v3, %v6136_v33  ;;  %v6697_v30 = vadd.f32 %v6632_v10, %v6145_v50  ;;  %v6701_v32 = vadd.f32 %v6637_v56, %v6149_v8 }
 0x4c0   :  { %v6705_v39 = vadd.f32 %v6607_v36, %v6153_v47  ;;  %v6709_v33 = vadd.f32 %v6611_v46, %v6158_v40  ;;  %v6713_v12 = vadd.f32 %v6615_v41, %v6162_v14  ;;  %v6717_v50 = vadd.f32 %v6619_v2, %v6166_v61 }
 0x4c1   :  { %v6721_v8 = vadd.f32 %v6623_v3, %v6170_v24  ;;  %v6725_v47 = vadd.f32 %v6627_v23, %v6174_v6  ;;  %v6729_v40 = vadd.f32 %v6632_v10, %v6178_v19  ;;  %v6733_v14 = vadd.f32 %v6637_v56, %v6182_v13 }
 0x4c2   :  { %v6737_v61 = vadd.f32 %v6607_v36, %v6186_v62  ;;  %v6741_v24 = vadd.f32 %v6611_v46, %v6190_v7  ;;  %v6745_v6 = vadd.f32 %v6615_v41, %v6194_v31  ;;  %v6749_v19 = vadd.f32 %v6619_v2, %v6198_v49 }
 0x4c3   :  { %8472 = vst [vmem:[#allocation77_spill] sm:$0xff] %v6729_v40  ;;  %8473 = vst [vmem:[#allocation131_spill] sm:$0xff] %v6733_v14  ;;  %v6753_v13 = vadd.f32 %v6623_v3, %v6202_v29  ;;  %v6757_v62 = vadd.f32 %v6627_v23, %v6206_v4  ;;  %v6761_v7 = vadd.f32 %v6632_v10, %v6210_v37 }
 0x4c4   :  { %v6765_v31 = vadd.f32 %v6637_v56, %v6219_v51  ;;  %v6769_v49 = vadd.f32 %v6607_v36, %v6223_v42  ;;  %v6773_v29 = vadd.f32 %v6611_v46, %v6227_v48  ;;  %v6777_v4 = vadd.f32 %v6615_v41, %v6231_v20  ;;  %v8480_v51 = vld [vmem:[#allocation35_spill] sm:$0xff] }
 0x4c5   :  { %v6781_v37 = vadd.f32 %v6619_v2, %v6235_v16  ;;  %v6785_v57 = vadd.f32 %v6623_v3, %v6239_v5  ;;  %v6789_v42 = vadd.f32 %v6627_v23, %v8480_v51  ;;  %v6793_v48 = vadd.f32 %v6632_v10, %v8482_v11 }
 0x4c6   :  { %8474 = vst [vmem:[#allocation132_spill] sm:$0xff] %v6765_v31  ;;  %8475 = vst [vmem:[#allocation66_spill] sm:$0xff] %v6769_v49  ;;  %v6797_v20 = vadd.f32 %v6637_v56, %v8484_v60  ;;  %v6801_v16 = vadd.f32 %v6607_v36, %v8486_v35  ;;  %v6805_v5 = vadd.f32 %v6611_v46, %v8488_v22 }
 0x4c7   :  { %8476 = vst [vmem:[#allocation68_spill] sm:$0xff] %v6773_v29  ;;  %8477 = vst [vmem:[#allocation104_spill] sm:$0xff] %v6777_v4  ;;  %v6809_v51 = vadd.f32 %v6615_v41, %v8490_v21 }
 0x4c8   :  { %8478 = vst [vmem:[#allocation105_spill] sm:$0xff] %v6781_v37  ;;  %8479 = vst [vmem:[#allocation78_spill] sm:$0xff] %v6785_v57 }
 0x4c9   :  { %8481 = vst [vmem:[#allocation79_spill] sm:$0xff] %v6789_v42  ;;  %8483 = vst [vmem:[#allocation133_spill] sm:$0xff] %v6793_v48  ;;  %v8492_v42 = vld [vmem:[#allocation84_spill] sm:$0xff]  ;;  %v8494_v48 = vld [vmem:[#allocation85_spill] sm:$0xff] }
 0x4ca   :  { %8485 = vst [vmem:[#allocation134_spill] sm:$0xff] %v6797_v20  ;;  %8487 = vst [vmem:[#allocation72_spill] sm:$0xff] %v6801_v16  ;;  %v6813_v11 = vadd.f32 %v6619_v2, %v8492_v42  ;;  %v6817_v60 = vadd.f32 %v6623_v3, %v8494_v48  ;;  %v8496_v20 = vld [vmem:[#allocation38_spill] sm:$0xff]  ;;  %v8498_v16 = vld [vmem:[#allocation39_spill] sm:$0xff] }
 0x4cb   :  { %8489 = vst [vmem:[#allocation73_spill] sm:$0xff] %v6805_v5  ;;  %8491 = vst [vmem:[#allocation106_spill] sm:$0xff] %v6809_v51  ;;  %v6821_v35 = vadd.f32 %v6627_v23, %v8496_v20  ;;  %v6825_v22 = vadd.f32 %v6632_v10, %v8498_v16  ;;  %v8500_v5 = vld [vmem:[#allocation112_spill] sm:$0xff]  ;;  %v8502_v51 = vld [vmem:[#allocation19_spill] sm:$0xff] }
 0x4cc   :  { %8493 = vst [vmem:[#allocation107_spill] sm:$0xff] %v6813_v11  ;;  %8495 = vst [vmem:[#allocation80_spill] sm:$0xff] %v6817_v60  ;;  %v6829_v21 = vadd.f32 %v6637_v56, %v8500_v5  ;;  %v6833_v42 = vadd.f32 %v6607_v36, %v8502_v51  ;;  %v8504_v11 = vld [vmem:[#allocation18_spill] sm:$0xff]  ;;  %v8506_v60 = vld [vmem:[#allocation113_spill] sm:$0xff] }
 0x4cd   :  { %8497 = vst [vmem:[#allocation81_spill] sm:$0xff] %v6821_v35  ;;  %8499 = vst [vmem:[#allocation135_spill] sm:$0xff] %v6825_v22  ;;  %v6837_v48 = vadd.f32 %v6611_v46, %v8504_v11  ;;  %v6841_v20 = vadd.f32 %v6615_v41, %v8506_v60  ;;  %v8508_v35 = vld [vmem:[#allocation32_spill] sm:$0xff]  ;;  %v8510_v22 = vld [vmem:[#allocation33_spill] sm:$0xff] }
 0x4ce   :  { %8501 = vst [vmem:[#allocation136_spill] sm:$0xff] %v6829_v21  ;;  %8503 = vst [vmem:[#allocation74_spill] sm:$0xff] %v6833_v42  ;;  %v6845_v16 = vadd.f32 %v6619_v2, %v8508_v35  ;;  %v6849_v5 = vadd.f32 %v6623_v3, %v8510_v22  ;;  %v8512_v21 = vld [vmem:[#allocation86_spill] sm:$0xff]  ;;  %v8514_v42 = vld [vmem:[#allocation87_spill] sm:$0xff] }
 0x4cf   :  { %8505 = vst [vmem:[#allocation76_spill] sm:$0xff] %v6837_v48  ;;  %8507 = vst [vmem:[#allocation108_spill] sm:$0xff] %v6841_v20  ;;  %v6853_v51 = vadd.f32 %v6627_v23, %v8512_v21  ;;  %v6857_v11 = vadd.f32 %v6632_v10, %v8514_v42  ;;  %v8516_v48 = vld [vmem:[#allocation43_spill] sm:$0xff]  ;;  %v8518_v20 = vld [vmem:[#allocation45_spill] sm:$0xff] }
 0x4d0   :  { %8509 = vst [vmem:[#allocation109_spill] sm:$0xff] %v6845_v16  ;;  %8511 = vst [vmem:[#allocation82_spill] sm:$0xff] %v6849_v5  ;;  %v6861_v60 = vadd.f32 %v6637_v56, %v8516_v48  ;;  %v6865_v35 = vadd.f32 %v6607_v36, %v8518_v20  ;;  %v8520_v16 = vld [vmem:[#allocation114_spill] sm:$0xff]  ;;  %v8522_v5 = vld [vmem:[#allocation115_spill] sm:$0xff] }
 0x4d1   :  { %8513 = vst [vmem:[#allocation83_spill] sm:$0xff] %v6853_v51  ;;  %8515 = vst [vmem:[#allocation137_spill] sm:$0xff] %v6857_v11  ;;  %v6869_v22 = vadd.f32 %v6611_v46, %v8520_v16  ;;  %v6873_v21 = vadd.f32 %v6615_v41, %v8522_v5  ;;  %v8524_v51 = vld [vmem:[#allocation34_spill] sm:$0xff]  ;;  %v8526_v11 = vld [vmem:[#allocation36_spill] sm:$0xff] }
 0x4d2   :  { %8517 = vst [vmem:[#allocation138_spill] sm:$0xff] %v6861_v60  ;;  %8519 = vst [vmem:[#allocation35_spill] sm:$0xff] %v6865_v35  ;;  %v6877_v42 = vadd.f32 %v6619_v2, %v8524_v51  ;;  %v6881_v48 = vadd.f32 %v6623_v3, %v8526_v11  ;;  %v8528_v60 = vld [vmem:[#allocation88_spill] sm:$0xff]  ;;  %v8530_v35 = vld [vmem:[#allocation89_spill] sm:$0xff] }
 0x4d3   :  { %8521 = vst [vmem:[#allocation37_spill] sm:$0xff] %v6869_v22  ;;  %8523 = vst [vmem:[#allocation110_spill] sm:$0xff] %v6873_v21  ;;  %v6885_v20 = vadd.f32 %v6627_v23, %v8528_v60  ;;  %v6889_v16 = vadd.f32 %v6632_v10, %v8530_v35  ;;  %v8532_v22 = vld [vmem:[#allocation46_spill] sm:$0xff]  ;;  %v8534_v21 = vld [vmem:[#allocation47_spill] sm:$0xff] }
 0x4d4   :  { %8525 = vst [vmem:[#allocation111_spill] sm:$0xff] %v6877_v42  ;;  %8527 = vst [vmem:[#allocation30_spill] sm:$0xff] %v6881_v48  ;;  %v6893_v5 = vadd.f32 %v6637_v56, %v8532_v22  ;;  %v6897_v51 = vadd.f32 %v6607_v36, %v8534_v21  ;;  %v8536_v42 = vld [vmem:[#allocation116_spill] sm:$0xff]  ;;  %v8538_v48 = vld [vmem:[#allocation117_spill] sm:$0xff] }
 0x4d5   :  { %8529 = vst [vmem:[#allocation31_spill] sm:$0xff] %v6885_v20  ;;  %8531 = vst [vmem:[#allocation84_spill] sm:$0xff] %v6889_v16  ;;  %v6901_v11 = vadd.f32 %v6611_v46, %v8536_v42  ;;  %v6905_v60 = vadd.f32 %v6615_v41, %v8538_v48  ;;  %v8540_v20 = vld [vmem:[#allocation40_spill] sm:$0xff]  ;;  %v8542_v16 = vld [vmem:[#allocation41_spill] sm:$0xff] }
 0x4d6   :  { %8533 = vst [vmem:[#allocation85_spill] sm:$0xff] %v6893_v5  ;;  %8535 = vst [vmem:[#allocation38_spill] sm:$0xff] %v6897_v51  ;;  %v6909_v35 = vadd.f32 %v6619_v2, %v8540_v20  ;;  %v6913_v22 = vadd.f32 %v6623_v3, %v8542_v16  ;;  %v8544_v5 = vld [vmem:[#allocation90_spill] sm:$0xff]  ;;  %v8546_v51 = vld [vmem:[#allocation91_spill] sm:$0xff] }
 0x4d7   :  { %8537 = vst [vmem:[#allocation39_spill] sm:$0xff] %v6901_v11  ;;  %8539 = vst [vmem:[#allocation112_spill] sm:$0xff] %v6905_v60  ;;  %v6917_v21 = vadd.f32 %v6627_v23, %v8544_v5  ;;  %v6921_v42 = vadd.f32 %v6632_v10, %v8546_v51  ;;  %v8548_v11 = vld [vmem:[#allocation51_spill] sm:$0xff]  ;;  %v8550_v60 = vld [vmem:[#allocation53_spill] sm:$0xff] }
 0x4d8   :  { %8541 = vst [vmem:[#allocation19_spill] sm:$0xff] %v6909_v35  ;;  %8543 = vst [vmem:[#allocation18_spill] sm:$0xff] %v6913_v22  ;;  %v6925_v48 = vadd.f32 %v6637_v56, %v8548_v11  ;;  %v6929_v20 = vadd.f32 %v6607_v36, %v8550_v60  ;;  %v8552_v35 = vld [vmem:[#allocation118_spill] sm:$0xff]  ;;  %v8554_v22 = vld [vmem:[#allocation119_spill] sm:$0xff] }
 0x4d9   :  { %8545 = vst [vmem:[#allocation113_spill] sm:$0xff] %v6917_v21  ;;  %8547 = vst [vmem:[#allocation32_spill] sm:$0xff] %v6921_v42  ;;  %v6933_v16 = vadd.f32 %v6611_v46, %v8552_v35  ;;  %v6937_v5 = vadd.f32 %v6615_v41, %v8554_v22  ;;  %v8556_v21 = vld [vmem:[#allocation42_spill] sm:$0xff]  ;;  %v8558_v42 = vld [vmem:[#allocation44_spill] sm:$0xff] }
 0x4da   :  { %8549 = vst [vmem:[#allocation33_spill] sm:$0xff] %v6925_v48  ;;  %8551 = vst [vmem:[#allocation86_spill] sm:$0xff] %v6929_v20  ;;  %v6941_v51 = vadd.f32 %v6619_v2, %v8556_v21  ;;  %v6945_v11 = vadd.f32 %v6623_v3, %v8558_v42  ;;  %v8560_v48 = vld [vmem:[#allocation92_spill] sm:$0xff]  ;;  %v8562_v20 = vld [vmem:[#allocation93_spill] sm:$0xff] }
 0x4db   :  { %8553 = vst [vmem:[#allocation87_spill] sm:$0xff] %v6933_v16  ;;  %8555 = vst [vmem:[#allocation43_spill] sm:$0xff] %v6937_v5  ;;  %v6949_v60 = vadd.f32 %v6627_v23, %v8560_v48  ;;  %v6953_v35 = vadd.f32 %v6632_v10, %v8562_v20  ;;  %v8564_v16 = vld [vmem:[#allocation54_spill] sm:$0xff]  ;;  %v8566_v5 = vld [vmem:[#allocation55_spill] sm:$0xff] }
 0x4dc   :  { %8557 = vst [vmem:[#allocation45_spill] sm:$0xff] %v6941_v51  ;;  %8559 = vst [vmem:[#allocation114_spill] sm:$0xff] %v6945_v11  ;;  %v6957_v22 = vadd.f32 %v6637_v56, %v8564_v16  ;;  %v6961_v21 = vadd.f32 %v6607_v36, %v8566_v5  ;;  %v8568_v51 = vld [vmem:[#allocation120_spill] sm:$0xff]  ;;  %v8570_v11 = vld [vmem:[#allocation121_spill] sm:$0xff] }
 0x4dd   :  { %8561 = vst [vmem:[#allocation115_spill] sm:$0xff] %v6949_v60  ;;  %8563 = vst [vmem:[#allocation34_spill] sm:$0xff] %v6953_v35  ;;  %v6965_v42 = vadd.f32 %v6611_v46, %v8568_v51  ;;  %v6969_v48 = vadd.f32 %v6615_v41, %v8570_v11  ;;  %v8572_v60 = vld [vmem:[#allocation48_spill] sm:$0xff]  ;;  %v8574_v35 = vld [vmem:[#allocation49_spill] sm:$0xff] }
 0x4de   :  { %8565 = vst [vmem:[#allocation36_spill] sm:$0xff] %v6957_v22  ;;  %8567 = vst [vmem:[#allocation88_spill] sm:$0xff] %v6961_v21  ;;  %v6973_v20 = vadd.f32 %v6619_v2, %v8572_v60  ;;  %v6977_v16 = vadd.f32 %v6623_v3, %v8574_v35  ;;  %v8576_v22 = vld [vmem:[#allocation94_spill] sm:$0xff]  ;;  %v8578_v21 = vld [vmem:[#allocation95_spill] sm:$0xff] }
 0x4df   :  { %8569 = vst [vmem:[#allocation89_spill] sm:$0xff] %v6965_v42  ;;  %8571 = vst [vmem:[#allocation46_spill] sm:$0xff] %v6969_v48  ;;  %v6981_v5 = vadd.f32 %v6627_v23, %v8576_v22  ;;  %v6985_v51 = vadd.f32 %v6632_v10, %v8578_v21  ;;  %v8580_v42 = vld [vmem:[#allocation59_spill] sm:$0xff]  ;;  %v8582_v48 = vld [vmem:[#allocation61_spill] sm:$0xff] }
 0x4e0   :  { %8573 = vst [vmem:[#allocation47_spill] sm:$0xff] %v6973_v20  ;;  %8575 = vst [vmem:[#allocation116_spill] sm:$0xff] %v6977_v16  ;;  %v6989_v11 = vadd.f32 %v6637_v56, %v8580_v42  ;;  %v6993_v60 = vadd.f32 %v6607_v36, %v8582_v48  ;;  %v8584_v20 = vld [vmem:[#allocation123_spill] sm:$0xff]  ;;  %v8586_v16 = vld [vmem:[#allocation124_spill] sm:$0xff] }
 0x4e1   :  { %8577 = vst [vmem:[#allocation117_spill] sm:$0xff] %v6981_v5  ;;  %8579 = vst [vmem:[#allocation40_spill] sm:$0xff] %v6985_v51  ;;  %v6997_v35 = vadd.f32 %v6611_v46, %v8584_v20  ;;  %v7001_v22 = vadd.f32 %v6615_v41, %v8586_v16  ;;  %v8588_v5 = vld [vmem:[#allocation50_spill] sm:$0xff]  ;;  %v8590_v51 = vld [vmem:[#allocation52_spill] sm:$0xff] }
 0x4e2   :  { %8581 = vst [vmem:[#allocation41_spill] sm:$0xff] %v6989_v11  ;;  %8583 = vst [vmem:[#allocation90_spill] sm:$0xff] %v6993_v60  ;;  %v7005_v21 = vadd.f32 %v6619_v2, %v8588_v5  ;;  %v7009_v42 = vadd.f32 %v6623_v3, %v8590_v51  ;;  %v8592_v11 = vld [vmem:[#allocation96_spill] sm:$0xff]  ;;  %v8594_v60 = vld [vmem:[#allocation97_spill] sm:$0xff] }
 0x4e3   :  { %8585 = vst [vmem:[#allocation91_spill] sm:$0xff] %v6997_v35  ;;  %8587 = vst [vmem:[#allocation51_spill] sm:$0xff] %v7001_v22  ;;  %v7013_v48 = vadd.f32 %v6627_v23, %v8592_v11  ;;  %v7017_v20 = vadd.f32 %v6632_v10, %v8594_v60  ;;  %v8596_v35 = vld [vmem:[#allocation62_spill] sm:$0xff]  ;;  %v8598_v22 = vld [vmem:[#allocation63_spill] sm:$0xff] }
 0x4e4   :  { %8589 = vst [vmem:[#allocation53_spill] sm:$0xff] %v7005_v21  ;;  %8591 = vst [vmem:[#allocation118_spill] sm:$0xff] %v7009_v42  ;;  %v7021_v16 = vadd.f32 %v6637_v56, %v8596_v35  ;;  %v7025_v5 = vadd.f32 %v6607_v36, %v8598_v22  ;;  %v8600_v21 = vld [vmem:[#allocation125_spill] sm:$0xff]  ;;  %v8602_v42 = vld [vmem:[#allocation126_spill] sm:$0xff] }
 0x4e5   :  { %8593 = vst [vmem:[#allocation119_spill] sm:$0xff] %v7013_v48  ;;  %8595 = vst [vmem:[#allocation42_spill] sm:$0xff] %v7017_v20  ;;  %v7029_v51 = vadd.f32 %v6611_v46, %v8600_v21  ;;  %v7033_v11 = vadd.f32 %v6615_v41, %v8602_v42  ;;  %v8604_v48 = vld [vmem:[#allocation56_spill] sm:$0xff]  ;;  %v8606_v20 = vld [vmem:[#allocation57_spill] sm:$0xff] }
 0x4e6   :  { %8597 = vst [vmem:[#allocation44_spill] sm:$0xff] %v7021_v16  ;;  %8599 = vst [vmem:[#allocation92_spill] sm:$0xff] %v7025_v5  ;;  %v7037_v60 = vadd.f32 %v6619_v2, %v8604_v48  ;;  %v7041_v35 = vadd.f32 %v6623_v3, %v8606_v20  ;;  %v8608_v16 = vld [vmem:[#allocation98_spill] sm:$0xff]  ;;  %v8610_v5 = vld [vmem:[#allocation99_spill] sm:$0xff] }
 0x4e7   :  { %8601 = vst [vmem:[#allocation93_spill] sm:$0xff] %v7029_v51  ;;  %8603 = vst [vmem:[#allocation54_spill] sm:$0xff] %v7033_v11  ;;  %v7045_v22 = vadd.f32 %v6627_v23, %v8608_v16  ;;  %v7049_v21 = vadd.f32 %v6632_v10, %v8610_v5  ;;  %v8612_v51 = vld [vmem:[#allocation67_spill] sm:$0xff]  ;;  %v8614_v11 = vld [vmem:[#allocation69_spill] sm:$0xff] }
 0x4e8   :  { %8605 = vst [vmem:[#allocation55_spill] sm:$0xff] %v7037_v60  ;;  %8607 = vst [vmem:[#allocation120_spill] sm:$0xff] %v7041_v35  ;;  %v7053_v42 = vadd.f32 %v6637_v56, %v8612_v51  ;;  %v7057_v48 = vadd.f32 %v6607_v36, %v8614_v11  ;;  %v8616_v60 = vld [vmem:[#allocation127_spill] sm:$0xff]  ;;  %v8618_v35 = vld [vmem:[#allocation128_spill] sm:$0xff] }
 0x4e9   :  { %8609 = vst [vmem:[#allocation121_spill] sm:$0xff] %v7045_v22  ;;  %8611 = vst [vmem:[#allocation48_spill] sm:$0xff] %v7049_v21  ;;  %v7061_v20 = vadd.f32 %v6611_v46, %v8616_v60  ;;  %v7065_v16 = vadd.f32 %v6615_v41, %v8618_v35  ;;  %v8620_v22 = vld [vmem:[#allocation58_spill] sm:$0xff]  ;;  %v8622_v21 = vld [vmem:[#allocation60_spill] sm:$0xff] }
 0x4ea   :  { %8613 = vst [vmem:[#allocation49_spill] sm:$0xff] %v7053_v42  ;;  %8615 = vst [vmem:[#allocation94_spill] sm:$0xff] %v7057_v48  ;;  %v7069_v5 = vadd.f32 %v6619_v2, %v8620_v22  ;;  %v7073_v51 = vadd.f32 %v6623_v3, %v8622_v21  ;;  %v8624_v42 = vld [vmem:[#allocation100_spill] sm:$0xff]  ;;  %v8626_v48 = vld [vmem:[#allocation101_spill] sm:$0xff] }
 0x4eb   :  { %8617 = vst [vmem:[#allocation95_spill] sm:$0xff] %v7061_v20  ;;  %8619 = vst [vmem:[#allocation59_spill] sm:$0xff] %v7065_v16  ;;  %v7077_v11 = vadd.f32 %v6627_v23, %v8624_v42  ;;  %v7081_v60 = vadd.f32 %v6632_v10, %v8626_v48  ;;  %v8628_v20 = vld [vmem:[#allocation70_spill] sm:$0xff]  ;;  %v8630_v16 = vld [vmem:[#allocation71_spill] sm:$0xff] }
 0x4ec   :  { %8621 = vst [vmem:[#allocation61_spill] sm:$0xff] %v7069_v5  ;;  %8623 = vst [vmem:[#allocation123_spill] sm:$0xff] %v7073_v51  ;;  %v7085_v35 = vadd.f32 %v6637_v56, %v8628_v20  ;;  %v7089_v22 = vadd.f32 %v6607_v36, %v8630_v16  ;;  %v8632_v5 = vld [vmem:[#allocation129_spill] sm:$0xff]  ;;  %v8634_v51 = vld [vmem:[#allocation130_spill] sm:$0xff] }
 0x4ed   :  { %8625 = vst [vmem:[#allocation124_spill] sm:$0xff] %v7077_v11  ;;  %8627 = vst [vmem:[#allocation50_spill] sm:$0xff] %v7081_v60  ;;  %v7093_v21 = vadd.f32 %v6611_v46, %v8632_v5  ;;  %v7097_v42 = vadd.f32 %v6615_v41, %v8634_v51  ;;  %v8635_v11 = vld [vmem:[#allocation64_spill] sm:$0xff]  ;;  %v8636_v60 = vld [vmem:[#allocation65_spill] sm:$0xff] }
 0x4ee   :  { %8629 = vst [vmem:[#allocation52_spill] sm:$0xff] %v7085_v35  ;;  %8631 = vst [vmem:[#allocation96_spill] sm:$0xff] %v7089_v22  ;;  %v7101_v48 = vadd.f32 %v6619_v2, %v8635_v11  ;;  %v7105_v20 = vadd.f32 %v6623_v3, %v8636_v60  ;;  %v8638_v35 = vld [vmem:[#allocation102_spill] sm:$0xff]  ;;  %v8640_v22 = vld [vmem:[#allocation103_spill] sm:$0xff]  ;;  %v7121_v11 = vadd.f32 %v6607_v36, %v6575_v52 }
 0x4ef   :  { %8633 = vst [vmem:[#allocation97_spill] sm:$0xff] %v7093_v21  ;;  %v7109_v16 = vadd.f32 %v6627_v23, %v8638_v35  ;;  %v7113_v5 = vadd.f32 %v6632_v10, %v8640_v22  ;;  %v8642_v21 = vld [vmem:[#allocation75_spill] sm:$0xff]  ;;  %v7125_v60 = vadd.f32 %v6611_v46, %v6579_v15  ;;  %v7129_v35 = vadd.f32 %v6615_v41, %v6583_v28 }
 0x4f0   :  { %8637 = vst [vmem:[#allocation62_spill] sm:$0xff] %v7105_v20  ;;  %v7117_v51 = vadd.f32 %v6637_v56, %v8642_v21  ;;  %v7133_v22 = vadd.f32 %v6619_v2, %v6587_v63  ;;  %v7137_v21 = vadd.f32 %v6623_v3, %v6591_v43  ;;  %v7141_v52 = vadd.f32 %v6627_v23, %v6595_v55 }
 0x4f1   :  { %8639 = vst [vmem:[#allocation63_spill] sm:$0xff] %v7109_v16  ;;  %8641 = vst [vmem:[#allocation125_spill] sm:$0xff] %v7113_v5  ;;  %v7145_v15 = vadd.f32 %v6632_v10, %v6599_v34  ;;  %v7149_v28 = vadd.f32 %v6637_v56, %v6603_v18  ;;  %v8714_v18 = vld [vmem:[#allocation49_spill] sm:$0xff]  ;;  %v8715_v36 = vld [vmem:[#allocation94_spill] sm:$0xff]  ;;  %v8725_v46 = vmax.f32 %v6673_v44, 0.0  ;;  %v8726_v63 = vmax.f32 %v6641_v0, 0.0 }
 0x4f2   :  { %8643 = vst [vmem:[#allocation126_spill] sm:$0xff] %v7117_v51  ;;  %8644 = vst [vmem:[#allocation56_spill] sm:$0xff] %v7137_v21  ;;  %v8716_v3 = vld [vmem:[#allocation95_spill] sm:$0xff]  ;;  %v8727_v23 = vmax.f32 %v6677_v53, 0.0  ;;  %v8728_v10 = vmax.f32 %v6645_v58, 0.0  ;;  %v8729_v43 = vmax.f32 %v6681_v25, 0.0 }
 0x4f3   :  { %8645 = vst [vmem:[#allocation57_spill] sm:$0xff] %v7141_v52  ;;  %8646 = vst [vmem:[#allocation98_spill] sm:$0xff] %v7145_v15  ;;  %v8717_v14 = vld [vmem:[#allocation59_spill] sm:$0xff]  ;;  %v8718_v40 = vld [vmem:[#allocation61_spill] sm:$0xff]  ;;  %v2545_v51 = vmax.f32 %v8726_v63, %v8725_v46  ;;  %v8730_v41 = vmax.f32 %v6649_v59, 0.0  ;;  %v8731_v55 = vmax.f32 %v6685_v1, 0.0 }
 0x4f4   :  { %8647 = vst [vmem:[#allocation99_spill] sm:$0xff] %v7149_v28  ;;  %v8719_v31 = vld [vmem:[#allocation123_spill] sm:$0xff]  ;;  %v8720_v49 = vld [vmem:[#allocation124_spill] sm:$0xff]  ;;  %v8721_v29 = vld [vmem:[#allocation50_spill] sm:$0xff]  ;;  %v2552_v56 = vmax.f32 %v8728_v10, %v8727_v23  ;;  %v8732_v2 = vmax.f32 %v6653_v38, 0.0  ;;  %v8733_v44 = vmax.f32 %v6689_v9, 0.0 }
 0x4f5   :  { %v8722_v4 = vld [vmem:[#allocation52_spill] sm:$0xff]  ;;  %v2559_v5 = vmax.f32 %v8730_v41, %v8729_v43  ;;  %v8734_v0 = vmax.f32 %v6657_v54, 0.0  ;;  %v8735_v53 = vmax.f32 %v6693_v26, 0.0  ;;  %v8736_v58 = vmax.f32 %v6661_v17, 0.0 }
 0x4f6   :  { %v8723_v37 = vld [vmem:[#allocation96_spill] sm:$0xff]  ;;  %v8724_v57 = vld [vmem:[#allocation97_spill] sm:$0xff]  ;;  %v2566_v34 = vmax.f32 %v8732_v2, %v8731_v55  ;;  %v2546_v23 = vrot.slane %v2545_v51, 4  ;;  %v2553_v25 = vrot.slane %v2552_v56, 4  ;;  %v8737_v59 = vmax.f32 %v6697_v30, 0.0 }
 0x4f7   :  { %v2573_v63 = vmax.f32 %v8734_v0, %v8733_v44  ;;  %v2580_v46 = vmax.f32 %v8736_v58, %v8735_v53  ;;  %v8738_v43 = vmax.f32 %v6665_v27, 0.0  ;;  %v8739_v38 = vmax.f32 %v6701_v32, 0.0 }
 0x4f8   :  { %v8740_v41 = vmax.f32 %v6669_v45, 0.0  ;;  %v2560_v55 = vrot.slane %v2559_v5, 4  ;;  %v2567_v54 = vrot.slane %v2566_v34, 4  ;;  %v2547_v26 = vmax.f32 %v2545_v51, %v2546_v23 }
 0x4f9   :  { %v2587_v1 = vmax.f32 %v8738_v43, %v8737_v59  ;;  %v2574_v2 = vrot.slane %v2573_v63, 4  ;;  %v2581_v10 = vrot.slane %v2580_v46, 4  ;;  %v2554_v44 = vmax.f32 %v2552_v56, %v2553_v25 }
 0x4fa   :  { %v2594_v9 = vmax.f32 %v8740_v41, %v8739_v38  ;;  %v2561_v53 = vmax.f32 %v2559_v5, %v2560_v55  ;;  %v2568_v58 = vmax.f32 %v2566_v34, %v2567_v54  ;;  %v2548_v15 = vrot.slane %v2547_v26, 2 }
 0x4fb   :  { %v2588_v17 = vrot.slane %v2587_v1, 4  ;;  %v2575_v28 = vmax.f32 %v2573_v63, %v2574_v2  ;;  %v2582_v30 = vmax.f32 %v2580_v46, %v2581_v10  ;;  %v2555_v27 = vrot.slane %v2554_v44, 2 }
 0x4fc   :  { %v2595_v0 = vrot.slane %v2594_v9, 4  ;;  %v2562_v32 = vrot.slane %v2561_v53, 2  ;;  %v2569_v16 = vrot.slane %v2568_v58, 2  ;;  %v2549_v41 = vmax.f32 %v2547_v26, %v2548_v15 }
 0x4fd   :  { %v2589_v59 = vmax.f32 %v2587_v1, %v2588_v17  ;;  %v2576_v45 = vrot.slane %v2575_v28, 2  ;;  %v2583_v38 = vrot.slane %v2582_v30, 2  ;;  %v2556_v52 = vmax.f32 %v2554_v44, %v2555_v27 }
 0x4fe   :  { %v2596_v43 = vmax.f32 %v2594_v9, %v2595_v0  ;;  %v2563_v51 = vmax.f32 %v2561_v53, %v2562_v32  ;;  %v2570_v56 = vmax.f32 %v2568_v58, %v2569_v16  ;;  %v2550_v5 = vrot.slane %v2549_v41, 1 }
 0x4ff   :  { %v2590_v20 = vrot.slane %v2589_v59, 2  ;;  %v2577_v23 = vmax.f32 %v2575_v28, %v2576_v45  ;;  %v2584_v25 = vmax.f32 %v2582_v30, %v2583_v38  ;;  %v2557_v34 = vrot.slane %v2556_v52, 1 }
 0x500   :  { %v2597_v21 = vrot.slane %v2596_v43, 2  ;;  %v2564_v55 = vrot.slane %v2563_v51, 1  ;;  %v2571_v54 = vrot.slane %v2570_v56, 1  ;;  %v7311_v2 = vmax.f32 %v2549_v41, %v2550_v5 }
 0x501   :  { %v2591_v63 = vmax.f32 %v2589_v59, %v2590_v20  ;;  %v2578_v1 = vrot.slane %v2577_v23, 1  ;;  %v2585_v9 = vrot.slane %v2584_v25, 1  ;;  %v7313_v10 = vmax.f32 %v2556_v52, %v2557_v34  ;;  %v8761_v34 = vld [vmem:[#allocation132_spill] sm:$0xff] }
 0x502   :  { %v2598_v46 = vmax.f32 %v2596_v43, %v2597_v21  ;;  %v7315_v44 = vmax.f32 %v2563_v51, %v2564_v55  ;;  %v7317_v17 = vmax.f32 %v2570_v56, %v2571_v54  ;;  %v8746_v0 = vmax.f32 %v6737_v61, 0.0 }
 0x503   :  { %v2592_v15 = vrot.slane %v2591_v63, 1  ;;  %v7319_v16 = vmax.f32 %v2577_v23, %v2578_v1  ;;  %v7321_v28 = vmax.f32 %v2584_v25, %v2585_v9  ;;  %v8747_v53 = vmax.f32 %v6705_v39, 0.0  ;;  %v8759_v25 = vld [vmem:[#allocation77_spill] sm:$0xff] }
 0x504   :  { %v2599_v26 = vrot.slane %v2598_v46, 1  ;;  %8741 = vst [vmem:[#allocation67_spill] sm:$0xff] %v7315_v44  ;;  %v8748_v58 = vmax.f32 %v6741_v24, 0.0  ;;  %v8749_v30 = vmax.f32 %v6709_v33, 0.0  ;;  %v8750_v59 = vmax.f32 %v6745_v6, 0.0 }
 0x505   :  { %8742 = vst [vmem:[#allocation69_spill] sm:$0xff] %v7319_v16  ;;  %8743 = vst [vmem:[#allocation127_spill] sm:$0xff] %v7321_v28  ;;  %v7323_v20 = vmax.f32 %v2591_v63, %v2592_v15  ;;  %v2601_v52 = vmax.f32 %v8747_v53, %v8746_v0  ;;  %v8751_v43 = vmax.f32 %v6713_v12, 0.0  ;;  %v8752_v45 = vmax.f32 %v6749_v19, 0.0  ;;  %v8763_v63 = vld [vmem:[#allocation131_spill] sm:$0xff] }
 0x506   :  { %v7325_v21 = vmax.f32 %v2598_v46, %v2599_v26  ;;  %v2608_v27 = vmax.f32 %v8749_v30, %v8748_v58  ;;  %v8753_v38 = vmax.f32 %v6717_v50, 0.0  ;;  %v8754_v61 = vmax.f32 %v6753_v13, 0.0 }
 0x507   :  { %8744 = vst [vmem:[#allocation128_spill] sm:$0xff] %v7323_v20  ;;  %v2615_v32 = vmax.f32 %v8751_v43, %v8750_v59  ;;  %v8755_v39 = vmax.f32 %v6721_v8, 0.0  ;;  %v8756_v24 = vmax.f32 %v6757_v62, 0.0  ;;  %v8757_v33 = vmax.f32 %v6725_v47, 0.0 }
 0x508   :  { %8745 = vst [vmem:[#allocation58_spill] sm:$0xff] %v7325_v21  ;;  %v2622_v41 = vmax.f32 %v8753_v38, %v8752_v45  ;;  %v2602_v23 = vrot.slane %v2601_v52, 4  ;;  %v2609_v6 = vrot.slane %v2608_v27, 4  ;;  %v8758_v12 = vmax.f32 %v6761_v7, 0.0 }
 0x509   :  { %v2629_v51 = vmax.f32 %v8755_v39, %v8754_v61  ;;  %v2636_v56 = vmax.f32 %v8757_v33, %v8756_v24  ;;  %v8760_v5 = vmax.f32 %v8759_v25, 0.0  ;;  %v8762_v50 = vmax.f32 %v8761_v34, 0.0 }
 0x50a   :  { %v8764_v46 = vmax.f32 %v8763_v63, 0.0  ;;  %v2616_v55 = vrot.slane %v2615_v32, 4  ;;  %v2623_v8 = vrot.slane %v2622_v41, 4  ;;  %v2603_v62 = vmax.f32 %v2601_v52, %v2602_v23 }
 0x50b   :  { %v2643_v19 = vmax.f32 %v8760_v5, %v8758_v12  ;;  %v2630_v54 = vrot.slane %v2629_v51, 4  ;;  %v2637_v1 = vrot.slane %v2636_v56, 4  ;;  %v2610_v9 = vmax.f32 %v2608_v27, %v2609_v6 }
 0x50c   :  { %v2650_v13 = vmax.f32 %v8764_v46, %v8762_v50  ;;  %v2617_v26 = vmax.f32 %v2615_v32, %v2616_v55  ;;  %v2624_v0 = vmax.f32 %v2622_v41, %v2623_v8  ;;  %v2604_v58 = vrot.slane %v2603_v62, 2 }
 0x50d   :  { %v2644_v47 = vrot.slane %v2643_v19, 4  ;;  %v2631_v53 = vmax.f32 %v2629_v51, %v2630_v54  ;;  %v2638_v7 = vmax.f32 %v2636_v56, %v2637_v1  ;;  %v2611_v30 = vrot.slane %v2610_v9, 2 }
 0x50e   :  { %v2651_v15 = vrot.slane %v2650_v13, 4  ;;  %v2618_v45 = vrot.slane %v2617_v26, 2  ;;  %v2625_v38 = vrot.slane %v2624_v0, 2  ;;  %v2605_v24 = vmax.f32 %v2603_v62, %v2604_v58  ;;  %v8774_v58 = vld [vmem:[#allocation73_spill] sm:$0xff] }
 0x50f   :  { %v2645_v59 = vmax.f32 %v2643_v19, %v2644_v47  ;;  %v2632_v61 = vrot.slane %v2631_v53, 2  ;;  %v2639_v39 = vrot.slane %v2638_v7, 2  ;;  %v2612_v33 = vmax.f32 %v2610_v9, %v2611_v30 }
 0x510   :  { %v2652_v43 = vmax.f32 %v2650_v13, %v2651_v15  ;;  %v2619_v52 = vmax.f32 %v2617_v26, %v2618_v45  ;;  %v2626_v27 = vmax.f32 %v2624_v0, %v2625_v38  ;;  %v2606_v32 = vrot.slane %v2605_v24, 1  ;;  %v8770_v15 = vld [vmem:[#allocation72_spill] sm:$0xff]  ;;  %v8772_v0 = vld [vmem:[#allocation66_spill] sm:$0xff] }
 0x511   :  { %v2646_v12 = vrot.slane %v2645_v59, 2  ;;  %v2633_v23 = vmax.f32 %v2631_v53, %v2632_v61  ;;  %v2640_v6 = vmax.f32 %v2638_v7, %v2639_v39  ;;  %v2613_v41 = vrot.slane %v2612_v33, 1  ;;  %v8778_v38 = vld [vmem:[#allocation106_spill] sm:$0xff]  ;;  %v8780_v39 = vld [vmem:[#allocation104_spill] sm:$0xff] }
 0x512   :  { %v2653_v25 = vrot.slane %v2652_v43, 2  ;;  %v2620_v5 = vrot.slane %v2619_v52, 1  ;;  %v2627_v34 = vrot.slane %v2626_v27, 1  ;;  %v7359_v63 = vmax.f32 %v2605_v24, %v2606_v32 }
 0x513   :  { %v2647_v51 = vmax.f32 %v2645_v59, %v2646_v12  ;;  %v2634_v19 = vrot.slane %v2633_v23, 1  ;;  %v2641_v50 = vrot.slane %v2640_v6, 1  ;;  %v7361_v46 = vmax.f32 %v2612_v33, %v2613_v41  ;;  %v8776_v59 = vld [vmem:[#allocation68_spill] sm:$0xff]  ;;  %v8782_v12 = vld [vmem:[#allocation107_spill] sm:$0xff]  ;;  %v8788_v41 = vld [vmem:[#allocation78_spill] sm:$0xff] }
 0x514   :  { %v2654_v56 = vmax.f32 %v2652_v43, %v2653_v25  ;;  %v7363_v8 = vmax.f32 %v2619_v52, %v2620_v5  ;;  %v7365_v54 = vmax.f32 %v2626_v27, %v2627_v34  ;;  %v8771_v26 = vmax.f32 %v8770_v15, 0.0  ;;  %v8784_v52 = vld [vmem:[#allocation105_spill] sm:$0xff] }
 0x515   :  { %v2648_v13 = vrot.slane %v2647_v51, 1  ;;  %v7367_v1 = vmax.f32 %v2633_v23, %v2634_v19  ;;  %v7369_v62 = vmax.f32 %v2640_v6, %v2641_v50  ;;  %v8773_v53 = vmax.f32 %v8772_v0, 0.0  ;;  %v8786_v6 = vld [vmem:[#allocation80_spill] sm:$0xff]  ;;  %v8790_v5 = vld [vmem:[#allocation81_spill] sm:$0xff]  ;;  %v8792_v19 = vld [vmem:[#allocation79_spill] sm:$0xff] }
 0x516   :  { %v2655_v55 = vrot.slane %v2654_v56, 1  ;;  %8765 = vst [vmem:[#allocation60_spill] sm:$0xff] %v7363_v8  ;;  %v8775_v30 = vmax.f32 %v8774_v58, 0.0  ;;  %v8777_v43 = vmax.f32 %v8776_v59, 0.0  ;;  %v8779_v61 = vmax.f32 %v8778_v38, 0.0  ;;  %v8798_v59 = vld [vmem:[#allocation136_spill] sm:$0xff] }
 0x517   :  { %8766 = vst [vmem:[#allocation100_spill] sm:$0xff] %v7367_v1  ;;  %8767 = vst [vmem:[#allocation101_spill] sm:$0xff] %v7369_v62  ;;  %v7371_v9 = vmax.f32 %v2647_v51, %v2648_v13  ;;  %v2657_v7 = vmax.f32 %v8773_v53, %v8771_v26  ;;  %v8781_v24 = vmax.f32 %v8780_v39, 0.0  ;;  %v8783_v25 = vmax.f32 %v8782_v12, 0.0  ;;  %v8794_v26 = vld [vmem:[#allocation135_spill] sm:$0xff]  ;;  %v8796_v53 = vld [vmem:[#allocation133_spill] sm:$0xff] }
 0x518   :  { %v7373_v47 = vmax.f32 %v2654_v56, %v2655_v55  ;;  %v2664_v45 = vmax.f32 %v8777_v43, %v8775_v30  ;;  %v8785_v27 = vmax.f32 %v8784_v52, 0.0  ;;  %v8787_v32 = vmax.f32 %v8786_v6, 0.0  ;;  %v8800_v38 = vld [vmem:[#allocation134_spill] sm:$0xff] }
 0x519   :  { %8768 = vst [vmem:[#allocation70_spill] sm:$0xff] %v7371_v9  ;;  %v2671_v33 = vmax.f32 %v8781_v24, %v8779_v61  ;;  %v8789_v51 = vmax.f32 %v8788_v41, 0.0  ;;  %v8791_v34 = vmax.f32 %v8790_v5, 0.0  ;;  %v8793_v50 = vmax.f32 %v8792_v19, 0.0 }
 0x51a   :  { %8769 = vst [vmem:[#allocation71_spill] sm:$0xff] %v7373_v47  ;;  %v2678_v23 = vmax.f32 %v8785_v27, %v8783_v25  ;;  %v2658_v55 = vrot.slane %v2657_v7, 4  ;;  %v2665_v15 = vrot.slane %v2664_v45, 4  ;;  %v8795_v0 = vmax.f32 %v8794_v26, 0.0 }
 0x51b   :  { %v2685_v56 = vmax.f32 %v8789_v51, %v8787_v32  ;;  %v2692_v13 = vmax.f32 %v8793_v50, %v8791_v34  ;;  %v8797_v58 = vmax.f32 %v8796_v53, 0.0  ;;  %v8799_v43 = vmax.f32 %v8798_v59, 0.0 }
 0x51c   :  { %v8801_v61 = vmax.f32 %v8800_v38, 0.0  ;;  %v2672_v24 = vrot.slane %v2671_v33, 4  ;;  %v2679_v12 = vrot.slane %v2678_v23, 4  ;;  %v2659_v27 = vmax.f32 %v2657_v7, %v2658_v55 }
 0x51d   :  { %v2699_v30 = vmax.f32 %v8797_v58, %v8795_v0  ;;  %v2686_v25 = vrot.slane %v2685_v56, 4  ;;  %v2693_v52 = vrot.slane %v2692_v13, 4  ;;  %v2666_v6 = vmax.f32 %v2664_v45, %v2665_v15 }
 0x51e   :  { %v2706_v39 = vmax.f32 %v8801_v61, %v8799_v43  ;;  %v2673_v51 = vmax.f32 %v2671_v33, %v2672_v24  ;;  %v2680_v5 = vmax.f32 %v2678_v23, %v2679_v12  ;;  %v2660_v50 = vrot.slane %v2659_v27, 2 }
 0x51f   :  { %v2700_v32 = vrot.slane %v2699_v30, 4  ;;  %v2687_v34 = vmax.f32 %v2685_v56, %v2686_v25  ;;  %v2694_v19 = vmax.f32 %v2692_v13, %v2693_v52  ;;  %v2667_v26 = vrot.slane %v2666_v6, 2 }
 0x520   :  { %v2707_v41 = vrot.slane %v2706_v39, 4  ;;  %v2674_v58 = vrot.slane %v2673_v51, 2  ;;  %v2681_v59 = vrot.slane %v2680_v5, 2  ;;  %v2661_v61 = vmax.f32 %v2659_v27, %v2660_v50  ;;  %v8809_v50 = vld [vmem:[#allocation74_spill] sm:$0xff] }
 0x521   :  { %v2701_v0 = vmax.f32 %v2699_v30, %v2700_v32  ;;  %v2688_v38 = vrot.slane %v2687_v34, 2  ;;  %v2695_v43 = vrot.slane %v2694_v19, 2  ;;  %v2668_v9 = vmax.f32 %v2666_v6, %v2667_v26 }
 0x522   :  { %v2708_v53 = vmax.f32 %v2706_v39, %v2707_v41  ;;  %v2675_v7 = vmax.f32 %v2673_v51, %v2674_v58  ;;  %v2682_v45 = vmax.f32 %v2680_v5, %v2681_v59  ;;  %v2662_v33 = vrot.slane %v2661_v61, 1  ;;  %v8813_v58 = vld [vmem:[#allocation76_spill] sm:$0xff] }
 0x523   :  { %v2702_v20 = vrot.slane %v2701_v0, 2  ;;  %v2689_v55 = vmax.f32 %v2687_v34, %v2688_v38  ;;  %v2696_v15 = vmax.f32 %v2694_v19, %v2695_v43  ;;  %v2669_v23 = vrot.slane %v2668_v9, 1  ;;  %v8807_v34 = vld [vmem:[#allocation35_spill] sm:$0xff]  ;;  %v8815_v43 = vld [vmem:[#allocation110_spill] sm:$0xff] }
 0x524   :  { %v2709_v47 = vrot.slane %v2708_v53, 2  ;;  %v2676_v24 = vrot.slane %v2675_v7, 1  ;;  %v2683_v12 = vrot.slane %v2682_v45, 1  ;;  %v7407_v25 = vmax.f32 %v2661_v61, %v2662_v33 }
 0x525   :  { %v2703_v56 = vmax.f32 %v2701_v0, %v2702_v20  ;;  %v2690_v30 = vrot.slane %v2689_v55, 1  ;;  %v2697_v39 = vrot.slane %v2696_v15, 1  ;;  %v7409_v52 = vmax.f32 %v2668_v9, %v2669_v23  ;;  %v8811_v0 = vld [vmem:[#allocation37_spill] sm:$0xff] }
 0x526   :  { %v2710_v13 = vmax.f32 %v2708_v53, %v2709_v47  ;;  %v7411_v32 = vmax.f32 %v2675_v7, %v2676_v24  ;;  %v7413_v41 = vmax.f32 %v2682_v45, %v2683_v12  ;;  %v8808_v19 = vmax.f32 %v8807_v34, 0.0  ;;  %v8817_v7 = vld [vmem:[#allocation108_spill] sm:$0xff]  ;;  %v8821_v23 = vld [vmem:[#allocation109_spill] sm:$0xff]  ;;  %v8823_v24 = vld [vmem:[#allocation30_spill] sm:$0xff] }
 0x527   :  { %v2704_v27 = vrot.slane %v2703_v56, 1  ;;  %v7415_v51 = vmax.f32 %v2689_v55, %v2690_v30  ;;  %v7417_v5 = vmax.f32 %v2696_v15, %v2697_v39  ;;  %v8810_v26 = vmax.f32 %v8809_v50, 0.0  ;;  %v8819_v15 = vld [vmem:[#allocation111_spill] sm:$0xff]  ;;  %v8825_v30 = vld [vmem:[#allocation82_spill] sm:$0xff] }
 0x528   :  { %v2711_v6 = vrot.slane %v2710_v13, 1  ;;  %8802 = vst [vmem:[#allocation129_spill] sm:$0xff] %v7411_v32  ;;  %v8812_v53 = vmax.f32 %v8811_v0, 0.0  ;;  %v8814_v59 = vmax.f32 %v8813_v58, 0.0  ;;  %v8816_v61 = vmax.f32 %v8815_v43, 0.0  ;;  %v8831_v58 = vld [vmem:[#allocation84_spill] sm:$0xff] }
 0x529   :  { %8803 = vst [vmem:[#allocation130_spill] sm:$0xff] %v7415_v51  ;;  %8804 = vst [vmem:[#allocation64_spill] sm:$0xff] %v7417_v5  ;;  %v7419_v20 = vmax.f32 %v2703_v56, %v2704_v27  ;;  %v2713_v9 = vmax.f32 %v8810_v26, %v8808_v19  ;;  %v8818_v45 = vmax.f32 %v8817_v7, 0.0  ;;  %v8820_v33 = vmax.f32 %v8819_v15, 0.0  ;;  %v8829_v19 = vld [vmem:[#allocation83_spill] sm:$0xff]  ;;  %v8833_v43 = vld [vmem:[#allocation137_spill] sm:$0xff] }
 0x52a   :  { %v7421_v47 = vmax.f32 %v2710_v13, %v2711_v6  ;;  %v2720_v38 = vmax.f32 %v8814_v59, %v8812_v53  ;;  %v8822_v56 = vmax.f32 %v8821_v23, 0.0  ;;  %v8824_v12 = vmax.f32 %v8823_v24, 0.0  ;;  %v8827_v6 = vld [vmem:[#allocation31_spill] sm:$0xff] }
 0x52b   :  { %8805 = vst [vmem:[#allocation65_spill] sm:$0xff] %v7419_v20  ;;  %v2727_v55 = vmax.f32 %v8818_v45, %v8816_v61  ;;  %v8826_v39 = vmax.f32 %v8825_v30, 0.0  ;;  %v8828_v34 = vmax.f32 %v8827_v6, 0.0  ;;  %v8830_v50 = vmax.f32 %v8829_v19, 0.0  ;;  %v8835_v45 = vld [vmem:[#allocation85_spill] sm:$0xff] }
 0x52c   :  { %8806 = vst [vmem:[#allocation102_spill] sm:$0xff] %v7421_v47  ;;  %v2734_v13 = vmax.f32 %v8822_v56, %v8820_v33  ;;  %v2714_v0 = vrot.slane %v2713_v9, 4  ;;  %v2721_v53 = vrot.slane %v2720_v38, 4  ;;  %v8832_v59 = vmax.f32 %v8831_v58, 0.0  ;;  %v8837_v33 = vld [vmem:[#allocation138_spill] sm:$0xff] }
 0x52d   :  { %v2741_v27 = vmax.f32 %v8826_v39, %v8824_v12  ;;  %v2748_v26 = vmax.f32 %v8830_v50, %v8828_v34  ;;  %v8834_v61 = vmax.f32 %v8833_v43, 0.0  ;;  %v8836_v15 = vmax.f32 %v8835_v45, 0.0 }
 0x52e   :  { %v8838_v23 = vmax.f32 %v8837_v33, 0.0  ;;  %v2728_v24 = vrot.slane %v2727_v55, 4  ;;  %v2735_v30 = vrot.slane %v2734_v13, 4  ;;  %v2715_v6 = vmax.f32 %v2713_v9, %v2714_v0 }
 0x52f   :  { %v2755_v7 = vmax.f32 %v8834_v61, %v8832_v59  ;;  %v2742_v12 = vrot.slane %v2741_v27, 4  ;;  %v2749_v39 = vrot.slane %v2748_v26, 4  ;;  %v2722_v20 = vmax.f32 %v2720_v38, %v2721_v53 }
 0x530   :  { %v2762_v56 = vmax.f32 %v8838_v23, %v8836_v15  ;;  %v2729_v50 = vmax.f32 %v2727_v55, %v2728_v24  ;;  %v2736_v47 = vmax.f32 %v2734_v13, %v2735_v30  ;;  %v2716_v51 = vrot.slane %v2715_v6, 2 }
 0x531   :  { %v2756_v19 = vrot.slane %v2755_v7, 4  ;;  %v2743_v21 = vmax.f32 %v2741_v27, %v2742_v12  ;;  %v2750_v58 = vmax.f32 %v2748_v26, %v2749_v39  ;;  %v2723_v43 = vrot.slane %v2722_v20, 2 }
 0x532   :  { %v2763_v34 = vrot.slane %v2762_v56, 4  ;;  %v2730_v45 = vrot.slane %v2729_v50, 2  ;;  %v2737_v1 = vrot.slane %v2736_v47, 2  ;;  %v2717_v23 = vmax.f32 %v2715_v6, %v2716_v51 }
 0x533   :  { %v2757_v59 = vmax.f32 %v2755_v7, %v2756_v19  ;;  %v2744_v33 = vrot.slane %v2743_v21, 2  ;;  %v2751_v15 = vrot.slane %v2750_v58, 2  ;;  %v2724_v16 = vmax.f32 %v2722_v20, %v2723_v43  ;;  %v8849_v43 = vld [vmem:[#allocation87_spill] sm:$0xff] }
 0x534   :  { %v2764_v61 = vmax.f32 %v2762_v56, %v2763_v34  ;;  %v2731_v9 = vmax.f32 %v2729_v50, %v2730_v45  ;;  %v2738_v38 = vmax.f32 %v2736_v47, %v2737_v1  ;;  %v2718_v55 = vrot.slane %v2717_v23, 1  ;;  %v8845_v47 = vld [vmem:[#allocation86_spill] sm:$0xff] }
 0x535   :  { %v2758_v5 = vrot.slane %v2757_v59, 2  ;;  %v2745_v0 = vmax.f32 %v2743_v21, %v2744_v33  ;;  %v2752_v53 = vmax.f32 %v2750_v58, %v2751_v15  ;;  %v2725_v13 = vrot.slane %v2724_v16, 1  ;;  %v8847_v50 = vld [vmem:[#allocation38_spill] sm:$0xff]  ;;  %v8853_v15 = vld [vmem:[#allocation43_spill] sm:$0xff] }
 0x536   :  { %v2765_v62 = vrot.slane %v2764_v61, 2  ;;  %v2732_v24 = vrot.slane %v2731_v9, 1  ;;  %v2739_v30 = vrot.slane %v2738_v38, 1  ;;  %v7455_v12 = vmax.f32 %v2717_v23, %v2718_v55 }
 0x537   :  { %v2759_v27 = vmax.f32 %v2757_v59, %v2758_v5  ;;  %v2746_v7 = vrot.slane %v2745_v0, 1  ;;  %v2753_v56 = vrot.slane %v2752_v53, 1  ;;  %v7457_v39 = vmax.f32 %v2724_v16, %v2725_v13  ;;  %v8859_v13 = vld [vmem:[#allocation19_spill] sm:$0xff] }
 0x538   :  { %v2766_v26 = vmax.f32 %v2764_v61, %v2765_v62  ;;  %v7459_v6 = vmax.f32 %v2731_v9, %v2732_v24  ;;  %v7461_v19 = vmax.f32 %v2738_v38, %v2739_v30  ;;  %v8846_v34 = vmax.f32 %v8845_v47, 0.0  ;;  %v8851_v61 = vld [vmem:[#allocation39_spill] sm:$0xff]  ;;  %v8855_v9 = vld [vmem:[#allocation112_spill] sm:$0xff]  ;;  %v8861_v24 = vld [vmem:[#allocation114_spill] sm:$0xff] }
 0x539   :  { %v2760_v51 = vrot.slane %v2759_v27, 1  ;;  %v7463_v21 = vmax.f32 %v2745_v0, %v2746_v7  ;;  %v7465_v1 = vmax.f32 %v2752_v53, %v2753_v56  ;;  %v8848_v58 = vmax.f32 %v8847_v50, 0.0  ;;  %v8857_v53 = vld [vmem:[#allocation45_spill] sm:$0xff]  ;;  %v8863_v7 = vld [vmem:[#allocation18_spill] sm:$0xff] }
 0x53a   :  { %v2767_v20 = vrot.slane %v2766_v26, 1  ;;  %8839 = vst [vmem:[#allocation103_spill] sm:$0xff] %v7459_v6  ;;  %8840 = vst [vmem:[#allocation75_spill] sm:$0xff] %v7461_v19  ;;  %v8850_v59 = vmax.f32 %v8849_v43, 0.0  ;;  %v8852_v45 = vmax.f32 %v8851_v61, 0.0  ;;  %v8854_v23 = vmax.f32 %v8853_v15, 0.0 }
 0x53b   :  { %8841 = vst [vmem:[#allocation49_spill] sm:$0xff] %v7463_v21  ;;  %8842 = vst [vmem:[#allocation94_spill] sm:$0xff] %v7465_v1  ;;  %v7467_v5 = vmax.f32 %v2759_v27, %v2760_v51  ;;  %v2769_v16 = vmax.f32 %v8848_v58, %v8846_v34  ;;  %v8856_v38 = vmax.f32 %v8855_v9, 0.0  ;;  %v8858_v55 = vmax.f32 %v8857_v53, 0.0  ;;  %v8867_v34 = vld [vmem:[#allocation113_spill] sm:$0xff]  ;;  %v8869_v61 = vld [vmem:[#allocation34_spill] sm:$0xff] }
 0x53c   :  { %v7469_v62 = vmax.f32 %v2766_v26, %v2767_v20  ;;  %v2776_v33 = vmax.f32 %v8852_v45, %v8850_v59  ;;  %v8860_v27 = vmax.f32 %v8859_v13, 0.0  ;;  %v8862_v30 = vmax.f32 %v8861_v24, 0.0  ;;  %v8865_v20 = vld [vmem:[#allocation115_spill] sm:$0xff]  ;;  %v8871_v15 = vld [vmem:[#allocation32_spill] sm:$0xff] }
 0x53d   :  { %8843 = vst [vmem:[#allocation95_spill] sm:$0xff] %v7467_v5  ;;  %v2783_v0 = vmax.f32 %v8856_v38, %v8854_v23  ;;  %v8864_v56 = vmax.f32 %v8863_v7, 0.0  ;;  %v8866_v47 = vmax.f32 %v8865_v20, 0.0  ;;  %v8868_v50 = vmax.f32 %v8867_v34, 0.0  ;;  %v8873_v38 = vld [vmem:[#allocation36_spill] sm:$0xff] }
 0x53e   :  { %8844 = vst [vmem:[#allocation59_spill] sm:$0xff] %v7469_v62  ;;  %v2790_v26 = vmax.f32 %v8860_v27, %v8858_v55  ;;  %v2770_v43 = vrot.slane %v2769_v16, 4  ;;  %v2777_v59 = vrot.slane %v2776_v33, 4  ;;  %v8870_v45 = vmax.f32 %v8869_v61, 0.0  ;;  %v8875_v55 = vld [vmem:[#allocation33_spill] sm:$0xff] }
 0x53f   :  { %v2797_v51 = vmax.f32 %v8864_v56, %v8862_v30  ;;  %v2804_v58 = vmax.f32 %v8868_v50, %v8866_v47  ;;  %v8872_v23 = vmax.f32 %v8871_v15, 0.0  ;;  %v8874_v53 = vmax.f32 %v8873_v38, 0.0 }
 0x540   :  { %v8876_v13 = vmax.f32 %v8875_v55, 0.0  ;;  %v2784_v24 = vrot.slane %v2783_v0, 4  ;;  %v2791_v7 = vrot.slane %v2790_v26, 4  ;;  %v2771_v20 = vmax.f32 %v2769_v16, %v2770_v43 }
 0x541   :  { %v2811_v9 = vmax.f32 %v8872_v23, %v8870_v45  ;;  %v2798_v30 = vrot.slane %v2797_v51, 4  ;;  %v2805_v56 = vrot.slane %v2804_v58, 4  ;;  %v2778_v5 = vmax.f32 %v2776_v33, %v2777_v59 }
 0x542   :  { %v2818_v27 = vmax.f32 %v8876_v13, %v8874_v53  ;;  %v2785_v50 = vmax.f32 %v2783_v0, %v2784_v24  ;;  %v2792_v62 = vmax.f32 %v2790_v26, %v2791_v7  ;;  %v2772_v1 = vrot.slane %v2771_v20, 2 }
 0x543   :  { %v2812_v34 = vrot.slane %v2811_v9, 4  ;;  %v2799_v21 = vmax.f32 %v2797_v51, %v2798_v30  ;;  %v2806_v61 = vmax.f32 %v2804_v58, %v2805_v56  ;;  %v2779_v15 = vrot.slane %v2778_v5, 2 }
 0x544   :  { %v2819_v47 = vrot.slane %v2818_v27, 4  ;;  %v2786_v38 = vrot.slane %v2785_v50, 2  ;;  %v2793_v6 = vrot.slane %v2792_v62, 2  ;;  %v2773_v13 = vmax.f32 %v2771_v20, %v2772_v1 }
 0x545   :  { %v2813_v45 = vmax.f32 %v2811_v9, %v2812_v34  ;;  %v2800_v55 = vrot.slane %v2799_v21, 2  ;;  %v2807_v53 = vrot.slane %v2806_v61, 2  ;;  %v2780_v28 = vmax.f32 %v2778_v5, %v2779_v15  ;;  %v8887_v15 = vld [vmem:[#allocation91_spill] sm:$0xff] }
 0x546   :  { %v2820_v23 = vmax.f32 %v2818_v27, %v2819_v47  ;;  %v2787_v16 = vmax.f32 %v2785_v50, %v2786_v38  ;;  %v2794_v33 = vmax.f32 %v2792_v62, %v2793_v6  ;;  %v2774_v0 = vrot.slane %v2773_v13, 1  ;;  %v8883_v62 = vld [vmem:[#allocation90_spill] sm:$0xff]  ;;  %v8885_v50 = vld [vmem:[#allocation88_spill] sm:$0xff] }
 0x547   :  { %v2814_v32 = vrot.slane %v2813_v45, 2  ;;  %v2801_v43 = vmax.f32 %v2799_v21, %v2800_v55  ;;  %v2808_v59 = vmax.f32 %v2806_v61, %v2807_v53  ;;  %v2781_v26 = vrot.slane %v2780_v28, 1  ;;  %v8891_v53 = vld [vmem:[#allocation51_spill] sm:$0xff] }
 0x548   :  { %v2821_v8 = vrot.slane %v2820_v23, 2  ;;  %v2788_v24 = vrot.slane %v2787_v16, 1  ;;  %v2795_v7 = vrot.slane %v2794_v33, 1  ;;  %v7503_v30 = vmax.f32 %v2773_v13, %v2774_v0 }
 0x549   :  { %v2815_v51 = vmax.f32 %v2813_v45, %v2814_v32  ;;  %v2802_v9 = vrot.slane %v2801_v43, 1  ;;  %v2809_v27 = vrot.slane %v2808_v59, 1  ;;  %v7505_v56 = vmax.f32 %v2780_v28, %v2781_v26  ;;  %v8897_v26 = vld [vmem:[#allocation47_spill] sm:$0xff] }
 0x54a   :  { %v2822_v58 = vmax.f32 %v2820_v23, %v2821_v8  ;;  %v7507_v20 = vmax.f32 %v2787_v16, %v2788_v24  ;;  %v7509_v34 = vmax.f32 %v2794_v33, %v2795_v7  ;;  %v8884_v47 = vmax.f32 %v8883_v62, 0.0  ;;  %v8889_v23 = vld [vmem:[#allocation89_spill] sm:$0xff]  ;;  %v8893_v16 = vld [vmem:[#allocation46_spill] sm:$0xff] }
 0x54b   :  { %v2816_v1 = vrot.slane %v2815_v51, 1  ;;  %v7511_v6 = vmax.f32 %v2801_v43, %v2802_v9  ;;  %v7513_v21 = vmax.f32 %v2808_v59, %v2809_v27  ;;  %v8886_v61 = vmax.f32 %v8885_v50, 0.0  ;;  %v8895_v59 = vld [vmem:[#allocation53_spill] sm:$0xff]  ;;  %v8899_v24 = vld [vmem:[#allocation118_spill] sm:$0xff]  ;;  %v8901_v9 = vld [vmem:[#allocation116_spill] sm:$0xff] }
 0x54c   :  { %v2823_v5 = vrot.slane %v2822_v58, 1  ;;  %8877 = vst [vmem:[#allocation61_spill] sm:$0xff] %v7507_v20  ;;  %8878 = vst [vmem:[#allocation123_spill] sm:$0xff] %v7509_v34  ;;  %v8888_v45 = vmax.f32 %v8887_v15, 0.0  ;;  %v8890_v38 = vmax.f32 %v8889_v23, 0.0  ;;  %v8892_v13 = vmax.f32 %v8891_v53, 0.0 }
 0x54d   :  { %8879 = vst [vmem:[#allocation124_spill] sm:$0xff] %v7511_v6  ;;  %8880 = vst [vmem:[#allocation50_spill] sm:$0xff] %v7513_v21  ;;  %v7515_v32 = vmax.f32 %v2815_v51, %v2816_v1  ;;  %v2825_v28 = vmax.f32 %v8886_v61, %v8884_v47  ;;  %v8894_v33 = vmax.f32 %v8893_v16, 0.0  ;;  %v8896_v0 = vmax.f32 %v8895_v59, 0.0  ;;  %v8905_v47 = vld [vmem:[#allocation117_spill] sm:$0xff]  ;;  %v8907_v23 = vld [vmem:[#allocation42_spill] sm:$0xff] }
 0x54e   :  { %v7517_v8 = vmax.f32 %v2822_v58, %v2823_v5  ;;  %v2832_v55 = vmax.f32 %v8890_v38, %v8888_v45  ;;  %v8898_v51 = vmax.f32 %v8897_v26, 0.0  ;;  %v8900_v7 = vmax.f32 %v8899_v24, 0.0  ;;  %v8903_v5 = vld [vmem:[#allocation119_spill] sm:$0xff]  ;;  %v8909_v53 = vld [vmem:[#allocation40_spill] sm:$0xff] }
 0x54f   :  { %8881 = vst [vmem:[#allocation52_spill] sm:$0xff] %v7515_v32  ;;  %v2839_v43 = vmax.f32 %v8894_v33, %v8892_v13  ;;  %v8902_v27 = vmax.f32 %v8901_v9, 0.0  ;;  %v8904_v62 = vmax.f32 %v8903_v5, 0.0  ;;  %v8906_v50 = vmax.f32 %v8905_v47, 0.0  ;;  %v8911_v33 = vld [vmem:[#allocation44_spill] sm:$0xff] }
 0x550   :  { %8882 = vst [vmem:[#allocation96_spill] sm:$0xff] %v7517_v8  ;;  %v2846_v58 = vmax.f32 %v8898_v51, %v8896_v0  ;;  %v2826_v15 = vrot.slane %v2825_v28, 4  ;;  %v2833_v45 = vrot.slane %v2832_v55, 4  ;;  %v8908_v38 = vmax.f32 %v8907_v23, 0.0  ;;  %v8913_v0 = vld [vmem:[#allocation41_spill] sm:$0xff] }
 0x551   :  { %v2853_v1 = vmax.f32 %v8902_v27, %v8900_v7  ;;  %v2860_v61 = vmax.f32 %v8906_v50, %v8904_v62  ;;  %v8910_v13 = vmax.f32 %v8909_v53, 0.0  ;;  %v8912_v59 = vmax.f32 %v8911_v33, 0.0 }
 0x552   :  { %v8914_v26 = vmax.f32 %v8913_v0, 0.0  ;;  %v2840_v24 = vrot.slane %v2839_v43, 4  ;;  %v2847_v9 = vrot.slane %v2846_v58, 4  ;;  %v2827_v5 = vmax.f32 %v2825_v28, %v2826_v15 }
 0x553   :  { %v2867_v16 = vmax.f32 %v8910_v13, %v8908_v38  ;;  %v2854_v7 = vrot.slane %v2853_v1, 4  ;;  %v2861_v27 = vrot.slane %v2860_v61, 4  ;;  %v2834_v32 = vmax.f32 %v2832_v55, %v2833_v45 }
 0x554   :  { %v2874_v51 = vmax.f32 %v8914_v26, %v8912_v59  ;;  %v2841_v50 = vmax.f32 %v2839_v43, %v2840_v24  ;;  %v2848_v8 = vmax.f32 %v2846_v58, %v2847_v9  ;;  %v2828_v21 = vrot.slane %v2827_v5, 2 }
 0x555   :  { %v2868_v47 = vrot.slane %v2867_v16, 4  ;;  %v2855_v6 = vmax.f32 %v2853_v1, %v2854_v7  ;;  %v2862_v23 = vmax.f32 %v2860_v61, %v2861_v27  ;;  %v2835_v53 = vrot.slane %v2834_v32, 2 }
 0x556   :  { %v2875_v62 = vrot.slane %v2874_v51, 4  ;;  %v2842_v33 = vrot.slane %v2841_v50, 2  ;;  %v2849_v20 = vrot.slane %v2848_v8, 2  ;;  %v2829_v26 = vmax.f32 %v2827_v5, %v2828_v21 }
 0x557   :  { %v2869_v38 = vmax.f32 %v2867_v16, %v2868_v47  ;;  %v2856_v0 = vrot.slane %v2855_v6, 2  ;;  %v2863_v59 = vrot.slane %v2862_v23, 2  ;;  %v2836_v44 = vmax.f32 %v2834_v32, %v2835_v53  ;;  %v8919_v53 = vld [vmem:[#allocation93_spill] sm:$0xff] }
 0x558   :  { %v2876_v13 = vmax.f32 %v2874_v51, %v2875_v62  ;;  %v2843_v28 = vmax.f32 %v2841_v50, %v2842_v33  ;;  %v2850_v55 = vmax.f32 %v2848_v8, %v2849_v20  ;;  %v2830_v43 = vrot.slane %v2829_v26, 1  ;;  %v8916_v62 = vld [vmem:[#allocation92_spill] sm:$0xff] }
 0x559   :  { %v2870_v34 = vrot.slane %v2869_v38, 2  ;;  %v2857_v15 = vmax.f32 %v2855_v6, %v2856_v0  ;;  %v2864_v45 = vmax.f32 %v2862_v23, %v2863_v59  ;;  %v2837_v58 = vrot.slane %v2836_v44, 1  ;;  %v8922_v0 = vld [vmem:[#allocation54_spill] sm:$0xff] }
 0x55a   :  { %v2877_v19 = vrot.slane %v2876_v13, 2  ;;  %v2844_v24 = vrot.slane %v2843_v28, 1  ;;  %v2851_v9 = vrot.slane %v2850_v55, 1  ;;  %v7551_v7 = vmax.f32 %v2829_v26, %v2830_v43  ;;  %v8928_v43 = vld [vmem:[#allocation120_spill] sm:$0xff] }
 0x55b   :  { %v2871_v1 = vmax.f32 %v2869_v38, %v2870_v34  ;;  %v2858_v16 = vrot.slane %v2857_v15, 1  ;;  %v2865_v51 = vrot.slane %v2864_v45, 1  ;;  %v7553_v27 = vmax.f32 %v2836_v44, %v2837_v58 }
 0x55c   :  { %v2878_v61 = vmax.f32 %v2876_v13, %v2877_v19  ;;  %v7555_v5 = vmax.f32 %v2843_v28, %v2844_v24  ;;  %v7557_v47 = vmax.f32 %v2850_v55, %v2851_v9  ;;  %v8915_v8 = vmax.f32 %v8715_v36, 0.0  ;;  %v8925_v55 = vld [vmem:[#allocation55_spill] sm:$0xff] }
 0x55d   :  { %v2872_v21 = vrot.slane %v2871_v1, 1  ;;  %v7559_v20 = vmax.f32 %v2857_v15, %v2858_v16  ;;  %v7561_v6 = vmax.f32 %v2864_v45, %v2865_v51  ;;  %v8917_v50 = vmax.f32 %v8916_v62, 0.0 }
 0x55e   :  { %v2879_v32 = vrot.slane %v2878_v61, 1  ;;  %v8918_v23 = vmax.f32 %v8716_v3, 0.0  ;;  %v8920_v38 = vmax.f32 %v8919_v53, 0.0  ;;  %v8921_v33 = vmax.f32 %v8717_v14, 0.0 }
 0x55f   :  { %v7563_v34 = vmax.f32 %v2871_v1, %v2872_v21  ;;  %v2881_v44 = vmax.f32 %v8917_v50, %v8915_v8  ;;  %v8923_v59 = vmax.f32 %v8922_v0, 0.0  ;;  %v8924_v28 = vmax.f32 %v8718_v40, 0.0  ;;  %v8934_v21 = vld [vmem:[#allocation48_spill] sm:$0xff] }
 0x560   :  { %v7565_v19 = vmax.f32 %v2878_v61, %v2879_v32  ;;  %v2888_v13 = vmax.f32 %v8920_v38, %v8918_v23  ;;  %v8926_v15 = vmax.f32 %v8925_v55, 0.0  ;;  %v8927_v36 = vmax.f32 %v8719_v31, 0.0  ;;  %v8931_v61 = vld [vmem:[#allocation121_spill] sm:$0xff] }
 0x561   :  { %v2895_v26 = vmax.f32 %v8923_v59, %v8921_v33  ;;  %v8929_v58 = vmax.f32 %v8928_v43, 0.0  ;;  %v8930_v3 = vmax.f32 %v8720_v49, 0.0  ;;  %v8932_v24 = vmax.f32 %v8931_v61, 0.0 }
 0x562   :  { %v2902_v45 = vmax.f32 %v8926_v15, %v8924_v28  ;;  %v2882_v16 = vrot.slane %v2881_v44, 4  ;;  %v2889_v14 = vrot.slane %v2888_v13, 4  ;;  %v8933_v51 = vmax.f32 %v8721_v29, 0.0 }
 0x563   :  { %v2909_v1 = vmax.f32 %v8929_v58, %v8927_v36  ;;  %v2916_v9 = vmax.f32 %v8932_v24, %v8930_v3  ;;  %v8935_v32 = vmax.f32 %v8934_v21, 0.0  ;;  %v8936_v8 = vmax.f32 %v8722_v4, 0.0 }
 0x564   :  { %v8937_v62 = vmax.f32 %v8714_v18, 0.0  ;;  %v2896_v50 = vrot.slane %v2895_v26, 4  ;;  %v2903_v23 = vrot.slane %v2902_v45, 4  ;;  %v2883_v49 = vmax.f32 %v2881_v44, %v2882_v16 }
 0x565   :  { %v2923_v40 = vmax.f32 %v8935_v32, %v8933_v51  ;;  %v2910_v53 = vrot.slane %v2909_v1, 4  ;;  %v2917_v38 = vrot.slane %v2916_v9, 4  ;;  %v2890_v33 = vmax.f32 %v2888_v13, %v2889_v14 }
 0x566   :  { %v2930_v31 = vmax.f32 %v8937_v62, %v8936_v8  ;;  %v2897_v28 = vmax.f32 %v2895_v26, %v2896_v50  ;;  %v2904_v55 = vmax.f32 %v2902_v45, %v2903_v23  ;;  %v2884_v36 = vrot.slane %v2883_v49, 2 }
 0x567   :  { %v2924_v0 = vrot.slane %v2923_v40, 4  ;;  %v2911_v15 = vmax.f32 %v2909_v1, %v2910_v53  ;;  %v2918_v29 = vmax.f32 %v2916_v9, %v2917_v38  ;;  %v2891_v43 = vrot.slane %v2890_v33, 2 }
 0x568   :  { %v2931_v59 = vrot.slane %v2930_v31, 4  ;;  %v2898_v4 = vrot.slane %v2897_v28, 2  ;;  %v2905_v61 = vrot.slane %v2904_v55, 2  ;;  %v2885_v51 = vmax.f32 %v2883_v49, %v2884_v36 }
 0x569   :  { %v2925_v58 = vmax.f32 %v2923_v40, %v2924_v0  ;;  %v2912_v18 = vrot.slane %v2911_v15, 2  ;;  %v2919_v24 = vrot.slane %v2918_v29, 2  ;;  %v2892_v21 = vmax.f32 %v2890_v33, %v2891_v43 }
 0x56a   :  { %v2932_v3 = vmax.f32 %v2930_v31, %v2931_v59  ;;  %v2899_v44 = vmax.f32 %v2897_v28, %v2898_v4  ;;  %v2906_v13 = vmax.f32 %v2904_v55, %v2905_v61  ;;  %v2886_v26 = vrot.slane %v2885_v51, 1 }
 0x56b   :  { %v2926_v32 = vrot.slane %v2925_v58, 2  ;;  %v2913_v16 = vmax.f32 %v2911_v15, %v2912_v18  ;;  %v2920_v14 = vmax.f32 %v2918_v29, %v2919_v24  ;;  %v2893_v45 = vrot.slane %v2892_v21, 1 }
 0x56c   :  { %v2933_v8 = vrot.slane %v2932_v3, 2  ;;  %v2900_v62 = vrot.slane %v2899_v44, 1  ;;  %v2907_v50 = vrot.slane %v2906_v13, 1  ;;  %v7599_v23 = vmax.f32 %v2885_v51, %v2886_v26 }
 0x56d   :  { %v2927_v1 = vmax.f32 %v2925_v58, %v2926_v32  ;;  %v2914_v40 = vrot.slane %v2913_v16, 1  ;;  %v2921_v31 = vrot.slane %v2920_v14, 1  ;;  %v7601_v53 = vmax.f32 %v2892_v21, %v2893_v45 }
 0x56e   :  { %v2934_v9 = vmax.f32 %v2932_v3, %v2933_v8  ;;  %v7603_v33 = vmax.f32 %v2899_v44, %v2900_v62  ;;  %v7605_v0 = vmax.f32 %v2906_v13, %v2907_v50  ;;  %v8938_v29 = vmax.f32 %v7121_v11, 0.0  ;;  %v8946_v8 = vld [vmem:[#allocation56_spill] sm:$0xff]  ;;  %v8948_v44 = vld [vmem:[#allocation62_spill] sm:$0xff]  ;;  %v8958_v50 = vld [vmem:[#allocation99_spill] sm:$0xff] }
 0x56f   :  { %v2928_v38 = vrot.slane %v2927_v1, 1  ;;  %v7607_v59 = vmax.f32 %v2913_v16, %v2914_v40  ;;  %v7609_v28 = vmax.f32 %v2920_v14, %v2921_v31  ;;  %v8939_v36 = vmax.f32 %v8723_v37, 0.0  ;;  %v8950_v16 = vld [vmem:[#allocation57_spill] sm:$0xff]  ;;  %v8952_v14 = vld [vmem:[#allocation63_spill] sm:$0xff]  ;;  %v8960_v40 = vld [vmem:[#allocation126_spill] sm:$0xff] }
 0x570   :  { %v2935_v49 = vrot.slane %v2934_v9, 1  ;;  %v8940_v58 = vmax.f32 %v7125_v60, 0.0  ;;  %v8941_v3 = vmax.f32 %v8724_v57, 0.0  ;;  %v8942_v61 = vmax.f32 %v7129_v35, 0.0 }
 0x571   :  { %v7611_v55 = vmax.f32 %v2927_v1, %v2928_v38  ;;  %v2937_v43 = vmax.f32 %v8939_v36, %v8938_v29  ;;  %v8943_v18 = vmax.f32 %v7097_v42, 0.0  ;;  %v8944_v51 = vmax.f32 %v7133_v22, 0.0  ;;  %v8954_v1 = vld [vmem:[#allocation98_spill] sm:$0xff] }
 0x572   :  { %v7613_v15 = vmax.f32 %v2934_v9, %v2935_v49  ;;  %v2944_v4 = vmax.f32 %v8941_v3, %v8940_v58  ;;  %v8945_v21 = vmax.f32 %v7101_v48, 0.0  ;;  %v8947_v11 = vmax.f32 %v8946_v8, 0.0  ;;  %v8956_v9 = vld [vmem:[#allocation125_spill] sm:$0xff] }
 0x573   :  { %v2951_v24 = vmax.f32 %v8943_v18, %v8942_v61  ;;  %v8949_v37 = vmax.f32 %v8948_v44, 0.0  ;;  %v8951_v60 = vmax.f32 %v8950_v16, 0.0  ;;  %v8953_v57 = vmax.f32 %v8952_v14, 0.0 }
 0x574   :  { %v2958_v32 = vmax.f32 %v8945_v21, %v8944_v51  ;;  %v2938_v45 = vrot.slane %v2937_v43, 4  ;;  %v2945_v35 = vrot.slane %v2944_v4, 4  ;;  %v8955_v42 = vmax.f32 %v8954_v1, 0.0 }
 0x575   :  { %v2965_v13 = vmax.f32 %v8949_v37, %v8947_v11  ;;  %v2972_v26 = vmax.f32 %v8953_v57, %v8951_v60  ;;  %v8957_v62 = vmax.f32 %v8956_v9, 0.0  ;;  %v8959_v48 = vmax.f32 %v8958_v50, 0.0 }
 0x576   :  { %v8961_v31 = vmax.f32 %v8960_v40, 0.0  ;;  %v2952_v49 = vrot.slane %v2951_v24, 4  ;;  %v2959_v29 = vrot.slane %v2958_v32, 4  ;;  %v2939_v3 = vmax.f32 %v2937_v43, %v2938_v45 }
 0x577   :  { %v2979_v22 = vmax.f32 %v8957_v62, %v8955_v42  ;;  %v2966_v36 = vrot.slane %v2965_v13, 4  ;;  %v2973_v58 = vrot.slane %v2972_v26, 4  ;;  %v2946_v61 = vmax.f32 %v2944_v4, %v2945_v35 }
 0x578   :  { %v2986_v38 = vmax.f32 %v8961_v31, %v8959_v48  ;;  %v2953_v21 = vmax.f32 %v2951_v24, %v2952_v49  ;;  %v2960_v8 = vmax.f32 %v2958_v32, %v2959_v29  ;;  %v2940_v37 = vrot.slane %v2939_v3, 2 }
 0x579   :  { %v2980_v18 = vrot.slane %v2979_v22, 4  ;;  %v2967_v11 = vmax.f32 %v2965_v13, %v2966_v36  ;;  %v2974_v44 = vmax.f32 %v2972_v26, %v2973_v58  ;;  %v2947_v16 = vrot.slane %v2946_v61, 2 }
 0x57a   :  { %v2987_v51 = vrot.slane %v2986_v38, 4  ;;  %v2954_v57 = vrot.slane %v2953_v21, 2  ;;  %v2961_v1 = vrot.slane %v2960_v8, 2  ;;  %v2941_v62 = vmax.f32 %v2939_v3, %v2940_v37 }
 0x57b   :  { %v2981_v60 = vmax.f32 %v2979_v22, %v2980_v18  ;;  %v2968_v42 = vrot.slane %v2967_v11, 2  ;;  %v2975_v9 = vrot.slane %v2974_v44, 2  ;;  %v2948_v50 = vmax.f32 %v2946_v61, %v2947_v16 }
 0x57c   :  { %v2988_v14 = vmax.f32 %v2986_v38, %v2987_v51  ;;  %v2955_v43 = vmax.f32 %v2953_v21, %v2954_v57  ;;  %v2962_v4 = vmax.f32 %v2960_v8, %v2961_v1  ;;  %v2942_v24 = vrot.slane %v2941_v62, 1 }
 0x57d   :  { %v2982_v48 = vrot.slane %v2981_v60, 2  ;;  %v2969_v45 = vmax.f32 %v2967_v11, %v2968_v42  ;;  %v2976_v35 = vmax.f32 %v2974_v44, %v2975_v9  ;;  %v2949_v32 = vrot.slane %v2948_v50, 1 }
 0x57e   :  { %v2989_v40 = vrot.slane %v2988_v14, 2  ;;  %v2956_v31 = vrot.slane %v2955_v43, 1  ;;  %v2963_v49 = vrot.slane %v2962_v4, 1  ;;  %v7647_v29 = vmax.f32 %v2941_v62, %v2942_v24 }
 0x57f   :  { %v2983_v13 = vmax.f32 %v2981_v60, %v2982_v48  ;;  %v2970_v22 = vrot.slane %v2969_v45, 1  ;;  %v2977_v38 = vrot.slane %v2976_v35, 1  ;;  %v2950_v36 = vmax.f32 %v2948_v50, %v2949_v32 }
 0x580   :  { %v2990_v26 = vmax.f32 %v2988_v14, %v2989_v40  ;;  %v7649_v61 = vmax.f32 %v2955_v43, %v2956_v31  ;;  %v7651_v18 = vmax.f32 %v2962_v4, %v2963_v49 }
 0x581   :  { %v2984_v58 = vrot.slane %v2983_v13, 1  ;;  %v7653_v51 = vmax.f32 %v2969_v45, %v2970_v22  ;;  %v7655_v21 = vmax.f32 %v2976_v35, %v2977_v38 }
 0x582   :  { %v2991_v3 = vrot.slane %v2990_v26, 1 }
 0x583   :  { %v7657_v8 = vmax.f32 %v2983_v13, %v2984_v58 }
 0x584   :  { %v7659_v11 = vmax.f32 %v2990_v26, %v2991_v3 }
 0x585   :  { %4612 = dma.done.wait [#allocation5 + $0x1], 32768 }
 0x586   :  { %4613 = vsyncadd [#allocation5 + $0x1], 4294934528  ;;  %v2998_v44 = vpack.c.bf16 %v7313_v10, %v7313_v10  ;;  %v3006_v37 = vpack.c.bf16 %v7361_v46, %v7361_v46  ;;  %v3014_v16 = vpack.c.bf16 %v7409_v52, %v7409_v52  ;;  %v3022_v60 = vpack.c.bf16 %v7457_v39, %v7457_v39  ;;  %v3062_v48 = vld [vmem:[#allocation3 + $0x8] sm:$0xff]  ;;  %v3064_v40 = vld [vmem:[#allocation3 + $0x18] sm:$0xff] }
 0x587   :  { %v3030_v14 = vpack.c.bf16 %v7505_v56, %v7505_v56  ;;  %v3038_v57 = vpack.c.bf16 %v7553_v27, %v7553_v27  ;;  %v3046_v1 = vpack.c.bf16 %v7601_v53, %v7601_v53  ;;  %v3054_v62 = vpack.c.bf16 %v2950_v36, %v2950_v36  ;;  %v3061_v53 = vld [vmem:[#allocation3] sm:$0xff]  ;;  %3524 = vmatprep.subr.bf16.mxu1 %v3062_v48  ;;  %v3063_v45 = vld [vmem:[#allocation3 + $0x10] sm:$0xff]  ;;  %v3066_v35 = vld [vmem:[#allocation3 + $0x28] sm:$0xff] }
 0x588   :  { %v3382_v42 = vunpack.c.l.b16 %v2998_v44  ;;  %v3390_v10 = vunpack.c.l.b16 %v3006_v37  ;;  %v3398_v9 = vunpack.c.l.b16 %v3014_v16  ;;  %v3406_v46 = vunpack.c.l.b16 %v3022_v60  ;;  %3688 = vmatprep.subr.bf16.mxu0 %v3064_v40  ;;  %v3068_v24 = vld [vmem:[#allocation3 + $0x38] sm:$0xff]  ;;  %3525 = vmatpush1.bf16.msra.mxu1 %v3061_v53  ;;  %v3065_v26 = vld [vmem:[#allocation3 + $0x20] sm:$0xff]  ;;  %v3067_v31 = vld [vmem:[#allocation3 + $0x30] sm:$0xff] }
 0x589   :  { %v3414_v50 = vunpack.c.l.b16 %v3030_v14  ;;  %vm3445_vm1 = vcmask 1041409   ;;  %vm3447_vm2 = vcmask 1042434   ;;  %vm3449_vm3 = vcmask 1043459   ;;  %3689 = vmatpush1.bf16.msra.mxu0 %v3063_v45  ;;  %3526 = vmatprep.subr.bf16.mxu1 %v3066_v35  ;;  %v3070_v22 = vld [vmem:[#allocation3 + $0x48] sm:$0xff]  ;;  %v3072_v38 = vld [vmem:[#allocation3 + $0x58] sm:$0xff]  ;;  %v3069_v3 = vld [vmem:[#allocation3 + $0x40] sm:$0xff] }
 0x58a   :  { %v3422_v52 = vunpack.c.l.b16 %v3038_v57  ;;  %vm3451_vm4 = vcmask 1044484   ;;  %v3459_v39 = vsel %vm3445_vm1, %v3390_v10, %v3382_v42  ;;  %v3430_v56 = vunpack.c.l.b16 %v3046_v1  ;;  %3690 = vmatprep.subr.bf16.mxu0 %v3068_v24  ;;  %v3071_v44 = vld [vmem:[#allocation3 + $0x50] sm:$0xff]  ;;  %v3074_v37 = vld [vmem:[#allocation3 + $0x68] sm:$0xff]  ;;  %v3076_v16 = vld [vmem:[#allocation3 + $0x78] sm:$0xff] }
 0x58b   :  { %vm3453_vm5 = vcmask 1045509   ;;  %v3460_v27 = vsel %vm3447_vm2, %v3398_v9, %v3459_v39  ;;  %v3438_v43 = vunpack.c.l.b16 %v3054_v62  ;;  %vm3455_vm6 = vcmask 1046534   ;;  %v3073_v60 = vld [vmem:[#allocation3 + $0x60] sm:$0xff]  ;;  %v3075_v14 = vld [vmem:[#allocation3 + $0x70] sm:$0xff]  ;;  %v3078_v57 = vld [vmem:[#allocation3 + $0x88] sm:$0xff] }
 0x58c   :  { %v3461_v4 = vsel %vm3449_vm3, %v3406_v46, %v3460_v27  ;;  %vm3457_vm7 = vcmask 1047559   ;;  %3527 = vmatpush1.bf16.msra.mxu1 %v3065_v26  ;;  %v3080_v1 = vld [vmem:[#allocation3 + $0x98] sm:$0xff]  ;;  %v3077_v42 = vld [vmem:[#allocation3 + $0x80] sm:$0xff]  ;;  %v3079_v10 = vld [vmem:[#allocation3 + $0x90] sm:$0xff]  ;;  %v2997_v26 = vpack.c.bf16 %v7311_v2, %v7311_v2 }
 0x58d   :  { %v3462_v32 = vsel %vm3451_vm4, %v3414_v50, %v3461_v4  ;;  %3691 = vmatpush1.bf16.msra.mxu0 %v3067_v31  ;;  %3528 = vmatprep.subr.bf16.mxu1 %v3070_v22  ;;  %v3082_v9 = vld [vmem:[#allocation3 + $0xa8] sm:$0xff]  ;;  %v3084_v62 = vld [vmem:[#allocation3 + $0xb8] sm:$0xff]  ;;  %v3081_v46 = vld [vmem:[#allocation3 + $0xa0] sm:$0xff]  ;;  %v3005_v31 = vpack.c.bf16 %v7359_v63, %v7359_v63  ;;  %v3021_v63 = vpack.c.bf16 %v7455_v12, %v7455_v12 }
 0x58e   :  { %v3463_v13 = vsel %vm3453_vm5, %v3422_v52, %v3462_v32  ;;  %3692 = vmatprep.subr.bf16.mxu0 %v3072_v38  ;;  %v3083_v50 = vld [vmem:[#allocation3 + $0xb0] sm:$0xff]  ;;  %v3086_v52 = vld [vmem:[#allocation3 + $0xc8] sm:$0xff]  ;;  %v3088_v39 = vld [vmem:[#allocation3 + $0xd8] sm:$0xff]  ;;  %v3013_v38 = vpack.c.bf16 %v7407_v25, %v7407_v25 }
 0x58f   :  { %v3464_v49 = vsel %vm3455_vm6, %v3430_v56, %v3463_v13  ;;  %v3085_v56 = vld [vmem:[#allocation3 + $0xc0] sm:$0xff]  ;;  %v3087_v27 = vld [vmem:[#allocation3 + $0xd0] sm:$0xff]  ;;  %v3090_v48 = vld [vmem:[#allocation3 + $0xe8] sm:$0xff] }
 0x590   :  { %v3465_v36 = vsel %vm3457_vm7, %v3438_v43, %v3464_v49  ;;  %3529 = vmatpush1.bf16.msra.mxu1 %v3069_v3  ;;  %v3092_v40 = vld [vmem:[#allocation3 + $0xf8] sm:$0xff]  ;;  %v3089_v53 = vld [vmem:[#allocation3 + $0xe0] sm:$0xff]  ;;  %v3091_v43 = vld [vmem:[#allocation3 + $0xf0] sm:$0xff] }
 0x591   :  { %v3509_v58 = vpack.c.b16 %v3465_v36, %v3465_v36  ;;  %3693 = vmatpush1.bf16.msra.mxu0 %v3071_v44  ;;  %3530 = vmatprep.subr.bf16.mxu1 %v3074_v37  ;;  %v3094_v4 = vld [vmem:[#allocation3 + $0x108] sm:$0xff]  ;;  %v3096_v45 = vld [vmem:[#allocation3 + $0x118] sm:$0xff]  ;;  %v3093_v35 = vld [vmem:[#allocation3 + $0x100] sm:$0xff]  ;;  %v3000_v36 = vpack.c.bf16 %v7317_v17, %v7317_v17  ;;  %v3381_v44 = vunpack.c.l.b16 %v2997_v26  ;;  %v3389_v37 = vunpack.c.l.b16 %v3005_v31 }
 0x592   :  { %3694 = vmatprep.subr.bf16.mxu0 %v3076_v16  ;;  %v3095_v24 = vld [vmem:[#allocation3 + $0x110] sm:$0xff]  ;;  %v3098_v32 = vld [vmem:[#allocation3 + $0x128] sm:$0xff]  ;;  %v3100_v13 = vld [vmem:[#allocation3 + $0x138] sm:$0xff]  ;;  %v3016_v16 = vpack.c.bf16 %v7413_v41, %v7413_v41  ;;  %v3397_v17 = vunpack.c.l.b16 %v3013_v38  ;;  %v3405_v41 = vunpack.c.l.b16 %v3021_v63 }
 0x593   :  { %3556 = vmatprep.mubr.bf16.mxu1 %v3509_v58  ;;  %3720 = vmatprep.mubr.bf16.mxu0 %v3509_v58  ;;  %v3097_v49 = vld [vmem:[#allocation3 + $0x120] sm:$0xff]  ;;  %v3099_v22 = vld [vmem:[#allocation3 + $0x130] sm:$0xff]  ;;  %v3008_v58 = vpack.c.bf16 %v7365_v54, %v7365_v54  ;;  %v3102_v3 = vld [vmem:[#allocation3 + $0x148] sm:$0xff] }
 0x594   :  { %3531 = vmatpush1.bf16.msra.mxu1 %v3073_v60  ;;  %v3104_v2 = vld [vmem:[#allocation3 + $0x158] sm:$0xff]  ;;  %v3101_v25 = vld [vmem:[#allocation3 + $0x140] sm:$0xff]  ;;  %v3103_v60 = vld [vmem:[#allocation3 + $0x150] sm:$0xff] }
 0x595   :  { %3695 = vmatpush1.bf16.msra.mxu0 %v3075_v14  ;;  %3532 = vmatprep.subr.bf16.mxu1 %v3078_v57  ;;  %v3384_v14 = vunpack.c.l.b16 %v3000_v36  ;;  %v3392_v57 = vunpack.c.l.b16 %v3008_v58  ;;  %v3106_v54 = vld [vmem:[#allocation3 + $0x168] sm:$0xff]  ;;  %v3116_v26 = vld [vmem:[#allocation3 + $0x1b8] sm:$0xff]  ;;  %v3053_v36 = vpack.c.bf16 %v7647_v29, %v7647_v29  ;;  %v3048_v58 = vpack.c.bf16 %v7605_v0, %v7605_v0  ;;  %v3117_v0 = vld [vmem:[#allocation3 + $0x1c0] sm:$0xff] }
 0x596   :  { %3696 = vmatprep.subr.bf16.mxu0 %v3080_v1  ;;  %v3108_v1 = vld [vmem:[#allocation3 + $0x178] sm:$0xff] }
 0x597   :  { %v3437_v29 = vunpack.c.l.b16 %v3053_v36  ;;  %v3145_v36 = vld [vmem:[#allocation3 + $0x2a0] sm:$0xff] }
 0x598   :  { %3533 = vmatpush1.bf16.msra.mxu1 %v3077_v42  ;;  %v3446_v42 = vsel %vm3445_vm1, %v3389_v37, %v3381_v44  ;;  %v3118_v44 = vld [vmem:[#allocation3 + $0x1c8] sm:$0xff]  ;;  %v3120_v37 = vld [vmem:[#allocation3 + $0x1d8] sm:$0xff] }
 0x599   :  { %3697 = vmatpush1.bf16.msra.mxu0 %v3079_v10  ;;  %3534 = vmatprep.subr.bf16.mxu1 %v3082_v9  ;;  %v3029_v10 = vpack.c.bf16 %v7503_v30, %v7503_v30  ;;  %v8962_v9 = vld [vmem:[#allocation75_spill] sm:$0xff]  ;;  %v3037_v30 = vpack.c.bf16 %v7551_v7, %v7551_v7  ;;  %v3040_v7 = vpack.c.bf16 %v7557_v47, %v7557_v47  ;;  %v3115_v47 = vld [vmem:[#allocation3 + $0x1b0] sm:$0xff] }
 0x59a   :  { %3698 = vmatprep.subr.bf16.mxu0 %v3084_v62  ;;  %v3024_v12 = vpack.c.bf16 %v8962_v9, %v8962_v9  ;;  %v3400_v62 = vunpack.c.l.b16 %v3016_v16  ;;  %v3121_v9 = vld [vmem:[#allocation3 + $0x1e0] sm:$0xff] }
 0x59b   :  { %v3421_v31 = vunpack.c.l.b16 %v3037_v30 }
 0x59c   :  { %3535 = vmatpush1.bf16.msra.mxu1 %v3081_v46  ;;  %v3105_v46 = vld [vmem:[#allocation3 + $0x160] sm:$0xff] }
 0x59d   :  { %3699 = vmatpush1.bf16.msra.mxu0 %v3083_v50  ;;  %3536 = vmatprep.subr.bf16.mxu1 %v3086_v52  ;;  %v3107_v50 = vld [vmem:[#allocation3 + $0x170] sm:$0xff]  ;;  %v3448_v52 = vsel %vm3447_vm2, %v3397_v17, %v3446_v42 }
 0x59e   :  { %3700 = vmatprep.subr.bf16.mxu0 %v3088_v39  ;;  %v3473_v39 = vsel %vm3445_vm1, %v3392_v57, %v3384_v14  ;;  %v3119_v17 = vld [vmem:[#allocation3 + $0x1d0] sm:$0xff] }
 0x5a0   :  { %3537 = vmatpush1.bf16.msra.mxu1 %v3085_v56  ;;  %v3110_v56 = vld [vmem:[#allocation3 + $0x188] sm:$0xff] }
 0x5a1   :  { %3701 = vmatpush1.bf16.msra.mxu0 %v3087_v27  ;;  %3538 = vmatprep.subr.bf16.mxu1 %v3090_v48  ;;  %v3112_v27 = vld [vmem:[#allocation3 + $0x198] sm:$0xff]  ;;  %v8963_v48 = vld [vmem:[#allocation123_spill] sm:$0xff] }
 0x5a2   :  { %3702 = vmatprep.subr.bf16.mxu0 %v3092_v40  ;;  %v3032_v40 = vpack.c.bf16 %v8963_v48, %v8963_v48  ;;  %v3129_v48 = vld [vmem:[#allocation3 + $0x220] sm:$0xff] }
 0x5a4   :  { %3539 = vmatpush1.bf16.msra.mxu1 %v3089_v53  ;;  %v3413_v53 = vunpack.c.l.b16 %v3029_v10 }
 0x5a5   :  { %3703 = vmatpush1.bf16.msra.mxu0 %v3091_v43  ;;  %3540 = vmatprep.subr.bf16.mxu1 %v3094_v4  ;;  %v3408_v43 = vunpack.c.l.b16 %v3024_v12  ;;  %v3450_v4 = vsel %vm3449_vm3, %v3405_v41, %v3448_v52  ;;  %v3123_v12 = vld [vmem:[#allocation3 + $0x1f0] sm:$0xff]  ;;  %v3126_v41 = vld [vmem:[#allocation3 + $0x208] sm:$0xff]  ;;  %v3125_v52 = vld [vmem:[#allocation3 + $0x200] sm:$0xff] }
 0x5a6   :  { %3704 = vmatprep.subr.bf16.mxu0 %v3096_v45  ;;  %v3474_v45 = vsel %vm3447_vm2, %v3400_v62, %v3473_v39  ;;  %v3128_v62 = vld [vmem:[#allocation3 + $0x218] sm:$0xff]  ;;  %v3127_v39 = vld [vmem:[#allocation3 + $0x210] sm:$0xff] }
 0x5a7   :  { %v3475_v38 = vsel %vm3449_vm3, %v3408_v43, %v3474_v45  ;;  %v3136_v43 = vld [vmem:[#allocation3 + $0x258] sm:$0xff]  ;;  %v3135_v45 = vld [vmem:[#allocation3 + $0x250] sm:$0xff] }
 0x5a8   :  { %3541 = vmatpush1.bf16.msra.mxu1 %v3093_v35  ;;  %v3109_v35 = vld [vmem:[#allocation3 + $0x180] sm:$0xff] }
 0x5a9   :  { %3705 = vmatpush1.bf16.msra.mxu0 %v3095_v24  ;;  %3542 = vmatprep.subr.bf16.mxu1 %v3098_v32  ;;  %v3111_v24 = vld [vmem:[#allocation3 + $0x190] sm:$0xff]  ;;  %v3045_v32 = vpack.c.bf16 %v7599_v23, %v7599_v23  ;;  %v3113_v23 = vld [vmem:[#allocation3 + $0x1a0] sm:$0xff] }
 0x5aa   :  { %3706 = vmatprep.subr.bf16.mxu0 %v3100_v13  ;;  %v3114_v13 = vld [vmem:[#allocation3 + $0x1a8] sm:$0xff] }
 0x5ac   :  { %3543 = vmatpush1.bf16.msra.mxu1 %v3097_v49  ;;  %v3416_v49 = vunpack.c.l.b16 %v3032_v40  ;;  %v3131_v40 = vld [vmem:[#allocation3 + $0x230] sm:$0xff] }
 0x5ad   :  { %3707 = vmatpush1.bf16.msra.mxu0 %v3099_v22  ;;  %3544 = vmatprep.subr.bf16.mxu1 %v3102_v3  ;;  %v3452_v22 = vsel %vm3451_vm4, %v3413_v53, %v3450_v4  ;;  %v3429_v3 = vunpack.c.l.b16 %v3045_v32  ;;  %v3134_v53 = vld [vmem:[#allocation3 + $0x248] sm:$0xff]  ;;  %v3133_v4 = vld [vmem:[#allocation3 + $0x240] sm:$0xff] }
 0x5ae   :  { %3708 = vmatprep.subr.bf16.mxu0 %v3104_v2  ;;  %v3424_v2 = vunpack.c.l.b16 %v3040_v7  ;;  %v3454_v63 = vsel %vm3453_vm5, %v3421_v31, %v3452_v22  ;;  %v3476_v16 = vsel %vm3451_vm4, %v3416_v49, %v3475_v38  ;;  %v3137_v32 = vld [vmem:[#allocation3 + $0x260] sm:$0xff]  ;;  %v3139_v7 = vld [vmem:[#allocation3 + $0x270] sm:$0xff]  ;;  %v3146_v22 = vld [vmem:[#allocation3 + $0x2a8] sm:$0xff] }
 0x5af   :  { %v3456_v14 = vsel %vm3455_vm6, %v3429_v3, %v3454_v63  ;;  %v3141_v31 = vld [vmem:[#allocation3 + $0x280] sm:$0xff]  ;;  %v3143_v49 = vld [vmem:[#allocation3 + $0x290] sm:$0xff]  ;;  %v3148_v38 = vld [vmem:[#allocation3 + $0x2b8] sm:$0xff] }
 0x5b0   :  { %3545 = vmatpush1.bf16.msra.mxu1 %v3101_v25  ;;  %v3056_v25 = vpack.c.bf16 %v7651_v18, %v7651_v18  ;;  %v3477_v57 = vsel %vm3453_vm5, %v3424_v2, %v3476_v16  ;;  %v3458_v10 = vsel %vm3457_vm7, %v3437_v29, %v3456_v14  ;;  %v3149_v3 = vld [vmem:[#allocation3 + $0x2c0] sm:$0xff]  ;;  %v3151_v2 = vld [vmem:[#allocation3 + $0x2d0] sm:$0xff]  ;;  %v3160_v29 = vld [vmem:[#allocation3 + $0x318] sm:$0xff] }
 0x5b1   :  { %3709 = vmatpush1.bf16.msra.mxu0 %v3103_v60  ;;  %3546 = vmatprep.subr.bf16.mxu1 %v3106_v54  ;;  %v3432_v60 = vunpack.c.l.b16 %v3048_v58  ;;  %v3122_v54 = vld [vmem:[#allocation3 + $0x1e8] sm:$0xff]  ;;  %v3147_v58 = vld [vmem:[#allocation3 + $0x2b0] sm:$0xff]  ;;  %v3153_v63 = vld [vmem:[#allocation3 + $0x2e0] sm:$0xff] }
 0x5b2   :  { %3710 = vmatprep.subr.bf16.mxu0 %v3108_v1  ;;  %v3124_v1 = vld [vmem:[#allocation3 + $0x1f8] sm:$0xff]  ;;  %v3440_v42 = vunpack.c.l.b16 %v3056_v25  ;;  %v3155_v16 = vld [vmem:[#allocation3 + $0x2f0] sm:$0xff]  ;;  %v3158_v25 = vld [vmem:[#allocation3 + $0x308] sm:$0xff] }
 0x5b3   :  { %v3478_v18 = vsel %vm3455_vm6, %v3432_v60, %v3477_v57  ;;  %v3157_v60 = vld [vmem:[#allocation3 + $0x300] sm:$0xff]  ;;  %v3164_v14 = vld [vmem:[#allocation3 + $0x338] sm:$0xff]  ;;  %v8964_v57 = vld [vmem:[#allocation67_spill] sm:$0xff] }
 0x5b4   :  { %3547 = vmatpush1.bf16.msra.mxu1 %v3105_v46  ;;  %v3508_v46 = vpack.c.b16 %v3458_v10, %v3458_v10  ;;  %v3161_v10 = vld [vmem:[#allocation3 + $0x320] sm:$0xff] }
 0x5b5   :  { %3711 = vmatpush1.bf16.msra.mxu0 %v3107_v50  ;;  %3548 = vmatprep.subr.bf16.mxu1 %v3110_v56  ;;  %v3479_v50 = vsel %vm3457_vm7, %v3440_v42, %v3478_v18  ;;  %v3130_v56 = vld [vmem:[#allocation3 + $0x228] sm:$0xff]  ;;  %v3163_v18 = vld [vmem:[#allocation3 + $0x330] sm:$0xff] }
 0x5b6   :  { %3712 = vmatprep.subr.bf16.mxu0 %v3112_v27  ;;  %v3132_v27 = vld [vmem:[#allocation3 + $0x238] sm:$0xff]  ;;  %v3511_v30 = vpack.c.b16 %v3479_v50, %v3479_v50 }
 0x5b8   :  { %3549 = vmatpush1.bf16.msra.mxu1 %v3109_v35  ;;  %v3138_v35 = vld [vmem:[#allocation3 + $0x268] sm:$0xff] }
 0x5b9   :  { %3713 = vmatpush1.bf16.msra.mxu0 %v3111_v24  ;;  %3550 = vmatprep.subr.bf16.mxu1 %v3114_v13  ;;  %v3140_v24 = vld [vmem:[#allocation3 + $0x278] sm:$0xff]  ;;  %v3142_v13 = vld [vmem:[#allocation3 + $0x288] sm:$0xff] }
 0x5ba   :  { %3714 = vmatprep.subr.bf16.mxu0 %v3116_v26  ;;  %v3144_v26 = vld [vmem:[#allocation3 + $0x298] sm:$0xff] }
 0x5bc   :  { %3551 = vmatpush1.bf16.msra.mxu1 %v3113_v23  ;;  %v3150_v23 = vld [vmem:[#allocation3 + $0x2c8] sm:$0xff] }
 0x5bd   :  { %3715 = vmatpush1.bf16.msra.mxu0 %v3115_v47  ;;  %3552 = vmatprep.subr.bf16.mxu1 %v3118_v44  ;;  %v3152_v47 = vld [vmem:[#allocation3 + $0x2d8] sm:$0xff]  ;;  %v3154_v44 = vld [vmem:[#allocation3 + $0x2e8] sm:$0xff] }
 0x5be   :  { %3716 = vmatprep.subr.bf16.mxu0 %v3120_v37  ;;  %v3156_v37 = vld [vmem:[#allocation3 + $0x2f8] sm:$0xff] }
 0x5c0   :  { %3553 = vmatpush1.bf16.msra.mxu1 %v3117_v0  ;;  %v3159_v0 = vld [vmem:[#allocation3 + $0x310] sm:$0xff] }
 0x5c1   :  { %3717 = vmatpush1.bf16.msra.mxu0 %v3119_v17  ;;  %3554 = vmatprep.subr.bf16.mxu1 %v3122_v54  ;;  %v3162_v17 = vld [vmem:[#allocation3 + $0x328] sm:$0xff]  ;;  %v2999_v54 = vpack.c.bf16 %v8964_v57, %v8964_v57  ;;  %v3047_v57 = vpack.c.bf16 %v7603_v33, %v7603_v33  ;;  %v3177_v33 = vld [vmem:[#allocation3 + $0x3a0] sm:$0xff] }
 0x5c2   :  { %3718 = vmatprep.subr.bf16.mxu0 %v3124_v1  ;;  %v8965_v1 = vld [vmem:[#allocation60_spill] sm:$0xff] }
 0x5c3   :  { %v3007_v42 = vpack.c.bf16 %v8965_v1, %v8965_v1  ;;  %v3180_v1 = vld [vmem:[#allocation3 + $0x3b8] sm:$0xff] }
 0x5c4   :  { %3555 = vmatpush1.bf16.msra.mxu1 %v3121_v9  ;;  %v8966_v9 = vld [vmem:[#allocation129_spill] sm:$0xff] }
 0x5c5   :  { %3719 = vmatpush1.bf16.msra.mxu0 %v3123_v12  ;;  %3565 = vmatprep.subr.bf16.mxu1 %v3126_v41  ;;  %v3015_v12 = vpack.c.bf16 %v8966_v9, %v8966_v9  ;;  %v8967_v41 = vld [vmem:[#allocation127_spill] sm:$0xff] }
 0x5c6   :  { %3729 = vmatprep.subr.bf16.mxu0 %v3128_v62  ;;  %v3002_v62 = vpack.c.bf16 %v8967_v41, %v8967_v41  ;;  %v3050_v41 = vpack.c.bf16 %v7609_v28, %v7609_v28  ;;  %v3181_v28 = vld [vmem:[#allocation3 + $0x3c0] sm:$0xff] }
 0x5c7   :  { %3557 = vmatmul.mubr.bf16.vlgmr.msra.gmra.mrb[48].mxu1 %v3508_v46 }
 0x5c8   :  { %3721 = vmatmul.mubr.bf16.vlgmr.msra.gmra.mrb[96].mxu0 %v3508_v46  ;;  %3566 = vmatpush1.bf16.msra.mxu1 %v3125_v52  ;;  %v8968_v46 = vld [vmem:[#allocation101_spill] sm:$0xff]  ;;  %v3166_v52 = vld [vmem:[#allocation3 + $0x348] sm:$0xff] }
 0x5c9   :  { %3730 = vmatpush1.bf16.msra.mxu0 %v3127_v39  ;;  %3567 = vmatprep.subr.bf16.mxu1 %v3130_v56  ;;  %v3010_v50 = vpack.c.bf16 %v8968_v46, %v8968_v46  ;;  %v3168_v39 = vld [vmem:[#allocation3 + $0x358] sm:$0xff]  ;;  %v3383_v56 = vunpack.c.l.b16 %v2999_v54  ;;  %v3178_v54 = vld [vmem:[#allocation3 + $0x3a8] sm:$0xff] }
 0x5ca   :  { %3731 = vmatprep.subr.bf16.mxu0 %v3132_v27  ;;  %3597 = vmatprep.mubr.bf16.mxu1 %v3511_v30  ;;  %v3391_v27 = vunpack.c.l.b16 %v3007_v42 }
 0x5cb   :  { %3761 = vmatprep.mubr.bf16.mxu0 %v3511_v30  ;;  %v8969_v30 = vld [vmem:[#allocation103_spill] sm:$0xff] }
 0x5cc   :  { %3568 = vmatpush1.bf16.msra.mxu1 %v3129_v48  ;;  %v3023_v48 = vpack.c.bf16 %v8969_v30, %v8969_v30  ;;  %v3434_v30 = vunpack.c.l.b16 %v3050_v41  ;;  %v3220_v41 = vld [vmem:[#allocation3 + $0x4f8] sm:$0xff] }
 0x5cd   :  { %3732 = vmatpush1.bf16.msra.mxu0 %v3131_v40  ;;  %3569 = vmatprep.subr.bf16.mxu1 %v3134_v53  ;;  %v8970_v40 = vld [vmem:[#allocation64_spill] sm:$0xff] }
 0x5ce   :  { %3733 = vmatprep.subr.bf16.mxu0 %v3136_v43  ;;  %v3018_v53 = vpack.c.bf16 %v8970_v40, %v8970_v40  ;;  %v3165_v43 = vld [vmem:[#allocation3 + $0x340] sm:$0xff] }
 0x5d0   :  { %3570 = vmatpush1.bf16.msra.mxu1 %v3133_v4  ;;  %v3167_v4 = vld [vmem:[#allocation3 + $0x350] sm:$0xff] }
 0x5d1   :  { %3734 = vmatpush1.bf16.msra.mxu0 %v3135_v45  ;;  %3571 = vmatprep.subr.bf16.mxu1 %v3138_v35  ;;  %v3399_v45 = vunpack.c.l.b16 %v3015_v12  ;;  %v3386_v35 = vunpack.c.l.b16 %v3002_v62  ;;  %v3055_v12 = vpack.c.bf16 %v7649_v61, %v7649_v61  ;;  %v3431_v62 = vunpack.c.l.b16 %v3047_v57  ;;  %v3210_v57 = vld [vmem:[#allocation3 + $0x4a8] sm:$0xff] }
 0x5d2   :  { %3735 = vmatprep.subr.bf16.mxu0 %v3140_v24  ;;  %v3394_v24 = vunpack.c.l.b16 %v3010_v50  ;;  %v3182_v50 = vld [vmem:[#allocation3 + $0x3c8] sm:$0xff] }
 0x5d3   :  { %v3439_v61 = vunpack.c.l.b16 %v3055_v12  ;;  %v3218_v12 = vld [vmem:[#allocation3 + $0x4e8] sm:$0xff] }
 0x5d4   :  { %3572 = vmatpush1.bf16.msra.mxu1 %v3137_v32  ;;  %v3170_v32 = vld [vmem:[#allocation3 + $0x368] sm:$0xff] }
 0x5d5   :  { %3736 = vmatpush1.bf16.msra.mxu0 %v3139_v7  ;;  %3573 = vmatprep.subr.bf16.mxu1 %v3142_v13  ;;  %v3172_v7 = vld [vmem:[#allocation3 + $0x378] sm:$0xff]  ;;  %v3466_v13 = vsel %vm3445_vm1, %v3391_v27, %v3383_v56  ;;  %v3058_v27 = vpack.c.bf16 %v7655_v21, %v7655_v21 }
 0x5d6   :  { %3737 = vmatprep.subr.bf16.mxu0 %v3144_v26  ;;  %v8971_v26 = vld [vmem:[#allocation61_spill] sm:$0xff] }
 0x5d8   :  { %3574 = vmatpush1.bf16.msra.mxu1 %v3141_v31  ;;  %v3031_v31 = vpack.c.bf16 %v8971_v26, %v8971_v26 }
 0x5d9   :  { %3738 = vmatpush1.bf16.msra.mxu0 %v3143_v49  ;;  %3575 = vmatprep.subr.bf16.mxu1 %v3146_v22  ;;  %v8972_v49 = vld [vmem:[#allocation94_spill] sm:$0xff] }
 0x5da   :  { %3739 = vmatprep.subr.bf16.mxu0 %v3148_v38  ;;  %v3026_v22 = vpack.c.bf16 %v8972_v49, %v8972_v49  ;;  %v3407_v38 = vunpack.c.l.b16 %v3023_v48  ;;  %v3183_v48 = vld [vmem:[#allocation3 + $0x3d0] sm:$0xff]  ;;  %v3189_v49 = vld [vmem:[#allocation3 + $0x400] sm:$0xff] }
 0x5dc   :  { %3576 = vmatpush1.bf16.msra.mxu1 %v3145_v36  ;;  %v3402_v36 = vunpack.c.l.b16 %v3018_v53 }
 0x5dd   :  { %3740 = vmatpush1.bf16.msra.mxu0 %v3147_v58  ;;  %3577 = vmatprep.subr.bf16.mxu1 %v3150_v23  ;;  %v3169_v58 = vld [vmem:[#allocation3 + $0x360] sm:$0xff]  ;;  %v3171_v23 = vld [vmem:[#allocation3 + $0x370] sm:$0xff] }
 0x5de   :  { %3741 = vmatprep.subr.bf16.mxu0 %v3152_v47  ;;  %v3467_v47 = vsel %vm3447_vm2, %v3399_v45, %v3466_v13  ;;  %v3442_v45 = vunpack.c.l.b16 %v3058_v27  ;;  %v3192_v13 = vld [vmem:[#allocation3 + $0x418] sm:$0xff] }
 0x5df   :  { %v8974_v27 = vld [vmem:[#allocation69_spill] sm:$0xff] }
 0x5e0   :  { %3578 = vmatpush1.bf16.msra.mxu1 %v3149_v3  ;;  %v3487_v3 = vsel %vm3445_vm1, %v3394_v24, %v3386_v35  ;;  %v3185_v24 = vld [vmem:[#allocation3 + $0x3e0] sm:$0xff] }
 0x5e1   :  { %3742 = vmatpush1.bf16.msra.mxu0 %v3151_v2  ;;  %3579 = vmatprep.subr.bf16.mxu1 %v3154_v44  ;;  %v3174_v2 = vld [vmem:[#allocation3 + $0x388] sm:$0xff]  ;;  %v3176_v44 = vld [vmem:[#allocation3 + $0x398] sm:$0xff] }
 0x5e2   :  { %3743 = vmatprep.subr.bf16.mxu0 %v3156_v37  ;;  %v3039_v37 = vpack.c.bf16 %v7555_v5, %v7555_v5  ;;  %v3042_v5 = vpack.c.bf16 %v7561_v6, %v7561_v6  ;;  %v3179_v6 = vld [vmem:[#allocation3 + $0x3b0] sm:$0xff] }
 0x5e4   :  { %3580 = vmatpush1.bf16.msra.mxu1 %v3153_v63  ;;  %v8973_v63 = vld [vmem:[#allocation50_spill] sm:$0xff]  ;;  %v3423_v42 = vunpack.c.l.b16 %v3039_v37  ;;  %v3426_v46 = vunpack.c.l.b16 %v3042_v5  ;;  %v3199_v37 = vld [vmem:[#allocation3 + $0x450] sm:$0xff]  ;;  %v3212_v5 = vld [vmem:[#allocation3 + $0x4b8] sm:$0xff] }
 0x5e5   :  { %3744 = vmatpush1.bf16.msra.mxu0 %v3155_v16  ;;  %3581 = vmatprep.subr.bf16.mxu1 %v3158_v25  ;;  %v3034_v16 = vpack.c.bf16 %v8973_v63, %v8973_v63  ;;  %v3415_v25 = vunpack.c.l.b16 %v3031_v31  ;;  %v3202_v63 = vld [vmem:[#allocation3 + $0x468] sm:$0xff] }
 0x5e6   :  { %3745 = vmatprep.subr.bf16.mxu0 %v3160_v29  ;;  %v3410_v29 = vunpack.c.l.b16 %v3026_v22  ;;  %v3191_v22 = vld [vmem:[#allocation3 + $0x410] sm:$0xff] }
 0x5e8   :  { %3582 = vmatpush1.bf16.msra.mxu1 %v3157_v60  ;;  %v3468_v60 = vsel %vm3449_vm3, %v3407_v38, %v3467_v47  ;;  %v3194_v38 = vld [vmem:[#allocation3 + $0x428] sm:$0xff]  ;;  %v3195_v47 = vld [vmem:[#allocation3 + $0x430] sm:$0xff] }
 0x5e9   :  { %3746 = vmatpush1.bf16.msra.mxu0 %v3159_v0  ;;  %3583 = vmatprep.subr.bf16.mxu1 %v3162_v17  ;;  %v3488_v0 = vsel %vm3447_vm2, %v3402_v36, %v3487_v3  ;;  %v3173_v17 = vld [vmem:[#allocation3 + $0x380] sm:$0xff]  ;;  %v3196_v36 = vld [vmem:[#allocation3 + $0x438] sm:$0xff]  ;;  %v3198_v3 = vld [vmem:[#allocation3 + $0x448] sm:$0xff] }
 0x5ea   :  { %3747 = vmatprep.subr.bf16.mxu0 %v3164_v14  ;;  %v3175_v14 = vld [vmem:[#allocation3 + $0x390] sm:$0xff]  ;;  %v3489_v9 = vsel %vm3449_vm3, %v3410_v29, %v3488_v0  ;;  %v3208_v0 = vld [vmem:[#allocation3 + $0x498] sm:$0xff] }
 0x5eb   :  { %v3203_v29 = vld [vmem:[#allocation3 + $0x470] sm:$0xff] }
 0x5ec   :  { %3584 = vmatpush1.bf16.msra.mxu1 %v3161_v10  ;;  %v3418_v10 = vunpack.c.l.b16 %v3034_v16  ;;  %v3204_v16 = vld [vmem:[#allocation3 + $0x478] sm:$0xff] }
 0x5ed   :  { %3748 = vmatpush1.bf16.msra.mxu0 %v3163_v18  ;;  %3585 = vmatprep.subr.bf16.mxu1 %v3166_v52  ;;  %v3469_v18 = vsel %vm3451_vm4, %v3415_v25, %v3468_v60  ;;  %v3184_v52 = vld [vmem:[#allocation3 + $0x3d8] sm:$0xff]  ;;  %v3201_v25 = vld [vmem:[#allocation3 + $0x460] sm:$0xff]  ;;  %v3206_v60 = vld [vmem:[#allocation3 + $0x488] sm:$0xff] }
 0x5ee   :  { %3749 = vmatprep.subr.bf16.mxu0 %v3168_v39  ;;  %v3470_v39 = vsel %vm3453_vm5, %v3423_v42, %v3469_v18  ;;  %v3490_v56 = vsel %vm3451_vm4, %v3418_v10, %v3489_v9  ;;  %v3214_v42 = vld [vmem:[#allocation3 + $0x4c8] sm:$0xff]  ;;  %v3216_v10 = vld [vmem:[#allocation3 + $0x4d8] sm:$0xff]  ;;  %v3213_v18 = vld [vmem:[#allocation3 + $0x4c0] sm:$0xff] }
 0x5ef   :  { %v3471_v40 = vsel %vm3455_vm6, %v3431_v62, %v3470_v39  ;;  %v3491_v53 = vsel %vm3453_vm5, %v3426_v46, %v3490_v56  ;;  %v3215_v9 = vld [vmem:[#allocation3 + $0x4d0] sm:$0xff]  ;;  %v3222_v62 = vld [vmem:[#allocation3 + $0x508] sm:$0xff]  ;;  %v3224_v46 = vld [vmem:[#allocation3 + $0x518] sm:$0xff] }
 0x5f0   :  { %3586 = vmatpush1.bf16.msra.mxu1 %v3165_v43  ;;  %v3186_v43 = vld [vmem:[#allocation3 + $0x3e8] sm:$0xff]  ;;  %v3472_v35 = vsel %vm3457_vm7, %v3439_v61, %v3471_v40  ;;  %v3492_v21 = vsel %vm3455_vm6, %v3434_v30, %v3491_v53  ;;  %v3228_v56 = vld [vmem:[#allocation3 + $0x538] sm:$0xff]  ;;  %v3001_v61 = vpack.c.bf16 %v8974_v27, %v8974_v27  ;;  %v8975_v30 = vld [vmem:[#allocation100_spill] sm:$0xff] }
 0x5f1   :  { %3750 = vmatpush1.bf16.msra.mxu0 %v3167_v4  ;;  %3587 = vmatprep.subr.bf16.mxu1 %v3170_v32  ;;  %v3188_v4 = vld [vmem:[#allocation3 + $0x3f8] sm:$0xff]  ;;  %v3187_v32 = vld [vmem:[#allocation3 + $0x3f0] sm:$0xff]  ;;  %v3510_v26 = vpack.c.b16 %v3472_v35, %v3472_v35  ;;  %v3493_v31 = vsel %vm3457_vm7, %v3442_v45, %v3492_v21  ;;  %v3226_v39 = vld [vmem:[#allocation3 + $0x528] sm:$0xff] }
 0x5f2   :  { %3751 = vmatprep.subr.bf16.mxu0 %v3172_v7  ;;  %v3190_v7 = vld [vmem:[#allocation3 + $0x408] sm:$0xff]  ;;  %v3227_v40 = vld [vmem:[#allocation3 + $0x530] sm:$0xff]  ;;  %v8976_v53 = vld [vmem:[#allocation130_spill] sm:$0xff] }
 0x5f3   :  { %v8978_v35 = vld [vmem:[#allocation71_spill] sm:$0xff] }
 0x5f4   :  { %3588 = vmatpush1.bf16.msra.mxu1 %v3169_v58  ;;  %v3513_v58 = vpack.c.b16 %v3493_v31, %v3493_v31  ;;  %v3012_v21 = vpack.c.bf16 %v8978_v35, %v8978_v35 }
 0x5f5   :  { %3752 = vmatpush1.bf16.msra.mxu0 %v3171_v23  ;;  %3589 = vmatprep.subr.bf16.mxu1 %v3174_v2  ;;  %v3193_v23 = vld [vmem:[#allocation3 + $0x420] sm:$0xff]  ;;  %v3200_v2 = vld [vmem:[#allocation3 + $0x458] sm:$0xff] }
 0x5f6   :  { %3753 = vmatprep.subr.bf16.mxu0 %v3176_v44  ;;  %v3197_v44 = vld [vmem:[#allocation3 + $0x440] sm:$0xff] }
 0x5f8   :  { %3590 = vmatpush1.bf16.msra.mxu1 %v3173_v17  ;;  %v3205_v17 = vld [vmem:[#allocation3 + $0x480] sm:$0xff] }
 0x5f9   :  { %3754 = vmatpush1.bf16.msra.mxu0 %v3175_v14  ;;  %3591 = vmatprep.subr.bf16.mxu1 %v3178_v54  ;;  %v3207_v14 = vld [vmem:[#allocation3 + $0x490] sm:$0xff]  ;;  %v3209_v54 = vld [vmem:[#allocation3 + $0x4a0] sm:$0xff] }
 0x5fa   :  { %3755 = vmatprep.subr.bf16.mxu0 %v3180_v1  ;;  %v3211_v1 = vld [vmem:[#allocation3 + $0x4b0] sm:$0xff] }
 0x5fc   :  { %3592 = vmatpush1.bf16.msra.mxu1 %v3177_v33  ;;  %v3217_v33 = vld [vmem:[#allocation3 + $0x4e0] sm:$0xff] }
 0x5fd   :  { %3756 = vmatpush1.bf16.msra.mxu0 %v3179_v6  ;;  %3593 = vmatprep.subr.bf16.mxu1 %v3182_v50  ;;  %v3219_v6 = vld [vmem:[#allocation3 + $0x4f0] sm:$0xff]  ;;  %v3221_v50 = vld [vmem:[#allocation3 + $0x500] sm:$0xff] }
 0x5fe   :  { %3757 = vmatprep.subr.bf16.mxu0 %v3184_v52  ;;  %v3223_v52 = vld [vmem:[#allocation3 + $0x510] sm:$0xff] }
 0x600   :  { %3594 = vmatpush1.bf16.msra.mxu1 %v3181_v28  ;;  %v3009_v28 = vpack.c.bf16 %v8975_v30, %v8975_v30  ;;  %v3052_v30 = vpack.c.bf16 %v7613_v15, %v7613_v15  ;;  %v3245_v15 = vld [vmem:[#allocation3 + $0x5c0] sm:$0xff] }
 0x601   :  { %3758 = vmatpush1.bf16.msra.mxu0 %v3183_v48  ;;  %3595 = vmatprep.subr.bf16.mxu1 %v3186_v43  ;;  %v3225_v48 = vld [vmem:[#allocation3 + $0x520] sm:$0xff]  ;;  %v3017_v43 = vpack.c.bf16 %v8976_v53, %v8976_v53  ;;  %v3248_v53 = vld [vmem:[#allocation3 + $0x5d8] sm:$0xff] }
 0x602   :  { %3759 = vmatprep.subr.bf16.mxu0 %v3188_v4  ;;  %v8977_v4 = vld [vmem:[#allocation58_spill] sm:$0xff]  ;;  %v3436_v35 = vunpack.c.l.b16 %v3052_v30  ;;  %v3287_v30 = vld [vmem:[#allocation3 + $0x710] sm:$0xff] }
 0x603   :  { %v3004_v45 = vpack.c.bf16 %v8977_v4, %v8977_v4 }
 0x604   :  { %3596 = vmatpush1.bf16.msra.mxu1 %v3185_v24  ;;  %v3230_v24 = vld [vmem:[#allocation3 + $0x548] sm:$0xff] }
 0x605   :  { %3760 = vmatpush1.bf16.msra.mxu0 %v3187_v32  ;;  %3606 = vmatprep.subr.bf16.mxu1 %v3190_v7  ;;  %v3232_v32 = vld [vmem:[#allocation3 + $0x558] sm:$0xff]  ;;  %v3385_v7 = vunpack.c.l.b16 %v3001_v61  ;;  %v3057_v61 = vpack.c.bf16 %v7653_v51, %v7653_v51 }
 0x606   :  { %3770 = vmatprep.subr.bf16.mxu0 %v3192_v13  ;;  %v3393_v13 = vunpack.c.l.b16 %v3009_v28 }
 0x607   :  { %3598 = vmatmul.mubr.bf16.vlgmr.msra.gmra.mrb[48].mxu1 %v3510_v26  ;;  %v3441_v51 = vunpack.c.l.b16 %v3057_v61  ;;  %v3285_v61 = vld [vmem:[#allocation3 + $0x700] sm:$0xff] }
 0x608   :  { %3762 = vmatmul.mubr.bf16.vlgmr.msra.gmra.mrb[96].mxu0 %v3510_v26  ;;  %3607 = vmatpush1.bf16.msra.mxu1 %v3189_v49  ;;  %v8979_v26 = vld [vmem:[#allocation49_spill] sm:$0xff]  ;;  %v8980_v49 = vld [vmem:[#allocation102_spill] sm:$0xff] }
 0x609   :  { %3771 = vmatpush1.bf16.msra.mxu0 %v3191_v22  ;;  %3608 = vmatprep.subr.bf16.mxu1 %v3194_v38  ;;  %v3025_v31 = vpack.c.bf16 %v8979_v26, %v8979_v26  ;;  %v3020_v22 = vpack.c.bf16 %v8980_v49, %v8980_v49  ;;  %v3229_v38 = vld [vmem:[#allocation3 + $0x540] sm:$0xff] }
 0x60a   :  { %3772 = vmatprep.subr.bf16.mxu0 %v3196_v36  ;;  %3638 = vmatprep.mubr.bf16.mxu1 %v3513_v58  ;;  %v3231_v36 = vld [vmem:[#allocation3 + $0x550] sm:$0xff]  ;;  %v3249_v49 = vld [vmem:[#allocation3 + $0x5e0] sm:$0xff] }
 0x60b   :  { %3802 = vmatprep.mubr.bf16.mxu0 %v3513_v58  ;;  %v3401_v58 = vunpack.c.l.b16 %v3017_v43 }
 0x60c   :  { %3609 = vmatpush1.bf16.msra.mxu1 %v3193_v23  ;;  %v3388_v23 = vunpack.c.l.b16 %v3004_v45  ;;  %v3060_v45 = vpack.c.bf16 %v7659_v11, %v7659_v11 }
 0x60d   :  { %3773 = vmatpush1.bf16.msra.mxu0 %v3195_v47  ;;  %3610 = vmatprep.subr.bf16.mxu1 %v3198_v3  ;;  %v3396_v47 = vunpack.c.l.b16 %v3012_v21  ;;  %v3234_v3 = vld [vmem:[#allocation3 + $0x568] sm:$0xff]  ;;  %v3247_v21 = vld [vmem:[#allocation3 + $0x5d0] sm:$0xff] }
 0x60e   :  { %3774 = vmatprep.subr.bf16.mxu0 %v3200_v2  ;;  %v3236_v2 = vld [vmem:[#allocation3 + $0x578] sm:$0xff]  ;;  %v3444_v26 = vunpack.c.l.b16 %v3060_v45 }
 0x60f   :  { %v8986_v45 = vld [vmem:[#allocation65_spill] sm:$0xff] }
 0x610   :  { %3611 = vmatpush1.bf16.msra.mxu1 %v3197_v44  ;;  %v3480_v44 = vsel %vm3445_vm1, %v3393_v13, %v3385_v7  ;;  %v3250_v7 = vld [vmem:[#allocation3 + $0x5e8] sm:$0xff]  ;;  %v3252_v13 = vld [vmem:[#allocation3 + $0x5f8] sm:$0xff] }
 0x611   :  { %3775 = vmatpush1.bf16.msra.mxu0 %v3199_v37  ;;  %3612 = vmatprep.subr.bf16.mxu1 %v3202_v63  ;;  %v8981_v37 = vld [vmem:[#allocation124_spill] sm:$0xff] }
 0x612   :  { %3776 = vmatprep.subr.bf16.mxu0 %v3204_v16  ;;  %v3033_v63 = vpack.c.bf16 %v8981_v37, %v8981_v37  ;;  %v8982_v16 = vld [vmem:[#allocation59_spill] sm:$0xff] }
 0x614   :  { %3613 = vmatpush1.bf16.msra.mxu1 %v3201_v25  ;;  %v3028_v25 = vpack.c.bf16 %v8982_v16, %v8982_v16  ;;  %v3259_v16 = vld [vmem:[#allocation3 + $0x630] sm:$0xff] }
 0x615   :  { %3777 = vmatpush1.bf16.msra.mxu0 %v3203_v29  ;;  %3614 = vmatprep.subr.bf16.mxu1 %v3206_v60  ;;  %v3409_v29 = vunpack.c.l.b16 %v3025_v31  ;;  %v3404_v60 = vunpack.c.l.b16 %v3020_v22  ;;  %v3251_v22 = vld [vmem:[#allocation3 + $0x5f0] sm:$0xff] }
 0x616   :  { %3778 = vmatprep.subr.bf16.mxu0 %v3208_v0  ;;  %v3233_v0 = vld [vmem:[#allocation3 + $0x560] sm:$0xff] }
 0x618   :  { %3615 = vmatpush1.bf16.msra.mxu1 %v3205_v17  ;;  %v3235_v17 = vld [vmem:[#allocation3 + $0x570] sm:$0xff] }
 0x619   :  { %3779 = vmatpush1.bf16.msra.mxu0 %v3207_v14  ;;  %3616 = vmatprep.subr.bf16.mxu1 %v3210_v57  ;;  %v3481_v14 = vsel %vm3447_vm2, %v3401_v58, %v3480_v44  ;;  %v3501_v57 = vsel %vm3445_vm1, %v3396_v47, %v3388_v23  ;;  %v3253_v47 = vld [vmem:[#allocation3 + $0x600] sm:$0xff]  ;;  %v3260_v44 = vld [vmem:[#allocation3 + $0x638] sm:$0xff] }
 0x61a   :  { %3780 = vmatprep.subr.bf16.mxu0 %v3212_v5  ;;  %v3238_v5 = vld [vmem:[#allocation3 + $0x588] sm:$0xff] }
 0x61c   :  { %3617 = vmatpush1.bf16.msra.mxu1 %v3209_v54  ;;  %v3240_v54 = vld [vmem:[#allocation3 + $0x598] sm:$0xff] }
 0x61d   :  { %3781 = vmatpush1.bf16.msra.mxu0 %v3211_v1  ;;  %3618 = vmatprep.subr.bf16.mxu1 %v3214_v42  ;;  %v3041_v1 = vpack.c.bf16 %v7559_v20, %v7559_v20  ;;  %v8983_v42 = vld [vmem:[#allocation96_spill] sm:$0xff]  ;;  %v3044_v20 = vpack.c.bf16 %v7565_v19, %v7565_v19 }
 0x61e   :  { %3782 = vmatprep.subr.bf16.mxu0 %v3216_v10  ;;  %v3036_v10 = vpack.c.bf16 %v8983_v42, %v8983_v42  ;;  %v3243_v19 = vld [vmem:[#allocation3 + $0x5b0] sm:$0xff]  ;;  %v3269_v42 = vld [vmem:[#allocation3 + $0x680] sm:$0xff] }
 0x620   :  { %3619 = vmatpush1.bf16.msra.mxu1 %v3213_v18  ;;  %v3417_v18 = vunpack.c.l.b16 %v3033_v63  ;;  %v3257_v63 = vld [vmem:[#allocation3 + $0x620] sm:$0xff] }
 0x621   :  { %3783 = vmatpush1.bf16.msra.mxu0 %v3215_v9  ;;  %3620 = vmatprep.subr.bf16.mxu1 %v3218_v12  ;;  %v3412_v9 = vunpack.c.l.b16 %v3028_v25  ;;  %v3482_v12 = vsel %vm3449_vm3, %v3409_v29, %v3481_v14  ;;  %v3262_v25 = vld [vmem:[#allocation3 + $0x648] sm:$0xff]  ;;  %v3264_v29 = vld [vmem:[#allocation3 + $0x658] sm:$0xff] }
 0x622   :  { %3784 = vmatprep.subr.bf16.mxu0 %v3220_v41  ;;  %v3502_v41 = vsel %vm3447_vm2, %v3404_v60, %v3501_v57  ;;  %v3261_v60 = vld [vmem:[#allocation3 + $0x640] sm:$0xff]  ;;  %v3268_v14 = vld [vmem:[#allocation3 + $0x678] sm:$0xff] }
 0x623   :  { %v3503_v27 = vsel %vm3449_vm3, %v3412_v9, %v3502_v41  ;;  %v3265_v57 = vld [vmem:[#allocation3 + $0x660] sm:$0xff]  ;;  %v3276_v9 = vld [vmem:[#allocation3 + $0x6b8] sm:$0xff]  ;;  %v3275_v41 = vld [vmem:[#allocation3 + $0x6b0] sm:$0xff] }
 0x624   :  { %3621 = vmatpush1.bf16.msra.mxu1 %v3217_v33  ;;  %v3237_v33 = vld [vmem:[#allocation3 + $0x580] sm:$0xff] }
 0x625   :  { %3785 = vmatpush1.bf16.msra.mxu0 %v3219_v6  ;;  %3622 = vmatprep.subr.bf16.mxu1 %v3222_v62  ;;  %v3239_v6 = vld [vmem:[#allocation3 + $0x590] sm:$0xff]  ;;  %v3049_v62 = vpack.c.bf16 %v7607_v59, %v7607_v59  ;;  %v3241_v59 = vld [vmem:[#allocation3 + $0x5a0] sm:$0xff] }
 0x626   :  { %3786 = vmatprep.subr.bf16.mxu0 %v3224_v46  ;;  %v3242_v46 = vld [vmem:[#allocation3 + $0x5a8] sm:$0xff] }
 0x627   :  { %v3433_v28 = vunpack.c.l.b16 %v3049_v62  ;;  %v3277_v62 = vld [vmem:[#allocation3 + $0x6c0] sm:$0xff] }
 0x628   :  { %3623 = vmatpush1.bf16.msra.mxu1 %v3221_v50  ;;  %v3244_v50 = vld [vmem:[#allocation3 + $0x5b8] sm:$0xff] }
 0x629   :  { %3787 = vmatpush1.bf16.msra.mxu0 %v3223_v52  ;;  %3624 = vmatprep.subr.bf16.mxu1 %v3226_v39  ;;  %v3425_v52 = vunpack.c.l.b16 %v3041_v1  ;;  %v3420_v39 = vunpack.c.l.b16 %v3036_v10  ;;  %v3272_v1 = vld [vmem:[#allocation3 + $0x698] sm:$0xff]  ;;  %v3271_v10 = vld [vmem:[#allocation3 + $0x690] sm:$0xff] }
 0x62a   :  { %3788 = vmatprep.subr.bf16.mxu0 %v3228_v56  ;;  %v3483_v56 = vsel %vm3451_vm4, %v3417_v18, %v3482_v12  ;;  %v3274_v18 = vld [vmem:[#allocation3 + $0x6a8] sm:$0xff]  ;;  %v3273_v12 = vld [vmem:[#allocation3 + $0x6a0] sm:$0xff] }
 0x62b   :  { %v3484_v43 = vsel %vm3453_vm5, %v3425_v52, %v3483_v56  ;;  %v3504_v4 = vsel %vm3451_vm4, %v3420_v39, %v3503_v27  ;;  %v3281_v52 = vld [vmem:[#allocation3 + $0x6e0] sm:$0xff]  ;;  %v3283_v39 = vld [vmem:[#allocation3 + $0x6f0] sm:$0xff]  ;;  %v3286_v56 = vld [vmem:[#allocation3 + $0x708] sm:$0xff] }
 0x62c   :  { %3625 = vmatpush1.bf16.msra.mxu1 %v3225_v48  ;;  %v3428_v48 = vunpack.c.l.b16 %v3044_v20  ;;  %v3279_v20 = vld [vmem:[#allocation3 + $0x6d0] sm:$0xff]  ;;  %v3288_v27 = vld [vmem:[#allocation3 + $0x718] sm:$0xff] }
 0x62d   :  { %3789 = vmatpush1.bf16.msra.mxu0 %v3227_v40  ;;  %3626 = vmatprep.subr.bf16.mxu1 %v3230_v24  ;;  %v3246_v40 = vld [vmem:[#allocation3 + $0x5c8] sm:$0xff]  ;;  %v3485_v24 = vsel %vm3455_vm6, %v3433_v28, %v3484_v43  ;;  %v8984_v28 = vld [vmem:[#allocation128_spill] sm:$0xff]  ;;  %v3289_v43 = vld [vmem:[#allocation3 + $0x720] sm:$0xff] }
 0x62e   :  { %3790 = vmatprep.subr.bf16.mxu0 %v3232_v32  ;;  %v3505_v32 = vsel %vm3453_vm5, %v3428_v48, %v3504_v4  ;;  %v3486_v31 = vsel %vm3457_vm7, %v3441_v51, %v3485_v24  ;;  %v3003_v48 = vpack.c.bf16 %v8984_v28, %v8984_v28  ;;  %v3291_v4 = vld [vmem:[#allocation3 + $0x730] sm:$0xff]  ;;  %v3019_v51 = vpack.c.bf16 %v8986_v45, %v8986_v45 }
 0x62f   :  { %v3506_v11 = vsel %vm3455_vm6, %v3436_v35, %v3505_v32  ;;  %v3512_v58 = vpack.c.b16 %v3486_v31, %v3486_v31  ;;  %v3294_v35 = vld [vmem:[#allocation3 + $0x748] sm:$0xff] }
 0x630   :  { %3627 = vmatpush1.bf16.msra.mxu1 %v3229_v38  ;;  %v3254_v38 = vld [vmem:[#allocation3 + $0x608] sm:$0xff]  ;;  %v3507_v23 = vsel %vm3457_vm7, %v3444_v26, %v3506_v11  ;;  %v3295_v26 = vld [vmem:[#allocation3 + $0x750] sm:$0xff]  ;;  %v3403_v31 = vunpack.c.l.b16 %v3019_v51 }
 0x631   :  { %3791 = vmatpush1.bf16.msra.mxu0 %v3231_v36  ;;  %3628 = vmatprep.subr.bf16.mxu1 %v3234_v3  ;;  %v3256_v36 = vld [vmem:[#allocation3 + $0x618] sm:$0xff]  ;;  %v3255_v3 = vld [vmem:[#allocation3 + $0x610] sm:$0xff]  ;;  %v3515_v37 = vpack.c.b16 %v3507_v23, %v3507_v23  ;;  %v8987_v32 = vld [vmem:[#allocation95_spill] sm:$0xff] }
 0x632   :  { %3792 = vmatprep.subr.bf16.mxu0 %v3236_v2  ;;  %v3258_v2 = vld [vmem:[#allocation3 + $0x628] sm:$0xff]  ;;  %v3297_v23 = vld [vmem:[#allocation3 + $0x760] sm:$0xff] }
 0x633   :  { %v3298_v11 = vld [vmem:[#allocation3 + $0x768] sm:$0xff] }
 0x634   :  { %3629 = vmatpush1.bf16.msra.mxu1 %v3233_v0  ;;  %v3263_v0 = vld [vmem:[#allocation3 + $0x650] sm:$0xff] }
 0x635   :  { %3793 = vmatpush1.bf16.msra.mxu0 %v3235_v17  ;;  %3630 = vmatprep.subr.bf16.mxu1 %v3238_v5  ;;  %v3266_v17 = vld [vmem:[#allocation3 + $0x668] sm:$0xff]  ;;  %v3267_v5 = vld [vmem:[#allocation3 + $0x670] sm:$0xff] }
 0x636   :  { %3794 = vmatprep.subr.bf16.mxu0 %v3240_v54  ;;  %v3270_v54 = vld [vmem:[#allocation3 + $0x688] sm:$0xff] }
 0x638   :  { %3631 = vmatpush1.bf16.msra.mxu1 %v3237_v33  ;;  %v3278_v33 = vld [vmem:[#allocation3 + $0x6c8] sm:$0xff] }
 0x639   :  { %3795 = vmatpush1.bf16.msra.mxu0 %v3239_v6  ;;  %3632 = vmatprep.subr.bf16.mxu1 %v3242_v46  ;;  %v3280_v6 = vld [vmem:[#allocation3 + $0x6d8] sm:$0xff]  ;;  %v3282_v46 = vld [vmem:[#allocation3 + $0x6e8] sm:$0xff] }
 0x63a   :  { %3796 = vmatprep.subr.bf16.mxu0 %v3244_v50  ;;  %v3284_v50 = vld [vmem:[#allocation3 + $0x6f8] sm:$0xff] }
 0x63c   :  { %3633 = vmatpush1.bf16.msra.mxu1 %v3241_v59  ;;  %v3290_v59 = vld [vmem:[#allocation3 + $0x728] sm:$0xff] }
 0x63d   :  { %3797 = vmatpush1.bf16.msra.mxu0 %v3243_v19  ;;  %3634 = vmatprep.subr.bf16.mxu1 %v3246_v40  ;;  %v3292_v19 = vld [vmem:[#allocation3 + $0x738] sm:$0xff]  ;;  %v8985_v40 = vld [vmem:[#allocation70_spill] sm:$0xff] }
 0x63e   :  { %3798 = vmatprep.subr.bf16.mxu0 %v3248_v53  ;;  %v3011_v53 = vpack.c.bf16 %v8985_v40, %v8985_v40 }
 0x640   :  { %3635 = vmatpush1.bf16.msra.mxu1 %v3245_v15  ;;  %v3296_v15 = vld [vmem:[#allocation3 + $0x758] sm:$0xff]  ;;  %v3395_v24 = vunpack.c.l.b16 %v3011_v53 }
 0x641   :  { %3799 = vmatpush1.bf16.msra.mxu0 %v3247_v21  ;;  %3636 = vmatprep.subr.bf16.mxu1 %v3250_v7  ;;  %v3387_v21 = vunpack.c.l.b16 %v3003_v48  ;;  %v3027_v7 = vpack.c.bf16 %v8987_v32, %v8987_v32 }
 0x642   :  { %3800 = vmatprep.subr.bf16.mxu0 %v3252_v13  ;;  %v3293_v13 = vld [vmem:[#allocation3 + $0x740] sm:$0xff] }
 0x644   :  { %3637 = vmatpush1.bf16.msra.mxu1 %v3249_v49  ;;  %v3300_v49 = vld [vmem:[#allocation3 + $0x778] sm:$0xff] }
 0x645   :  { %3801 = vmatpush1.bf16.msra.mxu0 %v3251_v22  ;;  %3647 = vmatprep.subr.bf16.mxu1 %v3254_v38  ;;  %v3494_v22 = vsel %vm3445_vm1, %v3395_v24, %v3387_v21  ;;  %v8988_v38 = vld [vmem:[#allocation52_spill] sm:$0xff] }
 0x646   :  { %3811 = vmatprep.subr.bf16.mxu0 %v3256_v36  ;;  %v3035_v36 = vpack.c.bf16 %v8988_v38, %v8988_v38 }
 0x647   :  { %3639 = vmatmul.mubr.bf16.vlgmr.msra.gmra.mrb[48].mxu1 %v3512_v58 }
 0x648   :  { %3803 = vmatmul.mubr.bf16.vlgmr.msra.gmra.mrb[96].mxu0 %v3512_v58  ;;  %3648 = vmatpush1.bf16.msra.mxu1 %v3253_v47  ;;  %v3411_v58 = vunpack.c.l.b16 %v3027_v7  ;;  %v3299_v47 = vld [vmem:[#allocation3 + $0x770] sm:$0xff] }
 0x649   :  { %3812 = vmatpush1.bf16.msra.mxu0 %v3255_v3  ;;  %3649 = vmatprep.subr.bf16.mxu1 %v3258_v2  ;;  %v3495_v3 = vsel %vm3447_vm2, %v3403_v31, %v3494_v22  ;;  %v3302_v2 = vld [vmem:[#allocation3 + $0x788] sm:$0xff] }
 0x64a   :  { %3813 = vmatprep.subr.bf16.mxu0 %v3260_v44  ;;  %3679 = vmatprep.mubr.bf16.mxu1 %v3515_v37  ;;  %v3304_v44 = vld [vmem:[#allocation3 + $0x798] sm:$0xff] }
 0x64b   :  { %3843 = vmatprep.mubr.bf16.mxu0 %v3515_v37  ;;  %v3043_v37 = vpack.c.bf16 %v7563_v34, %v7563_v34  ;;  %v3059_v34 = vpack.c.bf16 %v7657_v8, %v7657_v8  ;;  %v3316_v8 = vld [vmem:[#allocation3 + $0x7f8] sm:$0xff] }
 0x64c   :  { %3650 = vmatpush1.bf16.msra.mxu1 %v3257_v63  ;;  %v3419_v63 = vunpack.c.l.b16 %v3035_v36 }
 0x64d   :  { %3814 = vmatpush1.bf16.msra.mxu0 %v3259_v16  ;;  %3651 = vmatprep.subr.bf16.mxu1 %v3262_v25  ;;  %v3496_v16 = vsel %vm3449_vm3, %v3411_v58, %v3495_v3  ;;  %v3301_v25 = vld [vmem:[#allocation3 + $0x780] sm:$0xff] }
 0x64e   :  { %3815 = vmatprep.subr.bf16.mxu0 %v3264_v29  ;;  %v3303_v29 = vld [vmem:[#allocation3 + $0x790] sm:$0xff] }
 0x650   :  { %3652 = vmatpush1.bf16.msra.mxu1 %v3261_v60  ;;  %v3051_v60 = vpack.c.bf16 %v7611_v55, %v7611_v55  ;;  %v3443_v55 = vunpack.c.l.b16 %v3059_v34 }
 0x651   :  { %3816 = vmatpush1.bf16.msra.mxu0 %v3263_v0  ;;  %3653 = vmatprep.subr.bf16.mxu1 %v3266_v17  ;;  %v3306_v0 = vld [vmem:[#allocation3 + $0x7a8] sm:$0xff]  ;;  %v3308_v17 = vld [vmem:[#allocation3 + $0x7b8] sm:$0xff] }
 0x652   :  { %3817 = vmatprep.subr.bf16.mxu0 %v3268_v14  ;;  %v3427_v14 = vunpack.c.l.b16 %v3043_v37 }
 0x654   :  { %3654 = vmatpush1.bf16.msra.mxu1 %v3265_v57  ;;  %v3497_v57 = vsel %vm3451_vm4, %v3419_v63, %v3496_v16 }
 0x655   :  { %3818 = vmatpush1.bf16.msra.mxu0 %v3267_v5  ;;  %3655 = vmatprep.subr.bf16.mxu1 %v3270_v54  ;;  %v3305_v5 = vld [vmem:[#allocation3 + $0x7a0] sm:$0xff]  ;;  %v3307_v54 = vld [vmem:[#allocation3 + $0x7b0] sm:$0xff] }
 0x656   :  { %3819 = vmatprep.subr.bf16.mxu0 %v3272_v1  ;;  %v3435_v1 = vunpack.c.l.b16 %v3051_v60 }
 0x658   :  { %3656 = vmatpush1.bf16.msra.mxu1 %v3269_v42  ;;  %v3310_v42 = vld [vmem:[#allocation3 + $0x7c8] sm:$0xff] }
 0x659   :  { %3820 = vmatpush1.bf16.msra.mxu0 %v3271_v10  ;;  %3657 = vmatprep.subr.bf16.mxu1 %v3274_v18  ;;  %v3312_v10 = vld [vmem:[#allocation3 + $0x7d8] sm:$0xff]  ;;  %v3498_v18 = vsel %vm3453_vm5, %v3427_v14, %v3497_v57 }
 0x65a   :  { %3821 = vmatprep.subr.bf16.mxu0 %v3276_v9  ;;  %v3309_v9 = vld [vmem:[#allocation3 + $0x7c0] sm:$0xff] }
 0x65c   :  { %3658 = vmatpush1.bf16.msra.mxu1 %v3273_v12  ;;  %v3311_v12 = vld [vmem:[#allocation3 + $0x7d0] sm:$0xff] }
 0x65d   :  { %3822 = vmatpush1.bf16.msra.mxu0 %v3275_v41  ;;  %3659 = vmatprep.subr.bf16.mxu1 %v3278_v33  ;;  %v3499_v41 = vsel %vm3455_vm6, %v3435_v1, %v3498_v18  ;;  %v3314_v33 = vld [vmem:[#allocation3 + $0x7e8] sm:$0xff] }
 0x65e   :  { %3823 = vmatprep.subr.bf16.mxu0 %v3280_v6  ;;  %v3500_v6 = vsel %vm3457_vm7, %v3443_v55, %v3499_v41 }
 0x660   :  { %3660 = vmatpush1.bf16.msra.mxu1 %v3277_v62  ;;  %v3313_v62 = vld [vmem:[#allocation3 + $0x7e0] sm:$0xff] }
 0x661   :  { %3824 = vmatpush1.bf16.msra.mxu0 %v3279_v20  ;;  %3661 = vmatprep.subr.bf16.mxu1 %v3282_v46  ;;  %v3315_v20 = vld [vmem:[#allocation3 + $0x7f0] sm:$0xff]  ;;  %v3514_v46 = vpack.c.b16 %v3500_v6, %v3500_v6 }
 0x662   :  { %3825 = vmatprep.subr.bf16.mxu0 %v3284_v50 }
 0x664   :  { %3662 = vmatpush1.bf16.msra.mxu1 %v3281_v52 }
 0x665   :  { %3826 = vmatpush1.bf16.msra.mxu0 %v3283_v39  ;;  %3663 = vmatprep.subr.bf16.mxu1 %v3286_v56 }
 0x666   :  { %3827 = vmatprep.subr.bf16.mxu0 %v3288_v27 }
 0x668   :  { %3664 = vmatpush1.bf16.msra.mxu1 %v3285_v61 }
 0x669   :  { %3828 = vmatpush1.bf16.msra.mxu0 %v3287_v30  ;;  %3665 = vmatprep.subr.bf16.mxu1 %v3290_v59 }
 0x66a   :  { %3829 = vmatprep.subr.bf16.mxu0 %v3292_v19 }
 0x66c   :  { %3666 = vmatpush1.bf16.msra.mxu1 %v3289_v43 }
 0x66d   :  { %3830 = vmatpush1.bf16.msra.mxu0 %v3291_v4  ;;  %3667 = vmatprep.subr.bf16.mxu1 %v3294_v35 }
 0x66e   :  { %3831 = vmatprep.subr.bf16.mxu0 %v3296_v15 }
 0x670   :  { %3668 = vmatpush1.bf16.msra.mxu1 %v3293_v13 }
 0x671   :  { %3832 = vmatpush1.bf16.msra.mxu0 %v3295_v26  ;;  %3669 = vmatprep.subr.bf16.mxu1 %v3298_v11 }
 0x672   :  { %3833 = vmatprep.subr.bf16.mxu0 %v3300_v49 }
 0x674   :  { %3670 = vmatpush1.bf16.msra.mxu1 %v3297_v23 }
 0x675   :  { %3834 = vmatpush1.bf16.msra.mxu0 %v3299_v47  ;;  %3671 = vmatprep.subr.bf16.mxu1 %v3302_v2 }
 0x676   :  { %3835 = vmatprep.subr.bf16.mxu0 %v3304_v44 }
 0x678   :  { %3672 = vmatpush1.bf16.msra.mxu1 %v3301_v25 }
 0x679   :  { %3836 = vmatpush1.bf16.msra.mxu0 %v3303_v29  ;;  %3673 = vmatprep.subr.bf16.mxu1 %v3306_v0 }
 0x67a   :  { %3837 = vmatprep.subr.bf16.mxu0 %v3308_v17 }
 0x67c   :  { %3674 = vmatpush1.bf16.msra.mxu1 %v3305_v5 }
 0x67d   :  { %3838 = vmatpush1.bf16.msra.mxu0 %v3307_v54  ;;  %3675 = vmatprep.subr.bf16.mxu1 %v3310_v42 }
 0x67e   :  { %3839 = vmatprep.subr.bf16.mxu0 %v3312_v10 }
 0x680   :  { %3676 = vmatpush1.bf16.msra.mxu1 %v3309_v9 }
 0x681   :  { %3840 = vmatpush1.bf16.msra.mxu0 %v3311_v12  ;;  %3677 = vmatprep.subr.bf16.mxu1 %v3314_v33 }
 0x682   :  { %3841 = vmatprep.subr.bf16.mxu0 %v3316_v8 }
 0x684   :  { %3678 = vmatpush1.bf16.msra.mxu1 %v3313_v62 }
 0x685   :  { %3842 = vmatpush1.bf16.msra.mxu0 %v3315_v20 }
 0x687   :  { %3680 = vmatmul.mubr.bf16.vlgmr.msra.gmra.mrb[48].mxu1 %v3514_v46 }
 0x688   :  { %3844 = vmatmul.mubr.bf16.vlgmr.msra.gmra.mrb[96].mxu0 %v3514_v46 }
 0x75a   :  { %v7843_v50 = vpop.f32.mrb[48].mxu1 }
 0x75b   :  { %v7845_v52 = vpop.f32.mrb[96].mxu0  ;;  %v3852_v39 = vrot.slane %v7843_v50, 4  ;;  %v3876_v56 = vmul.f32 %v7843_v50, %v7843_v50  ;;  %v7853_v30 = vpop.f32.mrb[49].mxu1 }
 0x75c   :  { %v3864_v27 = vrot.slane %v7845_v52, 4  ;;  %v3878_v61 = vmul.f32 %v7845_v52, %v7845_v52  ;;  %v7855_v59 = vpop.f32.mrb[97].mxu0  ;;  %v3858_v19 = vrot.slane %v7853_v30, 4  ;;  %v3877_v28 = vmul.f32 %v7853_v30, %v7853_v30  ;;  %v3685_v53 = vpop.f32.mrb[50].mxu1 }
 0x75d   :  { %v3870_v48 = vrot.slane %v7855_v59, 4  ;;  %v3879_v40 = vmul.f32 %v7855_v59, %v7855_v59  ;;  %v3849_v43 = vpop.f32.mrb[98].mxu0  ;;  %v3853_v4 = vadd.f32 %v3852_v39, %v7843_v50  ;;  %v3880_v45 = vrot.slane %v3876_v56, 4  ;;  %v3686_v15 = vpop.f32.mrb[51].mxu1 }
 0x75e   :  { %v3865_v51 = vadd.f32 %v3864_v27, %v7845_v52  ;;  %v3892_v35 = vrot.slane %v3878_v61, 4  ;;  %v3850_v21 = vpop.f32.mrb[99].mxu0  ;;  %v3859_v24 = vadd.f32 %v3858_v19, %v7853_v30  ;;  %v3886_v32 = vrot.slane %v3877_v28, 4 }
 0x75f   :  { %v3871_v7 = vadd.f32 %v3870_v48, %v7855_v59  ;;  %v3898_v13 = vrot.slane %v3879_v40, 4  ;;  %v3854_v26 = vrot.slane %v3853_v4, 2  ;;  %v3881_v31 = vadd.f32 %v3880_v45, %v3876_v56 }
 0x760   :  { %v3866_v11 = vrot.slane %v3865_v51, 2  ;;  %v3893_v49 = vadd.f32 %v3892_v35, %v3878_v61  ;;  %v3860_v22 = vrot.slane %v3859_v24, 2  ;;  %v3887_v38 = vadd.f32 %v3886_v32, %v3877_v28 }
 0x761   :  { %v3872_v36 = vrot.slane %v3871_v7, 2  ;;  %v3899_v58 = vadd.f32 %v3898_v13, %v3879_v40  ;;  %v3855_v23 = vadd.f32 %v3854_v26, %v3853_v4  ;;  %v3882_v47 = vrot.slane %v3881_v31, 2 }
 0x762   :  { %v3867_v3 = vadd.f32 %v3866_v11, %v3865_v51  ;;  %v3894_v2 = vrot.slane %v3893_v49, 2  ;;  %v3861_v44 = vadd.f32 %v3860_v22, %v3859_v24  ;;  %v3888_v37 = vrot.slane %v3887_v38, 2 }
 0x763   :  { %v3873_v63 = vadd.f32 %v3872_v36, %v3871_v7  ;;  %v3900_v16 = vrot.slane %v3899_v58, 2  ;;  %v3856_v25 = vrot.slane %v3855_v23, 1  ;;  %v3883_v29 = vadd.f32 %v3882_v47, %v3881_v31  ;;  %v8989_v36 = vld [vmem:[#allocation122_spill] sm:$0xff] }
 0x764   :  { %v3868_v60 = vrot.slane %v3867_v3, 1  ;;  %v3895_v0 = vadd.f32 %v3894_v2, %v3893_v49  ;;  %v3862_v17 = vrot.slane %v3861_v44, 1  ;;  %v3889_v14 = vadd.f32 %v3888_v37, %v3887_v38  ;;  %v8990_v2 = vld [vmem:[#allocation20_spill] sm:$0xff]  ;;  %v8991_v37 = vld [vmem:[#allocation139_spill] sm:$0xff] }
 0x765   :  { %v3874_v57 = vrot.slane %v3873_v63, 1  ;;  %v3901_v34 = vadd.f32 %v3900_v16, %v3899_v58  ;;  %v3857_v5 = vadd.f32 %v3856_v25, %v3855_v23  ;;  %v3884_v54 = vrot.slane %v3883_v29, 1  ;;  %v8992_v16 = vld [vmem:[#allocation140_spill] sm:$0xff] }
 0x766   :  { %v3869_v1 = vadd.f32 %v3868_v60, %v3867_v3  ;;  %v3896_v42 = vrot.slane %v3895_v0, 1  ;;  %v3863_v10 = vadd.f32 %v3862_v17, %v3861_v44  ;;  %v3890_v18 = vrot.slane %v3889_v14, 1 }
 0x767   :  { %v3875_v55 = vadd.f32 %v3874_v57, %v3873_v63  ;;  %v3902_v9 = vrot.slane %v3901_v34, 1  ;;  %v3885_v12 = vadd.f32 %v3884_v54, %v3883_v29  ;;  %v3904_v41 = vmul.f32 0.125, %v3857_v5  ;;  %v8993_v29 = vld [vmem:[#allocation141_spill] sm:$0xff] }
 0x768   :  { %v3897_v33 = vadd.f32 %v3896_v42, %v3895_v0  ;;  %v3906_v8 = vmul.f32 0.125, %v3869_v1  ;;  %v3891_v6 = vadd.f32 %v3890_v18, %v3889_v14  ;;  %v3905_v62 = vmul.f32 0.125, %v3863_v10  ;;  %v8994_v0 = vld [vmem:[#allocation29_spill] sm:$0xff] }
 0x769   :  { %v3903_v20 = vadd.f32 %v3902_v9, %v3901_v34  ;;  %v3907_v46 = vmul.f32 0.125, %v3875_v55  ;;  %v3908_v39 = vmul.f32 0.125, %v3885_v12  ;;  %v3912_v56 = vmul.f32 %v3904_v41, %v3904_v41 }
 0x76a   :  { %v3910_v27 = vmul.f32 0.125, %v3897_v33  ;;  %v3914_v61 = vmul.f32 %v3906_v8, %v3906_v8  ;;  %v3909_v19 = vmul.f32 0.125, %v3891_v6  ;;  %v3913_v28 = vmul.f32 %v3905_v62, %v3905_v62  ;;  %v8995_v6 = vld [vmem:[#allocation21_spill] sm:$0xff] }
 0x76b   :  { %v3911_v48 = vmul.f32 0.125, %v3903_v20  ;;  %v3915_v40 = vmul.f32 %v3907_v46, %v3907_v46  ;;  %v3916_v53 = vsub.f32 %v3908_v39, %v3912_v56 }
 0x76c   :  { %v3918_v43 = vsub.f32 %v3910_v27, %v3914_v61  ;;  %v3917_v4 = vsub.f32 %v3909_v19, %v3913_v28 }
 0x76d   :  { %v3919_v45 = vsub.f32 %v3911_v48, %v3915_v40  ;;  %v3920_v51 = vmax.f32 %v3916_v53, 0.0 }
 0x76e   :  { %v3922_v35 = vmax.f32 %v3918_v43, 0.0  ;;  %v3921_v15 = vmax.f32 %v3917_v4, 0.0 }
 0x76f   :  { %v3923_v21 = vmax.f32 %v3919_v45, 0.0  ;;  %v3924_v24 = vadd.f32 1e-05, %v3920_v51 }
 0x770   :  { %v3926_v32 = vadd.f32 1e-05, %v3922_v35  ;;  %v3925_v7 = vadd.f32 1e-05, %v3921_v15 }
 0x771   :  { %v3927_v13 = vadd.f32 1e-05, %v3923_v21  ;;  %4574 = vrsqrt.f32 %v3924_v24 }
 0x772   :  { %4576 = vrsqrt.f32 %v3926_v32 }
 0x773   :  { %4578 = vrsqrt.f32 %v3925_v7 }
 0x774   :  { %4580 = vrsqrt.f32 %v3927_v13 }
 0x77b   :  { %v4575_v26 = vpop.eup %4574 }
 0x77c   :  { %v4577_v31 = vpop.eup %4576 }
 0x77d   :  { %v4579_v11 = vpop.eup %4578 }
 0x77e   :  { %v4581_v49 = vpop.eup %4580  ;;  %v3936_v22 = vcombine.low %v4575_v26, %v4579_v11 }
 0x77f   :  { %v3937_v38 = vcombine.low %v4577_v31, %v4581_v49 }
 0x780   :  { %v3944_v58 = vrot.slane %v3936_v22, %v8989_v36 }
 0x781   :  { %v3951_v23 = vrot.slane %v3937_v38, %v8989_v36 }
 0x783   :  { %v3952_v47 = vcombine.low %v3944_v58, %v3951_v23 }
 0x785   :  { %v3959_v3 = vrot.slane %v3952_v47, %v8989_v36 }
 0x787   :  { %v3961_v44 = vmul.f32 %v3959_v3, %v8990_v2 }
 0x789   :  { %v3966_v63 = vrot.slane %v3961_v44, %v8991_v37  ;;  %v3970_v25 = vrot.slane %v3961_v44, %v8992_v16  ;;  %v3974_v60 = vrot.slane %v3961_v44, %v8993_v29  ;;  %v3978_v17 = vrot.slane %v3961_v44, %v8994_v0 }
 0x78b   :  { %v3983_v14 = vmul.f32 %v3966_v63, %v3904_v41  ;;  %v3984_v57 = vmul.f32 %v3970_v25, %v3905_v62  ;;  %v3985_v34 = vmul.f32 %v3974_v60, %v3906_v8  ;;  %v3986_v5 = vmul.f32 %v3978_v17, %v3907_v46 }
 0x78c   :  { %v4017_v54 = vmul.f32 %v3966_v63, %v7843_v50  ;;  %v4018_v1 = vmul.f32 %v3970_v25, %v7853_v30  ;;  %v4019_v42 = vmul.f32 %v3974_v60, %v7845_v52  ;;  %v4020_v10 = vmul.f32 %v3978_v17, %v7855_v59 }
 0x78d   :  { %v3991_v18 = vcombine.low %v3983_v14, %v3984_v57  ;;  %v3992_v55 = vcombine.low %v3985_v34, %v3986_v5 }
 0x78f   :  { %v3999_v9 = vrot.slane %v3991_v18, %v8989_v36  ;;  %v4006_v12 = vrot.slane %v3992_v55, %v8989_v36 }
 0x791   :  { %v4007_v33 = vcombine.low %v3999_v9, %v4006_v12 }
 0x793   :  { %v4014_v41 = vrot.slane %v4007_v33, %v8989_v36 }
 0x795   :  { %v4016_v8 = vsub.f32 %v8995_v6, %v4014_v41 }
 0x797   :  { %v4025_v62 = vrot.slane %v4016_v8, %v8991_v37  ;;  %v4029_v50 = vrot.slane %v4016_v8, %v8992_v16  ;;  %v4033_v30 = vrot.slane %v4016_v8, %v8993_v29  ;;  %v4037_v52 = vrot.slane %v4016_v8, %v8994_v0 }
 0x799   :  { %v7887_v59 = vadd.f32 %v4025_v62, %v4017_v54  ;;  %v4043_v20 = vadd.f32 %v4029_v50, %v4018_v1  ;;  %v7889_v46 = vadd.f32 %v4033_v30, %v4019_v42  ;;  %v7891_v39 = vadd.f32 %v4037_v52, %v4020_v10 }
 0x79b   :  { %v4046_v56 = vmax.f32 %v7887_v59, 0.0  ;;  %v4047_v27 = vmax.f32 %v4043_v20, 0.0  ;;  %v4048_v61 = vmax.f32 %v7889_v46, 0.0  ;;  %v4049_v19 = vmax.f32 %v7891_v39, 0.0 }
 0x79c   :  { %4614 = dma.done.wait [#allocation5 + $0x2], 8192 }
 0x79d   :  { %4615 = vsyncadd [#allocation5 + $0x2], 4294959104  ;;  %v4055_v28 = vpack.c.bf16 %v4047_v27, %v4047_v27  ;;  %v4059_v48 = vld [vmem:[#allocation4 + $0x8] sm:$0xff]  ;;  %v4058_v40 = vld [vmem:[#allocation4] sm:$0xff]  ;;  %v4054_v57 = vpack.c.bf16 %v4046_v56, %v4046_v56  ;;  %v4057_v34 = vpack.c.bf16 %v4049_v19, %v4049_v19  ;;  %vm4382_vm8 = vcmask 72704  }
 0x79e   :  { %v4061_v53 = vld [vmem:[#allocation4 + $0x18] sm:$0xff]  ;;  %4122 = vmatprep.subr.bf16.mxu1 %v4059_v48  ;;  %v4060_v43 = vld [vmem:[#allocation4 + $0x10] sm:$0xff]  ;;  %v4063_v4 = vld [vmem:[#allocation4 + $0x28] sm:$0xff] }
 0x79f   :  { %4154 = vmatprep.mubr.bf16.mxu1 %v4055_v28  ;;  %4123 = vmatpush1.bf16.msra.mxu1 %v4058_v40  ;;  %v4062_v45 = vld [vmem:[#allocation4 + $0x20] sm:$0xff]  ;;  %v4065_v51 = vld [vmem:[#allocation4 + $0x38] sm:$0xff]  ;;  %v4064_v35 = vld [vmem:[#allocation4 + $0x30] sm:$0xff] }
 0x7a0   :  { %4124 = vmatprep.subr.bf16.mxu1 %v4061_v53  ;;  %v4067_v15 = vld [vmem:[#allocation4 + $0x48] sm:$0xff]  ;;  %v4066_v21 = vld [vmem:[#allocation4 + $0x40] sm:$0xff]  ;;  %v4069_v24 = vld [vmem:[#allocation4 + $0x58] sm:$0xff] }
 0x7a1   :  { %v4068_v32 = vld [vmem:[#allocation4 + $0x50] sm:$0xff]  ;;  %v4071_v7 = vld [vmem:[#allocation4 + $0x68] sm:$0xff]  ;;  %v4070_v13 = vld [vmem:[#allocation4 + $0x60] sm:$0xff] }
 0x7a2   :  { %v4073_v26 = vld [vmem:[#allocation4 + $0x78] sm:$0xff]  ;;  %v4072_v31 = vld [vmem:[#allocation4 + $0x70] sm:$0xff]  ;;  %v4075_v11 = vld [vmem:[#allocation4 + $0x88] sm:$0xff] }
 0x7a3   :  { %4125 = vmatpush1.bf16.msra.mxu1 %v4060_v43  ;;  %v4074_v49 = vld [vmem:[#allocation4 + $0x80] sm:$0xff]  ;;  %v4077_v22 = vld [vmem:[#allocation4 + $0x98] sm:$0xff]  ;;  %v4076_v38 = vld [vmem:[#allocation4 + $0x90] sm:$0xff] }
 0x7a4   :  { %4126 = vmatprep.subr.bf16.mxu1 %v4063_v4  ;;  %v4079_v58 = vld [vmem:[#allocation4 + $0xa8] sm:$0xff]  ;;  %v4078_v23 = vld [vmem:[#allocation4 + $0xa0] sm:$0xff]  ;;  %v4081_v47 = vld [vmem:[#allocation4 + $0xb8] sm:$0xff] }
 0x7a5   :  { %v4080_v3 = vld [vmem:[#allocation4 + $0xb0] sm:$0xff]  ;;  %v4083_v2 = vld [vmem:[#allocation4 + $0xc8] sm:$0xff]  ;;  %v4082_v44 = vld [vmem:[#allocation4 + $0xc0] sm:$0xff] }
 0x7a6   :  { %v4085_v63 = vld [vmem:[#allocation4 + $0xd8] sm:$0xff]  ;;  %v4084_v25 = vld [vmem:[#allocation4 + $0xd0] sm:$0xff]  ;;  %v4087_v29 = vld [vmem:[#allocation4 + $0xe8] sm:$0xff] }
 0x7a7   :  { %4127 = vmatpush1.bf16.msra.mxu1 %v4062_v45  ;;  %v4086_v60 = vld [vmem:[#allocation4 + $0xe0] sm:$0xff]  ;;  %v4089_v0 = vld [vmem:[#allocation4 + $0xf8] sm:$0xff]  ;;  %v4088_v17 = vld [vmem:[#allocation4 + $0xf0] sm:$0xff] }
 0x7a8   :  { %4128 = vmatprep.subr.bf16.mxu1 %v4065_v51  ;;  %v4091_v14 = vld [vmem:[#allocation4 + $0x108] sm:$0xff]  ;;  %v4090_v5 = vld [vmem:[#allocation4 + $0x100] sm:$0xff]  ;;  %v4093_v54 = vld [vmem:[#allocation4 + $0x118] sm:$0xff] }
 0x7a9   :  { %v4092_v1 = vld [vmem:[#allocation4 + $0x110] sm:$0xff]  ;;  %v4095_v42 = vld [vmem:[#allocation4 + $0x128] sm:$0xff]  ;;  %v4094_v10 = vld [vmem:[#allocation4 + $0x120] sm:$0xff] }
 0x7aa   :  { %v4097_v18 = vld [vmem:[#allocation4 + $0x138] sm:$0xff]  ;;  %v4096_v55 = vld [vmem:[#allocation4 + $0x130] sm:$0xff]  ;;  %v4099_v9 = vld [vmem:[#allocation4 + $0x148] sm:$0xff] }
 0x7ab   :  { %4129 = vmatpush1.bf16.msra.mxu1 %v4064_v35  ;;  %v4098_v12 = vld [vmem:[#allocation4 + $0x140] sm:$0xff]  ;;  %v4101_v33 = vld [vmem:[#allocation4 + $0x158] sm:$0xff]  ;;  %v4100_v41 = vld [vmem:[#allocation4 + $0x150] sm:$0xff]  ;;  %v4056_v35 = vpack.c.bf16 %v4048_v61, %v4048_v61 }
 0x7ac   :  { %4130 = vmatprep.subr.bf16.mxu1 %v4067_v15  ;;  %v4103_v6 = vld [vmem:[#allocation4 + $0x168] sm:$0xff]  ;;  %v4102_v8 = vld [vmem:[#allocation4 + $0x160] sm:$0xff]  ;;  %v4105_v62 = vld [vmem:[#allocation4 + $0x178] sm:$0xff] }
 0x7ad   :  { %v4104_v50 = vld [vmem:[#allocation4 + $0x170] sm:$0xff]  ;;  %v4107_v30 = vld [vmem:[#allocation4 + $0x188] sm:$0xff]  ;;  %v4106_v52 = vld [vmem:[#allocation4 + $0x180] sm:$0xff] }
 0x7ae   :  { %v4109_v59 = vld [vmem:[#allocation4 + $0x198] sm:$0xff]  ;;  %v4108_v20 = vld [vmem:[#allocation4 + $0x190] sm:$0xff]  ;;  %v4111_v39 = vld [vmem:[#allocation4 + $0x1a8] sm:$0xff] }
 0x7af   :  { %4131 = vmatpush1.bf16.msra.mxu1 %v4066_v21  ;;  %v4110_v56 = vld [vmem:[#allocation4 + $0x1a0] sm:$0xff]  ;;  %v4113_v27 = vld [vmem:[#allocation4 + $0x1b8] sm:$0xff]  ;;  %v4112_v19 = vld [vmem:[#allocation4 + $0x1b0] sm:$0xff] }
 0x7b0   :  { %4132 = vmatprep.subr.bf16.mxu1 %v4069_v24  ;;  %v4115_v28 = vld [vmem:[#allocation4 + $0x1c8] sm:$0xff]  ;;  %v4114_v48 = vld [vmem:[#allocation4 + $0x1c0] sm:$0xff]  ;;  %v4117_v40 = vld [vmem:[#allocation4 + $0x1d8] sm:$0xff] }
 0x7b1   :  { %v4116_v53 = vld [vmem:[#allocation4 + $0x1d0] sm:$0xff]  ;;  %v4119_v43 = vld [vmem:[#allocation4 + $0x1e8] sm:$0xff]  ;;  %v4118_v4 = vld [vmem:[#allocation4 + $0x1e0] sm:$0xff] }
 0x7b2   :  { %v4121_v45 = vld [vmem:[#allocation4 + $0x1f8] sm:$0xff]  ;;  %v4120_v51 = vld [vmem:[#allocation4 + $0x1f0] sm:$0xff]  ;;  %v8996_v15 = vld [vmem:[#allocation26_spill] sm:$0xff] }
 0x7b3   :  { %4133 = vmatpush1.bf16.msra.mxu1 %v4068_v32  ;;  %v8997_v21 = vld [vmem:[#allocation28_spill] sm:$0xff]  ;;  %v8998_v32 = vld [vmem:[#allocation25_spill] sm:$0xff] }
 0x7b4   :  { %4134 = vmatprep.subr.bf16.mxu1 %v4071_v7  ;;  %v4466_v24 = vpack.c.bf16 %v8997_v21, %v8996_v15  ;;  %v8999_v7 = vld [vmem:[#allocation27_spill] sm:$0xff] }
 0x7b6   :  { %4467 = vmatprep.subr.bf16.mxu0 %v4466_v24 }
 0x7b7   :  { %4135 = vmatpush1.bf16.msra.mxu1 %v4070_v13  ;;  %v4468_v13 = vpack.c.bf16 %v8999_v7, %v8998_v32  ;;  %v9001_v32 = vld [vmem:[#allocation23_spill] sm:$0xff] }
 0x7b8   :  { %4136 = vmatprep.subr.bf16.mxu1 %v4073_v26 }
 0x7b9   :  { %4469 = vmatpush1.bf16.xpose.msra.mxu0 %v4468_v13 }
 0x7bb   :  { %4137 = vmatpush1.bf16.msra.mxu1 %v4072_v31 }
 0x7bc   :  { %4138 = vmatprep.subr.bf16.mxu1 %v4075_v11 }
 0x7bf   :  { %4139 = vmatpush1.bf16.msra.mxu1 %v4074_v49 }
 0x7c0   :  { %4140 = vmatprep.subr.bf16.mxu1 %v4077_v22 }
 0x7c3   :  { %4141 = vmatpush1.bf16.msra.mxu1 %v4076_v38 }
 0x7c4   :  { %4142 = vmatprep.subr.bf16.mxu1 %v4079_v58 }
 0x7c7   :  { %4143 = vmatpush1.bf16.msra.mxu1 %v4078_v23 }
 0x7c8   :  { %4144 = vmatprep.subr.bf16.mxu1 %v4081_v47 }
 0x7cb   :  { %4145 = vmatpush1.bf16.msra.mxu1 %v4080_v3 }
 0x7cc   :  { %4146 = vmatprep.subr.bf16.mxu1 %v4083_v2 }
 0x7cf   :  { %4147 = vmatpush1.bf16.msra.mxu1 %v4082_v44 }
 0x7d0   :  { %4148 = vmatprep.subr.bf16.mxu1 %v4085_v63 }
 0x7d3   :  { %4149 = vmatpush1.bf16.msra.mxu1 %v4084_v25 }
 0x7d4   :  { %4150 = vmatprep.subr.bf16.mxu1 %v4087_v29 }
 0x7d7   :  { %4151 = vmatpush1.bf16.msra.mxu1 %v4086_v60 }
 0x7d8   :  { %4152 = vmatprep.subr.bf16.mxu1 %v4089_v0 }
 0x7db   :  { %4153 = vmatpush1.bf16.msra.mxu1 %v4088_v17 }
 0x7dc   :  { %4163 = vmatprep.subr.bf16.mxu1 %v4091_v14 }
 0x7de   :  { %4155 = vmatmul.mubr.bf16.vlgmr.msra.gmra.mrb[52].mxu1 %v4054_v57 }
 0x7df   :  { %4164 = vmatpush1.bf16.msra.mxu1 %v4090_v5  ;;  %4195 = vmatprep.mubr.bf16.mxu1 %v4057_v34 }
 0x7e0   :  { %4165 = vmatprep.subr.bf16.mxu1 %v4093_v54 }
 0x7e3   :  { %4166 = vmatpush1.bf16.msra.mxu1 %v4092_v1 }
 0x7e4   :  { %4167 = vmatprep.subr.bf16.mxu1 %v4095_v42 }
 0x7e7   :  { %4168 = vmatpush1.bf16.msra.mxu1 %v4094_v10 }
 0x7e8   :  { %4169 = vmatprep.subr.bf16.mxu1 %v4097_v18 }
 0x7eb   :  { %4170 = vmatpush1.bf16.msra.mxu1 %v4096_v55 }
 0x7ec   :  { %4171 = vmatprep.subr.bf16.mxu1 %v4099_v9 }
 0x7ef   :  { %4172 = vmatpush1.bf16.msra.mxu1 %v4098_v12 }
 0x7f0   :  { %4173 = vmatprep.subr.bf16.mxu1 %v4101_v33 }
 0x7f3   :  { %4174 = vmatpush1.bf16.msra.mxu1 %v4100_v41 }
 0x7f4   :  { %4175 = vmatprep.subr.bf16.mxu1 %v4103_v6 }
 0x7f7   :  { %4176 = vmatpush1.bf16.msra.mxu1 %v4102_v8 }
 0x7f8   :  { %4177 = vmatprep.subr.bf16.mxu1 %v4105_v62 }
 0x7fb   :  { %4178 = vmatpush1.bf16.msra.mxu1 %v4104_v50 }
 0x7fc   :  { %4179 = vmatprep.subr.bf16.mxu1 %v4107_v30 }
 0x7ff   :  { %4180 = vmatpush1.bf16.msra.mxu1 %v4106_v52 }
 0x800   :  { %4181 = vmatprep.subr.bf16.mxu1 %v4109_v59 }
 0x803   :  { %4182 = vmatpush1.bf16.msra.mxu1 %v4108_v20 }
 0x804   :  { %4183 = vmatprep.subr.bf16.mxu1 %v4111_v39 }
 0x807   :  { %4184 = vmatpush1.bf16.msra.mxu1 %v4110_v56 }
 0x808   :  { %4185 = vmatprep.subr.bf16.mxu1 %v4113_v27 }
 0x80b   :  { %4186 = vmatpush1.bf16.msra.mxu1 %v4112_v19 }
 0x80c   :  { %4187 = vmatprep.subr.bf16.mxu1 %v4115_v28 }
 0x80f   :  { %4188 = vmatpush1.bf16.msra.mxu1 %v4114_v48  ;;  %v9000_v48 = vld [vmem:[#allocation22_spill] sm:$0xff] }
 0x810   :  { %4189 = vmatprep.subr.bf16.mxu1 %v4117_v40 }
 0x813   :  { %4190 = vmatpush1.bf16.msra.mxu1 %v4116_v53 }
 0x814   :  { %4191 = vmatprep.subr.bf16.mxu1 %v4119_v43 }
 0x817   :  { %4192 = vmatpush1.bf16.msra.mxu1 %v4118_v4 }
 0x818   :  { %4193 = vmatprep.subr.bf16.mxu1 %v4121_v45 }
 0x81b   :  { %4194 = vmatpush1.bf16.msra.mxu1 %v4120_v51 }
 0x81e   :  { %4196 = vmatmul.mubr.bf16.vlgmr.msra.gmra.mrb[52].mxu1 %v4056_v35 }
 0x8f1   :  { %v4197_v26 = vpop.f32.mrb[52].mxu1 }
 0x8f2   :  { %v4204_v31 = vrot.slane %v4197_v26, 4  ;;  %v4216_v11 = vmul.f32 %v4197_v26, %v4197_v26  ;;  %v4199_v49 = vpop.f32.mrb[53].mxu1 }
 0x8f3   :  { %v4210_v22 = vrot.slane %v4199_v49, 4  ;;  %v4217_v38 = vmul.f32 %v4199_v49, %v4199_v49  ;;  %v4201_v58 = vpop.f32.mrb[54].mxu1 }
 0x8f4   :  { %v4205_v46 = vadd.f32 %v4204_v31, %v4197_v26  ;;  %v4218_v23 = vrot.slane %v4216_v11, 4  ;;  %v4202_v61 = vpop.f32.mrb[55].mxu1 }
 0x8f5   :  { %v4211_v47 = vadd.f32 %v4210_v22, %v4199_v49  ;;  %v4224_v3 = vrot.slane %v4217_v38, 4 }
 0x8f6   :  { %v4206_v2 = vrot.slane %v4205_v46, 2  ;;  %v4219_v44 = vadd.f32 %v4218_v23, %v4216_v11 }
 0x8f7   :  { %v4212_v63 = vrot.slane %v4211_v47, 2  ;;  %v4225_v25 = vadd.f32 %v4224_v3, %v4217_v38 }
 0x8f8   :  { %v4207_v29 = vadd.f32 %v4206_v2, %v4205_v46  ;;  %v4220_v60 = vrot.slane %v4219_v44, 2 }
 0x8f9   :  { %v4213_v0 = vadd.f32 %v4212_v63, %v4211_v47  ;;  %v4226_v17 = vrot.slane %v4225_v25, 2 }
 0x8fa   :  { %v4208_v14 = vrot.slane %v4207_v29, 1  ;;  %v4221_v57 = vadd.f32 %v4220_v60, %v4219_v44 }
 0x8fb   :  { %v4214_v34 = vrot.slane %v4213_v0, 1  ;;  %v4227_v5 = vadd.f32 %v4226_v17, %v4225_v25 }
 0x8fc   :  { %v4209_v54 = vadd.f32 %v4208_v14, %v4207_v29  ;;  %v4222_v1 = vrot.slane %v4221_v57, 1 }
 0x8fd   :  { %v4228_v42 = vrot.slane %v4227_v5, 1  ;;  %v4215_v10 = vadd.f32 %v4214_v34, %v4213_v0 }
 0x8fe   :  { %v4223_v18 = vadd.f32 %v4222_v1, %v4221_v57  ;;  %v4230_v55 = vmul.f32 0.125, %v4209_v54 }
 0x8ff   :  { %v4229_v9 = vadd.f32 %v4228_v42, %v4227_v5  ;;  %v4231_v12 = vmul.f32 0.125, %v4215_v10 }
 0x900   :  { %v4232_v33 = vmul.f32 0.125, %v4223_v18  ;;  %v4234_v41 = vmul.f32 %v4230_v55, %v4230_v55 }
 0x901   :  { %v4233_v6 = vmul.f32 0.125, %v4229_v9  ;;  %v4235_v8 = vmul.f32 %v4231_v12, %v4231_v12 }
 0x902   :  { %v4236_v62 = vsub.f32 %v4232_v33, %v4234_v41 }
 0x903   :  { %v4237_v50 = vsub.f32 %v4233_v6, %v4235_v8 }
 0x904   :  { %v4238_v30 = vmax.f32 %v4236_v62, 0.0 }
 0x905   :  { %v4239_v52 = vmax.f32 %v4237_v50, 0.0 }
 0x906   :  { %v4240_v59 = vadd.f32 1e-05, %v4238_v30 }
 0x907   :  { %v4241_v20 = vadd.f32 1e-05, %v4239_v52 }
 0x908   :  { %4582 = vrsqrt.f32 %v4240_v59 }
 0x909   :  { %4584 = vrsqrt.f32 %v4241_v20 }
 0x912   :  { %v4583_v39 = vpop.eup %4582 }
 0x913   :  { %v4585_v56 = vpop.eup %4584 }
 0x914   :  { %v4246_v27 = vcombine.low %v4583_v39, %v4585_v56 }
 0x916   :  { %v4253_v19 = vrot.slane %v4246_v27, %v8989_v36 }
 0x918   :  { %v4260_v28 = vrot.slane %v4253_v19, %v8989_v36 }
 0x91a   :  { %v4262_v40 = vmul.f32 %v4260_v28, %v9000_v48 }
 0x91c   :  { %v4267_v53 = vrot.slane %v4262_v40, %v8991_v37  ;;  %v4271_v43 = vrot.slane %v4262_v40, %v8992_v16 }
 0x91e   :  { %v4274_v4 = vmul.f32 %v4267_v53, %v4230_v55  ;;  %v4275_v45 = vmul.f32 %v4271_v43, %v4231_v12  ;;  %v4296_v51 = vmul.f32 %v4271_v43, %v4199_v49  ;;  %v4295_v35 = vmul.f32 %v4267_v53, %v4197_v26  ;;  %v9002_v26 = vld [vmem:[#allocation24_spill] sm:$0xff] }
 0x920   :  { %v4278_v15 = vcombine.low %v4274_v4, %v4275_v45 }
 0x922   :  { %v4285_v21 = vrot.slane %v4278_v15, %v8989_v36 }
 0x924   :  { %v4292_v24 = vrot.slane %v4285_v21, %v8989_v36 }
 0x926   :  { %v4294_v7 = vsub.f32 %v9001_v32, %v4292_v24 }
 0x928   :  { %v4305_v13 = vrot.slane %v4294_v7, %v8992_v16  ;;  %v4301_v31 = vrot.slane %v4294_v7, %v8991_v37 }
 0x92a   :  { %v4309_v11 = vadd.f32 %v4305_v13, %v4296_v51  ;;  %v4308_v22 = vadd.f32 %v4301_v31, %v4295_v35 }
 0x92c   :  { %v4311_v38 = vmax.f32 %v4309_v11, 0.0  ;;  %v4310_v58 = vmax.f32 %v4308_v22, 0.0 }
 0x92e   :  { %4376 = vmatprep.mubr.f32.mxu0 %v4311_v38 }
 0x92f   :  { %4377 = vmatmul.mubr.f32.vlgmr.msra.gmra.mrb[100].mxu0 %v4310_v58 }
 0xa02   :  { %v4378_v46 = vpop.f32.mrb[100].mxu0 }
 0xa03   :  { %v4379_v49 = vadd.f32 %v4378_v46, %v9002_v26  ;;  %v4380_v23 = vpop.f32.mrb[101].mxu0 }
 0xa05   :  { %4383 = vst.msk [vmem:[%s7929_s6] sm:$0xff] %vm4382_vm8, %v4379_v49 }
 0xa06   :  { %4388 = vsyncpa [#allocation7], 1 }
 0xa07   :  { %4389 = vsyncmov [#allocation5] }
 0xa0a   :  { %s4390_s21 = vpop.sfrf %4389 }
 0xa0b   :  { %p4427_p8 = scmp.ne.s32.totalorder %s4390_s21, 0 }
 0xa0d   :  { %4394 = shalt.err (%p4427_p8)  }
 0xa0e   :  { %4396 = vsyncmov [#allocation5 + $0x1] }
 0xa11   :  { %s4397_s22 = vpop.sfrf %4396 }
 0xa12   :  { %p4428_p9 = scmp.ne.s32.totalorder %s4397_s22, 0 }
 0xa14   :  { %4401 = shalt.err (%p4428_p9)  }
 0xa15   :  { %4403 = vsyncmov [#allocation5 + $0x2] }
 0xa18   :  { %s4404_s23 = vpop.sfrf %4403 }
 0xa19   :  { %p4429_p10 = scmp.ne.s32.totalorder %s4404_s23, 0 }
 0xa1b   :  { %4408 = shalt.err (%p4429_p10)  }

</bundles_post_ra>
